<compile_context>
chip_gen: v7x
topology: tpu7x:2x2x1
jax: 0.10.0
libtpu: 0.0.40
codegen_flags: <defaults>
</compile_context>

<pallas_src>
import jax
import jax.numpy as jnp
from jax.experimental import pallas as pl
from jax.experimental.pallas import tpu as pltpu

TARGET_SIZE = 256
HIDDEN = 2048
TN = 1024                      # N-block size; MUST stay <= 1024 (>=2 blocks) for v7x megacore
N_BLOCKS = HIDDEN // TN
LAYER_DIMS = [(TARGET_SIZE, HIDDEN), (HIDDEN, HIDDEN), (HIDDEN, HIDDEN), (HIDDEN, 1)]

assert TN <= 1024 and HIDDEN % TN == 0 and N_BLOCKS >= 2, (
    "keep >=2 N-blocks so both v7x TensorCores stream half the weights"
)


# ----------------------------------------------------------------------------
# Kernels
# ----------------------------------------------------------------------------
def _layers12_kernel(x_ref, w1_ref, b1_ref, w2_ref, b2_ref, o_ref):
    """o[:, nblk] = relu(relu(x @ w1 + b1) @ w2[:, nblk] + b2[nblk]).

    x / w1 / b1 are full blocks; h1 is recomputed per N-block (cheap at M=8).
    Single K step -> no accumulator, no pl.when plumbing.
    """
    h1 = jnp.dot(x_ref[...], w1_ref[...], preferred_element_type=jnp.float32)
    h1 = jnp.maximum(h1 + b1_ref[...], 0.0).astype(jnp.bfloat16)
    h2 = jnp.dot(h1, w2_ref[0], preferred_element_type=jnp.float32)
    o_ref[...] = jnp.maximum(h2 + b2_ref[...], 0.0).astype(o_ref.dtype)


def _layer3_head_kernel(h_ref, w3_ref, b3_ref, w4_ref, o_ref):
    """Per-N-block partial of the head.

    h3 = relu(h @ w3[:, nblk] + b3[nblk]);  o[nblk] = sum(h3 * w4_row[nblk]).
    The head uses a lane-dense (1, tn) row via VPU multiply + XLU reduce.
    Partials over N-blocks are summed (and b4 added) in the wrapper.
    """
    h3 = jnp.dot(h_ref[...], w3_ref[0], preferred_element_type=jnp.float32)
    h3 = jnp.maximum(h3 + b3_ref[...], 0.0)
    part = jnp.sum(h3 * w4_ref[...].astype(jnp.float32), axis=-1, keepdims=True)
    o_ref[...] = part[None]          # (1, M, 1)


# ----------------------------------------------------------------------------
# Wrappers
# ----------------------------------------------------------------------------
def _layers12_pallas(x_bf16, w1, b1, w2_blk, b2):
    M, k_in = x_bf16.shape
    H = w1.shape[1]
    assert w2_blk.shape == (N_BLOCKS, H, TN) and b2.shape == (1, H)

    flops = 2 * M * k_in * H * N_BLOCKS + 2 * M * H * H
    bytes_accessed = (
        M * k_in * 2 + k_in * H * 2 + H * 4          # x, w1, b1
        + H * H * 2 + H * 4                          # w2, b2
        + M * H * 2                                  # out
    )

    return pl.pallas_call(
        _layers12_kernel,
        out_shape=jax.ShapeDtypeStruct((M, H), jnp.bfloat16),
        grid_spec=pltpu.PrefetchScalarGridSpec(
            num_scalar_prefetch=0,
            grid=(N_BLOCKS,),
            in_specs=[
                pl.BlockSpec((M, k_in), lambda n: (0, 0)),     # x (full)
                pl.BlockSpec((k_in, H), lambda n: (0, 0)),     # w1 (full, ~1 MiB)
                pl.BlockSpec((1, H), lambda n: (0, 0)),        # b1 (full)
                pl.BlockSpec((1, H, TN), lambda n: (n, 0, 0)), # w2 pre-blocked tile
                pl.BlockSpec((1, TN), lambda n: (0, n)),       # b2 tile
            ],
            out_specs=pl.BlockSpec((M, TN), lambda n: (0, n)),
        ),
        compiler_params=pltpu.CompilerParams(dimension_semantics=("parallel",)),
        cost_estimate=pl.CostEstimate(
            flops=flops, transcendentals=0, bytes_accessed=bytes_accessed),
    )(x_bf16, w1, b1, w2_blk, b2)


def _layer3_head_pallas(h_bf16, w3_blk, b3, w4_row, b4):
    M, H = h_bf16.shape
    assert w3_blk.shape == (N_BLOCKS, H, TN)
    assert b3.shape == (1, H) and w4_row.shape == (1, H) and b4.shape == (1, 1)

    flops = 2 * M * H * H + 2 * M * H
    bytes_accessed = (
        M * H * 2 + H * H * 2 + H * 4 + H * 2        # h, w3, b3, w4
        + N_BLOCKS * M * 4                           # partial outputs
    )

    partials = pl.pallas_call(
        _layer3_head_kernel,
        out_shape=jax.ShapeDtypeStruct((N_BLOCKS, M, 1), jnp.float32),
        grid_spec=pltpu.PrefetchScalarGridSpec(
            num_scalar_prefetch=0,
            grid=(N_BLOCKS,),
            in_specs=[
                pl.BlockSpec((M, H), lambda n: (0, 0)),        # h (full, 32 KiB)
                pl.BlockSpec((1, H, TN), lambda n: (n, 0, 0)), # w3 pre-blocked tile
                pl.BlockSpec((1, TN), lambda n: (0, n)),       # b3 tile
                pl.BlockSpec((1, TN), lambda n: (0, n)),       # w4 row tile
            ],
            out_specs=pl.BlockSpec((1, M, 1), lambda n: (n, 0, 0)),
        ),
        compiler_params=pltpu.CompilerParams(dimension_semantics=("parallel",)),
        cost_estimate=pl.CostEstimate(
            flops=flops, transcendentals=0, bytes_accessed=bytes_accessed),
    )(h_bf16, w3_blk, b3, w4_row)

    # Tiny (N_BLOCKS, M, 1) reduction + final bias; negligible cost.
    return partials.sum(axis=0) + b4


@jax.jit
def production_evaluator_forward(x, packed_params):
    """x: [B, 256] f32 -> [B, 1] f32."""
    w1, b1, w2_blk, b2, w3_blk, b3, w4_row, b4 = packed_params
    h = _layers12_pallas(x.astype(jnp.bfloat16), w1, b1, w2_blk, b2)
    return _layer3_head_pallas(h, w3_blk, b3, w4_row, b4)


# ----------------------------------------------------------------------------
# Parameter construction / packing
# ----------------------------------------------------------------------------
def init_params(key):
    """PyTorch nn.Linear-style U(-1/sqrt(fan_in), 1/sqrt(fan_in)) init.

    Weights stored bf16 (weight-streaming optimization), biases f32.
    """
    params = []
    for fan_in, fan_out in LAYER_DIMS:
        key, kw, kb = jax.random.split(key, 3)
        bound = 1.0 / (fan_in ** 0.5)
        w = jax.random.uniform(kw, (fan_in, fan_out), jnp.float32,
                               minval=-bound, maxval=bound)
        b = jax.random.uniform(kb, (1, fan_out), jnp.float32,
                               minval=-bound, maxval=bound)
        params.append((w.astype(jnp.bfloat16), b))
    return params


def pack_params(params):
    """Host-side one-time repack into kernel layout.

    w2/w3 -> (N_BLOCKS, K, TN): each weight tile DMA becomes one contiguous
    ~4 MiB transfer.  Head weight -> lane-dense (1, HIDDEN) row.
    """
    (w1, b1), (w2, b2), (w3, b3), (w4, b4) = params

    def block(w):
        K, N = w.shape
        return w.reshape(K, N_BLOCKS, TN).transpose(1, 0, 2)

    return (w1, b1, block(w2), b2, block(w3), b3, w4.reshape(1, HIDDEN), b4)


def reference_forward(x, params):
    """Pure-JAX reference with the same bf16-weight / bf16-activation numerics."""
    (w1, b1), (w2, b2), (w3, b3), (w4, b4) = params

    def lin(h, w, b):
        return jnp.dot(h, w, preferred_element_type=jnp.float32) + b

    h = x.astype(jnp.bfloat16)
    h = jnp.maximum(lin(h, w1, b1), 0.0).astype(jnp.bfloat16)
    h = jnp.maximum(lin(h, w2, b2), 0.0).astype(jnp.bfloat16)
    h = jnp.maximum(lin(h, w3, b3), 0.0)
    return jnp.dot(h, w4.astype(jnp.float32),
                   preferred_element_type=jnp.float32) + b4


if __name__ == "__main__":
    key = jax.random.PRNGKey(0)
    key, kx = jax.random.split(key)

    batch = 8  # multiple of 8 keeps sublane tiling dense
    x = jax.random.normal(kx, (batch, TARGET_SIZE), jnp.float32)

    params = init_params(key)
    packed = pack_params(params)

    out = production_evaluator_forward(x, packed)
    out = jax.block_until_ready(out)

    assert out.shape == (batch, 1), out.shape
    ref = reference_forward(x, params)
    err = float(jnp.max(jnp.abs(out - ref)))
    assert err < 1e-3, f"max abs err {err}"

    print("KERNEL_OK")
</pallas_src>

<mosaic_0001>
module attributes {stable_mosaic.version = 11 : i64} {
  func.func @_layer3_head_kernel(%arg0: i32, %arg1: memref<8x2048xbf16, #tpu.memory_space<vmem>>, %arg2: memref<1x2048x1024xbf16, #tpu.memory_space<vmem>>, %arg3: memref<1x1024xf32, #tpu.memory_space<vmem>>, %arg4: memref<1x1024xbf16, #tpu.memory_space<vmem>>, %arg5: memref<1x8x1xf32, #tpu.memory_space<vmem>>) attributes {dimension_semantics = [#tpu.dimension_semantics<parallel>], iteration_bounds = array<i64: 2>, scalar_prefetch = 0 : i64, scratch_operands = 0 : i64, tpu.core_type = #tpu.core_type<tc>, window_params = [{pipeline_mode = #tpu.pipeline_mode<synchronous>, transform_indices = @transform_0, window_bounds = array<i64: 8, 2048>}, {transform_indices = @transform_1, window_bounds = array<i64: 1, 2048, 1024>}, {transform_indices = @transform_2, window_bounds = array<i64: 1, 1024>}, {transform_indices = @transform_3, window_bounds = array<i64: 1, 1024>}, {transform_indices = @transform_4, window_bounds = array<i64: 1, 8, 1>}]} {
    %c0 = arith.constant 0 : index
    %c0_0 = arith.constant 0 : index
    %0 = vector.load %arg1[%c0, %c0_0] : memref<8x2048xbf16, #tpu.memory_space<vmem>>, vector<8x2048xbf16>
    %c0_1 = arith.constant 0 : index
    %c0_2 = arith.constant 0 : index
    %c0_3 = arith.constant 0 : index
    %1 = vector.load %arg2[%c0_1, %c0_2, %c0_3] : memref<1x2048x1024xbf16, #tpu.memory_space<vmem>>, vector<1x2048x1024xbf16>
    %2 = vector.shape_cast %1 : vector<1x2048x1024xbf16> to vector<2048x1024xbf16>
    %cst = arith.constant dense<0.000000e+00> : vector<8x1024xf32>
    %3 = tpu.matmul %0, %2, %cst {dimension_numbers = #tpu.dot_dimension_numbers<[1], [0], [0], [1], [0, 0, 1, 1], [], []>} : vector<8x2048xbf16>, vector<2048x1024xbf16>, vector<8x1024xf32> -> vector<8x1024xf32>
    %c0_4 = arith.constant 0 : index
    %c0_5 = arith.constant 0 : index
    %4 = vector.load %arg3[%c0_4, %c0_5] : memref<1x1024xf32, #tpu.memory_space<vmem>>, vector<1x1024xf32>
    %5 = vector.broadcast %4 : vector<1x1024xf32> to vector<8x1024xf32>
    %6 = arith.addf %3, %5 : vector<8x1024xf32>
    %cst_6 = arith.constant 0.000000e+00 : f32
    %7 = vector.broadcast %cst_6 : f32 to vector<8x1024xf32>
    %8 = arith.maximumf %6, %7 : vector<8x1024xf32>
    %c0_7 = arith.constant 0 : index
    %c0_8 = arith.constant 0 : index
    %9 = vector.load %arg4[%c0_7, %c0_8] : memref<1x1024xbf16, #tpu.memory_space<vmem>>, vector<1x1024xbf16>
    %10 = arith.extf %9 : vector<1x1024xbf16> to vector<1x1024xf32>
    %11 = vector.broadcast %10 : vector<1x1024xf32> to vector<8x1024xf32>
    %12 = arith.mulf %8, %11 : vector<8x1024xf32>
    %cst_9 = arith.constant dense<0.000000e+00> : vector<8xf32>
    %13 = vector.multi_reduction <add>, %12, %cst_9 [1] : vector<8x1024xf32> to vector<8xf32>
    %14 = vector.shape_cast %13 : vector<8xf32> to vector<8x1xf32>
    %15 = vector.shape_cast %14 : vector<8x1xf32> to vector<1x8x1xf32>
    %c0_10 = arith.constant 0 : index
    %c0_11 = arith.constant 0 : index
    %c0_12 = arith.constant 0 : index
    %16 = vector.load %arg5[%c0_10, %c0_11, %c0_12] : memref<1x8x1xf32, #tpu.memory_space<vmem>>, vector<1x8x1xf32>
    tpu.vector_store %arg5[%c0_10, %c0_11, %c0_12], %15 {strides = array<i32>} : memref<1x8x1xf32, #tpu.memory_space<vmem>>, vector<1x8x1xf32>,
    return
  }
  func.func @transform_0(%arg0: i32) -> (i32, i32) {
    %c0_i32 = arith.constant 0 : i32
    %c0_i32_0 = arith.constant 0 : i32
    %c0_i32_1 = arith.constant 0 : i32
    return %c0_i32, %c0_i32_0 : i32, i32
  }
  func.func @transform_1(%arg0: i32) -> (i32, i32, i32) {
    %c0_i32 = arith.constant 0 : i32
    %c0_i32_0 = arith.constant 0 : i32
    %c0_i32_1 = arith.constant 0 : i32
    return %arg0, %c0_i32, %c0_i32_0 : i32, i32, i32
  }
  func.func @transform_2(%arg0: i32) -> (i32, i32) {
    %c0_i32 = arith.constant 0 : i32
    %c0_i32_0 = arith.constant 0 : i32
    return %c0_i32, %arg0 : i32, i32
  }
  func.func @transform_3(%arg0: i32) -> (i32, i32) {
    %c0_i32 = arith.constant 0 : i32
    %c0_i32_0 = arith.constant 0 : i32
    return %c0_i32, %arg0 : i32, i32
  }
  func.func @transform_4(%arg0: i32) -> (i32, i32, i32) {
    %c0_i32 = arith.constant 0 : i32
    %c0_i32_0 = arith.constant 0 : i32
    %c0_i32_1 = arith.constant 0 : i32
    return %arg0, %c0_i32, %c0_i32_0 : i32, i32, i32
  }
}

module attributes {stable_mosaic.version = 11 : i64} {
  func.func @_layers12_kernel(%arg0: i32, %arg1: memref<8x256xbf16, #tpu.memory_space<vmem>>, %arg2: memref<256x2048xbf16, #tpu.memory_space<vmem>>, %arg3: memref<1x2048xf32, #tpu.memory_space<vmem>>, %arg4: memref<1x2048x1024xbf16, #tpu.memory_space<vmem>>, %arg5: memref<1x1024xf32, #tpu.memory_space<vmem>>, %arg6: memref<8x1024xbf16, #tpu.memory_space<vmem>>) attributes {dimension_semantics = [#tpu.dimension_semantics<parallel>], iteration_bounds = array<i64: 2>, scalar_prefetch = 0 : i64, scratch_operands = 0 : i64, tpu.core_type = #tpu.core_type<tc>, window_params = [{pipeline_mode = #tpu.pipeline_mode<synchronous>, transform_indices = @transform_0, window_bounds = array<i64: 8, 256>}, {pipeline_mode = #tpu.pipeline_mode<synchronous>, transform_indices = @transform_1, window_bounds = array<i64: 256, 2048>}, {pipeline_mode = #tpu.pipeline_mode<synchronous>, transform_indices = @transform_2, window_bounds = array<i64: 1, 2048>}, {transform_indices = @transform_3, window_bounds = array<i64: 1, 2048, 1024>}, {transform_indices = @transform_4, window_bounds = array<i64: 1, 1024>}, {transform_indices = @transform_5, window_bounds = array<i64: 8, 1024>}]} {
    %c0 = arith.constant 0 : index
    %c0_0 = arith.constant 0 : index
    %0 = vector.load %arg1[%c0, %c0_0] : memref<8x256xbf16, #tpu.memory_space<vmem>>, vector<8x256xbf16>
    %c0_1 = arith.constant 0 : index
    %c0_2 = arith.constant 0 : index
    %1 = vector.load %arg2[%c0_1, %c0_2] : memref<256x2048xbf16, #tpu.memory_space<vmem>>, vector<256x2048xbf16>
    %cst = arith.constant dense<0.000000e+00> : vector<8x2048xf32>
    %2 = tpu.matmul %0, %1, %cst {dimension_numbers = #tpu.dot_dimension_numbers<[1], [0], [0], [1], [0, 0, 1, 1], [], []>} : vector<8x256xbf16>, vector<256x2048xbf16>, vector<8x2048xf32> -> vector<8x2048xf32>
    %c0_3 = arith.constant 0 : index
    %c0_4 = arith.constant 0 : index
    %3 = vector.load %arg3[%c0_3, %c0_4] : memref<1x2048xf32, #tpu.memory_space<vmem>>, vector<1x2048xf32>
    %4 = vector.broadcast %3 : vector<1x2048xf32> to vector<8x2048xf32>
    %5 = arith.addf %2, %4 : vector<8x2048xf32>
    %cst_5 = arith.constant 0.000000e+00 : f32
    %6 = vector.broadcast %cst_5 : f32 to vector<8x2048xf32>
    %7 = arith.maximumf %5, %6 : vector<8x2048xf32>
    %8 = arith.truncf %7 : vector<8x2048xf32> to vector<8x2048xbf16>
    %c0_6 = arith.constant 0 : index
    %c0_7 = arith.constant 0 : index
    %c0_8 = arith.constant 0 : index
    %9 = vector.load %arg4[%c0_6, %c0_7, %c0_8] : memref<1x2048x1024xbf16, #tpu.memory_space<vmem>>, vector<1x2048x1024xbf16>
    %10 = vector.shape_cast %9 : vector<1x2048x1024xbf16> to vector<2048x1024xbf16>
    %cst_9 = arith.constant dense<0.000000e+00> : vector<8x1024xf32>
    %11 = tpu.matmul %8, %10, %cst_9 {dimension_numbers = #tpu.dot_dimension_numbers<[1], [0], [0], [1], [0, 0, 1, 1], [], []>} : vector<8x2048xbf16>, vector<2048x1024xbf16>, vector<8x1024xf32> -> vector<8x1024xf32>
    %c0_10 = arith.constant 0 : index
    %c0_11 = arith.constant 0 : index
    %12 = vector.load %arg5[%c0_10, %c0_11] : memref<1x1024xf32, #tpu.memory_space<vmem>>, vector<1x1024xf32>
    %13 = vector.broadcast %12 : vector<1x1024xf32> to vector<8x1024xf32>
    %14 = arith.addf %11, %13 : vector<8x1024xf32>
    %cst_12 = arith.constant 0.000000e+00 : f32
    %15 = vector.broadcast %cst_12 : f32 to vector<8x1024xf32>
    %16 = arith.maximumf %14, %15 : vector<8x1024xf32>
    %17 = arith.truncf %16 : vector<8x1024xf32> to vector<8x1024xbf16>
    %c0_13 = arith.constant 0 : index
    %c0_14 = arith.constant 0 : index
    %18 = vector.load %arg6[%c0_13, %c0_14] : memref<8x1024xbf16, #tpu.memory_space<vmem>>, vector<8x1024xbf16>
    tpu.vector_store %arg6[%c0_13, %c0_14], %17 {strides = array<i32>} : memref<8x1024xbf16, #tpu.memory_space<vmem>>, vector<8x1024xbf16>,
    return
  }
  func.func @transform_0(%arg0: i32) -> (i32, i32) {
    %c0_i32 = arith.constant 0 : i32
    %c0_i32_0 = arith.constant 0 : i32
    %c0_i32_1 = arith.constant 0 : i32
    return %c0_i32, %c0_i32_0 : i32, i32
  }
  func.func @transform_1(%arg0: i32) -> (i32, i32) {
    %c0_i32 = arith.constant 0 : i32
    %c0_i32_0 = arith.constant 0 : i32
    %c0_i32_1 = arith.constant 0 : i32
    return %c0_i32, %c0_i32_0 : i32, i32
  }
  func.func @transform_2(%arg0: i32) -> (i32, i32) {
    %c0_i32 = arith.constant 0 : i32
    %c0_i32_0 = arith.constant 0 : i32
    %c0_i32_1 = arith.constant 0 : i32
    return %c0_i32, %c0_i32_0 : i32, i32
  }
  func.func @transform_3(%arg0: i32) -> (i32, i32, i32) {
    %c0_i32 = arith.constant 0 : i32
    %c0_i32_0 = arith.constant 0 : i32
    %c0_i32_1 = arith.constant 0 : i32
    return %arg0, %c0_i32, %c0_i32_0 : i32, i32, i32
  }
  func.func @transform_4(%arg0: i32) -> (i32, i32) {
    %c0_i32 = arith.constant 0 : i32
    %c0_i32_0 = arith.constant 0 : i32
    return %c0_i32, %arg0 : i32, i32
  }
  func.func @transform_5(%arg0: i32) -> (i32, i32) {
    %c0_i32 = arith.constant 0 : i32
    %c0_i32_0 = arith.constant 0 : i32
    return %c0_i32, %arg0 : i32, i32
  }
}

</mosaic_0001>

<bundles_post_ra>
// kernel: production_evaluator_forward.3
= control target key start
LH: loop header
LB: loop body
LE: loop exit
PB: predicated region body
PF: predicated region fallthrough
CT: control target
= control target key end

     0   :  { %s9203_s15 = smov 0   ;;  %s10494_s0 = inlined_call_operand.vmem [shape: bf16[8,2048], index: 0, kind: input, shape index: {}]   ;;  %s10495_s1 = inlined_call_operand.vmem [shape: bf16[2,2048,1024], index: 1, kind: input, shape index: {}]   ;;  %s10496_s2 = inlined_call_operand.vmem [shape: f32[1,2048], index: 2, kind: input, shape index: {}]   ;;  %s10497_s3 = inlined_call_operand.vmem [shape: bf16[1,2048], index: 3, kind: input, shape index: {}]   ;;  %s10498_s4 = inlined_call_operand.vmem [shape: f32[2,8,1], index: 4, kind: output, shape index: {}]  }
   0x1 LB: > { %s9209_s16 = sadd.s32 4294967295, %s9176_s15   ;;  %p7975_p0 = scmp.ge.s32.totalorder %s9176_s15, 1  ;;  %s9176_s15 = sphi %s9203_s15, %s14_s15  }
   0x2   : > { %p182_p1 = scmp.lt.s32.totalorder %s9176_s15, 3 }
   0x4   : > { %p183_p2 = pnand %p7975_p0, %p182_p1 }
   0x5   : > { %p215_p3 = scmp.lt.s32.totalorder (!%p183_p2), %s9209_s16, 1  ;;  %v9217_v0 = vld [vmem:[%s10494_s0] sm:$0xff] (!%p183_p2)  ;;  %s7978_s12 = sshll.u32 (!%p183_p2), %s9209_s16, 3  ;;  %vm7898_vm0 = vcmask (!%p183_p2), 7168  }
   0x6   : > { %186 = sbr.rel (%p183_p2) target bundleno = 1414 (0x586), region = 36  ;;  %v9221_v1 = vcombine.high (!%p183_p2), %v9217_v0, %v9217_v0  ;;  %p10082_p4 = scmp.lt.s32.totalorder (!%p183_p2), %s7978_s12, 15 }
   0x8   : > { %6516 = vmatprep.mubr.bf16.mxu0 (!%p183_p2), %v9221_v1  ;;  %6844 = vmatprep.mubr.bf16.mxu1 (!%p183_p2), %v9221_v1 }
   0xd   : > { %s9224_s19 = scalar_select %p215_p3, %s9209_s16, 1 }
   0xe   : > { %s10501_s12 = smov (!%p10082_p4, %s7978_s12), 15 }
   0xf   : > { %s9023_s20 = sshll.u32 %s9224_s19, 13  ;;  %s10106_s17 = scalar_lea.vmem %s10497_s3, %s10501_s12 }
  0x10   : > { %s9232_s23 = scalar_lea.vmem %s10495_s1, %s9023_s20  ;;  %s10119_s21 = scalar_lea.vmem %s10496_s2, %s10501_s12 }
  0x11   : > { %v242_v2 = vld [vmem:[%s9232_s23] sm:$0xff]  ;;  %v243_v4 = vld [vmem:[%s9232_s23 + $0x8] sm:$0xff]  ;;  %s7980_s22 = sshll.u32 %s9224_s19, 3 }
  0x12   : > { %v246_v3 = vld [vmem:[%s9232_s23 + $0x20] sm:$0xff]  ;;  %v247_v6 = vld [vmem:[%s9232_s23 + $0x28] sm:$0xff]  ;;  %s233_s25 = scalar_lea.vmem %s10498_s4, %s7980_s22 }
  0x13   : > { %v7998_v5 = vcombine.high %v242_v2, %v246_v3  ;;  %v7997_v7 = vcombine.low %v242_v2, %v246_v3  ;;  %v250_v8 = vld [vmem:[%s9232_s23 + $0x40] sm:$0xff]  ;;  %v8000_v10 = vcombine.high %v243_v4, %v247_v6  ;;  %v7999_v11 = vcombine.low %v243_v4, %v247_v6  ;;  %v251_v13 = vld [vmem:[%s9232_s23 + $0x48] sm:$0xff] }
  0x14   : > { %v254_v9 = vld [vmem:[%s9232_s23 + $0x60] sm:$0xff]  ;;  %v255_v14 = vld [vmem:[%s9232_s23 + $0x68] sm:$0xff] }
  0x15   : > { %v8006_v12 = vcombine.high %v250_v8, %v254_v9  ;;  %v258_v15 = vld [vmem:[%s9232_s23 + $0x80] sm:$0xff]  ;;  %6484 = vmatprep.subr.bf16.mxu0 %v7998_v5  ;;  %v8008_v16 = vcombine.high %v251_v13, %v255_v14  ;;  %v259_v18 = vld [vmem:[%s9232_s23 + $0x88] sm:$0xff]  ;;  %6812 = vmatprep.subr.bf16.mxu1 %v8000_v10  ;;  %v8005_v20 = vcombine.low %v250_v8, %v254_v9 }
  0x16   : > { %v262_v17 = vld [vmem:[%s9232_s23 + $0xa0] sm:$0xff]  ;;  %v263_v19 = vld [vmem:[%s9232_s23 + $0xa8] sm:$0xff]  ;;  %6485 = vmatpush1.bf16.msra.mxu0 %v7997_v7  ;;  %6813 = vmatpush1.bf16.msra.mxu1 %v7999_v11  ;;  %v8007_v21 = vcombine.low %v251_v13, %v255_v14 }
  0x17   : > { %6486 = vmatprep.subr.bf16.mxu0 %v8006_v12  ;;  %v8014_v22 = vcombine.high %v258_v15, %v262_v17  ;;  %6814 = vmatprep.subr.bf16.mxu1 %v8008_v16  ;;  %v8016_v23 = vcombine.high %v259_v18, %v263_v19  ;;  %v266_v24 = vld [vmem:[%s9232_s23 + $0xc0] sm:$0xff]  ;;  %v267_v26 = vld [vmem:[%s9232_s23 + $0xc8] sm:$0xff]  ;;  %v8013_v28 = vcombine.low %v258_v15, %v262_v17 }
  0x18   : > { %v270_v25 = vld [vmem:[%s9232_s23 + $0xe0] sm:$0xff]  ;;  %v271_v27 = vld [vmem:[%s9232_s23 + $0xe8] sm:$0xff]  ;;  %v8015_v29 = vcombine.low %v259_v18, %v263_v19 }
  0x19   : > { %v8022_v30 = vcombine.high %v266_v24, %v270_v25  ;;  %v8024_v31 = vcombine.high %v267_v26, %v271_v27  ;;  %v274_v32 = vld [vmem:[%s9232_s23 + $0x100] sm:$0xff]  ;;  %v275_v34 = vld [vmem:[%s9232_s23 + $0x108] sm:$0xff]  ;;  %v8021_v36 = vcombine.low %v266_v24, %v270_v25  ;;  %v8023_v37 = vcombine.low %v267_v26, %v271_v27 }
  0x1a   : > { %6487 = vmatpush1.bf16.msra.mxu0 %v8005_v20  ;;  %6815 = vmatpush1.bf16.msra.mxu1 %v8007_v21  ;;  %v278_v33 = vld [vmem:[%s9232_s23 + $0x120] sm:$0xff]  ;;  %v279_v35 = vld [vmem:[%s9232_s23 + $0x128] sm:$0xff] }
  0x1b   : > { %6488 = vmatprep.subr.bf16.mxu0 %v8014_v22  ;;  %6816 = vmatprep.subr.bf16.mxu1 %v8016_v23  ;;  %v8030_v38 = vcombine.high %v274_v32, %v278_v33  ;;  %v8032_v39 = vcombine.high %v275_v34, %v279_v35  ;;  %v282_v40 = vld [vmem:[%s9232_s23 + $0x140] sm:$0xff]  ;;  %v283_v42 = vld [vmem:[%s9232_s23 + $0x148] sm:$0xff]  ;;  %v8029_v44 = vcombine.low %v274_v32, %v278_v33 }
  0x1c   : > { %v286_v41 = vld [vmem:[%s9232_s23 + $0x160] sm:$0xff]  ;;  %v287_v43 = vld [vmem:[%s9232_s23 + $0x168] sm:$0xff]  ;;  %v8031_v45 = vcombine.low %v275_v34, %v279_v35 }
  0x1d   : > { %v8038_v46 = vcombine.high %v282_v40, %v286_v41  ;;  %v8040_v47 = vcombine.high %v283_v42, %v287_v43  ;;  %v290_v48 = vld [vmem:[%s9232_s23 + $0x180] sm:$0xff]  ;;  %v291_v50 = vld [vmem:[%s9232_s23 + $0x188] sm:$0xff]  ;;  %v8037_v52 = vcombine.low %v282_v40, %v286_v41  ;;  %v8039_v53 = vcombine.low %v283_v42, %v287_v43 }
  0x1e   : > { %6489 = vmatpush1.bf16.msra.mxu0 %v8013_v28  ;;  %6817 = vmatpush1.bf16.msra.mxu1 %v8015_v29  ;;  %v294_v49 = vld [vmem:[%s9232_s23 + $0x1a0] sm:$0xff]  ;;  %v295_v51 = vld [vmem:[%s9232_s23 + $0x1a8] sm:$0xff] }
  0x1f   : > { %6490 = vmatprep.subr.bf16.mxu0 %v8022_v30  ;;  %6818 = vmatprep.subr.bf16.mxu1 %v8024_v31  ;;  %v8046_v54 = vcombine.high %v290_v48, %v294_v49  ;;  %v8048_v55 = vcombine.high %v291_v50, %v295_v51  ;;  %v298_v56 = vld [vmem:[%s9232_s23 + $0x1c0] sm:$0xff]  ;;  %v299_v58 = vld [vmem:[%s9232_s23 + $0x1c8] sm:$0xff]  ;;  %v8045_v60 = vcombine.low %v290_v48, %v294_v49 }
  0x20   : > { %v302_v57 = vld [vmem:[%s9232_s23 + $0x1e0] sm:$0xff]  ;;  %v303_v59 = vld [vmem:[%s9232_s23 + $0x1e8] sm:$0xff]  ;;  %v8047_v61 = vcombine.low %v291_v50, %v295_v51 }
  0x21   : > { %v8054_v62 = vcombine.high %v298_v56, %v302_v57  ;;  %v8056_v63 = vcombine.high %v299_v58, %v303_v59  ;;  %v306_v2 = vld [vmem:[%s9232_s23 + $0x200] sm:$0xff]  ;;  %v307_v4 = vld [vmem:[%s9232_s23 + $0x208] sm:$0xff]  ;;  %v8053_v6 = vcombine.low %v298_v56, %v302_v57  ;;  %v8055_v7 = vcombine.low %v299_v58, %v303_v59 }
  0x22   : > { %6491 = vmatpush1.bf16.msra.mxu0 %v8021_v36  ;;  %6819 = vmatpush1.bf16.msra.mxu1 %v8023_v37  ;;  %v310_v3 = vld [vmem:[%s9232_s23 + $0x220] sm:$0xff]  ;;  %v311_v5 = vld [vmem:[%s9232_s23 + $0x228] sm:$0xff] }
  0x23   : > { %6492 = vmatprep.subr.bf16.mxu0 %v8030_v38  ;;  %6820 = vmatprep.subr.bf16.mxu1 %v8032_v39  ;;  %v8062_v8 = vcombine.high %v306_v2, %v310_v3  ;;  %v8064_v9 = vcombine.high %v307_v4, %v311_v5  ;;  %v314_v10 = vld [vmem:[%s9232_s23 + $0x240] sm:$0xff]  ;;  %v315_v12 = vld [vmem:[%s9232_s23 + $0x248] sm:$0xff]  ;;  %v8061_v14 = vcombine.low %v306_v2, %v310_v3 }
  0x24   : > { %v318_v11 = vld [vmem:[%s9232_s23 + $0x260] sm:$0xff]  ;;  %v319_v13 = vld [vmem:[%s9232_s23 + $0x268] sm:$0xff]  ;;  %v8063_v15 = vcombine.low %v307_v4, %v311_v5 }
  0x25   : > { %v8070_v16 = vcombine.high %v314_v10, %v318_v11  ;;  %v8072_v17 = vcombine.high %v315_v12, %v319_v13  ;;  %v322_v18 = vld [vmem:[%s9232_s23 + $0x280] sm:$0xff]  ;;  %v323_v20 = vld [vmem:[%s9232_s23 + $0x288] sm:$0xff]  ;;  %v8069_v22 = vcombine.low %v314_v10, %v318_v11  ;;  %v8071_v23 = vcombine.low %v315_v12, %v319_v13 }
  0x26   : > { %6493 = vmatpush1.bf16.msra.mxu0 %v8029_v44  ;;  %6821 = vmatpush1.bf16.msra.mxu1 %v8031_v45  ;;  %v326_v19 = vld [vmem:[%s9232_s23 + $0x2a0] sm:$0xff]  ;;  %v327_v21 = vld [vmem:[%s9232_s23 + $0x2a8] sm:$0xff] }
  0x27   : > { %6494 = vmatprep.subr.bf16.mxu0 %v8038_v46  ;;  %6822 = vmatprep.subr.bf16.mxu1 %v8040_v47  ;;  %v8078_v24 = vcombine.high %v322_v18, %v326_v19  ;;  %v8080_v25 = vcombine.high %v323_v20, %v327_v21  ;;  %v330_v26 = vld [vmem:[%s9232_s23 + $0x2c0] sm:$0xff]  ;;  %v331_v28 = vld [vmem:[%s9232_s23 + $0x2c8] sm:$0xff]  ;;  %v8077_v30 = vcombine.low %v322_v18, %v326_v19 }
  0x28   : > { %v334_v27 = vld [vmem:[%s9232_s23 + $0x2e0] sm:$0xff]  ;;  %v335_v29 = vld [vmem:[%s9232_s23 + $0x2e8] sm:$0xff]  ;;  %v8079_v31 = vcombine.low %v323_v20, %v327_v21 }
  0x29   : > { %v8086_v32 = vcombine.high %v330_v26, %v334_v27  ;;  %v8088_v33 = vcombine.high %v331_v28, %v335_v29  ;;  %v338_v34 = vld [vmem:[%s9232_s23 + $0x300] sm:$0xff]  ;;  %v339_v36 = vld [vmem:[%s9232_s23 + $0x308] sm:$0xff]  ;;  %v8085_v38 = vcombine.low %v330_v26, %v334_v27  ;;  %v8087_v39 = vcombine.low %v331_v28, %v335_v29 }
  0x2a   : > { %6495 = vmatpush1.bf16.msra.mxu0 %v8037_v52  ;;  %6823 = vmatpush1.bf16.msra.mxu1 %v8039_v53  ;;  %v342_v35 = vld [vmem:[%s9232_s23 + $0x320] sm:$0xff]  ;;  %v343_v37 = vld [vmem:[%s9232_s23 + $0x328] sm:$0xff] }
  0x2b   : > { %6496 = vmatprep.subr.bf16.mxu0 %v8046_v54  ;;  %6824 = vmatprep.subr.bf16.mxu1 %v8048_v55  ;;  %v8094_v40 = vcombine.high %v338_v34, %v342_v35  ;;  %v8096_v41 = vcombine.high %v339_v36, %v343_v37  ;;  %v346_v42 = vld [vmem:[%s9232_s23 + $0x340] sm:$0xff]  ;;  %v347_v44 = vld [vmem:[%s9232_s23 + $0x348] sm:$0xff]  ;;  %v8093_v46 = vcombine.low %v338_v34, %v342_v35 }
  0x2c   : > { %v350_v43 = vld [vmem:[%s9232_s23 + $0x360] sm:$0xff]  ;;  %v351_v45 = vld [vmem:[%s9232_s23 + $0x368] sm:$0xff]  ;;  %v8095_v47 = vcombine.low %v339_v36, %v343_v37 }
  0x2d   : > { %v8102_v48 = vcombine.high %v346_v42, %v350_v43  ;;  %v8104_v49 = vcombine.high %v347_v44, %v351_v45  ;;  %v354_v50 = vld [vmem:[%s9232_s23 + $0x380] sm:$0xff]  ;;  %v355_v52 = vld [vmem:[%s9232_s23 + $0x388] sm:$0xff]  ;;  %v8101_v54 = vcombine.low %v346_v42, %v350_v43  ;;  %v8103_v55 = vcombine.low %v347_v44, %v351_v45 }
  0x2e   : > { %6497 = vmatpush1.bf16.msra.mxu0 %v8045_v60  ;;  %6825 = vmatpush1.bf16.msra.mxu1 %v8047_v61  ;;  %v358_v51 = vld [vmem:[%s9232_s23 + $0x3a0] sm:$0xff]  ;;  %v359_v53 = vld [vmem:[%s9232_s23 + $0x3a8] sm:$0xff] }
  0x2f   : > { %6498 = vmatprep.subr.bf16.mxu0 %v8054_v62  ;;  %6826 = vmatprep.subr.bf16.mxu1 %v8056_v63  ;;  %v8110_v56 = vcombine.high %v354_v50, %v358_v51  ;;  %v8112_v57 = vcombine.high %v355_v52, %v359_v53  ;;  %v362_v58 = vld [vmem:[%s9232_s23 + $0x3c0] sm:$0xff]  ;;  %v363_v60 = vld [vmem:[%s9232_s23 + $0x3c8] sm:$0xff]  ;;  %v8109_v62 = vcombine.low %v354_v50, %v358_v51 }
  0x30   : > { %v366_v59 = vld [vmem:[%s9232_s23 + $0x3e0] sm:$0xff]  ;;  %v367_v61 = vld [vmem:[%s9232_s23 + $0x3e8] sm:$0xff]  ;;  %v8111_v63 = vcombine.low %v355_v52, %v359_v53 }
  0x31   : > { %v8118_v2 = vcombine.high %v362_v58, %v366_v59  ;;  %v8120_v3 = vcombine.high %v363_v60, %v367_v61  ;;  %v370_v4 = vld [vmem:[%s9232_s23 + $0x400] sm:$0xff] }
  0x32   : > { %6499 = vmatpush1.bf16.msra.mxu0 %v8053_v6  ;;  %6827 = vmatpush1.bf16.msra.mxu1 %v8055_v7  ;;  %v374_v5 = vld [vmem:[%s9232_s23 + $0x420] sm:$0xff]  ;;  %v371_v6 = vld [vmem:[%s9232_s23 + $0x408] sm:$0xff] }
  0x33   : > { %6500 = vmatprep.subr.bf16.mxu0 %v8062_v8  ;;  %6828 = vmatprep.subr.bf16.mxu1 %v8064_v9  ;;  %v375_v7 = vld [vmem:[%s9232_s23 + $0x428] sm:$0xff]  ;;  %v8117_v8 = vcombine.low %v362_v58, %v366_v59  ;;  %v8119_v9 = vcombine.low %v363_v60, %v367_v61  ;;  %v8126_v10 = vcombine.high %v370_v4, %v374_v5  ;;  %v378_v12 = vld [vmem:[%s9232_s23 + $0x440] sm:$0xff] }
  0x34   : > { %v8128_v11 = vcombine.high %v371_v6, %v375_v7  ;;  %v382_v13 = vld [vmem:[%s9232_s23 + $0x460] sm:$0xff]  ;;  %v8125_v18 = vcombine.low %v370_v4, %v374_v5  ;;  %v8127_v19 = vcombine.low %v371_v6, %v375_v7 }
  0x35   : > { %v8134_v20 = vcombine.high %v378_v12, %v382_v13  ;;  %v8133_v26 = vcombine.low %v378_v12, %v382_v13 }
  0x36   : > { %6501 = vmatpush1.bf16.msra.mxu0 %v8061_v14  ;;  %6829 = vmatpush1.bf16.msra.mxu1 %v8063_v15  ;;  %v9306_v14 = vcombine.low %v9217_v0, %v9217_v0  ;;  %v379_v15 = vld [vmem:[%s9232_s23 + $0x448] sm:$0xff]  ;;  %v386_v0 = vld [vmem:[%s9232_s23 + $0x480] sm:$0xff] }
  0x37   : > { %6502 = vmatprep.subr.bf16.mxu0 %v8070_v16  ;;  %6830 = vmatprep.subr.bf16.mxu1 %v8072_v17  ;;  %v383_v16 = vld [vmem:[%s9232_s23 + $0x468] sm:$0xff] }
  0x38   : > { %v9313_v17 = vld [vmem:[%s10494_s0 + $0x8] sm:$0xff]  ;;  %v8136_v21 = vcombine.high %v379_v15, %v383_v16  ;;  %v8135_v27 = vcombine.low %v379_v15, %v383_v16 }
  0x3a   : > { %6503 = vmatpush1.bf16.msra.mxu0 %v8069_v22  ;;  %6831 = vmatpush1.bf16.msra.mxu1 %v8071_v23  ;;  %v390_v22 = vld [vmem:[%s9232_s23 + $0x4a0] sm:$0xff]  ;;  %v9319_v23 = vcombine.high %v9313_v17, %v9313_v17 }
  0x3b   : > { %6504 = vmatprep.subr.bf16.mxu0 %v8078_v24  ;;  %6832 = vmatprep.subr.bf16.mxu1 %v8080_v25  ;;  %v387_v24 = vld [vmem:[%s9232_s23 + $0x488] sm:$0xff]  ;;  %v8142_v28 = vcombine.high %v386_v0, %v390_v22  ;;  %v8141_v34 = vcombine.low %v386_v0, %v390_v22 }
  0x3c   : > { %v391_v25 = vld [vmem:[%s9232_s23 + $0x4a8] sm:$0xff] }
  0x3d   : > { %v8144_v29 = vcombine.high %v387_v24, %v391_v25  ;;  %v8143_v35 = vcombine.low %v387_v24, %v391_v25 }
  0x3e   : > { %6505 = vmatpush1.bf16.msra.mxu0 %v8077_v30  ;;  %6833 = vmatpush1.bf16.msra.mxu1 %v8079_v31  ;;  %v394_v30 = vld [vmem:[%s9232_s23 + $0x4c0] sm:$0xff] }
  0x3f   : > { %6506 = vmatprep.subr.bf16.mxu0 %v8086_v32  ;;  %6834 = vmatprep.subr.bf16.mxu1 %v8088_v33  ;;  %v398_v31 = vld [vmem:[%s9232_s23 + $0x4e0] sm:$0xff]  ;;  %v395_v32 = vld [vmem:[%s9232_s23 + $0x4c8] sm:$0xff] }
  0x40   : > { %v399_v33 = vld [vmem:[%s9232_s23 + $0x4e8] sm:$0xff]  ;;  %v8150_v36 = vcombine.high %v394_v30, %v398_v31  ;;  %v8149_v42 = vcombine.low %v394_v30, %v398_v31 }
  0x41   : > { %v8152_v37 = vcombine.high %v395_v32, %v399_v33  ;;  %v8151_v43 = vcombine.low %v395_v32, %v399_v33 }
  0x42   : > { %6507 = vmatpush1.bf16.msra.mxu0 %v8085_v38  ;;  %6835 = vmatpush1.bf16.msra.mxu1 %v8087_v39  ;;  %v402_v38 = vld [vmem:[%s9232_s23 + $0x500] sm:$0xff] }
  0x43   : > { %6508 = vmatprep.subr.bf16.mxu0 %v8094_v40  ;;  %6836 = vmatprep.subr.bf16.mxu1 %v8096_v41  ;;  %v406_v39 = vld [vmem:[%s9232_s23 + $0x520] sm:$0xff]  ;;  %v403_v40 = vld [vmem:[%s9232_s23 + $0x508] sm:$0xff] }
  0x44   : > { %v407_v41 = vld [vmem:[%s9232_s23 + $0x528] sm:$0xff]  ;;  %v8158_v44 = vcombine.high %v402_v38, %v406_v39  ;;  %v8157_v50 = vcombine.low %v402_v38, %v406_v39 }
  0x45   : > { %v8160_v45 = vcombine.high %v403_v40, %v407_v41  ;;  %v8159_v51 = vcombine.low %v403_v40, %v407_v41 }
  0x46   : > { %6509 = vmatpush1.bf16.msra.mxu0 %v8093_v46  ;;  %6837 = vmatpush1.bf16.msra.mxu1 %v8095_v47  ;;  %v410_v46 = vld [vmem:[%s9232_s23 + $0x540] sm:$0xff] }
  0x47   : > { %6510 = vmatprep.subr.bf16.mxu0 %v8102_v48  ;;  %6838 = vmatprep.subr.bf16.mxu1 %v8104_v49  ;;  %v414_v47 = vld [vmem:[%s9232_s23 + $0x560] sm:$0xff]  ;;  %v411_v48 = vld [vmem:[%s9232_s23 + $0x548] sm:$0xff] }
  0x48   : > { %v415_v49 = vld [vmem:[%s9232_s23 + $0x568] sm:$0xff]  ;;  %v8166_v52 = vcombine.high %v410_v46, %v414_v47  ;;  %v8165_v58 = vcombine.low %v410_v46, %v414_v47 }
  0x49   : > { %v8168_v53 = vcombine.high %v411_v48, %v415_v49  ;;  %v8167_v59 = vcombine.low %v411_v48, %v415_v49 }
  0x4a   : > { %6511 = vmatpush1.bf16.msra.mxu0 %v8101_v54  ;;  %6839 = vmatpush1.bf16.msra.mxu1 %v8103_v55  ;;  %v418_v54 = vld [vmem:[%s9232_s23 + $0x580] sm:$0xff] }
  0x4b   : > { %6512 = vmatprep.subr.bf16.mxu0 %v8110_v56  ;;  %6840 = vmatprep.subr.bf16.mxu1 %v8112_v57  ;;  %v422_v55 = vld [vmem:[%s9232_s23 + $0x5a0] sm:$0xff]  ;;  %v419_v56 = vld [vmem:[%s9232_s23 + $0x588] sm:$0xff] }
  0x4c   : > { %v423_v57 = vld [vmem:[%s9232_s23 + $0x5a8] sm:$0xff]  ;;  %v8174_v60 = vcombine.high %v418_v54, %v422_v55  ;;  %v8173_v4 = vcombine.low %v418_v54, %v422_v55 }
  0x4d   : > { %v8176_v61 = vcombine.high %v419_v56, %v423_v57  ;;  %v8175_v5 = vcombine.low %v419_v56, %v423_v57 }
  0x4e   : > { %6513 = vmatpush1.bf16.msra.mxu0 %v8109_v62  ;;  %6841 = vmatpush1.bf16.msra.mxu1 %v8111_v63  ;;  %v426_v62 = vld [vmem:[%s9232_s23 + $0x5c0] sm:$0xff] }
  0x4f   : > { %6514 = vmatprep.subr.bf16.mxu0 %v8118_v2  ;;  %6842 = vmatprep.subr.bf16.mxu1 %v8120_v3  ;;  %v430_v63 = vld [vmem:[%s9232_s23 + $0x5e0] sm:$0xff]  ;;  %v427_v2 = vld [vmem:[%s9232_s23 + $0x5c8] sm:$0xff] }
  0x50   : > { %v431_v3 = vld [vmem:[%s9232_s23 + $0x5e8] sm:$0xff]  ;;  %v8182_v6 = vcombine.high %v426_v62, %v430_v63  ;;  %v8181_v12 = vcombine.low %v426_v62, %v430_v63 }
  0x51   : > { %v8184_v7 = vcombine.high %v427_v2, %v431_v3  ;;  %v8183_v13 = vcombine.low %v427_v2, %v431_v3 }
  0x52   : > { %6515 = vmatpush1.bf16.msra.mxu0 %v8117_v8  ;;  %6843 = vmatpush1.bf16.msra.mxu1 %v8119_v9  ;;  %v434_v8 = vld [vmem:[%s9232_s23 + $0x600] sm:$0xff] }
  0x53   : > { %6525 = vmatprep.subr.bf16.mxu0 %v8126_v10  ;;  %6853 = vmatprep.subr.bf16.mxu1 %v8128_v11  ;;  %v438_v9 = vld [vmem:[%s9232_s23 + $0x620] sm:$0xff]  ;;  %v435_v10 = vld [vmem:[%s9232_s23 + $0x608] sm:$0xff] }
  0x54   : > { %v439_v11 = vld [vmem:[%s9232_s23 + $0x628] sm:$0xff]  ;;  %v8190_v15 = vcombine.high %v434_v8, %v438_v9  ;;  %v8189_v0 = vcombine.low %v434_v8, %v438_v9 }
  0x55   : > { %6517 = vmatmul.mubr.bf16.vlgmr.msra.gmra.mrb[0].mxu0 %v9306_v14  ;;  %6845 = vmatmul.mubr.bf16.vlgmr.msra.gmra.mrb[0].mxu1 %v9306_v14  ;;  %v8192_v16 = vcombine.high %v435_v10, %v439_v11  ;;  %v8191_v22 = vcombine.low %v435_v10, %v439_v11 }
  0x56   : > { %6526 = vmatpush1.bf16.msra.mxu0 %v8125_v18  ;;  %6854 = vmatpush1.bf16.msra.mxu1 %v8127_v19  ;;  %v442_v18 = vld [vmem:[%s9232_s23 + $0x640] sm:$0xff] }
  0x57   : > { %6527 = vmatprep.subr.bf16.mxu0 %v8134_v20  ;;  %6855 = vmatprep.subr.bf16.mxu1 %v8136_v21  ;;  %v446_v19 = vld [vmem:[%s9232_s23 + $0x660] sm:$0xff]  ;;  %v443_v20 = vld [vmem:[%s9232_s23 + $0x648] sm:$0xff] }
  0x58   : > { %6557 = vmatprep.mubr.bf16.mxu0 %v9319_v23  ;;  %6885 = vmatprep.mubr.bf16.mxu1 %v9319_v23  ;;  %v447_v21 = vld [vmem:[%s9232_s23 + $0x668] sm:$0xff]  ;;  %v8198_v24 = vcombine.high %v442_v18, %v446_v19  ;;  %v8197_v30 = vcombine.low %v442_v18, %v446_v19 }
  0x59   : > { %v8200_v25 = vcombine.high %v443_v20, %v447_v21  ;;  %v8199_v31 = vcombine.low %v443_v20, %v447_v21 }
  0x5a   : > { %6528 = vmatpush1.bf16.msra.mxu0 %v8133_v26  ;;  %6856 = vmatpush1.bf16.msra.mxu1 %v8135_v27  ;;  %v450_v26 = vld [vmem:[%s9232_s23 + $0x680] sm:$0xff] }
  0x5b   : > { %6529 = vmatprep.subr.bf16.mxu0 %v8142_v28  ;;  %6857 = vmatprep.subr.bf16.mxu1 %v8144_v29  ;;  %v454_v27 = vld [vmem:[%s9232_s23 + $0x6a0] sm:$0xff]  ;;  %v451_v28 = vld [vmem:[%s9232_s23 + $0x688] sm:$0xff] }
  0x5c   : > { %v455_v29 = vld [vmem:[%s9232_s23 + $0x6a8] sm:$0xff]  ;;  %v8206_v32 = vcombine.high %v450_v26, %v454_v27  ;;  %v8205_v38 = vcombine.low %v450_v26, %v454_v27  ;;  %v9394_v27 = vld [vmem:[%s10494_s0 + $0x10] sm:$0xff] }
  0x5d   : > { %v8208_v33 = vcombine.high %v451_v28, %v455_v29  ;;  %v8207_v39 = vcombine.low %v451_v28, %v455_v29  ;;  %v511_v26 = vld [vmem:[%s9232_s23 + $0x868] sm:$0xff] }
  0x5e   : > { %6530 = vmatpush1.bf16.msra.mxu0 %v8141_v34  ;;  %6858 = vmatpush1.bf16.msra.mxu1 %v8143_v35  ;;  %v458_v34 = vld [vmem:[%s9232_s23 + $0x6c0] sm:$0xff] }
  0x5f   : > { %6531 = vmatprep.subr.bf16.mxu0 %v8150_v36  ;;  %6859 = vmatprep.subr.bf16.mxu1 %v8152_v37  ;;  %v462_v35 = vld [vmem:[%s9232_s23 + $0x6e0] sm:$0xff]  ;;  %v459_v36 = vld [vmem:[%s9232_s23 + $0x6c8] sm:$0xff] }
  0x60   : > { %v463_v37 = vld [vmem:[%s9232_s23 + $0x6e8] sm:$0xff]  ;;  %v8214_v40 = vcombine.high %v458_v34, %v462_v35  ;;  %v8213_v46 = vcombine.low %v458_v34, %v462_v35 }
  0x61   : > { %v8216_v41 = vcombine.high %v459_v36, %v463_v37  ;;  %v8215_v47 = vcombine.low %v459_v36, %v463_v37  ;;  %v515_v34 = vld [vmem:[%s9232_s23 + $0x888] sm:$0xff] }
  0x62   : > { %6532 = vmatpush1.bf16.msra.mxu0 %v8149_v42  ;;  %6860 = vmatpush1.bf16.msra.mxu1 %v8151_v43  ;;  %v466_v42 = vld [vmem:[%s9232_s23 + $0x700] sm:$0xff]  ;;  %v519_v35 = vld [vmem:[%s9232_s23 + $0x8a8] sm:$0xff] }
  0x63   : > { %6533 = vmatprep.subr.bf16.mxu0 %v8158_v44  ;;  %6861 = vmatprep.subr.bf16.mxu1 %v8160_v45  ;;  %v470_v43 = vld [vmem:[%s9232_s23 + $0x720] sm:$0xff]  ;;  %v467_v44 = vld [vmem:[%s9232_s23 + $0x708] sm:$0xff] }
  0x64   : > { %v471_v45 = vld [vmem:[%s9232_s23 + $0x728] sm:$0xff]  ;;  %v8222_v48 = vcombine.high %v466_v42, %v470_v43  ;;  %v8221_v54 = vcombine.low %v466_v42, %v470_v43 }
  0x65   : > { %v8224_v49 = vcombine.high %v467_v44, %v471_v45  ;;  %v8223_v55 = vcombine.low %v467_v44, %v471_v45  ;;  %v523_v42 = vld [vmem:[%s9232_s23 + $0x8c8] sm:$0xff]  ;;  %v8271_v45 = vcombine.low %v515_v34, %v519_v35 }
  0x66   : > { %6534 = vmatpush1.bf16.msra.mxu0 %v8157_v50  ;;  %6862 = vmatpush1.bf16.msra.mxu1 %v8159_v51  ;;  %v474_v50 = vld [vmem:[%s9232_s23 + $0x740] sm:$0xff]  ;;  %v527_v43 = vld [vmem:[%s9232_s23 + $0x8e8] sm:$0xff] }
  0x67   : > { %6535 = vmatprep.subr.bf16.mxu0 %v8166_v52  ;;  %6863 = vmatprep.subr.bf16.mxu1 %v8168_v53  ;;  %v478_v51 = vld [vmem:[%s9232_s23 + $0x760] sm:$0xff]  ;;  %v475_v52 = vld [vmem:[%s9232_s23 + $0x748] sm:$0xff] }
  0x68   : > { %v479_v53 = vld [vmem:[%s9232_s23 + $0x768] sm:$0xff]  ;;  %v8230_v56 = vcombine.high %v474_v50, %v478_v51  ;;  %v8229_v62 = vcombine.low %v474_v50, %v478_v51 }
  0x69   : > { %v8232_v57 = vcombine.high %v475_v52, %v479_v53  ;;  %v8231_v63 = vcombine.low %v475_v52, %v479_v53  ;;  %v531_v50 = vld [vmem:[%s9232_s23 + $0x908] sm:$0xff]  ;;  %v8279_v53 = vcombine.low %v523_v42, %v527_v43 }
  0x6a   : > { %6536 = vmatpush1.bf16.msra.mxu0 %v8165_v58  ;;  %6864 = vmatpush1.bf16.msra.mxu1 %v8167_v59  ;;  %v482_v58 = vld [vmem:[%s9232_s23 + $0x780] sm:$0xff]  ;;  %v535_v51 = vld [vmem:[%s9232_s23 + $0x928] sm:$0xff] }
  0x6b   : > { %6537 = vmatprep.subr.bf16.mxu0 %v8174_v60  ;;  %6865 = vmatprep.subr.bf16.mxu1 %v8176_v61  ;;  %v486_v59 = vld [vmem:[%s9232_s23 + $0x7a0] sm:$0xff]  ;;  %v483_v60 = vld [vmem:[%s9232_s23 + $0x788] sm:$0xff] }
  0x6c   : > { %v487_v61 = vld [vmem:[%s9232_s23 + $0x7a8] sm:$0xff]  ;;  %v8238_v2 = vcombine.high %v482_v58, %v486_v59  ;;  %v8237_v8 = vcombine.low %v482_v58, %v486_v59 }
  0x6d   : > { %v8240_v3 = vcombine.high %v483_v60, %v487_v61  ;;  %v8239_v9 = vcombine.low %v483_v60, %v487_v61  ;;  %v539_v58 = vld [vmem:[%s9232_s23 + $0x948] sm:$0xff]  ;;  %v8287_v61 = vcombine.low %v531_v50, %v535_v51 }
  0x6e   : > { %6538 = vmatpush1.bf16.msra.mxu0 %v8173_v4  ;;  %6866 = vmatpush1.bf16.msra.mxu1 %v8175_v5  ;;  %v490_v4 = vld [vmem:[%s9232_s23 + $0x7c0] sm:$0xff]  ;;  %v543_v59 = vld [vmem:[%s9232_s23 + $0x968] sm:$0xff] }
  0x6f   : > { %6539 = vmatprep.subr.bf16.mxu0 %v8182_v6  ;;  %6867 = vmatprep.subr.bf16.mxu1 %v8184_v7  ;;  %v494_v5 = vld [vmem:[%s9232_s23 + $0x7e0] sm:$0xff]  ;;  %v491_v6 = vld [vmem:[%s9232_s23 + $0x7c8] sm:$0xff] }
  0x70   : > { %v495_v7 = vld [vmem:[%s9232_s23 + $0x7e8] sm:$0xff]  ;;  %v8246_v10 = vcombine.high %v490_v4, %v494_v5  ;;  %v8245_v18 = vcombine.low %v490_v4, %v494_v5 }
  0x71   : > { %v8248_v11 = vcombine.high %v491_v6, %v495_v7  ;;  %v8247_v19 = vcombine.low %v491_v6, %v495_v7  ;;  %v547_v4 = vld [vmem:[%s9232_s23 + $0x988] sm:$0xff]  ;;  %v8295_v7 = vcombine.low %v539_v58, %v543_v59 }
  0x72   : > { %6540 = vmatpush1.bf16.msra.mxu0 %v8181_v12  ;;  %6868 = vmatpush1.bf16.msra.mxu1 %v8183_v13  ;;  %v498_v12 = vld [vmem:[%s9232_s23 + $0x800] sm:$0xff]  ;;  %v551_v5 = vld [vmem:[%s9232_s23 + $0x9a8] sm:$0xff] }
  0x73   : > { %6541 = vmatprep.subr.bf16.mxu0 %v8190_v15  ;;  %6869 = vmatprep.subr.bf16.mxu1 %v8192_v16  ;;  %v502_v13 = vld [vmem:[%s9232_s23 + $0x820] sm:$0xff]  ;;  %v499_v15 = vld [vmem:[%s9232_s23 + $0x808] sm:$0xff] }
  0x74   : > { %v503_v16 = vld [vmem:[%s9232_s23 + $0x828] sm:$0xff]  ;;  %v8254_v20 = vcombine.high %v498_v12, %v502_v13  ;;  %v8253_v28 = vcombine.low %v498_v12, %v502_v13 }
  0x75   : > { %v8256_v21 = vcombine.high %v499_v15, %v503_v16  ;;  %v8255_v29 = vcombine.low %v499_v15, %v503_v16  ;;  %v555_v12 = vld [vmem:[%s9232_s23 + $0x9c8] sm:$0xff]  ;;  %v8303_v16 = vcombine.low %v547_v4, %v551_v5 }
  0x76   : > { %6542 = vmatpush1.bf16.msra.mxu0 %v8189_v0  ;;  %6870 = vmatpush1.bf16.msra.mxu1 %v8191_v22  ;;  %v506_v0 = vld [vmem:[%s9232_s23 + $0x840] sm:$0xff]  ;;  %v559_v13 = vld [vmem:[%s9232_s23 + $0x9e8] sm:$0xff] }
  0x77   : > { %6543 = vmatprep.subr.bf16.mxu0 %v8198_v24  ;;  %6871 = vmatprep.subr.bf16.mxu1 %v8200_v25  ;;  %v510_v22 = vld [vmem:[%s9232_s23 + $0x860] sm:$0xff]  ;;  %v9387_v24 = vcombine.low %v9313_v17, %v9313_v17  ;;  %v507_v25 = vld [vmem:[%s9232_s23 + $0x848] sm:$0xff] }
  0x78   : > { %v514_v17 = vld [vmem:[%s9232_s23 + $0x880] sm:$0xff]  ;;  %v8261_v36 = vcombine.low %v506_v0, %v510_v22  ;;  %v8263_v37 = vcombine.low %v507_v25, %v511_v26 }
  0x7a   : > { %6544 = vmatpush1.bf16.msra.mxu0 %v8197_v30  ;;  %6872 = vmatpush1.bf16.msra.mxu1 %v8199_v31  ;;  %v8262_v30 = vcombine.high %v506_v0, %v510_v22  ;;  %v8264_v31 = vcombine.high %v507_v25, %v511_v26  ;;  %v563_v0 = vld [vmem:[%s9232_s23 + $0xa08] sm:$0xff]  ;;  %v8311_v26 = vcombine.low %v555_v12, %v559_v13 }
  0x7b   : > { %6545 = vmatprep.subr.bf16.mxu0 %v8206_v32  ;;  %6873 = vmatprep.subr.bf16.mxu1 %v8208_v33  ;;  %v518_v32 = vld [vmem:[%s9232_s23 + $0x8a0] sm:$0xff]  ;;  %v9400_v33 = vcombine.high %v9394_v27, %v9394_v27  ;;  %v567_v22 = vld [vmem:[%s9232_s23 + $0xa28] sm:$0xff] }
  0x7c   : > { %v8269_v44 = vcombine.low %v514_v17, %v518_v32 }
  0x7e   : > { %6546 = vmatpush1.bf16.msra.mxu0 %v8205_v38  ;;  %6874 = vmatpush1.bf16.msra.mxu1 %v8207_v39  ;;  %v8270_v38 = vcombine.high %v514_v17, %v518_v32  ;;  %v8272_v39 = vcombine.high %v515_v34, %v519_v35  ;;  %v571_v17 = vld [vmem:[%s9232_s23 + $0xa48] sm:$0xff]  ;;  %v8319_v35 = vcombine.low %v563_v0, %v567_v22 }
  0x7f   : > { %6547 = vmatprep.subr.bf16.mxu0 %v8214_v40  ;;  %6875 = vmatprep.subr.bf16.mxu1 %v8216_v41  ;;  %v522_v40 = vld [vmem:[%s9232_s23 + $0x8c0] sm:$0xff]  ;;  %v575_v32 = vld [vmem:[%s9232_s23 + $0xa68] sm:$0xff] }
  0x80   : > { %v526_v41 = vld [vmem:[%s9232_s23 + $0x8e0] sm:$0xff] }
  0x81   : > { %v8277_v52 = vcombine.low %v522_v40, %v526_v41 }
  0x82   : > { %6548 = vmatpush1.bf16.msra.mxu0 %v8213_v46  ;;  %6876 = vmatpush1.bf16.msra.mxu1 %v8215_v47  ;;  %v8278_v46 = vcombine.high %v522_v40, %v526_v41  ;;  %v8280_v47 = vcombine.high %v523_v42, %v527_v43  ;;  %v579_v40 = vld [vmem:[%s9232_s23 + $0xa88] sm:$0xff]  ;;  %v8327_v43 = vcombine.low %v571_v17, %v575_v32 }
  0x83   : > { %6549 = vmatprep.subr.bf16.mxu0 %v8222_v48  ;;  %6877 = vmatprep.subr.bf16.mxu1 %v8224_v49  ;;  %v530_v48 = vld [vmem:[%s9232_s23 + $0x900] sm:$0xff]  ;;  %v583_v41 = vld [vmem:[%s9232_s23 + $0xaa8] sm:$0xff] }
  0x84   : > { %v534_v49 = vld [vmem:[%s9232_s23 + $0x920] sm:$0xff] }
  0x85   : > { %v8285_v60 = vcombine.low %v530_v48, %v534_v49 }
  0x86   : > { %6550 = vmatpush1.bf16.msra.mxu0 %v8221_v54  ;;  %6878 = vmatpush1.bf16.msra.mxu1 %v8223_v55  ;;  %v8286_v54 = vcombine.high %v530_v48, %v534_v49  ;;  %v8288_v55 = vcombine.high %v531_v50, %v535_v51  ;;  %v587_v48 = vld [vmem:[%s9232_s23 + $0xac8] sm:$0xff]  ;;  %v8335_v51 = vcombine.low %v579_v40, %v583_v41 }
  0x87   : > { %6551 = vmatprep.subr.bf16.mxu0 %v8230_v56  ;;  %6879 = vmatprep.subr.bf16.mxu1 %v8232_v57  ;;  %v538_v56 = vld [vmem:[%s9232_s23 + $0x940] sm:$0xff]  ;;  %v591_v49 = vld [vmem:[%s9232_s23 + $0xae8] sm:$0xff] }
  0x88   : > { %v542_v57 = vld [vmem:[%s9232_s23 + $0x960] sm:$0xff] }
  0x89   : > { %v8293_v6 = vcombine.low %v538_v56, %v542_v57 }
  0x8a   : > { %6552 = vmatpush1.bf16.msra.mxu0 %v8229_v62  ;;  %6880 = vmatpush1.bf16.msra.mxu1 %v8231_v63  ;;  %v8294_v62 = vcombine.high %v538_v56, %v542_v57  ;;  %v8296_v63 = vcombine.high %v539_v58, %v543_v59  ;;  %v595_v56 = vld [vmem:[%s9232_s23 + $0xb08] sm:$0xff]  ;;  %v8343_v59 = vcombine.low %v587_v48, %v591_v49 }
  0x8b   : > { %6553 = vmatprep.subr.bf16.mxu0 %v8238_v2  ;;  %6881 = vmatprep.subr.bf16.mxu1 %v8240_v3  ;;  %v546_v2 = vld [vmem:[%s9232_s23 + $0x980] sm:$0xff]  ;;  %v599_v57 = vld [vmem:[%s9232_s23 + $0xb28] sm:$0xff] }
  0x8c   : > { %v550_v3 = vld [vmem:[%s9232_s23 + $0x9a0] sm:$0xff] }
  0x8d   : > { %v8301_v15 = vcombine.low %v546_v2, %v550_v3 }
  0x8e   : > { %6554 = vmatpush1.bf16.msra.mxu0 %v8237_v8  ;;  %6882 = vmatpush1.bf16.msra.mxu1 %v8239_v9  ;;  %v8302_v8 = vcombine.high %v546_v2, %v550_v3  ;;  %v8304_v9 = vcombine.high %v547_v4, %v551_v5  ;;  %v603_v2 = vld [vmem:[%s9232_s23 + $0xb48] sm:$0xff]  ;;  %v8351_v5 = vcombine.low %v595_v56, %v599_v57 }
  0x8f   : > { %6555 = vmatprep.subr.bf16.mxu0 %v8246_v10  ;;  %6883 = vmatprep.subr.bf16.mxu1 %v8248_v11  ;;  %v554_v10 = vld [vmem:[%s9232_s23 + $0x9c0] sm:$0xff]  ;;  %v607_v3 = vld [vmem:[%s9232_s23 + $0xb68] sm:$0xff] }
  0x90   : > { %v558_v11 = vld [vmem:[%s9232_s23 + $0x9e0] sm:$0xff] }
  0x91   : > { %v8309_v25 = vcombine.low %v554_v10, %v558_v11 }
  0x92   : > { %6556 = vmatpush1.bf16.msra.mxu0 %v8245_v18  ;;  %6884 = vmatpush1.bf16.msra.mxu1 %v8247_v19  ;;  %v8310_v18 = vcombine.high %v554_v10, %v558_v11  ;;  %v8312_v19 = vcombine.high %v555_v12, %v559_v13  ;;  %v611_v10 = vld [vmem:[%s9232_s23 + $0xb88] sm:$0xff]  ;;  %v8359_v13 = vcombine.low %v603_v2, %v607_v3 }
  0x93   : > { %6566 = vmatprep.subr.bf16.mxu0 %v8254_v20  ;;  %6894 = vmatprep.subr.bf16.mxu1 %v8256_v21  ;;  %v562_v20 = vld [vmem:[%s9232_s23 + $0xa00] sm:$0xff]  ;;  %v615_v11 = vld [vmem:[%s9232_s23 + $0xba8] sm:$0xff] }
  0x94   : > { %v566_v21 = vld [vmem:[%s9232_s23 + $0xa20] sm:$0xff] }
  0x95   : > { %6558 = vmatmul.mubr.bf16.vlgmr.msra.gmra.mrb[0].mxu0 %v9387_v24  ;;  %6886 = vmatmul.mubr.bf16.vlgmr.msra.gmra.mrb[0].mxu1 %v9387_v24  ;;  %v8317_v34 = vcombine.low %v562_v20, %v566_v21 }
  0x96   : > { %6567 = vmatpush1.bf16.msra.mxu0 %v8253_v28  ;;  %6895 = vmatpush1.bf16.msra.mxu1 %v8255_v29  ;;  %v8318_v28 = vcombine.high %v562_v20, %v566_v21  ;;  %v8320_v29 = vcombine.high %v563_v0, %v567_v22  ;;  %v619_v20 = vld [vmem:[%s9232_s23 + $0xbc8] sm:$0xff]  ;;  %v8367_v22 = vcombine.low %v611_v10, %v615_v11 }
  0x97   : > { %6568 = vmatprep.subr.bf16.mxu0 %v8262_v30  ;;  %6896 = vmatprep.subr.bf16.mxu1 %v8264_v31  ;;  %v570_v30 = vld [vmem:[%s9232_s23 + $0xa40] sm:$0xff]  ;;  %v623_v21 = vld [vmem:[%s9232_s23 + $0xbe8] sm:$0xff] }
  0x98   : > { %6598 = vmatprep.mubr.bf16.mxu0 %v9400_v33  ;;  %6926 = vmatprep.mubr.bf16.mxu1 %v9400_v33  ;;  %v574_v31 = vld [vmem:[%s9232_s23 + $0xa60] sm:$0xff] }
  0x99   : > { %v8325_v42 = vcombine.low %v570_v30, %v574_v31 }
  0x9a   : > { %6569 = vmatpush1.bf16.msra.mxu0 %v8261_v36  ;;  %6897 = vmatpush1.bf16.msra.mxu1 %v8263_v37  ;;  %v8326_v36 = vcombine.high %v570_v30, %v574_v31  ;;  %v8328_v37 = vcombine.high %v571_v17, %v575_v32  ;;  %v627_v30 = vld [vmem:[%s9232_s23 + $0xc08] sm:$0xff]  ;;  %v8375_v32 = vcombine.low %v619_v20, %v623_v21 }
  0x9b   : > { %6570 = vmatprep.subr.bf16.mxu0 %v8270_v38  ;;  %6898 = vmatprep.subr.bf16.mxu1 %v8272_v39  ;;  %v578_v38 = vld [vmem:[%s9232_s23 + $0xa80] sm:$0xff]  ;;  %v631_v31 = vld [vmem:[%s9232_s23 + $0xc28] sm:$0xff] }
  0x9c   : > { %v582_v39 = vld [vmem:[%s9232_s23 + $0xaa0] sm:$0xff] }
  0x9d   : > { %v8333_v50 = vcombine.low %v578_v38, %v582_v39 }
  0x9e   : > { %6571 = vmatpush1.bf16.msra.mxu0 %v8269_v44  ;;  %6899 = vmatpush1.bf16.msra.mxu1 %v8271_v45  ;;  %v8334_v44 = vcombine.high %v578_v38, %v582_v39  ;;  %v8336_v45 = vcombine.high %v579_v40, %v583_v41  ;;  %v9468_v38 = vcombine.low %v9394_v27, %v9394_v27  ;;  %v635_v39 = vld [vmem:[%s9232_s23 + $0xc48] sm:$0xff]  ;;  %v9475_v41 = vld [vmem:[%s10494_s0 + $0x18] sm:$0xff]  ;;  %v642_v27 = vld [vmem:[%s9232_s23 + $0xc80] sm:$0xff] }
  0x9f   : > { %6572 = vmatprep.subr.bf16.mxu0 %v8278_v46  ;;  %6900 = vmatprep.subr.bf16.mxu1 %v8280_v47  ;;  %v586_v46 = vld [vmem:[%s9232_s23 + $0xac0] sm:$0xff]  ;;  %v639_v40 = vld [vmem:[%s9232_s23 + $0xc68] sm:$0xff] }
  0xa0   : > { %v590_v47 = vld [vmem:[%s9232_s23 + $0xae0] sm:$0xff] }
  0xa1   : > { %v8341_v58 = vcombine.low %v586_v46, %v590_v47 }
  0xa2   : > { %6573 = vmatpush1.bf16.msra.mxu0 %v8277_v52  ;;  %6901 = vmatpush1.bf16.msra.mxu1 %v8279_v53  ;;  %v8342_v52 = vcombine.high %v586_v46, %v590_v47  ;;  %v8344_v53 = vcombine.high %v587_v48, %v591_v49  ;;  %v646_v46 = vld [vmem:[%s9232_s23 + $0xca0] sm:$0xff]  ;;  %v9481_v47 = vcombine.high %v9475_v41, %v9475_v41  ;;  %v643_v48 = vld [vmem:[%s9232_s23 + $0xc88] sm:$0xff] }
  0xa3   : > { %6574 = vmatprep.subr.bf16.mxu0 %v8286_v54  ;;  %6902 = vmatprep.subr.bf16.mxu1 %v8288_v55  ;;  %v594_v54 = vld [vmem:[%s9232_s23 + $0xb00] sm:$0xff]  ;;  %v647_v49 = vld [vmem:[%s9232_s23 + $0xca8] sm:$0xff] }
  0xa4   : > { %v598_v55 = vld [vmem:[%s9232_s23 + $0xb20] sm:$0xff] }
  0xa5   : > { %v8349_v4 = vcombine.low %v594_v54, %v598_v55 }
  0xa6   : > { %6575 = vmatpush1.bf16.msra.mxu0 %v8285_v60  ;;  %6903 = vmatpush1.bf16.msra.mxu1 %v8287_v61  ;;  %v8350_v60 = vcombine.high %v594_v54, %v598_v55  ;;  %v8352_v61 = vcombine.high %v595_v56, %v599_v57  ;;  %v650_v54 = vld [vmem:[%s9232_s23 + $0xcc0] sm:$0xff]  ;;  %v651_v56 = vld [vmem:[%s9232_s23 + $0xcc8] sm:$0xff] }
  0xa7   : > { %6576 = vmatprep.subr.bf16.mxu0 %v8294_v62  ;;  %6904 = vmatprep.subr.bf16.mxu1 %v8296_v63  ;;  %v602_v62 = vld [vmem:[%s9232_s23 + $0xb40] sm:$0xff]  ;;  %v655_v57 = vld [vmem:[%s9232_s23 + $0xce8] sm:$0xff] }
  0xa8   : > { %v606_v63 = vld [vmem:[%s9232_s23 + $0xb60] sm:$0xff] }
  0xa9   : > { %v8357_v12 = vcombine.low %v602_v62, %v606_v63  ;;  %v654_v55 = vld [vmem:[%s9232_s23 + $0xce0] sm:$0xff] }
  0xaa   : > { %6577 = vmatpush1.bf16.msra.mxu0 %v8293_v6  ;;  %6905 = vmatpush1.bf16.msra.mxu1 %v8295_v7  ;;  %v8358_v6 = vcombine.high %v602_v62, %v606_v63  ;;  %v8360_v7 = vcombine.high %v603_v2, %v607_v3  ;;  %v658_v62 = vld [vmem:[%s9232_s23 + $0xd00] sm:$0xff]  ;;  %v659_v2 = vld [vmem:[%s9232_s23 + $0xd08] sm:$0xff] }
  0xab   : > { %6578 = vmatprep.subr.bf16.mxu0 %v8302_v8  ;;  %6906 = vmatprep.subr.bf16.mxu1 %v8304_v9  ;;  %v610_v8 = vld [vmem:[%s9232_s23 + $0xb80] sm:$0xff]  ;;  %v663_v3 = vld [vmem:[%s9232_s23 + $0xd28] sm:$0xff] }
  0xac   : > { %v614_v9 = vld [vmem:[%s9232_s23 + $0xba0] sm:$0xff] }
  0xad   : > { %v8365_v0 = vcombine.low %v610_v8, %v614_v9  ;;  %v662_v63 = vld [vmem:[%s9232_s23 + $0xd20] sm:$0xff] }
  0xae   : > { %6579 = vmatpush1.bf16.msra.mxu0 %v8301_v15  ;;  %6907 = vmatpush1.bf16.msra.mxu1 %v8303_v16  ;;  %v8366_v15 = vcombine.high %v610_v8, %v614_v9  ;;  %v8368_v16 = vcombine.high %v611_v10, %v615_v11  ;;  %v666_v8 = vld [vmem:[%s9232_s23 + $0xd40] sm:$0xff]  ;;  %v667_v10 = vld [vmem:[%s9232_s23 + $0xd48] sm:$0xff] }
  0xaf   : > { %6580 = vmatprep.subr.bf16.mxu0 %v8310_v18  ;;  %6908 = vmatprep.subr.bf16.mxu1 %v8312_v19  ;;  %v618_v18 = vld [vmem:[%s9232_s23 + $0xbc0] sm:$0xff]  ;;  %v671_v11 = vld [vmem:[%s9232_s23 + $0xd68] sm:$0xff] }
  0xb0   : > { %v622_v19 = vld [vmem:[%s9232_s23 + $0xbe0] sm:$0xff] }
  0xb1   : > { %v8373_v17 = vcombine.low %v618_v18, %v622_v19  ;;  %v670_v9 = vld [vmem:[%s9232_s23 + $0xd60] sm:$0xff] }
  0xb2   : > { %6581 = vmatpush1.bf16.msra.mxu0 %v8309_v25  ;;  %6909 = vmatpush1.bf16.msra.mxu1 %v8311_v26  ;;  %v8374_v25 = vcombine.high %v618_v18, %v622_v19  ;;  %v8376_v26 = vcombine.high %v619_v20, %v623_v21  ;;  %v674_v18 = vld [vmem:[%s9232_s23 + $0xd80] sm:$0xff]  ;;  %v675_v20 = vld [vmem:[%s9232_s23 + $0xd88] sm:$0xff] }
  0xb3   : > { %6582 = vmatprep.subr.bf16.mxu0 %v8318_v28  ;;  %6910 = vmatprep.subr.bf16.mxu1 %v8320_v29  ;;  %v626_v28 = vld [vmem:[%s9232_s23 + $0xc00] sm:$0xff]  ;;  %v679_v21 = vld [vmem:[%s9232_s23 + $0xda8] sm:$0xff] }
  0xb4   : > { %v630_v29 = vld [vmem:[%s9232_s23 + $0xc20] sm:$0xff] }
  0xb5   : > { %v678_v19 = vld [vmem:[%s9232_s23 + $0xda0] sm:$0xff] }
  0xb6   : > { %6583 = vmatpush1.bf16.msra.mxu0 %v8317_v34  ;;  %6911 = vmatpush1.bf16.msra.mxu1 %v8319_v35  ;;  %v8382_v34 = vcombine.high %v626_v28, %v630_v29  ;;  %v8384_v35 = vcombine.high %v627_v30, %v631_v31 }
  0xb7   : > { %6584 = vmatprep.subr.bf16.mxu0 %v8326_v36  ;;  %6912 = vmatprep.subr.bf16.mxu1 %v8328_v37  ;;  %v634_v36 = vld [vmem:[%s9232_s23 + $0xc40] sm:$0xff] }
  0xb8   : > { %v638_v37 = vld [vmem:[%s9232_s23 + $0xc60] sm:$0xff] }
  0xba   : > { %6585 = vmatpush1.bf16.msra.mxu0 %v8325_v42  ;;  %6913 = vmatpush1.bf16.msra.mxu1 %v8327_v43  ;;  %v8381_v42 = vcombine.low %v626_v28, %v630_v29  ;;  %v8383_v43 = vcombine.low %v627_v30, %v631_v31  ;;  %v682_v28 = vld [vmem:[%s9232_s23 + $0xdc0] sm:$0xff]  ;;  %v683_v30 = vld [vmem:[%s9232_s23 + $0xdc8] sm:$0xff] }
  0xbb   : > { %6586 = vmatprep.subr.bf16.mxu0 %v8334_v44  ;;  %6914 = vmatprep.subr.bf16.mxu1 %v8336_v45  ;;  %v8390_v44 = vcombine.high %v634_v36, %v638_v37  ;;  %v8392_v45 = vcombine.high %v635_v39, %v639_v40  ;;  %v686_v29 = vld [vmem:[%s9232_s23 + $0xde0] sm:$0xff]  ;;  %v687_v31 = vld [vmem:[%s9232_s23 + $0xde8] sm:$0xff] }
  0xbe   : > { %6587 = vmatpush1.bf16.msra.mxu0 %v8333_v50  ;;  %6915 = vmatpush1.bf16.msra.mxu1 %v8335_v51  ;;  %v8389_v50 = vcombine.low %v634_v36, %v638_v37  ;;  %v8391_v51 = vcombine.low %v635_v39, %v639_v40  ;;  %v690_v36 = vld [vmem:[%s9232_s23 + $0xe00] sm:$0xff]  ;;  %v691_v39 = vld [vmem:[%s9232_s23 + $0xe08] sm:$0xff] }
  0xbf   : > { %6588 = vmatprep.subr.bf16.mxu0 %v8342_v52  ;;  %6916 = vmatprep.subr.bf16.mxu1 %v8344_v53  ;;  %v8398_v52 = vcombine.high %v642_v27, %v646_v46  ;;  %v8400_v53 = vcombine.high %v643_v48, %v647_v49  ;;  %v694_v37 = vld [vmem:[%s9232_s23 + $0xe20] sm:$0xff]  ;;  %v695_v40 = vld [vmem:[%s9232_s23 + $0xe28] sm:$0xff] }
  0xc2   : > { %6589 = vmatpush1.bf16.msra.mxu0 %v8341_v58  ;;  %6917 = vmatpush1.bf16.msra.mxu1 %v8343_v59  ;;  %v8397_v58 = vcombine.low %v642_v27, %v646_v46  ;;  %v8399_v59 = vcombine.low %v643_v48, %v647_v49  ;;  %v698_v27 = vld [vmem:[%s9232_s23 + $0xe40] sm:$0xff]  ;;  %v699_v48 = vld [vmem:[%s9232_s23 + $0xe48] sm:$0xff] }
  0xc3   : > { %6590 = vmatprep.subr.bf16.mxu0 %v8350_v60  ;;  %6918 = vmatprep.subr.bf16.mxu1 %v8352_v61  ;;  %v8406_v60 = vcombine.high %v650_v54, %v654_v55  ;;  %v8408_v61 = vcombine.high %v651_v56, %v655_v57  ;;  %v702_v46 = vld [vmem:[%s9232_s23 + $0xe60] sm:$0xff]  ;;  %v703_v49 = vld [vmem:[%s9232_s23 + $0xe68] sm:$0xff] }
  0xc6   : > { %6591 = vmatpush1.bf16.msra.mxu0 %v8349_v4  ;;  %6919 = vmatpush1.bf16.msra.mxu1 %v8351_v5  ;;  %v8405_v4 = vcombine.low %v650_v54, %v654_v55  ;;  %v8407_v5 = vcombine.low %v651_v56, %v655_v57  ;;  %v706_v54 = vld [vmem:[%s9232_s23 + $0xe80] sm:$0xff]  ;;  %v707_v56 = vld [vmem:[%s9232_s23 + $0xe88] sm:$0xff] }
  0xc7   : > { %6592 = vmatprep.subr.bf16.mxu0 %v8358_v6  ;;  %6920 = vmatprep.subr.bf16.mxu1 %v8360_v7  ;;  %v8414_v6 = vcombine.high %v658_v62, %v662_v63  ;;  %v8416_v7 = vcombine.high %v659_v2, %v663_v3  ;;  %v710_v55 = vld [vmem:[%s9232_s23 + $0xea0] sm:$0xff]  ;;  %v711_v57 = vld [vmem:[%s9232_s23 + $0xea8] sm:$0xff] }
  0xca   : > { %6593 = vmatpush1.bf16.msra.mxu0 %v8357_v12  ;;  %6921 = vmatpush1.bf16.msra.mxu1 %v8359_v13  ;;  %v8413_v12 = vcombine.low %v658_v62, %v662_v63  ;;  %v8415_v13 = vcombine.low %v659_v2, %v663_v3  ;;  %v714_v62 = vld [vmem:[%s9232_s23 + $0xec0] sm:$0xff]  ;;  %v715_v2 = vld [vmem:[%s9232_s23 + $0xec8] sm:$0xff] }
  0xcb   : > { %6594 = vmatprep.subr.bf16.mxu0 %v8366_v15  ;;  %6922 = vmatprep.subr.bf16.mxu1 %v8368_v16  ;;  %v8422_v15 = vcombine.high %v666_v8, %v670_v9  ;;  %v8424_v16 = vcombine.high %v667_v10, %v671_v11  ;;  %v718_v63 = vld [vmem:[%s9232_s23 + $0xee0] sm:$0xff]  ;;  %v719_v3 = vld [vmem:[%s9232_s23 + $0xee8] sm:$0xff] }
  0xce   : > { %6595 = vmatpush1.bf16.msra.mxu0 %v8365_v0  ;;  %6923 = vmatpush1.bf16.msra.mxu1 %v8367_v22  ;;  %v8421_v0 = vcombine.low %v666_v8, %v670_v9  ;;  %v8423_v22 = vcombine.low %v667_v10, %v671_v11  ;;  %v722_v8 = vld [vmem:[%s9232_s23 + $0xf00] sm:$0xff]  ;;  %v723_v10 = vld [vmem:[%s9232_s23 + $0xf08] sm:$0xff] }
  0xcf   : > { %6596 = vmatprep.subr.bf16.mxu0 %v8374_v25  ;;  %6924 = vmatprep.subr.bf16.mxu1 %v8376_v26  ;;  %v8430_v25 = vcombine.high %v674_v18, %v678_v19  ;;  %v8432_v26 = vcombine.high %v675_v20, %v679_v21  ;;  %v726_v9 = vld [vmem:[%s9232_s23 + $0xf20] sm:$0xff]  ;;  %v727_v11 = vld [vmem:[%s9232_s23 + $0xf28] sm:$0xff] }
  0xd2   : > { %6597 = vmatpush1.bf16.msra.mxu0 %v8373_v17  ;;  %6925 = vmatpush1.bf16.msra.mxu1 %v8375_v32  ;;  %v8429_v17 = vcombine.low %v674_v18, %v678_v19  ;;  %v8431_v32 = vcombine.low %v675_v20, %v679_v21  ;;  %v730_v18 = vld [vmem:[%s9232_s23 + $0xf40] sm:$0xff]  ;;  %v731_v20 = vld [vmem:[%s9232_s23 + $0xf48] sm:$0xff] }
  0xd3   : > { %6607 = vmatprep.subr.bf16.mxu0 %v8382_v34  ;;  %6935 = vmatprep.subr.bf16.mxu1 %v8384_v35  ;;  %v8438_v34 = vcombine.high %v682_v28, %v686_v29  ;;  %v8440_v35 = vcombine.high %v683_v30, %v687_v31  ;;  %v734_v19 = vld [vmem:[%s9232_s23 + $0xf60] sm:$0xff]  ;;  %v735_v21 = vld [vmem:[%s9232_s23 + $0xf68] sm:$0xff] }
  0xd5   : > { %6599 = vmatmul.mubr.bf16.vlgmr.msra.gmra.mrb[0].mxu0 %v9468_v38  ;;  %6927 = vmatmul.mubr.bf16.vlgmr.msra.gmra.mrb[0].mxu1 %v9468_v38 }
  0xd6   : > { %6608 = vmatpush1.bf16.msra.mxu0 %v8381_v42  ;;  %6936 = vmatpush1.bf16.msra.mxu1 %v8383_v43  ;;  %v8437_v42 = vcombine.low %v682_v28, %v686_v29  ;;  %v8439_v43 = vcombine.low %v683_v30, %v687_v31  ;;  %v738_v28 = vld [vmem:[%s9232_s23 + $0xf80] sm:$0xff]  ;;  %v739_v30 = vld [vmem:[%s9232_s23 + $0xf88] sm:$0xff] }
  0xd7   : > { %6609 = vmatprep.subr.bf16.mxu0 %v8390_v44  ;;  %6937 = vmatprep.subr.bf16.mxu1 %v8392_v45  ;;  %v8446_v44 = vcombine.high %v690_v36, %v694_v37  ;;  %v8448_v45 = vcombine.high %v691_v39, %v695_v40  ;;  %v742_v29 = vld [vmem:[%s9232_s23 + $0xfa0] sm:$0xff]  ;;  %v743_v31 = vld [vmem:[%s9232_s23 + $0xfa8] sm:$0xff] }
  0xd8   : > { %6639 = vmatprep.mubr.bf16.mxu0 %v9481_v47  ;;  %6967 = vmatprep.mubr.bf16.mxu1 %v9481_v47 }
  0xda   : > { %6610 = vmatpush1.bf16.msra.mxu0 %v8389_v50  ;;  %6938 = vmatpush1.bf16.msra.mxu1 %v8391_v51  ;;  %v8445_v50 = vcombine.low %v690_v36, %v694_v37  ;;  %v8447_v51 = vcombine.low %v691_v39, %v695_v40  ;;  %v746_v36 = vld [vmem:[%s9232_s23 + $0xfc0] sm:$0xff]  ;;  %v747_v39 = vld [vmem:[%s9232_s23 + $0xfc8] sm:$0xff] }
  0xdb   : > { %6611 = vmatprep.subr.bf16.mxu0 %v8398_v52  ;;  %6939 = vmatprep.subr.bf16.mxu1 %v8400_v53  ;;  %v8454_v52 = vcombine.high %v698_v27, %v702_v46  ;;  %v8456_v53 = vcombine.high %v699_v48, %v703_v49  ;;  %v750_v37 = vld [vmem:[%s9232_s23 + $0xfe0] sm:$0xff]  ;;  %v751_v40 = vld [vmem:[%s9232_s23 + $0xfe8] sm:$0xff] }
  0xde   : > { %6612 = vmatpush1.bf16.msra.mxu0 %v8397_v58  ;;  %6940 = vmatpush1.bf16.msra.mxu1 %v8399_v59  ;;  %v8453_v58 = vcombine.low %v698_v27, %v702_v46  ;;  %v8455_v59 = vcombine.low %v699_v48, %v703_v49  ;;  %v754_v27 = vld [vmem:[%s9232_s23 + $0x1000] sm:$0xff]  ;;  %v755_v48 = vld [vmem:[%s9232_s23 + $0x1008] sm:$0xff] }
  0xdf   : > { %6613 = vmatprep.subr.bf16.mxu0 %v8406_v60  ;;  %6941 = vmatprep.subr.bf16.mxu1 %v8408_v61  ;;  %v8462_v60 = vcombine.high %v706_v54, %v710_v55  ;;  %v8464_v61 = vcombine.high %v707_v56, %v711_v57  ;;  %v758_v46 = vld [vmem:[%s9232_s23 + $0x1020] sm:$0xff]  ;;  %v759_v49 = vld [vmem:[%s9232_s23 + $0x1028] sm:$0xff] }
  0xe2   : > { %6614 = vmatpush1.bf16.msra.mxu0 %v8405_v4  ;;  %6942 = vmatpush1.bf16.msra.mxu1 %v8407_v5  ;;  %v8461_v4 = vcombine.low %v706_v54, %v710_v55  ;;  %v8463_v5 = vcombine.low %v707_v56, %v711_v57  ;;  %v762_v54 = vld [vmem:[%s9232_s23 + $0x1040] sm:$0xff]  ;;  %v9549_v56 = vcombine.low %v9475_v41, %v9475_v41  ;;  %v763_v57 = vld [vmem:[%s9232_s23 + $0x1048] sm:$0xff] }
  0xe3   : > { %6615 = vmatprep.subr.bf16.mxu0 %v8414_v6  ;;  %6943 = vmatprep.subr.bf16.mxu1 %v8416_v7  ;;  %v8470_v6 = vcombine.high %v714_v62, %v718_v63  ;;  %v8472_v7 = vcombine.high %v715_v2, %v719_v3  ;;  %v766_v55 = vld [vmem:[%s9232_s23 + $0x1060] sm:$0xff] }
  0xe4   : > { %v770_v41 = vld [vmem:[%s9232_s23 + $0x1080] sm:$0xff] }
  0xe6   : > { %6616 = vmatpush1.bf16.msra.mxu0 %v8413_v12  ;;  %6944 = vmatpush1.bf16.msra.mxu1 %v8415_v13  ;;  %v8469_v12 = vcombine.low %v714_v62, %v718_v63  ;;  %v8471_v13 = vcombine.low %v715_v2, %v719_v3  ;;  %v8518_v62 = vcombine.high %v762_v54, %v766_v55  ;;  %v774_v2 = vld [vmem:[%s9232_s23 + $0x10a0] sm:$0xff] }
  0xe7   : > { %6617 = vmatprep.subr.bf16.mxu0 %v8422_v15  ;;  %6945 = vmatprep.subr.bf16.mxu1 %v8424_v16  ;;  %v8478_v15 = vcombine.high %v722_v8, %v726_v9  ;;  %v8480_v16 = vcombine.high %v723_v10, %v727_v11 }
  0xea   : > { %6618 = vmatpush1.bf16.msra.mxu0 %v8421_v0  ;;  %6946 = vmatpush1.bf16.msra.mxu1 %v8423_v22  ;;  %v8477_v0 = vcombine.low %v722_v8, %v726_v9  ;;  %v8479_v22 = vcombine.low %v723_v10, %v727_v11  ;;  %v8526_v8 = vcombine.high %v770_v41, %v774_v2  ;;  %v778_v10 = vld [vmem:[%s9232_s23 + $0x10c0] sm:$0xff] }
  0xeb   : > { %6619 = vmatprep.subr.bf16.mxu0 %v8430_v25  ;;  %6947 = vmatprep.subr.bf16.mxu1 %v8432_v26  ;;  %v8486_v25 = vcombine.high %v730_v18, %v734_v19  ;;  %v8488_v26 = vcombine.high %v731_v20, %v735_v21  ;;  %v782_v11 = vld [vmem:[%s9232_s23 + $0x10e0] sm:$0xff] }
  0xee   : > { %6620 = vmatpush1.bf16.msra.mxu0 %v8429_v17  ;;  %6948 = vmatpush1.bf16.msra.mxu1 %v8431_v32  ;;  %v8485_v17 = vcombine.low %v730_v18, %v734_v19  ;;  %v8487_v32 = vcombine.low %v731_v20, %v735_v21  ;;  %v8534_v18 = vcombine.high %v778_v10, %v782_v11  ;;  %v786_v20 = vld [vmem:[%s9232_s23 + $0x1100] sm:$0xff] }
  0xef   : > { %6621 = vmatprep.subr.bf16.mxu0 %v8438_v34  ;;  %6949 = vmatprep.subr.bf16.mxu1 %v8440_v35  ;;  %v8494_v34 = vcombine.high %v738_v28, %v742_v29  ;;  %v8496_v35 = vcombine.high %v739_v30, %v743_v31  ;;  %v790_v21 = vld [vmem:[%s9232_s23 + $0x1120] sm:$0xff] }
  0xf2   : > { %6622 = vmatpush1.bf16.msra.mxu0 %v8437_v42  ;;  %6950 = vmatpush1.bf16.msra.mxu1 %v8439_v43  ;;  %v8493_v42 = vcombine.low %v738_v28, %v742_v29  ;;  %v8495_v43 = vcombine.low %v739_v30, %v743_v31  ;;  %v8542_v28 = vcombine.high %v786_v20, %v790_v21  ;;  %v794_v30 = vld [vmem:[%s9232_s23 + $0x1140] sm:$0xff] }
  0xf3   : > { %6623 = vmatprep.subr.bf16.mxu0 %v8446_v44  ;;  %6951 = vmatprep.subr.bf16.mxu1 %v8448_v45  ;;  %v8502_v44 = vcombine.high %v746_v36, %v750_v37  ;;  %v8504_v45 = vcombine.high %v747_v39, %v751_v40  ;;  %v798_v31 = vld [vmem:[%s9232_s23 + $0x1160] sm:$0xff] }
  0xf6   : > { %6624 = vmatpush1.bf16.msra.mxu0 %v8445_v50  ;;  %6952 = vmatpush1.bf16.msra.mxu1 %v8447_v51  ;;  %v8501_v50 = vcombine.low %v746_v36, %v750_v37  ;;  %v8503_v51 = vcombine.low %v747_v39, %v751_v40  ;;  %v8550_v36 = vcombine.high %v794_v30, %v798_v31  ;;  %v802_v39 = vld [vmem:[%s9232_s23 + $0x1180] sm:$0xff] }
  0xf7   : > { %6625 = vmatprep.subr.bf16.mxu0 %v8454_v52  ;;  %6953 = vmatprep.subr.bf16.mxu1 %v8456_v53  ;;  %v8510_v52 = vcombine.high %v754_v27, %v758_v46  ;;  %v8512_v53 = vcombine.high %v755_v48, %v759_v49  ;;  %v806_v40 = vld [vmem:[%s9232_s23 + $0x11a0] sm:$0xff] }
  0xfa   : > { %6626 = vmatpush1.bf16.msra.mxu0 %v8453_v58  ;;  %6954 = vmatpush1.bf16.msra.mxu1 %v8455_v59  ;;  %v767_v58 = vld [vmem:[%s9232_s23 + $0x1068] sm:$0xff]  ;;  %v9556_v59 = vld [vmem:[%s10494_s0 + $0x20] sm:$0xff] }
  0xfb   : > { %6627 = vmatprep.subr.bf16.mxu0 %v8462_v60  ;;  %6955 = vmatprep.subr.bf16.mxu1 %v8464_v61  ;;  %v8509_v60 = vcombine.low %v754_v27, %v758_v46  ;;  %v8511_v61 = vcombine.low %v755_v48, %v759_v49  ;;  %v8520_v63 = vcombine.high %v763_v57, %v767_v58  ;;  %v810_v48 = vld [vmem:[%s9232_s23 + $0x11c0] sm:$0xff] }
  0xfc   : > { %v9562_v3 = vcombine.high %v9556_v59, %v9556_v59  ;;  %v8558_v27 = vcombine.high %v802_v39, %v806_v40  ;;  %v814_v49 = vld [vmem:[%s9232_s23 + $0x11e0] sm:$0xff] }
  0xfe   : > { %6628 = vmatpush1.bf16.msra.mxu0 %v8461_v4  ;;  %6956 = vmatpush1.bf16.msra.mxu1 %v8463_v5  ;;  %v771_v4 = vld [vmem:[%s9232_s23 + $0x1088] sm:$0xff] }
  0xff   : > { %6629 = vmatprep.subr.bf16.mxu0 %v8470_v6  ;;  %6957 = vmatprep.subr.bf16.mxu1 %v8472_v7  ;;  %v775_v5 = vld [vmem:[%s9232_s23 + $0x10a8] sm:$0xff]  ;;  %v8517_v6 = vcombine.low %v762_v54, %v766_v55  ;;  %v8519_v7 = vcombine.low %v763_v57, %v767_v58  ;;  %v8566_v54 = vcombine.high %v810_v48, %v814_v49  ;;  %v818_v57 = vld [vmem:[%s9232_s23 + $0x1200] sm:$0xff] }
 0x100   : > { %v8528_v9 = vcombine.high %v771_v4, %v775_v5  ;;  %v822_v58 = vld [vmem:[%s9232_s23 + $0x1220] sm:$0xff] }
 0x102   : > { %6630 = vmatpush1.bf16.msra.mxu0 %v8469_v12  ;;  %6958 = vmatpush1.bf16.msra.mxu1 %v8471_v13  ;;  %v779_v12 = vld [vmem:[%s9232_s23 + $0x10c8] sm:$0xff] }
 0x103   : > { %6631 = vmatprep.subr.bf16.mxu0 %v8478_v15  ;;  %6959 = vmatprep.subr.bf16.mxu1 %v8480_v16  ;;  %v783_v13 = vld [vmem:[%s9232_s23 + $0x10e8] sm:$0xff]  ;;  %v8525_v15 = vcombine.low %v770_v41, %v774_v2  ;;  %v8527_v16 = vcombine.low %v771_v4, %v775_v5  ;;  %v8574_v41 = vcombine.high %v818_v57, %v822_v58  ;;  %v826_v4 = vld [vmem:[%s9232_s23 + $0x1240] sm:$0xff] }
 0x104   : > { %v8536_v19 = vcombine.high %v779_v12, %v783_v13  ;;  %v830_v5 = vld [vmem:[%s9232_s23 + $0x1260] sm:$0xff] }
 0x106   : > { %6632 = vmatpush1.bf16.msra.mxu0 %v8477_v0  ;;  %6960 = vmatpush1.bf16.msra.mxu1 %v8479_v22  ;;  %v787_v0 = vld [vmem:[%s9232_s23 + $0x1108] sm:$0xff] }
 0x107   : > { %6633 = vmatprep.subr.bf16.mxu0 %v8486_v25  ;;  %6961 = vmatprep.subr.bf16.mxu1 %v8488_v26  ;;  %v791_v22 = vld [vmem:[%s9232_s23 + $0x1128] sm:$0xff]  ;;  %v8533_v25 = vcombine.low %v778_v10, %v782_v11  ;;  %v8535_v26 = vcombine.low %v779_v12, %v783_v13  ;;  %v8582_v10 = vcombine.high %v826_v4, %v830_v5  ;;  %v834_v12 = vld [vmem:[%s9232_s23 + $0x1280] sm:$0xff] }
 0x108   : > { %v8544_v29 = vcombine.high %v787_v0, %v791_v22  ;;  %v838_v13 = vld [vmem:[%s9232_s23 + $0x12a0] sm:$0xff] }
 0x10a   : > { %6634 = vmatpush1.bf16.msra.mxu0 %v8485_v17  ;;  %6962 = vmatpush1.bf16.msra.mxu1 %v8487_v32  ;;  %v795_v17 = vld [vmem:[%s9232_s23 + $0x1148] sm:$0xff] }
 0x10b   : > { %6635 = vmatprep.subr.bf16.mxu0 %v8494_v34  ;;  %6963 = vmatprep.subr.bf16.mxu1 %v8496_v35  ;;  %v799_v32 = vld [vmem:[%s9232_s23 + $0x1168] sm:$0xff]  ;;  %v8541_v34 = vcombine.low %v786_v20, %v790_v21  ;;  %v8543_v35 = vcombine.low %v787_v0, %v791_v22  ;;  %v8590_v20 = vcombine.high %v834_v12, %v838_v13  ;;  %v842_v0 = vld [vmem:[%s9232_s23 + $0x12c0] sm:$0xff] }
 0x10c   : > { %v8552_v37 = vcombine.high %v795_v17, %v799_v32  ;;  %v846_v22 = vld [vmem:[%s9232_s23 + $0x12e0] sm:$0xff] }
 0x10e   : > { %6636 = vmatpush1.bf16.msra.mxu0 %v8493_v42  ;;  %6964 = vmatpush1.bf16.msra.mxu1 %v8495_v43  ;;  %v803_v42 = vld [vmem:[%s9232_s23 + $0x1188] sm:$0xff] }
 0x10f   : > { %6637 = vmatprep.subr.bf16.mxu0 %v8502_v44  ;;  %6965 = vmatprep.subr.bf16.mxu1 %v8504_v45  ;;  %v807_v43 = vld [vmem:[%s9232_s23 + $0x11a8] sm:$0xff]  ;;  %v8549_v44 = vcombine.low %v794_v30, %v798_v31  ;;  %v8551_v45 = vcombine.low %v795_v17, %v799_v32  ;;  %v8598_v30 = vcombine.high %v842_v0, %v846_v22  ;;  %v850_v17 = vld [vmem:[%s9232_s23 + $0x1300] sm:$0xff] }
 0x110   : > { %v8560_v46 = vcombine.high %v803_v42, %v807_v43  ;;  %v854_v32 = vld [vmem:[%s9232_s23 + $0x1320] sm:$0xff] }
 0x112   : > { %6638 = vmatpush1.bf16.msra.mxu0 %v8501_v50  ;;  %6966 = vmatpush1.bf16.msra.mxu1 %v8503_v51  ;;  %v811_v50 = vld [vmem:[%s9232_s23 + $0x11c8] sm:$0xff] }
 0x113   : > { %6648 = vmatprep.subr.bf16.mxu0 %v8510_v52  ;;  %6976 = vmatprep.subr.bf16.mxu1 %v8512_v53  ;;  %v815_v51 = vld [vmem:[%s9232_s23 + $0x11e8] sm:$0xff]  ;;  %v8557_v52 = vcombine.low %v802_v39, %v806_v40  ;;  %v8559_v53 = vcombine.low %v803_v42, %v807_v43  ;;  %v8606_v39 = vcombine.high %v850_v17, %v854_v32  ;;  %v858_v42 = vld [vmem:[%s9232_s23 + $0x1340] sm:$0xff] }
 0x114   : > { %v8568_v55 = vcombine.high %v811_v50, %v815_v51  ;;  %v862_v43 = vld [vmem:[%s9232_s23 + $0x1360] sm:$0xff] }
 0x115   : > { %6640 = vmatmul.mubr.bf16.vlgmr.msra.gmra.mrb[0].mxu0 %v9549_v56  ;;  %6968 = vmatmul.mubr.bf16.vlgmr.msra.gmra.mrb[0].mxu1 %v9549_v56 }
 0x116   : > { %6649 = vmatpush1.bf16.msra.mxu0 %v8509_v60  ;;  %6977 = vmatpush1.bf16.msra.mxu1 %v8511_v61  ;;  %v819_v60 = vld [vmem:[%s9232_s23 + $0x1208] sm:$0xff] }
 0x117   : > { %6650 = vmatprep.subr.bf16.mxu0 %v8518_v62  ;;  %6978 = vmatprep.subr.bf16.mxu1 %v8520_v63  ;;  %v823_v61 = vld [vmem:[%s9232_s23 + $0x1228] sm:$0xff]  ;;  %v8565_v62 = vcombine.low %v810_v48, %v814_v49  ;;  %v8567_v63 = vcombine.low %v811_v50, %v815_v51  ;;  %v8614_v48 = vcombine.high %v858_v42, %v862_v43  ;;  %v866_v50 = vld [vmem:[%s9232_s23 + $0x1380] sm:$0xff] }
 0x118   : > { %6680 = vmatprep.mubr.bf16.mxu0 %v9562_v3  ;;  %7008 = vmatprep.mubr.bf16.mxu1 %v9562_v3  ;;  %v8576_v2 = vcombine.high %v819_v60, %v823_v61  ;;  %v870_v51 = vld [vmem:[%s9232_s23 + $0x13a0] sm:$0xff] }
 0x11a   : > { %6651 = vmatpush1.bf16.msra.mxu0 %v8517_v6  ;;  %6979 = vmatpush1.bf16.msra.mxu1 %v8519_v7  ;;  %v827_v6 = vld [vmem:[%s9232_s23 + $0x1248] sm:$0xff] }
 0x11b   : > { %6652 = vmatprep.subr.bf16.mxu0 %v8526_v8  ;;  %6980 = vmatprep.subr.bf16.mxu1 %v8528_v9  ;;  %v831_v7 = vld [vmem:[%s9232_s23 + $0x1268] sm:$0xff]  ;;  %v8573_v8 = vcombine.low %v818_v57, %v822_v58  ;;  %v8575_v9 = vcombine.low %v819_v60, %v823_v61  ;;  %v8622_v57 = vcombine.high %v866_v50, %v870_v51  ;;  %v874_v60 = vld [vmem:[%s9232_s23 + $0x13c0] sm:$0xff] }
 0x11c   : > { %v8584_v11 = vcombine.high %v827_v6, %v831_v7  ;;  %v878_v61 = vld [vmem:[%s9232_s23 + $0x13e0] sm:$0xff] }
 0x11e   : > { %6653 = vmatpush1.bf16.msra.mxu0 %v8525_v15  ;;  %6981 = vmatpush1.bf16.msra.mxu1 %v8527_v16  ;;  %v835_v15 = vld [vmem:[%s9232_s23 + $0x1288] sm:$0xff] }
 0x11f   : > { %6654 = vmatprep.subr.bf16.mxu0 %v8534_v18  ;;  %6982 = vmatprep.subr.bf16.mxu1 %v8536_v19  ;;  %v839_v16 = vld [vmem:[%s9232_s23 + $0x12a8] sm:$0xff]  ;;  %v8581_v18 = vcombine.low %v826_v4, %v830_v5  ;;  %v8583_v19 = vcombine.low %v827_v6, %v831_v7  ;;  %v8630_v4 = vcombine.high %v874_v60, %v878_v61  ;;  %v882_v6 = vld [vmem:[%s9232_s23 + $0x1400] sm:$0xff] }
 0x120   : > { %v8592_v21 = vcombine.high %v835_v15, %v839_v16  ;;  %v886_v7 = vld [vmem:[%s9232_s23 + $0x1420] sm:$0xff] }
 0x122   : > { %6655 = vmatpush1.bf16.msra.mxu0 %v8533_v25  ;;  %6983 = vmatpush1.bf16.msra.mxu1 %v8535_v26  ;;  %v843_v25 = vld [vmem:[%s9232_s23 + $0x12c8] sm:$0xff] }
 0x123   : > { %6656 = vmatprep.subr.bf16.mxu0 %v8542_v28  ;;  %6984 = vmatprep.subr.bf16.mxu1 %v8544_v29  ;;  %v847_v26 = vld [vmem:[%s9232_s23 + $0x12e8] sm:$0xff]  ;;  %v8589_v28 = vcombine.low %v834_v12, %v838_v13  ;;  %v8591_v29 = vcombine.low %v835_v15, %v839_v16  ;;  %v8638_v12 = vcombine.high %v882_v6, %v886_v7  ;;  %v890_v15 = vld [vmem:[%s9232_s23 + $0x1440] sm:$0xff] }
 0x124   : > { %v8600_v31 = vcombine.high %v843_v25, %v847_v26  ;;  %v894_v16 = vld [vmem:[%s9232_s23 + $0x1460] sm:$0xff] }
 0x126   : > { %6657 = vmatpush1.bf16.msra.mxu0 %v8541_v34  ;;  %6985 = vmatpush1.bf16.msra.mxu1 %v8543_v35  ;;  %v851_v34 = vld [vmem:[%s9232_s23 + $0x1308] sm:$0xff] }
 0x127   : > { %6658 = vmatprep.subr.bf16.mxu0 %v8550_v36  ;;  %6986 = vmatprep.subr.bf16.mxu1 %v8552_v37  ;;  %v855_v35 = vld [vmem:[%s9232_s23 + $0x1328] sm:$0xff]  ;;  %v8597_v36 = vcombine.low %v842_v0, %v846_v22  ;;  %v8599_v37 = vcombine.low %v843_v25, %v847_v26  ;;  %v8637_v0 = vcombine.low %v882_v6, %v886_v7 }
 0x128   : > { %v8608_v40 = vcombine.high %v851_v34, %v855_v35  ;;  %v8646_v25 = vcombine.high %v890_v15, %v894_v16 }
 0x12a   : > { %6659 = vmatpush1.bf16.msra.mxu0 %v8549_v44  ;;  %6987 = vmatpush1.bf16.msra.mxu1 %v8551_v45  ;;  %v859_v44 = vld [vmem:[%s9232_s23 + $0x1348] sm:$0xff] }
 0x12b   : > { %6660 = vmatprep.subr.bf16.mxu0 %v8558_v27  ;;  %6988 = vmatprep.subr.bf16.mxu1 %v8560_v46  ;;  %v863_v45 = vld [vmem:[%s9232_s23 + $0x1368] sm:$0xff]  ;;  %v8605_v27 = vcombine.low %v850_v17, %v854_v32  ;;  %v8607_v46 = vcombine.low %v851_v34, %v855_v35  ;;  %v8645_v17 = vcombine.low %v890_v15, %v894_v16 }
 0x12c   : > { %v8616_v49 = vcombine.high %v859_v44, %v863_v45 }
 0x12e   : > { %6661 = vmatpush1.bf16.msra.mxu0 %v8557_v52  ;;  %6989 = vmatpush1.bf16.msra.mxu1 %v8559_v53  ;;  %v867_v52 = vld [vmem:[%s9232_s23 + $0x1388] sm:$0xff] }
 0x12f   : > { %6662 = vmatprep.subr.bf16.mxu0 %v8566_v54  ;;  %6990 = vmatprep.subr.bf16.mxu1 %v8568_v55  ;;  %v871_v53 = vld [vmem:[%s9232_s23 + $0x13a8] sm:$0xff]  ;;  %v8613_v54 = vcombine.low %v858_v42, %v862_v43  ;;  %v8615_v55 = vcombine.low %v859_v44, %v863_v45 }
 0x130   : > { %v8624_v58 = vcombine.high %v867_v52, %v871_v53 }
 0x132   : > { %6663 = vmatpush1.bf16.msra.mxu0 %v8565_v62  ;;  %6991 = vmatpush1.bf16.msra.mxu1 %v8567_v63  ;;  %v875_v62 = vld [vmem:[%s9232_s23 + $0x13c8] sm:$0xff] }
 0x133   : > { %6664 = vmatprep.subr.bf16.mxu0 %v8574_v41  ;;  %6992 = vmatprep.subr.bf16.mxu1 %v8576_v2  ;;  %v879_v63 = vld [vmem:[%s9232_s23 + $0x13e8] sm:$0xff]  ;;  %v8621_v41 = vcombine.low %v866_v50, %v870_v51  ;;  %v8623_v2 = vcombine.low %v867_v52, %v871_v53 }
 0x134   : > { %v8632_v5 = vcombine.high %v875_v62, %v879_v63 }
 0x136   : > { %6665 = vmatpush1.bf16.msra.mxu0 %v8573_v8  ;;  %6993 = vmatpush1.bf16.msra.mxu1 %v8575_v9  ;;  %v883_v8 = vld [vmem:[%s9232_s23 + $0x1408] sm:$0xff] }
 0x137   : > { %6666 = vmatprep.subr.bf16.mxu0 %v8582_v10  ;;  %6994 = vmatprep.subr.bf16.mxu1 %v8584_v11  ;;  %v887_v9 = vld [vmem:[%s9232_s23 + $0x1428] sm:$0xff]  ;;  %v8629_v10 = vcombine.low %v874_v60, %v878_v61  ;;  %v8631_v11 = vcombine.low %v875_v62, %v879_v63 }
 0x138   : > { %v8640_v13 = vcombine.high %v883_v8, %v887_v9  ;;  %v8639_v22 = vcombine.low %v883_v8, %v887_v9 }
 0x13a   : > { %6667 = vmatpush1.bf16.msra.mxu0 %v8581_v18  ;;  %6995 = vmatpush1.bf16.msra.mxu1 %v8583_v19  ;;  %v9630_v18 = vcombine.low %v9556_v59, %v9556_v59  ;;  %v891_v19 = vld [vmem:[%s9232_s23 + $0x1448] sm:$0xff]  ;;  %v898_v59 = vld [vmem:[%s9232_s23 + $0x1480] sm:$0xff] }
 0x13b   : > { %6668 = vmatprep.subr.bf16.mxu0 %v8590_v20  ;;  %6996 = vmatprep.subr.bf16.mxu1 %v8592_v21  ;;  %v895_v20 = vld [vmem:[%s9232_s23 + $0x1468] sm:$0xff] }
 0x13c   : > { %v9637_v21 = vld [vmem:[%s10494_s0 + $0x28] sm:$0xff]  ;;  %v8648_v26 = vcombine.high %v891_v19, %v895_v20  ;;  %v8647_v32 = vcombine.low %v891_v19, %v895_v20 }
 0x13e   : > { %6669 = vmatpush1.bf16.msra.mxu0 %v8589_v28  ;;  %6997 = vmatpush1.bf16.msra.mxu1 %v8591_v29  ;;  %v902_v28 = vld [vmem:[%s9232_s23 + $0x14a0] sm:$0xff]  ;;  %v9643_v29 = vcombine.high %v9637_v21, %v9637_v21 }
 0x13f   : > { %6670 = vmatprep.subr.bf16.mxu0 %v8598_v30  ;;  %6998 = vmatprep.subr.bf16.mxu1 %v8600_v31  ;;  %v899_v30 = vld [vmem:[%s9232_s23 + $0x1488] sm:$0xff]  ;;  %v8654_v34 = vcombine.high %v898_v59, %v902_v28  ;;  %v8653_v42 = vcombine.low %v898_v59, %v902_v28 }
 0x140   : > { %v903_v31 = vld [vmem:[%s9232_s23 + $0x14a8] sm:$0xff] }
 0x141   : > { %v8656_v35 = vcombine.high %v899_v30, %v903_v31  ;;  %v8655_v43 = vcombine.low %v899_v30, %v903_v31 }
 0x142   : > { %6671 = vmatpush1.bf16.msra.mxu0 %v8597_v36  ;;  %6999 = vmatpush1.bf16.msra.mxu1 %v8599_v37  ;;  %v906_v36 = vld [vmem:[%s9232_s23 + $0x14c0] sm:$0xff] }
 0x143   : > { %6672 = vmatprep.subr.bf16.mxu0 %v8606_v39  ;;  %7000 = vmatprep.subr.bf16.mxu1 %v8608_v40  ;;  %v910_v37 = vld [vmem:[%s9232_s23 + $0x14e0] sm:$0xff]  ;;  %v907_v39 = vld [vmem:[%s9232_s23 + $0x14c8] sm:$0xff] }
 0x144   : > { %v911_v40 = vld [vmem:[%s9232_s23 + $0x14e8] sm:$0xff]  ;;  %v8662_v44 = vcombine.high %v906_v36, %v910_v37  ;;  %v8661_v50 = vcombine.low %v906_v36, %v910_v37 }
 0x145   : > { %v8664_v45 = vcombine.high %v907_v39, %v911_v40  ;;  %v8663_v51 = vcombine.low %v907_v39, %v911_v40 }
 0x146   : > { %6673 = vmatpush1.bf16.msra.mxu0 %v8605_v27  ;;  %7001 = vmatpush1.bf16.msra.mxu1 %v8607_v46  ;;  %v914_v27 = vld [vmem:[%s9232_s23 + $0x1500] sm:$0xff] }
 0x147   : > { %6674 = vmatprep.subr.bf16.mxu0 %v8614_v48  ;;  %7002 = vmatprep.subr.bf16.mxu1 %v8616_v49  ;;  %v918_v46 = vld [vmem:[%s9232_s23 + $0x1520] sm:$0xff]  ;;  %v915_v48 = vld [vmem:[%s9232_s23 + $0x1508] sm:$0xff] }
 0x148   : > { %v919_v49 = vld [vmem:[%s9232_s23 + $0x1528] sm:$0xff]  ;;  %v8670_v52 = vcombine.high %v914_v27, %v918_v46  ;;  %v8669_v60 = vcombine.low %v914_v27, %v918_v46 }
 0x149   : > { %v8672_v53 = vcombine.high %v915_v48, %v919_v49  ;;  %v8671_v61 = vcombine.low %v915_v48, %v919_v49 }
 0x14a   : > { %6675 = vmatpush1.bf16.msra.mxu0 %v8613_v54  ;;  %7003 = vmatpush1.bf16.msra.mxu1 %v8615_v55  ;;  %v922_v54 = vld [vmem:[%s9232_s23 + $0x1540] sm:$0xff] }
 0x14b   : > { %6676 = vmatprep.subr.bf16.mxu0 %v8622_v57  ;;  %7004 = vmatprep.subr.bf16.mxu1 %v8624_v58  ;;  %v926_v55 = vld [vmem:[%s9232_s23 + $0x1560] sm:$0xff]  ;;  %v923_v57 = vld [vmem:[%s9232_s23 + $0x1548] sm:$0xff] }
 0x14c   : > { %v927_v58 = vld [vmem:[%s9232_s23 + $0x1568] sm:$0xff]  ;;  %v8678_v62 = vcombine.high %v922_v54, %v926_v55  ;;  %v8677_v6 = vcombine.low %v922_v54, %v926_v55 }
 0x14d   : > { %v8680_v63 = vcombine.high %v923_v57, %v927_v58  ;;  %v8679_v7 = vcombine.low %v923_v57, %v927_v58 }
 0x14e   : > { %6677 = vmatpush1.bf16.msra.mxu0 %v8621_v41  ;;  %7005 = vmatpush1.bf16.msra.mxu1 %v8623_v2  ;;  %v930_v41 = vld [vmem:[%s9232_s23 + $0x1580] sm:$0xff] }
 0x14f   : > { %6678 = vmatprep.subr.bf16.mxu0 %v8630_v4  ;;  %7006 = vmatprep.subr.bf16.mxu1 %v8632_v5  ;;  %v934_v2 = vld [vmem:[%s9232_s23 + $0x15a0] sm:$0xff]  ;;  %v931_v4 = vld [vmem:[%s9232_s23 + $0x1588] sm:$0xff] }
 0x150   : > { %v935_v5 = vld [vmem:[%s9232_s23 + $0x15a8] sm:$0xff]  ;;  %v8686_v8 = vcombine.high %v930_v41, %v934_v2  ;;  %v8685_v15 = vcombine.low %v930_v41, %v934_v2 }
 0x151   : > { %v8688_v9 = vcombine.high %v931_v4, %v935_v5  ;;  %v8687_v16 = vcombine.low %v931_v4, %v935_v5 }
 0x152   : > { %6679 = vmatpush1.bf16.msra.mxu0 %v8629_v10  ;;  %7007 = vmatpush1.bf16.msra.mxu1 %v8631_v11  ;;  %v938_v10 = vld [vmem:[%s9232_s23 + $0x15c0] sm:$0xff] }
 0x153   : > { %6689 = vmatprep.subr.bf16.mxu0 %v8638_v12  ;;  %7017 = vmatprep.subr.bf16.mxu1 %v8640_v13  ;;  %v942_v11 = vld [vmem:[%s9232_s23 + $0x15e0] sm:$0xff]  ;;  %v939_v12 = vld [vmem:[%s9232_s23 + $0x15c8] sm:$0xff] }
 0x154   : > { %v943_v13 = vld [vmem:[%s9232_s23 + $0x15e8] sm:$0xff]  ;;  %v8694_v19 = vcombine.high %v938_v10, %v942_v11  ;;  %v8693_v59 = vcombine.low %v938_v10, %v942_v11 }
 0x155   : > { %6681 = vmatmul.mubr.bf16.vlgmr.msra.gmra.mrb[0].mxu0 %v9630_v18  ;;  %7009 = vmatmul.mubr.bf16.vlgmr.msra.gmra.mrb[0].mxu1 %v9630_v18  ;;  %v8696_v20 = vcombine.high %v939_v12, %v943_v13  ;;  %v8695_v28 = vcombine.low %v939_v12, %v943_v13 }
 0x156   : > { %6690 = vmatpush1.bf16.msra.mxu0 %v8637_v0  ;;  %7018 = vmatpush1.bf16.msra.mxu1 %v8639_v22  ;;  %v946_v0 = vld [vmem:[%s9232_s23 + $0x1600] sm:$0xff] }
 0x157   : > { %6691 = vmatprep.subr.bf16.mxu0 %v8646_v25  ;;  %7019 = vmatprep.subr.bf16.mxu1 %v8648_v26  ;;  %v950_v22 = vld [vmem:[%s9232_s23 + $0x1620] sm:$0xff]  ;;  %v947_v25 = vld [vmem:[%s9232_s23 + $0x1608] sm:$0xff] }
 0x158   : > { %6721 = vmatprep.mubr.bf16.mxu0 %v9643_v29  ;;  %7049 = vmatprep.mubr.bf16.mxu1 %v9643_v29  ;;  %v951_v26 = vld [vmem:[%s9232_s23 + $0x1628] sm:$0xff]  ;;  %v8702_v30 = vcombine.high %v946_v0, %v950_v22  ;;  %v8701_v36 = vcombine.low %v946_v0, %v950_v22 }
 0x159   : > { %v8704_v31 = vcombine.high %v947_v25, %v951_v26  ;;  %v8703_v37 = vcombine.low %v947_v25, %v951_v26 }
 0x15a   : > { %6692 = vmatpush1.bf16.msra.mxu0 %v8645_v17  ;;  %7020 = vmatpush1.bf16.msra.mxu1 %v8647_v32  ;;  %v954_v17 = vld [vmem:[%s9232_s23 + $0x1640] sm:$0xff] }
 0x15b   : > { %6693 = vmatprep.subr.bf16.mxu0 %v8654_v34  ;;  %7021 = vmatprep.subr.bf16.mxu1 %v8656_v35  ;;  %v958_v32 = vld [vmem:[%s9232_s23 + $0x1660] sm:$0xff]  ;;  %v955_v34 = vld [vmem:[%s9232_s23 + $0x1648] sm:$0xff] }
 0x15c   : > { %v959_v35 = vld [vmem:[%s9232_s23 + $0x1668] sm:$0xff]  ;;  %v8710_v39 = vcombine.high %v954_v17, %v958_v32  ;;  %v8709_v27 = vcombine.low %v954_v17, %v958_v32 }
 0x15d   : > { %v8712_v40 = vcombine.high %v955_v34, %v959_v35  ;;  %v8711_v46 = vcombine.low %v955_v34, %v959_v35 }
 0x15e   : > { %6694 = vmatpush1.bf16.msra.mxu0 %v8653_v42  ;;  %7022 = vmatpush1.bf16.msra.mxu1 %v8655_v43  ;;  %v962_v42 = vld [vmem:[%s9232_s23 + $0x1680] sm:$0xff] }
 0x15f   : > { %6695 = vmatprep.subr.bf16.mxu0 %v8662_v44  ;;  %7023 = vmatprep.subr.bf16.mxu1 %v8664_v45  ;;  %v966_v43 = vld [vmem:[%s9232_s23 + $0x16a0] sm:$0xff]  ;;  %v963_v44 = vld [vmem:[%s9232_s23 + $0x1688] sm:$0xff] }
 0x160   : > { %v967_v45 = vld [vmem:[%s9232_s23 + $0x16a8] sm:$0xff]  ;;  %v8718_v48 = vcombine.high %v962_v42, %v966_v43  ;;  %v8717_v54 = vcombine.low %v962_v42, %v966_v43 }
 0x161   : > { %v8720_v49 = vcombine.high %v963_v44, %v967_v45  ;;  %v8719_v55 = vcombine.low %v963_v44, %v967_v45 }
 0x162   : > { %6696 = vmatpush1.bf16.msra.mxu0 %v8661_v50  ;;  %7024 = vmatpush1.bf16.msra.mxu1 %v8663_v51  ;;  %v970_v50 = vld [vmem:[%s9232_s23 + $0x16c0] sm:$0xff] }
 0x163   : > { %6697 = vmatprep.subr.bf16.mxu0 %v8670_v52  ;;  %7025 = vmatprep.subr.bf16.mxu1 %v8672_v53  ;;  %v974_v51 = vld [vmem:[%s9232_s23 + $0x16e0] sm:$0xff]  ;;  %v971_v52 = vld [vmem:[%s9232_s23 + $0x16c8] sm:$0xff] }
 0x164   : > { %v975_v53 = vld [vmem:[%s9232_s23 + $0x16e8] sm:$0xff]  ;;  %v8726_v57 = vcombine.high %v970_v50, %v974_v51  ;;  %v8725_v41 = vcombine.low %v970_v50, %v974_v51  ;;  %v9718_v51 = vld [vmem:[%s10494_s0 + $0x30] sm:$0xff] }
 0x165   : > { %v8728_v58 = vcombine.high %v971_v52, %v975_v53  ;;  %v8727_v2 = vcombine.low %v971_v52, %v975_v53  ;;  %v1023_v50 = vld [vmem:[%s9232_s23 + $0x1868] sm:$0xff] }
 0x166   : > { %6698 = vmatpush1.bf16.msra.mxu0 %v8669_v60  ;;  %7026 = vmatpush1.bf16.msra.mxu1 %v8671_v61  ;;  %v978_v60 = vld [vmem:[%s9232_s23 + $0x1700] sm:$0xff] }
 0x167   : > { %6699 = vmatprep.subr.bf16.mxu0 %v8678_v62  ;;  %7027 = vmatprep.subr.bf16.mxu1 %v8680_v63  ;;  %v982_v61 = vld [vmem:[%s9232_s23 + $0x1720] sm:$0xff]  ;;  %v979_v62 = vld [vmem:[%s9232_s23 + $0x1708] sm:$0xff] }
 0x168   : > { %v983_v63 = vld [vmem:[%s9232_s23 + $0x1728] sm:$0xff]  ;;  %v8734_v4 = vcombine.high %v978_v60, %v982_v61  ;;  %v8733_v10 = vcombine.low %v978_v60, %v982_v61 }
 0x169   : > { %v8736_v5 = vcombine.high %v979_v62, %v983_v63  ;;  %v8735_v11 = vcombine.low %v979_v62, %v983_v63  ;;  %v1027_v60 = vld [vmem:[%s9232_s23 + $0x1888] sm:$0xff] }
 0x16a   : > { %6700 = vmatpush1.bf16.msra.mxu0 %v8677_v6  ;;  %7028 = vmatpush1.bf16.msra.mxu1 %v8679_v7  ;;  %v986_v6 = vld [vmem:[%s9232_s23 + $0x1740] sm:$0xff]  ;;  %v1031_v61 = vld [vmem:[%s9232_s23 + $0x18a8] sm:$0xff] }
 0x16b   : > { %6701 = vmatprep.subr.bf16.mxu0 %v8686_v8  ;;  %7029 = vmatprep.subr.bf16.mxu1 %v8688_v9  ;;  %v990_v7 = vld [vmem:[%s9232_s23 + $0x1760] sm:$0xff]  ;;  %v987_v8 = vld [vmem:[%s9232_s23 + $0x1748] sm:$0xff] }
 0x16c   : > { %v991_v9 = vld [vmem:[%s9232_s23 + $0x1768] sm:$0xff]  ;;  %v8742_v12 = vcombine.high %v986_v6, %v990_v7  ;;  %v8741_v0 = vcombine.low %v986_v6, %v990_v7 }
 0x16d   : > { %v8744_v13 = vcombine.high %v987_v8, %v991_v9  ;;  %v8743_v22 = vcombine.low %v987_v8, %v991_v9  ;;  %v1035_v6 = vld [vmem:[%s9232_s23 + $0x18c8] sm:$0xff]  ;;  %v8783_v9 = vcombine.low %v1027_v60, %v1031_v61 }
 0x16e   : > { %6702 = vmatpush1.bf16.msra.mxu0 %v8685_v15  ;;  %7030 = vmatpush1.bf16.msra.mxu1 %v8687_v16  ;;  %v994_v15 = vld [vmem:[%s9232_s23 + $0x1780] sm:$0xff]  ;;  %v1039_v7 = vld [vmem:[%s9232_s23 + $0x18e8] sm:$0xff] }
 0x16f   : > { %6703 = vmatprep.subr.bf16.mxu0 %v8694_v19  ;;  %7031 = vmatprep.subr.bf16.mxu1 %v8696_v20  ;;  %v998_v16 = vld [vmem:[%s9232_s23 + $0x17a0] sm:$0xff]  ;;  %v995_v19 = vld [vmem:[%s9232_s23 + $0x1788] sm:$0xff] }
 0x170   : > { %v999_v20 = vld [vmem:[%s9232_s23 + $0x17a8] sm:$0xff]  ;;  %v8750_v25 = vcombine.high %v994_v15, %v998_v16  ;;  %v8749_v17 = vcombine.low %v994_v15, %v998_v16 }
 0x171   : > { %v8752_v26 = vcombine.high %v995_v19, %v999_v20  ;;  %v8751_v32 = vcombine.low %v995_v19, %v999_v20  ;;  %v1043_v15 = vld [vmem:[%s9232_s23 + $0x1908] sm:$0xff]  ;;  %v8791_v20 = vcombine.low %v1035_v6, %v1039_v7 }
 0x172   : > { %6704 = vmatpush1.bf16.msra.mxu0 %v8693_v59  ;;  %7032 = vmatpush1.bf16.msra.mxu1 %v8695_v28  ;;  %v1002_v59 = vld [vmem:[%s9232_s23 + $0x17c0] sm:$0xff]  ;;  %v1047_v16 = vld [vmem:[%s9232_s23 + $0x1928] sm:$0xff] }
 0x173   : > { %6705 = vmatprep.subr.bf16.mxu0 %v8702_v30  ;;  %7033 = vmatprep.subr.bf16.mxu1 %v8704_v31  ;;  %v1006_v28 = vld [vmem:[%s9232_s23 + $0x17e0] sm:$0xff]  ;;  %v1003_v30 = vld [vmem:[%s9232_s23 + $0x17c8] sm:$0xff] }
 0x174   : > { %v1007_v31 = vld [vmem:[%s9232_s23 + $0x17e8] sm:$0xff]  ;;  %v8758_v34 = vcombine.high %v1002_v59, %v1006_v28  ;;  %v8757_v42 = vcombine.low %v1002_v59, %v1006_v28 }
 0x175   : > { %v8760_v35 = vcombine.high %v1003_v30, %v1007_v31  ;;  %v8759_v43 = vcombine.low %v1003_v30, %v1007_v31  ;;  %v1051_v59 = vld [vmem:[%s9232_s23 + $0x1948] sm:$0xff]  ;;  %v8799_v31 = vcombine.low %v1043_v15, %v1047_v16 }
 0x176   : > { %6706 = vmatpush1.bf16.msra.mxu0 %v8701_v36  ;;  %7034 = vmatpush1.bf16.msra.mxu1 %v8703_v37  ;;  %v1010_v36 = vld [vmem:[%s9232_s23 + $0x1800] sm:$0xff]  ;;  %v1055_v28 = vld [vmem:[%s9232_s23 + $0x1968] sm:$0xff] }
 0x177   : > { %6707 = vmatprep.subr.bf16.mxu0 %v8710_v39  ;;  %7035 = vmatprep.subr.bf16.mxu1 %v8712_v40  ;;  %v1014_v37 = vld [vmem:[%s9232_s23 + $0x1820] sm:$0xff]  ;;  %v1011_v39 = vld [vmem:[%s9232_s23 + $0x1808] sm:$0xff] }
 0x178   : > { %v1015_v40 = vld [vmem:[%s9232_s23 + $0x1828] sm:$0xff]  ;;  %v8766_v44 = vcombine.high %v1010_v36, %v1014_v37  ;;  %v8765_v52 = vcombine.low %v1010_v36, %v1014_v37 }
 0x179   : > { %v8768_v45 = vcombine.high %v1011_v39, %v1015_v40  ;;  %v8767_v53 = vcombine.low %v1011_v39, %v1015_v40  ;;  %v1059_v36 = vld [vmem:[%s9232_s23 + $0x1988] sm:$0xff]  ;;  %v8807_v40 = vcombine.low %v1051_v59, %v1055_v28 }
 0x17a   : > { %6708 = vmatpush1.bf16.msra.mxu0 %v8709_v27  ;;  %7036 = vmatpush1.bf16.msra.mxu1 %v8711_v46  ;;  %v1018_v27 = vld [vmem:[%s9232_s23 + $0x1840] sm:$0xff]  ;;  %v1063_v37 = vld [vmem:[%s9232_s23 + $0x19a8] sm:$0xff] }
 0x17b   : > { %6709 = vmatprep.subr.bf16.mxu0 %v8718_v48  ;;  %7037 = vmatprep.subr.bf16.mxu1 %v8720_v49  ;;  %v1022_v46 = vld [vmem:[%s9232_s23 + $0x1860] sm:$0xff]  ;;  %v9711_v48 = vcombine.low %v9637_v21, %v9637_v21  ;;  %v1019_v49 = vld [vmem:[%s9232_s23 + $0x1848] sm:$0xff] }
 0x17c   : > { %v1026_v21 = vld [vmem:[%s9232_s23 + $0x1880] sm:$0xff]  ;;  %v8773_v62 = vcombine.low %v1018_v27, %v1022_v46  ;;  %v8775_v63 = vcombine.low %v1019_v49, %v1023_v50 }
 0x17e   : > { %6710 = vmatpush1.bf16.msra.mxu0 %v8717_v54  ;;  %7038 = vmatpush1.bf16.msra.mxu1 %v8719_v55  ;;  %v8774_v54 = vcombine.high %v1018_v27, %v1022_v46  ;;  %v8776_v55 = vcombine.high %v1019_v49, %v1023_v50  ;;  %v1067_v27 = vld [vmem:[%s9232_s23 + $0x19c8] sm:$0xff]  ;;  %v8815_v50 = vcombine.low %v1059_v36, %v1063_v37 }
 0x17f   : > { %6711 = vmatprep.subr.bf16.mxu0 %v8726_v57  ;;  %7039 = vmatprep.subr.bf16.mxu1 %v8728_v58  ;;  %v1030_v57 = vld [vmem:[%s9232_s23 + $0x18a0] sm:$0xff]  ;;  %v9724_v58 = vcombine.high %v9718_v51, %v9718_v51  ;;  %v1071_v46 = vld [vmem:[%s9232_s23 + $0x19e8] sm:$0xff] }
 0x180   : > { %v8781_v8 = vcombine.low %v1026_v21, %v1030_v57 }
 0x182   : > { %6712 = vmatpush1.bf16.msra.mxu0 %v8725_v41  ;;  %7040 = vmatpush1.bf16.msra.mxu1 %v8727_v2  ;;  %v8782_v41 = vcombine.high %v1026_v21, %v1030_v57  ;;  %v8784_v2 = vcombine.high %v1027_v60, %v1031_v61  ;;  %v1075_v21 = vld [vmem:[%s9232_s23 + $0x1a08] sm:$0xff]  ;;  %v8823_v61 = vcombine.low %v1067_v27, %v1071_v46 }
 0x183   : > { %6713 = vmatprep.subr.bf16.mxu0 %v8734_v4  ;;  %7041 = vmatprep.subr.bf16.mxu1 %v8736_v5  ;;  %v1034_v4 = vld [vmem:[%s9232_s23 + $0x18c0] sm:$0xff]  ;;  %v1079_v57 = vld [vmem:[%s9232_s23 + $0x1a28] sm:$0xff] }
 0x184   : > { %v1038_v5 = vld [vmem:[%s9232_s23 + $0x18e0] sm:$0xff] }
 0x185   : > { %v8789_v19 = vcombine.low %v1034_v4, %v1038_v5 }
 0x186   : > { %6714 = vmatpush1.bf16.msra.mxu0 %v8733_v10  ;;  %7042 = vmatpush1.bf16.msra.mxu1 %v8735_v11  ;;  %v8790_v10 = vcombine.high %v1034_v4, %v1038_v5  ;;  %v8792_v11 = vcombine.high %v1035_v6, %v1039_v7  ;;  %v1083_v4 = vld [vmem:[%s9232_s23 + $0x1a48] sm:$0xff]  ;;  %v8831_v7 = vcombine.low %v1075_v21, %v1079_v57 }
 0x187   : > { %6715 = vmatprep.subr.bf16.mxu0 %v8742_v12  ;;  %7043 = vmatprep.subr.bf16.mxu1 %v8744_v13  ;;  %v1042_v12 = vld [vmem:[%s9232_s23 + $0x1900] sm:$0xff]  ;;  %v1087_v5 = vld [vmem:[%s9232_s23 + $0x1a68] sm:$0xff] }
 0x188   : > { %v1046_v13 = vld [vmem:[%s9232_s23 + $0x1920] sm:$0xff] }
 0x189   : > { %v8797_v30 = vcombine.low %v1042_v12, %v1046_v13 }
 0x18a   : > { %6716 = vmatpush1.bf16.msra.mxu0 %v8741_v0  ;;  %7044 = vmatpush1.bf16.msra.mxu1 %v8743_v22  ;;  %v8798_v0 = vcombine.high %v1042_v12, %v1046_v13  ;;  %v8800_v22 = vcombine.high %v1043_v15, %v1047_v16  ;;  %v1091_v12 = vld [vmem:[%s9232_s23 + $0x1a88] sm:$0xff]  ;;  %v8839_v16 = vcombine.low %v1083_v4, %v1087_v5 }
 0x18b   : > { %6717 = vmatprep.subr.bf16.mxu0 %v8750_v25  ;;  %7045 = vmatprep.subr.bf16.mxu1 %v8752_v26  ;;  %v1050_v25 = vld [vmem:[%s9232_s23 + $0x1940] sm:$0xff]  ;;  %v1095_v13 = vld [vmem:[%s9232_s23 + $0x1aa8] sm:$0xff] }
 0x18c   : > { %v1054_v26 = vld [vmem:[%s9232_s23 + $0x1960] sm:$0xff] }
 0x18d   : > { %v8805_v39 = vcombine.low %v1050_v25, %v1054_v26 }
 0x18e   : > { %6718 = vmatpush1.bf16.msra.mxu0 %v8749_v17  ;;  %7046 = vmatpush1.bf16.msra.mxu1 %v8751_v32  ;;  %v8806_v17 = vcombine.high %v1050_v25, %v1054_v26  ;;  %v8808_v32 = vcombine.high %v1051_v59, %v1055_v28  ;;  %v1099_v25 = vld [vmem:[%s9232_s23 + $0x1ac8] sm:$0xff]  ;;  %v8847_v28 = vcombine.low %v1091_v12, %v1095_v13 }
 0x18f   : > { %6719 = vmatprep.subr.bf16.mxu0 %v8758_v34  ;;  %7047 = vmatprep.subr.bf16.mxu1 %v8760_v35  ;;  %v1058_v34 = vld [vmem:[%s9232_s23 + $0x1980] sm:$0xff]  ;;  %v1103_v26 = vld [vmem:[%s9232_s23 + $0x1ae8] sm:$0xff] }
 0x190   : > { %v1062_v35 = vld [vmem:[%s9232_s23 + $0x19a0] sm:$0xff] }
 0x191   : > { %v8813_v49 = vcombine.low %v1058_v34, %v1062_v35 }
 0x192   : > { %6720 = vmatpush1.bf16.msra.mxu0 %v8757_v42  ;;  %7048 = vmatpush1.bf16.msra.mxu1 %v8759_v43  ;;  %v8814_v42 = vcombine.high %v1058_v34, %v1062_v35  ;;  %v8816_v43 = vcombine.high %v1059_v36, %v1063_v37  ;;  %v1107_v34 = vld [vmem:[%s9232_s23 + $0x1b08] sm:$0xff]  ;;  %v8855_v37 = vcombine.low %v1099_v25, %v1103_v26 }
 0x193   : > { %6730 = vmatprep.subr.bf16.mxu0 %v8766_v44  ;;  %7058 = vmatprep.subr.bf16.mxu1 %v8768_v45  ;;  %v1066_v44 = vld [vmem:[%s9232_s23 + $0x19c0] sm:$0xff]  ;;  %v1111_v35 = vld [vmem:[%s9232_s23 + $0x1b28] sm:$0xff] }
 0x194   : > { %v1070_v45 = vld [vmem:[%s9232_s23 + $0x19e0] sm:$0xff] }
 0x195   : > { %6722 = vmatmul.mubr.bf16.vlgmr.msra.gmra.mrb[0].mxu0 %v9711_v48  ;;  %7050 = vmatmul.mubr.bf16.vlgmr.msra.gmra.mrb[0].mxu1 %v9711_v48  ;;  %v8821_v60 = vcombine.low %v1066_v44, %v1070_v45 }
 0x196   : > { %6731 = vmatpush1.bf16.msra.mxu0 %v8765_v52  ;;  %7059 = vmatpush1.bf16.msra.mxu1 %v8767_v53  ;;  %v8822_v52 = vcombine.high %v1066_v44, %v1070_v45  ;;  %v8824_v53 = vcombine.high %v1067_v27, %v1071_v46  ;;  %v1115_v44 = vld [vmem:[%s9232_s23 + $0x1b48] sm:$0xff]  ;;  %v8863_v46 = vcombine.low %v1107_v34, %v1111_v35 }
 0x197   : > { %6732 = vmatprep.subr.bf16.mxu0 %v8774_v54  ;;  %7060 = vmatprep.subr.bf16.mxu1 %v8776_v55  ;;  %v1074_v54 = vld [vmem:[%s9232_s23 + $0x1a00] sm:$0xff]  ;;  %v1119_v45 = vld [vmem:[%s9232_s23 + $0x1b68] sm:$0xff] }
 0x198   : > { %6762 = vmatprep.mubr.bf16.mxu0 %v9724_v58  ;;  %7090 = vmatprep.mubr.bf16.mxu1 %v9724_v58  ;;  %v1078_v55 = vld [vmem:[%s9232_s23 + $0x1a20] sm:$0xff] }
 0x199   : > { %v8829_v6 = vcombine.low %v1074_v54, %v1078_v55 }
 0x19a   : > { %6733 = vmatpush1.bf16.msra.mxu0 %v8773_v62  ;;  %7061 = vmatpush1.bf16.msra.mxu1 %v8775_v63  ;;  %v8830_v62 = vcombine.high %v1074_v54, %v1078_v55  ;;  %v8832_v63 = vcombine.high %v1075_v21, %v1079_v57  ;;  %v1123_v54 = vld [vmem:[%s9232_s23 + $0x1b88] sm:$0xff]  ;;  %v8871_v57 = vcombine.low %v1115_v44, %v1119_v45 }
 0x19b   : > { %6734 = vmatprep.subr.bf16.mxu0 %v8782_v41  ;;  %7062 = vmatprep.subr.bf16.mxu1 %v8784_v2  ;;  %v1082_v41 = vld [vmem:[%s9232_s23 + $0x1a40] sm:$0xff]  ;;  %v1127_v55 = vld [vmem:[%s9232_s23 + $0x1ba8] sm:$0xff] }
 0x19c   : > { %v1086_v2 = vld [vmem:[%s9232_s23 + $0x1a60] sm:$0xff] }
 0x19d   : > { %v8837_v15 = vcombine.low %v1082_v41, %v1086_v2 }
 0x19e   : > { %6735 = vmatpush1.bf16.msra.mxu0 %v8781_v8  ;;  %7063 = vmatpush1.bf16.msra.mxu1 %v8783_v9  ;;  %v8838_v8 = vcombine.high %v1082_v41, %v1086_v2  ;;  %v8840_v9 = vcombine.high %v1083_v4, %v1087_v5  ;;  %v1131_v41 = vld [vmem:[%s9232_s23 + $0x1bc8] sm:$0xff]  ;;  %v8879_v5 = vcombine.low %v1123_v54, %v1127_v55 }
 0x19f   : > { %6736 = vmatprep.subr.bf16.mxu0 %v8790_v10  ;;  %7064 = vmatprep.subr.bf16.mxu1 %v8792_v11  ;;  %v1090_v10 = vld [vmem:[%s9232_s23 + $0x1a80] sm:$0xff]  ;;  %v1135_v2 = vld [vmem:[%s9232_s23 + $0x1be8] sm:$0xff] }
 0x1a0   : > { %v1094_v11 = vld [vmem:[%s9232_s23 + $0x1aa0] sm:$0xff] }
 0x1a1   : > { %v8845_v59 = vcombine.low %v1090_v10, %v1094_v11 }
 0x1a2   : > { %6737 = vmatpush1.bf16.msra.mxu0 %v8789_v19  ;;  %7065 = vmatpush1.bf16.msra.mxu1 %v8791_v20  ;;  %v8846_v19 = vcombine.high %v1090_v10, %v1094_v11  ;;  %v8848_v20 = vcombine.high %v1091_v12, %v1095_v13  ;;  %v1139_v10 = vld [vmem:[%s9232_s23 + $0x1c08] sm:$0xff]  ;;  %v8887_v13 = vcombine.low %v1131_v41, %v1135_v2 }
 0x1a3   : > { %6738 = vmatprep.subr.bf16.mxu0 %v8798_v0  ;;  %7066 = vmatprep.subr.bf16.mxu1 %v8800_v22  ;;  %v1098_v0 = vld [vmem:[%s9232_s23 + $0x1ac0] sm:$0xff]  ;;  %v1143_v11 = vld [vmem:[%s9232_s23 + $0x1c28] sm:$0xff] }
 0x1a4   : > { %v1102_v22 = vld [vmem:[%s9232_s23 + $0x1ae0] sm:$0xff] }
 0x1a5   : > { %v8853_v36 = vcombine.low %v1098_v0, %v1102_v22 }
 0x1a6   : > { %6739 = vmatpush1.bf16.msra.mxu0 %v8797_v30  ;;  %7067 = vmatpush1.bf16.msra.mxu1 %v8799_v31  ;;  %v8854_v30 = vcombine.high %v1098_v0, %v1102_v22  ;;  %v8856_v31 = vcombine.high %v1099_v25, %v1103_v26  ;;  %v9792_v0 = vcombine.low %v9718_v51, %v9718_v51  ;;  %v1147_v22 = vld [vmem:[%s9232_s23 + $0x1c48] sm:$0xff]  ;;  %v9799_v26 = vld [vmem:[%s10494_s0 + $0x38] sm:$0xff]  ;;  %v1154_v51 = vld [vmem:[%s9232_s23 + $0x1c80] sm:$0xff] }
 0x1a7   : > { %6740 = vmatprep.subr.bf16.mxu0 %v8806_v17  ;;  %7068 = vmatprep.subr.bf16.mxu1 %v8808_v32  ;;  %v1106_v17 = vld [vmem:[%s9232_s23 + $0x1b00] sm:$0xff]  ;;  %v1151_v25 = vld [vmem:[%s9232_s23 + $0x1c68] sm:$0xff] }
 0x1a8   : > { %v1110_v32 = vld [vmem:[%s9232_s23 + $0x1b20] sm:$0xff] }
 0x1a9   : > { %v8861_v27 = vcombine.low %v1106_v17, %v1110_v32 }
 0x1aa   : > { %6741 = vmatpush1.bf16.msra.mxu0 %v8805_v39  ;;  %7069 = vmatpush1.bf16.msra.mxu1 %v8807_v40  ;;  %v8862_v39 = vcombine.high %v1106_v17, %v1110_v32  ;;  %v8864_v40 = vcombine.high %v1107_v34, %v1111_v35  ;;  %v1158_v17 = vld [vmem:[%s9232_s23 + $0x1ca0] sm:$0xff]  ;;  %v9805_v32 = vcombine.high %v9799_v26, %v9799_v26  ;;  %v1155_v34 = vld [vmem:[%s9232_s23 + $0x1c88] sm:$0xff] }
 0x1ab   : > { %6742 = vmatprep.subr.bf16.mxu0 %v8814_v42  ;;  %7070 = vmatprep.subr.bf16.mxu1 %v8816_v43  ;;  %v1114_v42 = vld [vmem:[%s9232_s23 + $0x1b40] sm:$0xff]  ;;  %v1159_v35 = vld [vmem:[%s9232_s23 + $0x1ca8] sm:$0xff] }
 0x1ac   : > { %v1118_v43 = vld [vmem:[%s9232_s23 + $0x1b60] sm:$0xff] }
 0x1ad   : > { %v8869_v21 = vcombine.low %v1114_v42, %v1118_v43 }
 0x1ae   : > { %6743 = vmatpush1.bf16.msra.mxu0 %v8813_v49  ;;  %7071 = vmatpush1.bf16.msra.mxu1 %v8815_v50  ;;  %v8870_v49 = vcombine.high %v1114_v42, %v1118_v43  ;;  %v8872_v50 = vcombine.high %v1115_v44, %v1119_v45  ;;  %v1162_v42 = vld [vmem:[%s9232_s23 + $0x1cc0] sm:$0xff]  ;;  %v1163_v44 = vld [vmem:[%s9232_s23 + $0x1cc8] sm:$0xff] }
 0x1af   : > { %6744 = vmatprep.subr.bf16.mxu0 %v8822_v52  ;;  %7072 = vmatprep.subr.bf16.mxu1 %v8824_v53  ;;  %v1122_v52 = vld [vmem:[%s9232_s23 + $0x1b80] sm:$0xff]  ;;  %v1167_v45 = vld [vmem:[%s9232_s23 + $0x1ce8] sm:$0xff] }
 0x1b0   : > { %v1126_v53 = vld [vmem:[%s9232_s23 + $0x1ba0] sm:$0xff] }
 0x1b1   : > { %v8877_v4 = vcombine.low %v1122_v52, %v1126_v53  ;;  %v1166_v43 = vld [vmem:[%s9232_s23 + $0x1ce0] sm:$0xff] }
 0x1b2   : > { %6745 = vmatpush1.bf16.msra.mxu0 %v8821_v60  ;;  %7073 = vmatpush1.bf16.msra.mxu1 %v8823_v61  ;;  %v8878_v60 = vcombine.high %v1122_v52, %v1126_v53  ;;  %v8880_v61 = vcombine.high %v1123_v54, %v1127_v55  ;;  %v1170_v52 = vld [vmem:[%s9232_s23 + $0x1d00] sm:$0xff]  ;;  %v1171_v54 = vld [vmem:[%s9232_s23 + $0x1d08] sm:$0xff] }
 0x1b3   : > { %6746 = vmatprep.subr.bf16.mxu0 %v8830_v62  ;;  %7074 = vmatprep.subr.bf16.mxu1 %v8832_v63  ;;  %v1130_v62 = vld [vmem:[%s9232_s23 + $0x1bc0] sm:$0xff]  ;;  %v1175_v55 = vld [vmem:[%s9232_s23 + $0x1d28] sm:$0xff] }
 0x1b4   : > { %v1134_v63 = vld [vmem:[%s9232_s23 + $0x1be0] sm:$0xff] }
 0x1b5   : > { %v8885_v12 = vcombine.low %v1130_v62, %v1134_v63  ;;  %v1174_v53 = vld [vmem:[%s9232_s23 + $0x1d20] sm:$0xff] }
 0x1b6   : > { %6747 = vmatpush1.bf16.msra.mxu0 %v8829_v6  ;;  %7075 = vmatpush1.bf16.msra.mxu1 %v8831_v7  ;;  %v8886_v6 = vcombine.high %v1130_v62, %v1134_v63  ;;  %v8888_v7 = vcombine.high %v1131_v41, %v1135_v2  ;;  %v1178_v62 = vld [vmem:[%s9232_s23 + $0x1d40] sm:$0xff]  ;;  %v1179_v41 = vld [vmem:[%s9232_s23 + $0x1d48] sm:$0xff] }
 0x1b7   : > { %6748 = vmatprep.subr.bf16.mxu0 %v8838_v8  ;;  %7076 = vmatprep.subr.bf16.mxu1 %v8840_v9  ;;  %v1138_v8 = vld [vmem:[%s9232_s23 + $0x1c00] sm:$0xff]  ;;  %v1183_v2 = vld [vmem:[%s9232_s23 + $0x1d68] sm:$0xff] }
 0x1b8   : > { %v1142_v9 = vld [vmem:[%s9232_s23 + $0x1c20] sm:$0xff] }
 0x1b9   : > { %v1182_v63 = vld [vmem:[%s9232_s23 + $0x1d60] sm:$0xff] }
 0x1ba   : > { %6749 = vmatpush1.bf16.msra.mxu0 %v8837_v15  ;;  %7077 = vmatpush1.bf16.msra.mxu1 %v8839_v16  ;;  %v8894_v15 = vcombine.high %v1138_v8, %v1142_v9  ;;  %v8896_v16 = vcombine.high %v1139_v10, %v1143_v11 }
 0x1bb   : > { %6750 = vmatprep.subr.bf16.mxu0 %v8846_v19  ;;  %7078 = vmatprep.subr.bf16.mxu1 %v8848_v20  ;;  %v1146_v19 = vld [vmem:[%s9232_s23 + $0x1c40] sm:$0xff] }
 0x1bc   : > { %v1150_v20 = vld [vmem:[%s9232_s23 + $0x1c60] sm:$0xff] }
 0x1be   : > { %6751 = vmatpush1.bf16.msra.mxu0 %v8845_v59  ;;  %7079 = vmatpush1.bf16.msra.mxu1 %v8847_v28  ;;  %v8893_v59 = vcombine.low %v1138_v8, %v1142_v9  ;;  %v8895_v28 = vcombine.low %v1139_v10, %v1143_v11  ;;  %v1186_v8 = vld [vmem:[%s9232_s23 + $0x1d80] sm:$0xff]  ;;  %v1187_v10 = vld [vmem:[%s9232_s23 + $0x1d88] sm:$0xff] }
 0x1bf   : > { %6752 = vmatprep.subr.bf16.mxu0 %v8854_v30  ;;  %7080 = vmatprep.subr.bf16.mxu1 %v8856_v31  ;;  %v8902_v30 = vcombine.high %v1146_v19, %v1150_v20  ;;  %v8904_v31 = vcombine.high %v1147_v22, %v1151_v25  ;;  %v1190_v9 = vld [vmem:[%s9232_s23 + $0x1da0] sm:$0xff]  ;;  %v1191_v11 = vld [vmem:[%s9232_s23 + $0x1da8] sm:$0xff] }
 0x1c2   : > { %6753 = vmatpush1.bf16.msra.mxu0 %v8853_v36  ;;  %7081 = vmatpush1.bf16.msra.mxu1 %v8855_v37  ;;  %v8901_v36 = vcombine.low %v1146_v19, %v1150_v20  ;;  %v8903_v37 = vcombine.low %v1147_v22, %v1151_v25  ;;  %v1194_v19 = vld [vmem:[%s9232_s23 + $0x1dc0] sm:$0xff]  ;;  %v1195_v22 = vld [vmem:[%s9232_s23 + $0x1dc8] sm:$0xff] }
 0x1c3   : > { %6754 = vmatprep.subr.bf16.mxu0 %v8862_v39  ;;  %7082 = vmatprep.subr.bf16.mxu1 %v8864_v40  ;;  %v8910_v39 = vcombine.high %v1154_v51, %v1158_v17  ;;  %v8912_v40 = vcombine.high %v1155_v34, %v1159_v35  ;;  %v1198_v20 = vld [vmem:[%s9232_s23 + $0x1de0] sm:$0xff]  ;;  %v1199_v25 = vld [vmem:[%s9232_s23 + $0x1de8] sm:$0xff] }
 0x1c6   : > { %6755 = vmatpush1.bf16.msra.mxu0 %v8861_v27  ;;  %7083 = vmatpush1.bf16.msra.mxu1 %v8863_v46  ;;  %v8909_v27 = vcombine.low %v1154_v51, %v1158_v17  ;;  %v8911_v46 = vcombine.low %v1155_v34, %v1159_v35  ;;  %v1202_v51 = vld [vmem:[%s9232_s23 + $0x1e00] sm:$0xff]  ;;  %v1203_v34 = vld [vmem:[%s9232_s23 + $0x1e08] sm:$0xff] }
 0x1c7   : > { %6756 = vmatprep.subr.bf16.mxu0 %v8870_v49  ;;  %7084 = vmatprep.subr.bf16.mxu1 %v8872_v50  ;;  %v8918_v49 = vcombine.high %v1162_v42, %v1166_v43  ;;  %v8920_v50 = vcombine.high %v1163_v44, %v1167_v45  ;;  %v1206_v17 = vld [vmem:[%s9232_s23 + $0x1e20] sm:$0xff]  ;;  %v1207_v35 = vld [vmem:[%s9232_s23 + $0x1e28] sm:$0xff] }
 0x1ca   : > { %6757 = vmatpush1.bf16.msra.mxu0 %v8869_v21  ;;  %7085 = vmatpush1.bf16.msra.mxu1 %v8871_v57  ;;  %v8917_v21 = vcombine.low %v1162_v42, %v1166_v43  ;;  %v8919_v57 = vcombine.low %v1163_v44, %v1167_v45  ;;  %v1210_v42 = vld [vmem:[%s9232_s23 + $0x1e40] sm:$0xff]  ;;  %v1211_v44 = vld [vmem:[%s9232_s23 + $0x1e48] sm:$0xff] }
 0x1cb   : > { %6758 = vmatprep.subr.bf16.mxu0 %v8878_v60  ;;  %7086 = vmatprep.subr.bf16.mxu1 %v8880_v61  ;;  %v8926_v60 = vcombine.high %v1170_v52, %v1174_v53  ;;  %v8928_v61 = vcombine.high %v1171_v54, %v1175_v55  ;;  %v1214_v43 = vld [vmem:[%s9232_s23 + $0x1e60] sm:$0xff]  ;;  %v1215_v45 = vld [vmem:[%s9232_s23 + $0x1e68] sm:$0xff] }
 0x1ce   : > { %6759 = vmatpush1.bf16.msra.mxu0 %v8877_v4  ;;  %7087 = vmatpush1.bf16.msra.mxu1 %v8879_v5  ;;  %v8925_v4 = vcombine.low %v1170_v52, %v1174_v53  ;;  %v8927_v5 = vcombine.low %v1171_v54, %v1175_v55  ;;  %v1218_v52 = vld [vmem:[%s9232_s23 + $0x1e80] sm:$0xff]  ;;  %v1219_v54 = vld [vmem:[%s9232_s23 + $0x1e88] sm:$0xff] }
 0x1cf   : > { %6760 = vmatprep.subr.bf16.mxu0 %v8886_v6  ;;  %7088 = vmatprep.subr.bf16.mxu1 %v8888_v7  ;;  %v8934_v6 = vcombine.high %v1178_v62, %v1182_v63  ;;  %v8936_v7 = vcombine.high %v1179_v41, %v1183_v2  ;;  %v1222_v53 = vld [vmem:[%s9232_s23 + $0x1ea0] sm:$0xff]  ;;  %v1223_v55 = vld [vmem:[%s9232_s23 + $0x1ea8] sm:$0xff] }
 0x1d2   : > { %6761 = vmatpush1.bf16.msra.mxu0 %v8885_v12  ;;  %7089 = vmatpush1.bf16.msra.mxu1 %v8887_v13  ;;  %v8933_v12 = vcombine.low %v1178_v62, %v1182_v63  ;;  %v8935_v13 = vcombine.low %v1179_v41, %v1183_v2  ;;  %v1226_v62 = vld [vmem:[%s9232_s23 + $0x1ec0] sm:$0xff]  ;;  %v1227_v41 = vld [vmem:[%s9232_s23 + $0x1ec8] sm:$0xff] }
 0x1d3   : > { %6771 = vmatprep.subr.bf16.mxu0 %v8894_v15  ;;  %7099 = vmatprep.subr.bf16.mxu1 %v8896_v16  ;;  %v8942_v15 = vcombine.high %v1186_v8, %v1190_v9  ;;  %v8944_v16 = vcombine.high %v1187_v10, %v1191_v11  ;;  %v1230_v63 = vld [vmem:[%s9232_s23 + $0x1ee0] sm:$0xff]  ;;  %v1231_v2 = vld [vmem:[%s9232_s23 + $0x1ee8] sm:$0xff] }
 0x1d5   : > { %6763 = vmatmul.mubr.bf16.vlgmr.msra.gmra.mrb[0].mxu0 %v9792_v0  ;;  %7091 = vmatmul.mubr.bf16.vlgmr.msra.gmra.mrb[0].mxu1 %v9792_v0 }
 0x1d6   : > { %6772 = vmatpush1.bf16.msra.mxu0 %v8893_v59  ;;  %7100 = vmatpush1.bf16.msra.mxu1 %v8895_v28  ;;  %v8941_v59 = vcombine.low %v1186_v8, %v1190_v9  ;;  %v8943_v28 = vcombine.low %v1187_v10, %v1191_v11  ;;  %v1234_v8 = vld [vmem:[%s9232_s23 + $0x1f00] sm:$0xff]  ;;  %v1235_v10 = vld [vmem:[%s9232_s23 + $0x1f08] sm:$0xff] }
 0x1d7   : > { %6773 = vmatprep.subr.bf16.mxu0 %v8902_v30  ;;  %7101 = vmatprep.subr.bf16.mxu1 %v8904_v31  ;;  %v8950_v30 = vcombine.high %v1194_v19, %v1198_v20  ;;  %v8952_v31 = vcombine.high %v1195_v22, %v1199_v25  ;;  %v1238_v9 = vld [vmem:[%s9232_s23 + $0x1f20] sm:$0xff]  ;;  %v1239_v11 = vld [vmem:[%s9232_s23 + $0x1f28] sm:$0xff] }
 0x1d8   : > { %6803 = vmatprep.mubr.bf16.mxu0 %v9805_v32  ;;  %7131 = vmatprep.mubr.bf16.mxu1 %v9805_v32 }
 0x1da   : > { %6774 = vmatpush1.bf16.msra.mxu0 %v8901_v36  ;;  %7102 = vmatpush1.bf16.msra.mxu1 %v8903_v37  ;;  %v8949_v36 = vcombine.low %v1194_v19, %v1198_v20  ;;  %v8951_v37 = vcombine.low %v1195_v22, %v1199_v25  ;;  %v1242_v19 = vld [vmem:[%s9232_s23 + $0x1f40] sm:$0xff]  ;;  %v1243_v22 = vld [vmem:[%s9232_s23 + $0x1f48] sm:$0xff] }
 0x1db   : > { %6775 = vmatprep.subr.bf16.mxu0 %v8910_v39  ;;  %7103 = vmatprep.subr.bf16.mxu1 %v8912_v40  ;;  %v8958_v39 = vcombine.high %v1202_v51, %v1206_v17  ;;  %v8960_v40 = vcombine.high %v1203_v34, %v1207_v35  ;;  %v1246_v20 = vld [vmem:[%s9232_s23 + $0x1f60] sm:$0xff]  ;;  %v1247_v25 = vld [vmem:[%s9232_s23 + $0x1f68] sm:$0xff] }
 0x1de   : > { %6776 = vmatpush1.bf16.msra.mxu0 %v8909_v27  ;;  %7104 = vmatpush1.bf16.msra.mxu1 %v8911_v46  ;;  %v8957_v27 = vcombine.low %v1202_v51, %v1206_v17  ;;  %v8959_v46 = vcombine.low %v1203_v34, %v1207_v35  ;;  %v1250_v51 = vld [vmem:[%s9232_s23 + $0x1f80] sm:$0xff]  ;;  %v1251_v34 = vld [vmem:[%s9232_s23 + $0x1f88] sm:$0xff] }
 0x1df   : > { %6777 = vmatprep.subr.bf16.mxu0 %v8918_v49  ;;  %7105 = vmatprep.subr.bf16.mxu1 %v8920_v50  ;;  %v8966_v49 = vcombine.high %v1210_v42, %v1214_v43  ;;  %v8968_v50 = vcombine.high %v1211_v44, %v1215_v45  ;;  %v1254_v17 = vld [vmem:[%s9232_s23 + $0x1fa0] sm:$0xff]  ;;  %v1255_v35 = vld [vmem:[%s9232_s23 + $0x1fa8] sm:$0xff] }
 0x1e2   : > { %6778 = vmatpush1.bf16.msra.mxu0 %v8917_v21  ;;  %7106 = vmatpush1.bf16.msra.mxu1 %v8919_v57  ;;  %v8965_v21 = vcombine.low %v1210_v42, %v1214_v43  ;;  %v8967_v57 = vcombine.low %v1211_v44, %v1215_v45  ;;  %v1258_v42 = vld [vmem:[%s9232_s23 + $0x1fc0] sm:$0xff]  ;;  %v1259_v44 = vld [vmem:[%s9232_s23 + $0x1fc8] sm:$0xff] }
 0x1e3   : > { %6779 = vmatprep.subr.bf16.mxu0 %v8926_v60  ;;  %7107 = vmatprep.subr.bf16.mxu1 %v8928_v61  ;;  %v8974_v60 = vcombine.high %v1218_v52, %v1222_v53  ;;  %v8976_v61 = vcombine.high %v1219_v54, %v1223_v55  ;;  %v1262_v43 = vld [vmem:[%s9232_s23 + $0x1fe0] sm:$0xff]  ;;  %v1263_v45 = vld [vmem:[%s9232_s23 + $0x1fe8] sm:$0xff] }
 0x1e6   : > { %6780 = vmatpush1.bf16.msra.mxu0 %v8925_v4  ;;  %7108 = vmatpush1.bf16.msra.mxu1 %v8927_v5  ;;  %v8973_v4 = vcombine.low %v1218_v52, %v1222_v53  ;;  %v8975_v5 = vcombine.low %v1219_v54, %v1223_v55  ;;  %v244_v52 = vld [vmem:[%s9232_s23 + $0x10] sm:$0xff]  ;;  %v245_v54 = vld [vmem:[%s9232_s23 + $0x18] sm:$0xff] }
 0x1e7   : > { %6781 = vmatprep.subr.bf16.mxu0 %v8934_v6  ;;  %7109 = vmatprep.subr.bf16.mxu1 %v8936_v7  ;;  %v8982_v6 = vcombine.high %v1226_v62, %v1230_v63  ;;  %v8984_v7 = vcombine.high %v1227_v41, %v1231_v2  ;;  %v248_v53 = vld [vmem:[%s9232_s23 + $0x30] sm:$0xff]  ;;  %v249_v55 = vld [vmem:[%s9232_s23 + $0x38] sm:$0xff] }
 0x1ea   : > { %6782 = vmatpush1.bf16.msra.mxu0 %v8933_v12  ;;  %7110 = vmatpush1.bf16.msra.mxu1 %v8935_v13  ;;  %v8981_v12 = vcombine.low %v1226_v62, %v1230_v63  ;;  %v8983_v13 = vcombine.low %v1227_v41, %v1231_v2  ;;  %v252_v62 = vld [vmem:[%s9232_s23 + $0x50] sm:$0xff]  ;;  %v9873_v41 = vcombine.low %v9799_v26, %v9799_v26  ;;  %v253_v2 = vld [vmem:[%s9232_s23 + $0x58] sm:$0xff] }
 0x1eb   : > { %6783 = vmatprep.subr.bf16.mxu0 %v8942_v15  ;;  %7111 = vmatprep.subr.bf16.mxu1 %v8944_v16  ;;  %v8990_v15 = vcombine.high %v1234_v8, %v1238_v9  ;;  %v8992_v16 = vcombine.high %v1235_v10, %v1239_v11  ;;  %v256_v63 = vld [vmem:[%s9232_s23 + $0x70] sm:$0xff]  ;;  %v261_v26 = vld [vmem:[%s9232_s23 + $0x98] sm:$0xff] }
 0x1ee   : > { %6784 = vmatpush1.bf16.msra.mxu0 %v8941_v59  ;;  %7112 = vmatpush1.bf16.msra.mxu1 %v8943_v28  ;;  %v8989_v59 = vcombine.low %v1234_v8, %v1238_v9  ;;  %v8991_v28 = vcombine.low %v1235_v10, %v1239_v11  ;;  %v260_v9 = vld [vmem:[%s9232_s23 + $0x90] sm:$0xff]  ;;  %v265_v11 = vld [vmem:[%s9232_s23 + $0xb8] sm:$0xff] }
 0x1ef   : > { %6785 = vmatprep.subr.bf16.mxu0 %v8950_v30  ;;  %7113 = vmatprep.subr.bf16.mxu1 %v8952_v31  ;;  %v8998_v30 = vcombine.high %v1242_v19, %v1246_v20  ;;  %v9000_v31 = vcombine.high %v1243_v22, %v1247_v25  ;;  %v264_v10 = vld [vmem:[%s9232_s23 + $0xb0] sm:$0xff] }
 0x1f2   : > { %6786 = vmatpush1.bf16.msra.mxu0 %v8949_v36  ;;  %7114 = vmatpush1.bf16.msra.mxu1 %v8951_v37  ;;  %v8997_v36 = vcombine.low %v1242_v19, %v1246_v20  ;;  %v8999_v37 = vcombine.low %v1243_v22, %v1247_v25  ;;  %v268_v19 = vld [vmem:[%s9232_s23 + $0xd0] sm:$0xff]  ;;  %v269_v22 = vld [vmem:[%s9232_s23 + $0xd8] sm:$0xff] }
 0x1f3   : > { %6787 = vmatprep.subr.bf16.mxu0 %v8958_v39  ;;  %7115 = vmatprep.subr.bf16.mxu1 %v8960_v40  ;;  %v9006_v39 = vcombine.high %v1250_v51, %v1254_v17  ;;  %v9008_v40 = vcombine.high %v1251_v34, %v1255_v35  ;;  %v272_v20 = vld [vmem:[%s9232_s23 + $0xf0] sm:$0xff]  ;;  %v273_v25 = vld [vmem:[%s9232_s23 + $0xf8] sm:$0xff] }
 0x1f6   : > { %6788 = vmatpush1.bf16.msra.mxu0 %v8957_v27  ;;  %7116 = vmatpush1.bf16.msra.mxu1 %v8959_v46  ;;  %v9005_v27 = vcombine.low %v1250_v51, %v1254_v17  ;;  %v9007_v46 = vcombine.low %v1251_v34, %v1255_v35  ;;  %v276_v51 = vld [vmem:[%s9232_s23 + $0x110] sm:$0xff]  ;;  %v277_v34 = vld [vmem:[%s9232_s23 + $0x118] sm:$0xff] }
 0x1f7   : > { %6789 = vmatprep.subr.bf16.mxu0 %v8966_v49  ;;  %7117 = vmatprep.subr.bf16.mxu1 %v8968_v50  ;;  %v9014_v49 = vcombine.high %v1258_v42, %v1262_v43  ;;  %v9016_v50 = vcombine.high %v1259_v44, %v1263_v45  ;;  %v280_v17 = vld [vmem:[%s9232_s23 + $0x130] sm:$0xff]  ;;  %v281_v35 = vld [vmem:[%s9232_s23 + $0x138] sm:$0xff] }
 0x1fa   : > { %6790 = vmatpush1.bf16.msra.mxu0 %v8965_v21  ;;  %7118 = vmatpush1.bf16.msra.mxu1 %v8967_v57  ;;  %v9013_v21 = vcombine.low %v1258_v42, %v1262_v43  ;;  %v9015_v57 = vcombine.low %v1259_v44, %v1263_v45  ;;  %v288_v42 = vld [vmem:[%s9232_s23 + $0x170] sm:$0xff]  ;;  %v285_v43 = vld [vmem:[%s9232_s23 + $0x158] sm:$0xff]  ;;  %v8033_v45 = vcombine.low %v276_v51, %v280_v17 }
 0x1fb   : > { %6791 = vmatprep.subr.bf16.mxu0 %v8974_v60  ;;  %7119 = vmatprep.subr.bf16.mxu1 %v8976_v61  ;;  %v8002_v60 = vcombine.high %v244_v52, %v248_v53  ;;  %v8004_v61 = vcombine.high %v245_v54, %v249_v55  ;;  %v289_v44 = vld [vmem:[%s9232_s23 + $0x178] sm:$0xff] }
 0x1fe   : > { %6792 = vmatpush1.bf16.msra.mxu0 %v8973_v4  ;;  %7120 = vmatpush1.bf16.msra.mxu1 %v8975_v5  ;;  %v257_v4 = vld [vmem:[%s9232_s23 + $0x78] sm:$0xff]  ;;  %v8001_v5 = vcombine.low %v244_v52, %v248_v53  ;;  %v296_v52 = vld [vmem:[%s9232_s23 + $0x1b0] sm:$0xff] }
 0x1ff   : > { %6793 = vmatprep.subr.bf16.mxu0 %v8982_v6  ;;  %7121 = vmatprep.subr.bf16.mxu1 %v8984_v7  ;;  %v8003_v6 = vcombine.low %v245_v54, %v249_v55  ;;  %v8010_v7 = vcombine.high %v252_v62, %v256_v63  ;;  %v8012_v8 = vcombine.high %v253_v2, %v257_v4  ;;  %v293_v53 = vld [vmem:[%s9232_s23 + $0x198] sm:$0xff] }
 0x200   : > { %v297_v54 = vld [vmem:[%s9232_s23 + $0x1b8] sm:$0xff] }
 0x202   : > { %6794 = vmatpush1.bf16.msra.mxu0 %v8981_v12  ;;  %7122 = vmatpush1.bf16.msra.mxu1 %v8983_v13  ;;  %v8009_v12 = vcombine.low %v252_v62, %v256_v63  ;;  %v8011_v13 = vcombine.low %v253_v2, %v257_v4  ;;  %v304_v62 = vld [vmem:[%s9232_s23 + $0x1f0] sm:$0xff]  ;;  %v301_v63 = vld [vmem:[%s9232_s23 + $0x1d8] sm:$0xff] }
 0x203   : > { %6795 = vmatprep.subr.bf16.mxu0 %v8990_v15  ;;  %7123 = vmatprep.subr.bf16.mxu1 %v8992_v16  ;;  %v8018_v15 = vcombine.high %v260_v9, %v264_v10  ;;  %v8020_v16 = vcombine.high %v261_v26, %v265_v11  ;;  %v305_v2 = vld [vmem:[%s9232_s23 + $0x1f8] sm:$0xff] }
 0x206   : > { %6796 = vmatpush1.bf16.msra.mxu0 %v8989_v59  ;;  %7124 = vmatpush1.bf16.msra.mxu1 %v8991_v28  ;;  %v8017_v59 = vcombine.low %v260_v9, %v264_v10  ;;  %v8019_v28 = vcombine.low %v261_v26, %v265_v11  ;;  %v312_v9 = vld [vmem:[%s9232_s23 + $0x230] sm:$0xff]  ;;  %v309_v10 = vld [vmem:[%s9232_s23 + $0x218] sm:$0xff] }
 0x207   : > { %6797 = vmatprep.subr.bf16.mxu0 %v8998_v30  ;;  %7125 = vmatprep.subr.bf16.mxu1 %v9000_v31  ;;  %v8026_v30 = vcombine.high %v268_v19, %v272_v20  ;;  %v8028_v31 = vcombine.high %v269_v22, %v273_v25  ;;  %v313_v26 = vld [vmem:[%s9232_s23 + $0x238] sm:$0xff] }
 0x20a   : > { %6798 = vmatpush1.bf16.msra.mxu0 %v8997_v36  ;;  %7126 = vmatpush1.bf16.msra.mxu1 %v8999_v37  ;;  %v8025_v36 = vcombine.low %v268_v19, %v272_v20  ;;  %v8034_v37 = vcombine.high %v276_v51, %v280_v17  ;;  %v320_v19 = vld [vmem:[%s9232_s23 + $0x270] sm:$0xff]  ;;  %v317_v20 = vld [vmem:[%s9232_s23 + $0x258] sm:$0xff] }
 0x20b   : > { %6799 = vmatprep.subr.bf16.mxu0 %v9006_v39  ;;  %7127 = vmatprep.subr.bf16.mxu1 %v9008_v40  ;;  %v8036_v39 = vcombine.high %v277_v34, %v281_v35  ;;  %v284_v40 = vld [vmem:[%s9232_s23 + $0x150] sm:$0xff]  ;;  %v325_v17 = vld [vmem:[%s9232_s23 + $0x298] sm:$0xff] }
 0x20c   : > { %v8041_v55 = vcombine.low %v284_v40, %v288_v42  ;;  %v328_v51 = vld [vmem:[%s9232_s23 + $0x2b0] sm:$0xff] }
 0x20e   : > { %6800 = vmatpush1.bf16.msra.mxu0 %v9005_v27  ;;  %7128 = vmatpush1.bf16.msra.mxu1 %v9007_v46  ;;  %v8035_v27 = vcombine.low %v277_v34, %v281_v35  ;;  %v8042_v46 = vcombine.high %v284_v40, %v288_v42  ;;  %v329_v34 = vld [vmem:[%s9232_s23 + $0x2b8] sm:$0xff]  ;;  %v336_v40 = vld [vmem:[%s9232_s23 + $0x2f0] sm:$0xff] }
 0x20f   : > { %6801 = vmatprep.subr.bf16.mxu0 %v9014_v49  ;;  %7129 = vmatprep.subr.bf16.mxu1 %v9016_v50  ;;  %v8044_v49 = vcombine.high %v285_v43, %v289_v44  ;;  %v292_v50 = vld [vmem:[%s9232_s23 + $0x190] sm:$0xff]  ;;  %v333_v42 = vld [vmem:[%s9232_s23 + $0x2d8] sm:$0xff] }
 0x210   : > { %v8049_v4 = vcombine.low %v292_v50, %v296_v52 }
 0x212   : > { %6802 = vmatpush1.bf16.msra.mxu0 %v9013_v21  ;;  %7130 = vmatpush1.bf16.msra.mxu1 %v9015_v57  ;;  %v8043_v21 = vcombine.low %v285_v43, %v289_v44  ;;  %v8050_v57 = vcombine.high %v292_v50, %v296_v52  ;;  %v337_v43 = vld [vmem:[%s9232_s23 + $0x2f8] sm:$0xff]  ;;  %v344_v50 = vld [vmem:[%s9232_s23 + $0x330] sm:$0xff] }
 0x213   : > { %7140 = vmatprep.subr.bf16.mxu0 %v8002_v60  ;;  %7468 = vmatprep.subr.bf16.mxu1 %v8004_v61  ;;  %v8052_v60 = vcombine.high %v293_v53, %v297_v54  ;;  %v300_v61 = vld [vmem:[%s9232_s23 + $0x1d0] sm:$0xff]  ;;  %v341_v52 = vld [vmem:[%s9232_s23 + $0x318] sm:$0xff] }
 0x214   : > { %v8057_v11 = vcombine.low %v300_v61, %v304_v62 }
 0x215   : > { %6804 = vmatmul.mubr.bf16.vlgmr.msra.gmra.mrb[0].mxu0 %v9873_v41  ;;  %7132 = vmatmul.mubr.bf16.vlgmr.msra.gmra.mrb[0].mxu1 %v9873_v41 }
 0x216   : > { %7141 = vmatpush1.bf16.msra.mxu0 %v8001_v5  ;;  %7469 = vmatpush1.bf16.msra.mxu1 %v8003_v6  ;;  %v8051_v5 = vcombine.low %v293_v53, %v297_v54  ;;  %v8058_v6 = vcombine.high %v300_v61, %v304_v62  ;;  %v345_v53 = vld [vmem:[%s9232_s23 + $0x338] sm:$0xff]  ;;  %v352_v61 = vld [vmem:[%s9232_s23 + $0x370] sm:$0xff] }
 0x217   : > { %7142 = vmatprep.subr.bf16.mxu0 %v8010_v7  ;;  %7470 = vmatprep.subr.bf16.mxu1 %v8012_v8  ;;  %v8060_v7 = vcombine.high %v301_v63, %v305_v2  ;;  %v308_v8 = vld [vmem:[%s9232_s23 + $0x210] sm:$0xff]  ;;  %v349_v62 = vld [vmem:[%s9232_s23 + $0x358] sm:$0xff] }
 0x218   : > { %7172 = vmatprep.mubr.bf16.mxu0 %v9221_v1  ;;  %7500 = vmatprep.mubr.bf16.mxu1 %v9221_v1  ;;  %v8027_v1 = vcombine.low %v269_v22, %v273_v25  ;;  %v321_v22 = vld [vmem:[%s9232_s23 + $0x278] sm:$0xff]  ;;  %v8065_v25 = vcombine.low %v308_v8, %v312_v9 }
 0x21a   : > { %7143 = vmatpush1.bf16.msra.mxu0 %v8009_v12  ;;  %7471 = vmatpush1.bf16.msra.mxu1 %v8011_v13  ;;  %v8059_v12 = vcombine.low %v301_v63, %v305_v2  ;;  %v8066_v13 = vcombine.high %v308_v8, %v312_v9  ;;  %v353_v63 = vld [vmem:[%s9232_s23 + $0x378] sm:$0xff]  ;;  %v360_v8 = vld [vmem:[%s9232_s23 + $0x3b0] sm:$0xff] }
 0x21b   : > { %7144 = vmatprep.subr.bf16.mxu0 %v8018_v15  ;;  %7472 = vmatprep.subr.bf16.mxu1 %v8020_v16  ;;  %v8068_v15 = vcombine.high %v309_v10, %v313_v26  ;;  %v316_v16 = vld [vmem:[%s9232_s23 + $0x250] sm:$0xff]  ;;  %v357_v9 = vld [vmem:[%s9232_s23 + $0x398] sm:$0xff] }
 0x21c   : > { %v8073_v35 = vcombine.low %v316_v16, %v320_v19 }
 0x21e   : > { %7145 = vmatpush1.bf16.msra.mxu0 %v8017_v59  ;;  %7473 = vmatpush1.bf16.msra.mxu1 %v8019_v28  ;;  %v8067_v59 = vcombine.low %v309_v10, %v313_v26  ;;  %v8074_v28 = vcombine.high %v316_v16, %v320_v19  ;;  %v361_v10 = vld [vmem:[%s9232_s23 + $0x3b8] sm:$0xff]  ;;  %v368_v16 = vld [vmem:[%s9232_s23 + $0x3f0] sm:$0xff] }
 0x21f   : > { %7146 = vmatprep.subr.bf16.mxu0 %v8026_v30  ;;  %7474 = vmatprep.subr.bf16.mxu1 %v8028_v31  ;;  %v8076_v30 = vcombine.high %v317_v20, %v321_v22  ;;  %v324_v31 = vld [vmem:[%s9232_s23 + $0x290] sm:$0xff]  ;;  %v365_v19 = vld [vmem:[%s9232_s23 + $0x3d8] sm:$0xff] }
 0x220   : > { %v8081_v44 = vcombine.low %v324_v31, %v328_v51 }
 0x222   : > { %7147 = vmatpush1.bf16.msra.mxu0 %v8025_v36  ;;  %7475 = vmatpush1.bf16.msra.mxu1 %v8027_v1  ;;  %v8075_v36 = vcombine.low %v317_v20, %v321_v22  ;;  %v8082_v1 = vcombine.high %v324_v31, %v328_v51  ;;  %v369_v20 = vld [vmem:[%s9232_s23 + $0x3f8] sm:$0xff]  ;;  %v376_v31 = vld [vmem:[%s9232_s23 + $0x430] sm:$0xff] }
 0x223   : > { %7148 = vmatprep.subr.bf16.mxu0 %v8034_v37  ;;  %7476 = vmatprep.subr.bf16.mxu1 %v8036_v39  ;;  %v8084_v37 = vcombine.high %v325_v17, %v329_v34  ;;  %v332_v39 = vld [vmem:[%s9232_s23 + $0x2d0] sm:$0xff]  ;;  %v373_v51 = vld [vmem:[%s9232_s23 + $0x418] sm:$0xff] }
 0x224   : > { %v8089_v54 = vcombine.low %v332_v39, %v336_v40 }
 0x226   : > { %7149 = vmatpush1.bf16.msra.mxu0 %v8033_v45  ;;  %7477 = vmatpush1.bf16.msra.mxu1 %v8035_v27  ;;  %v8083_v45 = vcombine.low %v325_v17, %v329_v34  ;;  %v8090_v27 = vcombine.high %v332_v39, %v336_v40  ;;  %v377_v17 = vld [vmem:[%s9232_s23 + $0x438] sm:$0xff]  ;;  %v384_v39 = vld [vmem:[%s9232_s23 + $0x470] sm:$0xff] }
 0x227   : > { %7150 = vmatprep.subr.bf16.mxu0 %v8042_v46  ;;  %7478 = vmatprep.subr.bf16.mxu1 %v8044_v49  ;;  %v8092_v46 = vcombine.high %v333_v42, %v337_v43  ;;  %v340_v49 = vld [vmem:[%s9232_s23 + $0x310] sm:$0xff]  ;;  %v381_v40 = vld [vmem:[%s9232_s23 + $0x458] sm:$0xff] }
 0x228   : > { %v8097_v2 = vcombine.low %v340_v49, %v344_v50 }
 0x22a   : > { %7151 = vmatpush1.bf16.msra.mxu0 %v8041_v55  ;;  %7479 = vmatpush1.bf16.msra.mxu1 %v8043_v21  ;;  %v8091_v55 = vcombine.low %v333_v42, %v337_v43  ;;  %v8098_v21 = vcombine.high %v340_v49, %v344_v50  ;;  %v385_v42 = vld [vmem:[%s9232_s23 + $0x478] sm:$0xff]  ;;  %v392_v49 = vld [vmem:[%s9232_s23 + $0x4b0] sm:$0xff] }
 0x22b   : > { %7152 = vmatprep.subr.bf16.mxu0 %v8050_v57  ;;  %7480 = vmatprep.subr.bf16.mxu1 %v8052_v60  ;;  %v8100_v57 = vcombine.high %v341_v52, %v345_v53  ;;  %v348_v60 = vld [vmem:[%s9232_s23 + $0x350] sm:$0xff]  ;;  %v389_v50 = vld [vmem:[%s9232_s23 + $0x498] sm:$0xff] }
 0x22c   : > { %v8105_v26 = vcombine.low %v348_v60, %v352_v61 }
 0x22e   : > { %7153 = vmatpush1.bf16.msra.mxu0 %v8049_v4  ;;  %7481 = vmatpush1.bf16.msra.mxu1 %v8051_v5  ;;  %v8099_v4 = vcombine.low %v341_v52, %v345_v53  ;;  %v8106_v5 = vcombine.high %v348_v60, %v352_v61  ;;  %v393_v52 = vld [vmem:[%s9232_s23 + $0x4b8] sm:$0xff]  ;;  %v400_v60 = vld [vmem:[%s9232_s23 + $0x4f0] sm:$0xff] }
 0x22f   : > { %7154 = vmatprep.subr.bf16.mxu0 %v8058_v6  ;;  %7482 = vmatprep.subr.bf16.mxu1 %v8060_v7  ;;  %v8108_v6 = vcombine.high %v349_v62, %v353_v63  ;;  %v356_v7 = vld [vmem:[%s9232_s23 + $0x390] sm:$0xff]  ;;  %v397_v61 = vld [vmem:[%s9232_s23 + $0x4d8] sm:$0xff] }
 0x230   : > { %v8113_v22 = vcombine.low %v356_v7, %v360_v8 }
 0x232   : > { %7155 = vmatpush1.bf16.msra.mxu0 %v8057_v11  ;;  %7483 = vmatpush1.bf16.msra.mxu1 %v8059_v12  ;;  %v8107_v11 = vcombine.low %v349_v62, %v353_v63  ;;  %v8114_v12 = vcombine.high %v356_v7, %v360_v8  ;;  %v401_v62 = vld [vmem:[%s9232_s23 + $0x4f8] sm:$0xff]  ;;  %v8147_v63 = vcombine.low %v389_v50, %v393_v52 }
 0x233   : > { %7156 = vmatprep.subr.bf16.mxu0 %v8066_v13  ;;  %7484 = vmatprep.subr.bf16.mxu1 %v8068_v15  ;;  %v8116_v13 = vcombine.high %v357_v9, %v361_v10  ;;  %v364_v15 = vld [vmem:[%s9232_s23 + $0x3d0] sm:$0xff]  ;;  %v405_v7 = vld [vmem:[%s9232_s23 + $0x518] sm:$0xff] }
 0x234   : > { %v8121_v34 = vcombine.low %v364_v15, %v368_v16  ;;  %v409_v8 = vld [vmem:[%s9232_s23 + $0x538] sm:$0xff] }
 0x236   : > { %7157 = vmatpush1.bf16.msra.mxu0 %v8065_v25  ;;  %7485 = vmatpush1.bf16.msra.mxu1 %v8067_v59  ;;  %v8115_v25 = vcombine.low %v357_v9, %v361_v10  ;;  %v8122_v59 = vcombine.high %v364_v15, %v368_v16  ;;  %v417_v15 = vld [vmem:[%s9232_s23 + $0x578] sm:$0xff] }
 0x237   : > { %7158 = vmatprep.subr.bf16.mxu0 %v8074_v28  ;;  %7486 = vmatprep.subr.bf16.mxu1 %v8076_v30  ;;  %v8124_v28 = vcombine.high %v365_v19, %v369_v20  ;;  %v372_v30 = vld [vmem:[%s9232_s23 + $0x410] sm:$0xff] }
 0x238   : > { %v8129_v43 = vcombine.low %v372_v30, %v376_v31 }
 0x23a   : > { %7159 = vmatpush1.bf16.msra.mxu0 %v8073_v35  ;;  %7487 = vmatpush1.bf16.msra.mxu1 %v8075_v36  ;;  %v8123_v35 = vcombine.low %v365_v19, %v369_v20  ;;  %v8130_v36 = vcombine.high %v372_v30, %v376_v31  ;;  %v8163_v19 = vcombine.low %v405_v7, %v409_v8  ;;  %v425_v30 = vld [vmem:[%s9232_s23 + $0x5b8] sm:$0xff] }
 0x23b   : > { %7160 = vmatprep.subr.bf16.mxu0 %v8082_v1  ;;  %7488 = vmatprep.subr.bf16.mxu1 %v8084_v37  ;;  %v8132_v1 = vcombine.high %v373_v51, %v377_v17  ;;  %v380_v37 = vld [vmem:[%s9232_s23 + $0x450] sm:$0xff] }
 0x23c   : > { %v8137_v53 = vcombine.low %v380_v37, %v384_v39 }
 0x23e   : > { %7161 = vmatpush1.bf16.msra.mxu0 %v8081_v44  ;;  %7489 = vmatpush1.bf16.msra.mxu1 %v8083_v45  ;;  %v8131_v44 = vcombine.low %v373_v51, %v377_v17  ;;  %v8138_v45 = vcombine.high %v380_v37, %v384_v39  ;;  %v433_v37 = vld [vmem:[%s9232_s23 + $0x5f8] sm:$0xff] }
 0x23f   : > { %7162 = vmatprep.subr.bf16.mxu0 %v8090_v27  ;;  %7490 = vmatprep.subr.bf16.mxu1 %v8092_v46  ;;  %v8140_v27 = vcombine.high %v381_v40, %v385_v42  ;;  %v388_v46 = vld [vmem:[%s9232_s23 + $0x490] sm:$0xff] }
 0x242   : > { %7163 = vmatpush1.bf16.msra.mxu0 %v8089_v54  ;;  %7491 = vmatpush1.bf16.msra.mxu1 %v8091_v55  ;;  %v8139_v54 = vcombine.low %v381_v40, %v385_v42  ;;  %v8146_v55 = vcombine.high %v388_v46, %v392_v49 }
 0x243   : > { %7164 = vmatprep.subr.bf16.mxu0 %v8098_v21  ;;  %7492 = vmatprep.subr.bf16.mxu1 %v8100_v57  ;;  %v8148_v21 = vcombine.high %v389_v50, %v393_v52  ;;  %v396_v57 = vld [vmem:[%s9232_s23 + $0x4d0] sm:$0xff] }
 0x244   : > { %v8153_v9 = vcombine.low %v396_v57, %v400_v60 }
 0x246   : > { %7165 = vmatpush1.bf16.msra.mxu0 %v8097_v2  ;;  %7493 = vmatpush1.bf16.msra.mxu1 %v8099_v4  ;;  %v8154_v2 = vcombine.high %v396_v57, %v400_v60  ;;  %v8156_v4 = vcombine.high %v397_v61, %v401_v62  ;;  %v449_v57 = vld [vmem:[%s9232_s23 + $0x678] sm:$0xff] }
 0x247   : > { %7166 = vmatprep.subr.bf16.mxu0 %v8106_v5  ;;  %7494 = vmatprep.subr.bf16.mxu1 %v8108_v6  ;;  %v404_v5 = vld [vmem:[%s9232_s23 + $0x510] sm:$0xff] }
 0x248   : > { %v408_v6 = vld [vmem:[%s9232_s23 + $0x530] sm:$0xff] }
 0x249   : > { %v8162_v10 = vcombine.high %v404_v5, %v408_v6  ;;  %v8161_v16 = vcombine.low %v404_v5, %v408_v6  ;;  %v457_v5 = vld [vmem:[%s9232_s23 + $0x6b8] sm:$0xff] }
 0x24a   : > { %7167 = vmatpush1.bf16.msra.mxu0 %v8105_v26  ;;  %7495 = vmatpush1.bf16.msra.mxu1 %v8107_v11  ;;  %v8164_v26 = vcombine.high %v405_v7, %v409_v8  ;;  %v412_v11 = vld [vmem:[%s9232_s23 + $0x550] sm:$0xff] }
 0x24b   : > { %7168 = vmatprep.subr.bf16.mxu0 %v8114_v12  ;;  %7496 = vmatprep.subr.bf16.mxu1 %v8116_v13  ;;  %v416_v12 = vld [vmem:[%s9232_s23 + $0x570] sm:$0xff]  ;;  %v413_v13 = vld [vmem:[%s9232_s23 + $0x558] sm:$0xff] }
 0x24c   : > { %v8170_v20 = vcombine.high %v412_v11, %v416_v12  ;;  %v8169_v31 = vcombine.low %v412_v11, %v416_v12  ;;  %v8171_v51 = vcombine.low %v413_v13, %v417_v15  ;;  %v465_v11 = vld [vmem:[%s9232_s23 + $0x6f8] sm:$0xff] }
 0x24e   : > { %7169 = vmatpush1.bf16.msra.mxu0 %v8113_v22  ;;  %7497 = vmatpush1.bf16.msra.mxu1 %v8115_v25  ;;  %v8172_v22 = vcombine.high %v413_v13, %v417_v15  ;;  %v420_v25 = vld [vmem:[%s9232_s23 + $0x590] sm:$0xff] }
 0x24f   : > { %7170 = vmatprep.subr.bf16.mxu0 %v8122_v59  ;;  %7498 = vmatprep.subr.bf16.mxu1 %v8124_v28  ;;  %v424_v59 = vld [vmem:[%s9232_s23 + $0x5b0] sm:$0xff]  ;;  %v421_v28 = vld [vmem:[%s9232_s23 + $0x598] sm:$0xff] }
 0x250   : > { %v8178_v17 = vcombine.high %v420_v25, %v424_v59  ;;  %v8177_v39 = vcombine.low %v420_v25, %v424_v59  ;;  %v8179_v40 = vcombine.low %v421_v28, %v425_v30  ;;  %v473_v25 = vld [vmem:[%s9232_s23 + $0x738] sm:$0xff] }
 0x252   : > { %7171 = vmatpush1.bf16.msra.mxu0 %v8121_v34  ;;  %7499 = vmatpush1.bf16.msra.mxu1 %v8123_v35  ;;  %v8180_v34 = vcombine.high %v421_v28, %v425_v30  ;;  %v428_v35 = vld [vmem:[%s9232_s23 + $0x5d0] sm:$0xff] }
 0x253   : > { %7181 = vmatprep.subr.bf16.mxu0 %v8130_v36  ;;  %7509 = vmatprep.subr.bf16.mxu1 %v8132_v1  ;;  %v432_v36 = vld [vmem:[%s9232_s23 + $0x5f0] sm:$0xff]  ;;  %v429_v1 = vld [vmem:[%s9232_s23 + $0x5d8] sm:$0xff] }
 0x254   : > { %v8186_v42 = vcombine.high %v428_v35, %v432_v36  ;;  %v8187_v50 = vcombine.low %v429_v1, %v433_v37 }
 0x255   : > { %7173 = vmatmul.mubr.bf16.vlgmr.msra.gmra.mrb[4].mxu0 %v9306_v14  ;;  %7501 = vmatmul.mubr.bf16.vlgmr.msra.gmra.mrb[4].mxu1 %v9306_v14  ;;  %v8145_v14 = vcombine.low %v388_v46, %v392_v49  ;;  %v441_v46 = vld [vmem:[%s9232_s23 + $0x638] sm:$0xff]  ;;  %v8185_v49 = vcombine.low %v428_v35, %v432_v36 }
 0x256   : > { %7182 = vmatpush1.bf16.msra.mxu0 %v8129_v43  ;;  %7510 = vmatpush1.bf16.msra.mxu1 %v8131_v44  ;;  %v8188_v43 = vcombine.high %v429_v1, %v433_v37  ;;  %v436_v44 = vld [vmem:[%s9232_s23 + $0x610] sm:$0xff]  ;;  %v481_v35 = vld [vmem:[%s9232_s23 + $0x778] sm:$0xff] }
 0x257   : > { %7183 = vmatprep.subr.bf16.mxu0 %v8138_v45  ;;  %7511 = vmatprep.subr.bf16.mxu1 %v8140_v27  ;;  %v440_v45 = vld [vmem:[%s9232_s23 + $0x630] sm:$0xff]  ;;  %v437_v27 = vld [vmem:[%s9232_s23 + $0x618] sm:$0xff] }
 0x258   : > { %7213 = vmatprep.mubr.bf16.mxu0 %v9319_v23  ;;  %7541 = vmatprep.mubr.bf16.mxu1 %v9319_v23  ;;  %v8155_v23 = vcombine.low %v397_v61, %v401_v62  ;;  %v8194_v52 = vcombine.high %v436_v44, %v440_v45  ;;  %v8193_v60 = vcombine.low %v436_v44, %v440_v45  ;;  %v489_v44 = vld [vmem:[%s9232_s23 + $0x7b8] sm:$0xff] }
 0x259   : > { %v8195_v61 = vcombine.low %v437_v27, %v441_v46 }
 0x25a   : > { %7184 = vmatpush1.bf16.msra.mxu0 %v8137_v53  ;;  %7512 = vmatpush1.bf16.msra.mxu1 %v8139_v54  ;;  %v8196_v53 = vcombine.high %v437_v27, %v441_v46  ;;  %v444_v54 = vld [vmem:[%s9232_s23 + $0x650] sm:$0xff] }
 0x25b   : > { %7185 = vmatprep.subr.bf16.mxu0 %v8146_v55  ;;  %7513 = vmatprep.subr.bf16.mxu1 %v8148_v21  ;;  %v448_v55 = vld [vmem:[%s9232_s23 + $0x670] sm:$0xff]  ;;  %v445_v21 = vld [vmem:[%s9232_s23 + $0x658] sm:$0xff] }
 0x25c   : > { %v8202_v62 = vcombine.high %v444_v54, %v448_v55  ;;  %v8201_v6 = vcombine.low %v444_v54, %v448_v55  ;;  %v8203_v7 = vcombine.low %v445_v21, %v449_v57  ;;  %v497_v54 = vld [vmem:[%s9232_s23 + $0x7f8] sm:$0xff] }
 0x25e   : > { %7186 = vmatpush1.bf16.msra.mxu0 %v8145_v14  ;;  %7514 = vmatpush1.bf16.msra.mxu1 %v8147_v63  ;;  %v8204_v14 = vcombine.high %v445_v21, %v449_v57  ;;  %v452_v63 = vld [vmem:[%s9232_s23 + $0x690] sm:$0xff] }
 0x25f   : > { %7187 = vmatprep.subr.bf16.mxu0 %v8154_v2  ;;  %7515 = vmatprep.subr.bf16.mxu1 %v8156_v4  ;;  %v456_v2 = vld [vmem:[%s9232_s23 + $0x6b0] sm:$0xff]  ;;  %v453_v4 = vld [vmem:[%s9232_s23 + $0x698] sm:$0xff] }
 0x260   : > { %v8210_v8 = vcombine.high %v452_v63, %v456_v2  ;;  %v8209_v12 = vcombine.low %v452_v63, %v456_v2  ;;  %v8211_v13 = vcombine.low %v453_v4, %v457_v5  ;;  %v505_v63 = vld [vmem:[%s9232_s23 + $0x838] sm:$0xff] }
 0x262   : > { %7188 = vmatpush1.bf16.msra.mxu0 %v8153_v9  ;;  %7516 = vmatpush1.bf16.msra.mxu1 %v8155_v23  ;;  %v8212_v9 = vcombine.high %v453_v4, %v457_v5  ;;  %v460_v23 = vld [vmem:[%s9232_s23 + $0x6d0] sm:$0xff] }
 0x263   : > { %7189 = vmatprep.subr.bf16.mxu0 %v8162_v10  ;;  %7517 = vmatprep.subr.bf16.mxu1 %v8164_v26  ;;  %v464_v10 = vld [vmem:[%s9232_s23 + $0x6f0] sm:$0xff]  ;;  %v461_v26 = vld [vmem:[%s9232_s23 + $0x6d8] sm:$0xff] }
 0x264   : > { %v8218_v15 = vcombine.high %v460_v23, %v464_v10  ;;  %v8217_v59 = vcombine.low %v460_v23, %v464_v10  ;;  %v8219_v28 = vcombine.low %v461_v26, %v465_v11  ;;  %v513_v23 = vld [vmem:[%s9232_s23 + $0x878] sm:$0xff] }
 0x266   : > { %7190 = vmatpush1.bf16.msra.mxu0 %v8161_v16  ;;  %7518 = vmatpush1.bf16.msra.mxu1 %v8163_v19  ;;  %v8220_v16 = vcombine.high %v461_v26, %v465_v11  ;;  %v468_v19 = vld [vmem:[%s9232_s23 + $0x710] sm:$0xff] }
 0x267   : > { %7191 = vmatprep.subr.bf16.mxu0 %v8170_v20  ;;  %7519 = vmatprep.subr.bf16.mxu1 %v8172_v22  ;;  %v472_v20 = vld [vmem:[%s9232_s23 + $0x730] sm:$0xff]  ;;  %v469_v22 = vld [vmem:[%s9232_s23 + $0x718] sm:$0xff] }
 0x268   : > { %v8226_v30 = vcombine.high %v468_v19, %v472_v20  ;;  %v8225_v36 = vcombine.low %v468_v19, %v472_v20  ;;  %v8227_v1 = vcombine.low %v469_v22, %v473_v25  ;;  %v521_v19 = vld [vmem:[%s9232_s23 + $0x8b8] sm:$0xff] }
 0x26a   : > { %7192 = vmatpush1.bf16.msra.mxu0 %v8169_v31  ;;  %7520 = vmatpush1.bf16.msra.mxu1 %v8171_v51  ;;  %v8228_v31 = vcombine.high %v469_v22, %v473_v25  ;;  %v476_v51 = vld [vmem:[%s9232_s23 + $0x750] sm:$0xff] }
 0x26b   : > { %7193 = vmatprep.subr.bf16.mxu0 %v8178_v17  ;;  %7521 = vmatprep.subr.bf16.mxu1 %v8180_v34  ;;  %v480_v17 = vld [vmem:[%s9232_s23 + $0x770] sm:$0xff]  ;;  %v477_v34 = vld [vmem:[%s9232_s23 + $0x758] sm:$0xff] }
 0x26c   : > { %v8234_v37 = vcombine.high %v476_v51, %v480_v17  ;;  %v8233_v45 = vcombine.low %v476_v51, %v480_v17  ;;  %v8235_v27 = vcombine.low %v477_v34, %v481_v35  ;;  %v529_v51 = vld [vmem:[%s9232_s23 + $0x8f8] sm:$0xff] }
 0x26e   : > { %7194 = vmatpush1.bf16.msra.mxu0 %v8177_v39  ;;  %7522 = vmatpush1.bf16.msra.mxu1 %v8179_v40  ;;  %v8236_v39 = vcombine.high %v477_v34, %v481_v35  ;;  %v484_v40 = vld [vmem:[%s9232_s23 + $0x790] sm:$0xff] }
 0x26f   : > { %7195 = vmatprep.subr.bf16.mxu0 %v8186_v42  ;;  %7523 = vmatprep.subr.bf16.mxu1 %v8188_v43  ;;  %v488_v42 = vld [vmem:[%s9232_s23 + $0x7b0] sm:$0xff]  ;;  %v485_v43 = vld [vmem:[%s9232_s23 + $0x798] sm:$0xff] }
 0x270   : > { %v8242_v46 = vcombine.high %v484_v40, %v488_v42  ;;  %v8241_v55 = vcombine.low %v484_v40, %v488_v42  ;;  %v8243_v21 = vcombine.low %v485_v43, %v489_v44 }
 0x272   : > { %7196 = vmatpush1.bf16.msra.mxu0 %v8185_v49  ;;  %7524 = vmatpush1.bf16.msra.mxu1 %v8187_v50  ;;  %v8244_v49 = vcombine.high %v485_v43, %v489_v44  ;;  %v492_v50 = vld [vmem:[%s9232_s23 + $0x7d0] sm:$0xff] }
 0x273   : > { %7197 = vmatprep.subr.bf16.mxu0 %v8194_v52  ;;  %7525 = vmatprep.subr.bf16.mxu1 %v8196_v53  ;;  %v496_v52 = vld [vmem:[%s9232_s23 + $0x7f0] sm:$0xff]  ;;  %v493_v53 = vld [vmem:[%s9232_s23 + $0x7d8] sm:$0xff] }
 0x274   : > { %v8250_v57 = vcombine.high %v492_v50, %v496_v52  ;;  %v8249_v2 = vcombine.low %v492_v50, %v496_v52  ;;  %v8251_v4 = vcombine.low %v493_v53, %v497_v54  ;;  %v540_v44 = vld [vmem:[%s9232_s23 + $0x950] sm:$0xff] }
 0x276   : > { %7198 = vmatpush1.bf16.msra.mxu0 %v8193_v60  ;;  %7526 = vmatpush1.bf16.msra.mxu1 %v8195_v61  ;;  %v8252_v60 = vcombine.high %v493_v53, %v497_v54  ;;  %v500_v61 = vld [vmem:[%s9232_s23 + $0x810] sm:$0xff] }
 0x277   : > { %7199 = vmatprep.subr.bf16.mxu0 %v8202_v62  ;;  %7527 = vmatprep.subr.bf16.mxu1 %v8204_v14  ;;  %v504_v62 = vld [vmem:[%s9232_s23 + $0x830] sm:$0xff]  ;;  %v501_v14 = vld [vmem:[%s9232_s23 + $0x818] sm:$0xff] }
 0x278   : > { %v8258_v5 = vcombine.high %v500_v61, %v504_v62  ;;  %v8257_v10 = vcombine.low %v500_v61, %v504_v62  ;;  %v8259_v26 = vcombine.low %v501_v14, %v505_v63  ;;  %v548_v54 = vld [vmem:[%s9232_s23 + $0x990] sm:$0xff] }
 0x27a   : > { %7200 = vmatpush1.bf16.msra.mxu0 %v8201_v6  ;;  %7528 = vmatpush1.bf16.msra.mxu1 %v8203_v7  ;;  %v8260_v6 = vcombine.high %v501_v14, %v505_v63  ;;  %v508_v7 = vld [vmem:[%s9232_s23 + $0x850] sm:$0xff] }
 0x27b   : > { %7201 = vmatprep.subr.bf16.mxu0 %v8210_v8  ;;  %7529 = vmatprep.subr.bf16.mxu1 %v8212_v9  ;;  %v512_v8 = vld [vmem:[%s9232_s23 + $0x870] sm:$0xff]  ;;  %v509_v9 = vld [vmem:[%s9232_s23 + $0x858] sm:$0xff] }
 0x27c   : > { %v8266_v11 = vcombine.high %v508_v7, %v512_v8  ;;  %v8265_v20 = vcombine.low %v508_v7, %v512_v8  ;;  %v8267_v22 = vcombine.low %v509_v9, %v513_v23  ;;  %v556_v63 = vld [vmem:[%s9232_s23 + $0x9d0] sm:$0xff] }
 0x27e   : > { %7202 = vmatpush1.bf16.msra.mxu0 %v8209_v12  ;;  %7530 = vmatpush1.bf16.msra.mxu1 %v8211_v13  ;;  %v8268_v12 = vcombine.high %v509_v9, %v513_v23  ;;  %v516_v13 = vld [vmem:[%s9232_s23 + $0x890] sm:$0xff] }
 0x27f   : > { %7203 = vmatprep.subr.bf16.mxu0 %v8218_v15  ;;  %7531 = vmatprep.subr.bf16.mxu1 %v8220_v16  ;;  %v520_v15 = vld [vmem:[%s9232_s23 + $0x8b0] sm:$0xff]  ;;  %v517_v16 = vld [vmem:[%s9232_s23 + $0x898] sm:$0xff] }
 0x280   : > { %v8274_v25 = vcombine.high %v516_v13, %v520_v15  ;;  %v8275_v17 = vcombine.low %v517_v16, %v521_v19  ;;  %v564_v23 = vld [vmem:[%s9232_s23 + $0xa10] sm:$0xff] }
 0x282   : > { %7204 = vmatpush1.bf16.msra.mxu0 %v8217_v59  ;;  %7532 = vmatpush1.bf16.msra.mxu1 %v8219_v28  ;;  %v8276_v59 = vcombine.high %v517_v16, %v521_v19  ;;  %v524_v28 = vld [vmem:[%s9232_s23 + $0x8d0] sm:$0xff] }
 0x283   : > { %7205 = vmatprep.subr.bf16.mxu0 %v8226_v30  ;;  %7533 = vmatprep.subr.bf16.mxu1 %v8228_v31  ;;  %v528_v30 = vld [vmem:[%s9232_s23 + $0x8f0] sm:$0xff]  ;;  %v525_v31 = vld [vmem:[%s9232_s23 + $0x8d8] sm:$0xff] }
 0x284   : > { %v8282_v34 = vcombine.high %v524_v28, %v528_v30  ;;  %v8284_v35 = vcombine.high %v525_v31, %v529_v51  ;;  %v8281_v40 = vcombine.low %v524_v28, %v528_v30  ;;  %v572_v19 = vld [vmem:[%s9232_s23 + $0xa50] sm:$0xff] }
 0x286   : > { %7206 = vmatpush1.bf16.msra.mxu0 %v8225_v36  ;;  %7534 = vmatpush1.bf16.msra.mxu1 %v8227_v1  ;;  %v532_v36 = vld [vmem:[%s9232_s23 + $0x910] sm:$0xff] }
 0x287   : > { %7207 = vmatprep.subr.bf16.mxu0 %v8234_v37  ;;  %7535 = vmatprep.subr.bf16.mxu1 %v8236_v39  ;;  %v536_v1 = vld [vmem:[%s9232_s23 + $0x930] sm:$0xff]  ;;  %v533_v37 = vld [vmem:[%s9232_s23 + $0x918] sm:$0xff] }
 0x288   : > { %v537_v39 = vld [vmem:[%s9232_s23 + $0x938] sm:$0xff]  ;;  %v8290_v42 = vcombine.high %v532_v36, %v536_v1 }
 0x289   : > { %v8292_v43 = vcombine.high %v533_v37, %v537_v39  ;;  %v8291_v50 = vcombine.low %v533_v37, %v537_v39  ;;  %v588_v39 = vld [vmem:[%s9232_s23 + $0xad0] sm:$0xff] }
 0x28a   : > { %7208 = vmatpush1.bf16.msra.mxu0 %v8233_v45  ;;  %7536 = vmatpush1.bf16.msra.mxu1 %v8235_v27  ;;  %v544_v45 = vld [vmem:[%s9232_s23 + $0x970] sm:$0xff]  ;;  %v541_v27 = vld [vmem:[%s9232_s23 + $0x958] sm:$0xff] }
 0x28b   : > { %7209 = vmatprep.subr.bf16.mxu0 %v8242_v46  ;;  %7537 = vmatprep.subr.bf16.mxu1 %v8244_v49  ;;  %v545_v46 = vld [vmem:[%s9232_s23 + $0x978] sm:$0xff]  ;;  %v8289_v49 = vcombine.low %v532_v36, %v536_v1  ;;  %v8298_v52 = vcombine.high %v540_v44, %v544_v45 }
 0x28c   : > { %v8300_v53 = vcombine.high %v541_v27, %v545_v46  ;;  %v8299_v61 = vcombine.low %v541_v27, %v545_v46  ;;  %v596_v46 = vld [vmem:[%s9232_s23 + $0xb10] sm:$0xff] }
 0x28e   : > { %7210 = vmatpush1.bf16.msra.mxu0 %v8241_v55  ;;  %7538 = vmatpush1.bf16.msra.mxu1 %v8243_v21  ;;  %v552_v55 = vld [vmem:[%s9232_s23 + $0x9b0] sm:$0xff]  ;;  %v549_v21 = vld [vmem:[%s9232_s23 + $0x998] sm:$0xff] }
 0x28f   : > { %7211 = vmatprep.subr.bf16.mxu0 %v8250_v57  ;;  %7539 = vmatprep.subr.bf16.mxu1 %v8252_v60  ;;  %v553_v57 = vld [vmem:[%s9232_s23 + $0x9b8] sm:$0xff]  ;;  %v8297_v60 = vcombine.low %v540_v44, %v544_v45  ;;  %v8306_v62 = vcombine.high %v548_v54, %v552_v55 }
 0x290   : > { %v8308_v14 = vcombine.high %v549_v21, %v553_v57  ;;  %v8307_v7 = vcombine.low %v549_v21, %v553_v57  ;;  %v604_v57 = vld [vmem:[%s9232_s23 + $0xb50] sm:$0xff] }
 0x292   : > { %7212 = vmatpush1.bf16.msra.mxu0 %v8249_v2  ;;  %7540 = vmatpush1.bf16.msra.mxu1 %v8251_v4  ;;  %v560_v2 = vld [vmem:[%s9232_s23 + $0x9f0] sm:$0xff]  ;;  %v557_v4 = vld [vmem:[%s9232_s23 + $0x9d8] sm:$0xff] }
 0x293   : > { %7222 = vmatprep.subr.bf16.mxu0 %v8258_v5  ;;  %7550 = vmatprep.subr.bf16.mxu1 %v8260_v6  ;;  %v561_v5 = vld [vmem:[%s9232_s23 + $0x9f8] sm:$0xff]  ;;  %v8305_v6 = vcombine.low %v548_v54, %v552_v55  ;;  %v8314_v8 = vcombine.high %v556_v63, %v560_v2 }
 0x294   : > { %v8316_v9 = vcombine.high %v557_v4, %v561_v5 }
 0x295   : > { %7214 = vmatmul.mubr.bf16.vlgmr.msra.gmra.mrb[4].mxu0 %v9387_v24  ;;  %7542 = vmatmul.mubr.bf16.vlgmr.msra.gmra.mrb[4].mxu1 %v9387_v24  ;;  %v8273_v24 = vcombine.low %v516_v13, %v520_v15  ;;  %v8315_v13 = vcombine.low %v557_v4, %v561_v5  ;;  %v612_v5 = vld [vmem:[%s9232_s23 + $0xb90] sm:$0xff] }
 0x296   : > { %7223 = vmatpush1.bf16.msra.mxu0 %v8257_v10  ;;  %7551 = vmatpush1.bf16.msra.mxu1 %v8259_v26  ;;  %v568_v10 = vld [vmem:[%s9232_s23 + $0xa30] sm:$0xff]  ;;  %v565_v26 = vld [vmem:[%s9232_s23 + $0xa18] sm:$0xff] }
 0x297   : > { %7224 = vmatprep.subr.bf16.mxu0 %v8266_v11  ;;  %7552 = vmatprep.subr.bf16.mxu1 %v8268_v12  ;;  %v569_v11 = vld [vmem:[%s9232_s23 + $0xa38] sm:$0xff]  ;;  %v8313_v12 = vcombine.low %v556_v63, %v560_v2  ;;  %v8322_v15 = vcombine.high %v564_v23, %v568_v10 }
 0x298   : > { %7254 = vmatprep.mubr.bf16.mxu0 %v9400_v33  ;;  %7582 = vmatprep.mubr.bf16.mxu1 %v9400_v33  ;;  %v8283_v33 = vcombine.low %v525_v31, %v529_v51  ;;  %v8324_v16 = vcombine.high %v565_v26, %v569_v11  ;;  %v8323_v28 = vcombine.low %v565_v26, %v569_v11  ;;  %v580_v51 = vld [vmem:[%s9232_s23 + $0xa90] sm:$0xff] }
 0x299   : > { %v620_v11 = vld [vmem:[%s9232_s23 + $0xbd0] sm:$0xff] }
 0x29a   : > { %7225 = vmatpush1.bf16.msra.mxu0 %v8265_v20  ;;  %7553 = vmatpush1.bf16.msra.mxu1 %v8267_v22  ;;  %v576_v20 = vld [vmem:[%s9232_s23 + $0xa70] sm:$0xff]  ;;  %v573_v22 = vld [vmem:[%s9232_s23 + $0xa58] sm:$0xff] }
 0x29b   : > { %7226 = vmatprep.subr.bf16.mxu0 %v8274_v25  ;;  %7554 = vmatprep.subr.bf16.mxu1 %v8276_v59  ;;  %v577_v25 = vld [vmem:[%s9232_s23 + $0xa78] sm:$0xff]  ;;  %v8321_v59 = vcombine.low %v564_v23, %v568_v10  ;;  %v8330_v30 = vcombine.high %v572_v19, %v576_v20 }
 0x29c   : > { %v8332_v31 = vcombine.high %v573_v22, %v577_v25  ;;  %v8331_v36 = vcombine.low %v573_v22, %v577_v25  ;;  %v628_v25 = vld [vmem:[%s9232_s23 + $0xc10] sm:$0xff] }
 0x29e   : > { %7227 = vmatpush1.bf16.msra.mxu0 %v8273_v24  ;;  %7555 = vmatpush1.bf16.msra.mxu1 %v8275_v17  ;;  %v584_v24 = vld [vmem:[%s9232_s23 + $0xab0] sm:$0xff]  ;;  %v581_v17 = vld [vmem:[%s9232_s23 + $0xa98] sm:$0xff] }
 0x29f   : > { %7228 = vmatprep.subr.bf16.mxu0 %v8282_v34  ;;  %7556 = vmatprep.subr.bf16.mxu1 %v8284_v35  ;;  %v585_v34 = vld [vmem:[%s9232_s23 + $0xab8] sm:$0xff]  ;;  %v8329_v35 = vcombine.low %v572_v19, %v576_v20  ;;  %v8338_v1 = vcombine.high %v580_v51, %v584_v24 }
 0x2a0   : > { %v8340_v37 = vcombine.high %v581_v17, %v585_v34  ;;  %v8339_v44 = vcombine.low %v581_v17, %v585_v34  ;;  %v636_v34 = vld [vmem:[%s9232_s23 + $0xc50] sm:$0xff] }
 0x2a2   : > { %7229 = vmatpush1.bf16.msra.mxu0 %v8281_v40  ;;  %7557 = vmatpush1.bf16.msra.mxu1 %v8283_v33  ;;  %v592_v40 = vld [vmem:[%s9232_s23 + $0xaf0] sm:$0xff]  ;;  %v589_v33 = vld [vmem:[%s9232_s23 + $0xad8] sm:$0xff] }
 0x2a3   : > { %7230 = vmatprep.subr.bf16.mxu0 %v8290_v42  ;;  %7558 = vmatprep.subr.bf16.mxu1 %v8292_v43  ;;  %v593_v42 = vld [vmem:[%s9232_s23 + $0xaf8] sm:$0xff]  ;;  %v8337_v43 = vcombine.low %v580_v51, %v584_v24  ;;  %v8346_v45 = vcombine.high %v588_v39, %v592_v40 }
 0x2a4   : > { %v8348_v27 = vcombine.high %v589_v33, %v593_v42  ;;  %v8347_v54 = vcombine.low %v589_v33, %v593_v42  ;;  %v644_v42 = vld [vmem:[%s9232_s23 + $0xc90] sm:$0xff] }
 0x2a6   : > { %7231 = vmatpush1.bf16.msra.mxu0 %v8289_v49  ;;  %7559 = vmatpush1.bf16.msra.mxu1 %v8291_v50  ;;  %v600_v49 = vld [vmem:[%s9232_s23 + $0xb30] sm:$0xff]  ;;  %v597_v50 = vld [vmem:[%s9232_s23 + $0xb18] sm:$0xff] }
 0x2a7   : > { %7232 = vmatprep.subr.bf16.mxu0 %v8298_v52  ;;  %7560 = vmatprep.subr.bf16.mxu1 %v8300_v53  ;;  %v601_v52 = vld [vmem:[%s9232_s23 + $0xb38] sm:$0xff]  ;;  %v8345_v53 = vcombine.low %v588_v39, %v592_v40  ;;  %v8354_v55 = vcombine.high %v596_v46, %v600_v49 }
 0x2a8   : > { %v8356_v21 = vcombine.high %v597_v50, %v601_v52  ;;  %v8355_v63 = vcombine.low %v597_v50, %v601_v52  ;;  %v652_v52 = vld [vmem:[%s9232_s23 + $0xcd0] sm:$0xff] }
 0x2aa   : > { %7233 = vmatpush1.bf16.msra.mxu0 %v8297_v60  ;;  %7561 = vmatpush1.bf16.msra.mxu1 %v8299_v61  ;;  %v608_v60 = vld [vmem:[%s9232_s23 + $0xb70] sm:$0xff]  ;;  %v605_v61 = vld [vmem:[%s9232_s23 + $0xb58] sm:$0xff] }
 0x2ab   : > { %7234 = vmatprep.subr.bf16.mxu0 %v8306_v62  ;;  %7562 = vmatprep.subr.bf16.mxu1 %v8308_v14  ;;  %v609_v62 = vld [vmem:[%s9232_s23 + $0xb78] sm:$0xff]  ;;  %v8353_v14 = vcombine.low %v596_v46, %v600_v49  ;;  %v8362_v2 = vcombine.high %v604_v57, %v608_v60 }
 0x2ac   : > { %v8364_v4 = vcombine.high %v605_v61, %v609_v62  ;;  %v8363_v23 = vcombine.low %v605_v61, %v609_v62  ;;  %v660_v62 = vld [vmem:[%s9232_s23 + $0xd10] sm:$0xff] }
 0x2ae   : > { %7235 = vmatpush1.bf16.msra.mxu0 %v8305_v6  ;;  %7563 = vmatpush1.bf16.msra.mxu1 %v8307_v7  ;;  %v616_v6 = vld [vmem:[%s9232_s23 + $0xbb0] sm:$0xff]  ;;  %v613_v7 = vld [vmem:[%s9232_s23 + $0xb98] sm:$0xff] }
 0x2af   : > { %7236 = vmatprep.subr.bf16.mxu0 %v8314_v8  ;;  %7564 = vmatprep.subr.bf16.mxu1 %v8316_v9  ;;  %v617_v8 = vld [vmem:[%s9232_s23 + $0xbb8] sm:$0xff]  ;;  %v8361_v9 = vcombine.low %v604_v57, %v608_v60  ;;  %v8370_v10 = vcombine.high %v612_v5, %v616_v6 }
 0x2b0   : > { %v8372_v26 = vcombine.high %v613_v7, %v617_v8  ;;  %v8371_v19 = vcombine.low %v613_v7, %v617_v8 }
 0x2b2   : > { %7237 = vmatpush1.bf16.msra.mxu0 %v8313_v12  ;;  %7565 = vmatpush1.bf16.msra.mxu1 %v8315_v13  ;;  %v624_v12 = vld [vmem:[%s9232_s23 + $0xbf0] sm:$0xff]  ;;  %v621_v13 = vld [vmem:[%s9232_s23 + $0xbd8] sm:$0xff] }
 0x2b3   : > { %7238 = vmatprep.subr.bf16.mxu0 %v8322_v15  ;;  %7566 = vmatprep.subr.bf16.mxu1 %v8324_v16  ;;  %v625_v15 = vld [vmem:[%s9232_s23 + $0xbf8] sm:$0xff]  ;;  %v8369_v16 = vcombine.low %v612_v5, %v616_v6  ;;  %v8378_v20 = vcombine.high %v620_v11, %v624_v12  ;;  %v7804_v5 = vld [vmem:[%s10106_s17] sm:$0xff] }
 0x2b4   : > { %v8380_v22 = vcombine.high %v621_v13, %v625_v15  ;;  %v8379_v51 = vcombine.low %v621_v13, %v625_v15  ;;  %v1266_v15 = vld [vmem:[%s10119_s21] sm:$0xff] }
 0x2b6   : > { %7239 = vmatpush1.bf16.msra.mxu0 %v8321_v59  ;;  %7567 = vmatpush1.bf16.msra.mxu1 %v8323_v28  ;;  %v632_v59 = vld [vmem:[%s9232_s23 + $0xc30] sm:$0xff]  ;;  %v629_v28 = vld [vmem:[%s9232_s23 + $0xc18] sm:$0xff] }
 0x2b7   : > { %7240 = vmatprep.subr.bf16.mxu0 %v8330_v30  ;;  %7568 = vmatprep.subr.bf16.mxu1 %v8332_v31  ;;  %v633_v30 = vld [vmem:[%s9232_s23 + $0xc38] sm:$0xff]  ;;  %v8377_v31 = vcombine.low %v620_v11, %v624_v12  ;;  %v8386_v24 = vcombine.high %v628_v25, %v632_v59 }
 0x2b8   : > { %v8388_v17 = vcombine.high %v629_v28, %v633_v30  ;;  %v8387_v39 = vcombine.low %v629_v28, %v633_v30  ;;  %v669_v11 = vld [vmem:[%s9232_s23 + $0xd58] sm:$0xff]  ;;  %v676_v30 = vld [vmem:[%s9232_s23 + $0xd90] sm:$0xff] }
 0x2b9   : > { %v673_v12 = vld [vmem:[%s9232_s23 + $0xd78] sm:$0xff] }
 0x2ba   : > { %7241 = vmatpush1.bf16.msra.mxu0 %v8329_v35  ;;  %7569 = vmatpush1.bf16.msra.mxu1 %v8331_v36  ;;  %v640_v35 = vld [vmem:[%s9232_s23 + $0xc70] sm:$0xff]  ;;  %v637_v36 = vld [vmem:[%s9232_s23 + $0xc58] sm:$0xff]  ;;  %v8428_v28 = vcombine.high %v669_v11, %v673_v12 }
 0x2bb   : > { %7242 = vmatprep.subr.bf16.mxu0 %v8338_v1  ;;  %7570 = vmatprep.subr.bf16.mxu1 %v8340_v37  ;;  %v641_v1 = vld [vmem:[%s9232_s23 + $0xc78] sm:$0xff]  ;;  %v8385_v37 = vcombine.low %v628_v25, %v632_v59  ;;  %v8394_v40 = vcombine.high %v636_v34, %v640_v35 }
 0x2bc   : > { %v8396_v33 = vcombine.high %v637_v36, %v641_v1  ;;  %v8395_v46 = vcombine.low %v637_v36, %v641_v1 }
 0x2be   : > { %7243 = vmatpush1.bf16.msra.mxu0 %v8337_v43  ;;  %7571 = vmatpush1.bf16.msra.mxu1 %v8339_v44  ;;  %v648_v43 = vld [vmem:[%s9232_s23 + $0xcb0] sm:$0xff]  ;;  %v645_v44 = vld [vmem:[%s9232_s23 + $0xc98] sm:$0xff] }
 0x2bf   : > { %7244 = vmatprep.subr.bf16.mxu0 %v8346_v45  ;;  %7572 = vmatprep.subr.bf16.mxu1 %v8348_v27  ;;  %v649_v45 = vld [vmem:[%s9232_s23 + $0xcb8] sm:$0xff]  ;;  %v8393_v27 = vcombine.low %v636_v34, %v640_v35  ;;  %v8402_v49 = vcombine.high %v644_v42, %v648_v43 }
 0x2c0   : > { %v8404_v50 = vcombine.high %v645_v44, %v649_v45  ;;  %v8403_v57 = vcombine.low %v645_v44, %v649_v45  ;;  %v677_v34 = vld [vmem:[%s9232_s23 + $0xd98] sm:$0xff] }
 0x2c1   : > { %v681_v35 = vld [vmem:[%s9232_s23 + $0xdb8] sm:$0xff] }
 0x2c2   : > { %7245 = vmatpush1.bf16.msra.mxu0 %v8345_v53  ;;  %7573 = vmatpush1.bf16.msra.mxu1 %v8347_v54  ;;  %v656_v53 = vld [vmem:[%s9232_s23 + $0xcf0] sm:$0xff]  ;;  %v653_v54 = vld [vmem:[%s9232_s23 + $0xcd8] sm:$0xff]  ;;  %v8436_v45 = vcombine.high %v677_v34, %v681_v35 }
 0x2c3   : > { %7246 = vmatprep.subr.bf16.mxu0 %v8354_v55  ;;  %7574 = vmatprep.subr.bf16.mxu1 %v8356_v21  ;;  %v1268_v55 = vlaneseq  ;;  %v8401_v21 = vcombine.low %v644_v42, %v648_v43  ;;  %v8410_v60 = vcombine.high %v652_v52, %v656_v53 }
 0x2c6   : > { %7247 = vmatpush1.bf16.msra.mxu0 %v8353_v14  ;;  %7575 = vmatpush1.bf16.msra.mxu1 %v8355_v63  ;;  %v664_v14 = vld [vmem:[%s9232_s23 + $0xd30] sm:$0xff]  ;;  %v665_v63 = vld [vmem:[%s9232_s23 + $0xd38] sm:$0xff] }
 0x2c7   : > { %7248 = vmatprep.subr.bf16.mxu0 %v8362_v2  ;;  %7576 = vmatprep.subr.bf16.mxu1 %v8364_v4  ;;  %v10112_v2 = vshrl.u32 %v1268_v55, 7  ;;  %v8409_v4 = vcombine.low %v652_v52, %v656_v53  ;;  %v8418_v7 = vcombine.high %v660_v62, %v664_v14  ;;  %v8417_v13 = vcombine.low %v660_v62, %v664_v14  ;;  %v689_v55 = vld [vmem:[%s9232_s23 + $0xdf8] sm:$0xff] }
 0x2c9   : > { %v10137_v59 = vsub.s32 4, %v10112_v2 }
 0x2ca   : > { %7249 = vmatpush1.bf16.msra.mxu0 %v8361_v9  ;;  %7577 = vmatpush1.bf16.msra.mxu1 %v8363_v23  ;;  %v668_v9 = vld [vmem:[%s9232_s23 + $0xd50] sm:$0xff] }
 0x2cb   : > { %7250 = vmatprep.subr.bf16.mxu0 %v8370_v10  ;;  %7578 = vmatprep.subr.bf16.mxu1 %v8372_v26  ;;  %v672_v23 = vld [vmem:[%s9232_s23 + $0xd70] sm:$0xff]  ;;  %v10124_v10 = vsub.s32 0, %v10112_v2  ;;  %v10126_v26 = vunpack.c.l.bf16 %v7804_v5 }
 0x2cc   : > { %v8426_v25 = vcombine.high %v668_v9, %v672_v23 }
 0x2cd   : > { %v7820_v44 = vrot.slane %v10126_v26, %v10137_v59 }
 0x2ce   : > { %7251 = vmatpush1.bf16.msra.mxu0 %v8369_v16  ;;  %7579 = vmatpush1.bf16.msra.mxu1 %v8371_v19  ;;  %v10132_v16 = vsub.s32 2, %v10112_v2  ;;  %v1274_v19 = vsub.s32 1, %v10112_v2 }
 0x2cf   : > { %7252 = vmatprep.subr.bf16.mxu0 %v8378_v20  ;;  %7580 = vmatprep.subr.bf16.mxu1 %v8380_v22  ;;  %v1282_v22 = vsub.s32 3, %v10112_v2 }
 0x2d0   : > { %v1279_v36 = vrot.slane %v1266_v15, %v10132_v16  ;;  %v1275_v1 = vrot.slane %v1266_v15, %v1274_v19  ;;  %v693_v19 = vld [vmem:[%s9232_s23 + $0xe18] sm:$0xff] }
 0x2d2   : > { %7253 = vmatpush1.bf16.msra.mxu0 %v8377_v31  ;;  %7581 = vmatpush1.bf16.msra.mxu1 %v8379_v51  ;;  %v680_v31 = vld [vmem:[%s9232_s23 + $0xdb0] sm:$0xff]  ;;  %v1271_v51 = vrot.slane %v1266_v15, %v10124_v10 }
 0x2d3   : > { %7263 = vmatprep.subr.bf16.mxu0 %v8386_v24  ;;  %7591 = vmatprep.subr.bf16.mxu1 %v8388_v17  ;;  %v7812_v24 = vrot.slane %v10126_v26, %v10124_v10  ;;  %v10145_v17 = vsub.s32 6, %v10112_v2  ;;  %v8434_v42 = vcombine.high %v676_v30, %v680_v31  ;;  %v8433_v14 = vcombine.low %v676_v30, %v680_v31 }
 0x2d5   : > { %7255 = vmatmul.mubr.bf16.vlgmr.msra.gmra.mrb[4].mxu0 %v9468_v38  ;;  %7583 = vmatmul.mubr.bf16.vlgmr.msra.gmra.mrb[4].mxu1 %v9468_v38  ;;  %v657_v38 = vld [vmem:[%s9232_s23 + $0xcf8] sm:$0xff] }
 0x2d6   : > { %7264 = vmatpush1.bf16.msra.mxu0 %v8385_v37  ;;  %7592 = vmatpush1.bf16.msra.mxu1 %v8387_v39  ;;  %v8412_v61 = vcombine.high %v653_v54, %v657_v38  ;;  %v8411_v6 = vcombine.low %v653_v54, %v657_v38  ;;  %v7816_v37 = vrot.slane %v10126_v26, %v10132_v16  ;;  %v685_v38 = vld [vmem:[%s9232_s23 + $0xdd8] sm:$0xff] }
 0x2d7   : > { %7265 = vmatprep.subr.bf16.mxu0 %v8394_v40  ;;  %7593 = vmatprep.subr.bf16.mxu1 %v8396_v33  ;;  %v8425_v39 = vcombine.low %v668_v9, %v672_v23  ;;  %v1283_v40 = vrot.slane %v1266_v15, %v1282_v22  ;;  %v8427_v33 = vcombine.low %v669_v11, %v673_v12  ;;  %v692_v12 = vld [vmem:[%s9232_s23 + $0xe10] sm:$0xff] }
 0x2d8   : > { %7295 = vmatprep.mubr.bf16.mxu0 %v9481_v47  ;;  %7623 = vmatprep.mubr.bf16.mxu1 %v9481_v47  ;;  %v661_v47 = vld [vmem:[%s9232_s23 + $0xd18] sm:$0xff]  ;;  %v7824_v54 = vrot.slane %v10126_v26, %v10145_v17  ;;  %v7860_v9 = vrot.slane %v7820_v44, %v10124_v10  ;;  %v8444_v11 = vcombine.high %v685_v38, %v689_v55 }
 0x2d9   : > { %v8420_v8 = vcombine.high %v661_v47, %v665_v63  ;;  %v8419_v20 = vcombine.low %v661_v47, %v665_v63  ;;  %v8443_v31 = vcombine.low %v685_v38, %v689_v55 }
 0x2da   : > { %7266 = vmatpush1.bf16.msra.mxu0 %v8393_v27  ;;  %7594 = vmatpush1.bf16.msra.mxu1 %v8395_v46  ;;  %v684_v27 = vld [vmem:[%s9232_s23 + $0xdd0] sm:$0xff] }
 0x2db   : > { %7267 = vmatprep.subr.bf16.mxu0 %v8402_v49  ;;  %7595 = vmatprep.subr.bf16.mxu1 %v8404_v50  ;;  %v688_v46 = vld [vmem:[%s9232_s23 + $0xdf0] sm:$0xff]  ;;  %v7852_v50 = vrot.slane %v7812_v24, %v10124_v10 }
 0x2dc   : > { %v8441_v30 = vcombine.low %v684_v27, %v688_v46 }
 0x2de   : > { %7268 = vmatpush1.bf16.msra.mxu0 %v8401_v21  ;;  %7596 = vmatpush1.bf16.msra.mxu1 %v8403_v57 }
 0x2df   : > { %7269 = vmatprep.subr.bf16.mxu0 %v8410_v60  ;;  %7597 = vmatprep.subr.bf16.mxu1 %v8412_v61  ;;  %v7856_v60 = vrot.slane %v7816_v37, %v10124_v10  ;;  %v701_v37 = vld [vmem:[%s9232_s23 + $0xe58] sm:$0xff] }
 0x2e2   : > { %7270 = vmatpush1.bf16.msra.mxu0 %v8409_v4  ;;  %7598 = vmatpush1.bf16.msra.mxu1 %v8411_v6  ;;  %v8435_v6 = vcombine.low %v677_v34, %v681_v35 }
 0x2e3   : > { %7271 = vmatprep.subr.bf16.mxu0 %v8418_v7  ;;  %7599 = vmatprep.subr.bf16.mxu1 %v8420_v8  ;;  %v8442_v7 = vcombine.high %v684_v27, %v688_v46  ;;  %v708_v46 = vld [vmem:[%s9232_s23 + $0xe90] sm:$0xff] }
 0x2e6   : > { %7272 = vmatpush1.bf16.msra.mxu0 %v8417_v13  ;;  %7600 = vmatpush1.bf16.msra.mxu1 %v8419_v20  ;;  %v696_v13 = vld [vmem:[%s9232_s23 + $0xe30] sm:$0xff]  ;;  %v697_v20 = vld [vmem:[%s9232_s23 + $0xe38] sm:$0xff] }
 0x2e7   : > { %7273 = vmatprep.subr.bf16.mxu0 %v8426_v25  ;;  %7601 = vmatprep.subr.bf16.mxu1 %v8428_v28  ;;  %v7864_v28 = vrot.slane %v7824_v54, %v10124_v10  ;;  %v8452_v35 = vcombine.high %v693_v19, %v697_v20 }
 0x2e8   : > { %v6805_v43 = vpop.f32.mrb[0].mxu0  ;;  %v7133_v52 = vpop.f32.mrb[0].mxu1 }
 0x2e9   : > { %v9024_v49 = vadd.f32 %v6805_v43, %v1271_v51  ;;  %v6807_v53 = vpop.f32.mrb[1].mxu0  ;;  %v9026_v21 = vadd.f32 %v7133_v52, %v1279_v36  ;;  %v7135_v61 = vpop.f32.mrb[1].mxu1  ;;  %v8450_v51 = vcombine.high %v692_v12, %v696_v13  ;;  %v700_v36 = vld [vmem:[%s9232_s23 + $0xe50] sm:$0xff]  ;;  %v8451_v43 = vcombine.low %v693_v19, %v697_v20  ;;  %v713_v52 = vld [vmem:[%s9232_s23 + $0xeb8] sm:$0xff] }
 0x2ea   : > { %v9025_v57 = vadd.f32 %v6807_v53, %v1275_v1  ;;  %v6809_v62 = vpop.f32.mrb[2].mxu0  ;;  %7274 = vmatpush1.bf16.msra.mxu0 %v8425_v39  ;;  %v9027_v63 = vadd.f32 %v7135_v61, %v1283_v40  ;;  %v7137_v4 = vpop.f32.mrb[2].mxu1  ;;  %7602 = vmatpush1.bf16.msra.mxu1 %v8427_v33  ;;  %v704_v1 = vld [vmem:[%s9232_s23 + $0xe70] sm:$0xff]  ;;  %v705_v39 = vld [vmem:[%s9232_s23 + $0xe78] sm:$0xff] }
 0x2eb   : > { %v7796_v47 = vmax.f32 %v9024_v49, 0.0  ;;  %v6810_v5 = vpop.f32.mrb[3].mxu0  ;;  %7275 = vmatprep.subr.bf16.mxu0 %v8434_v42  ;;  %v7798_v8 = vmax.f32 %v9026_v21, 0.0  ;;  %v7138_v26 = vpop.f32.mrb[3].mxu1  ;;  %7603 = vmatprep.subr.bf16.mxu1 %v8436_v45  ;;  %v8449_v42 = vcombine.low %v692_v12, %v696_v13  ;;  %v8458_v44 = vcombine.high %v700_v36, %v704_v1  ;;  %v712_v49 = vld [vmem:[%s9232_s23 + $0xeb0] sm:$0xff]  ;;  %v721_v61 = vld [vmem:[%s9232_s23 + $0xef8] sm:$0xff] }
 0x2ec   : > { %v7797_v23 = vmax.f32 %v9025_v57, 0.0  ;;  %v7799_v25 = vmax.f32 %v9027_v63, 0.0  ;;  %v8460_v27 = vcombine.high %v701_v37, %v705_v39  ;;  %v8457_v53 = vcombine.low %v700_v36, %v704_v1  ;;  %v716_v21 = vld [vmem:[%s9232_s23 + $0xed0] sm:$0xff]  ;;  %v733_v13 = vld [vmem:[%s9232_s23 + $0xf58] sm:$0xff] }
 0x2ed   : > { %v7881_v15 = vmul.f32 %v7852_v50, %v7796_v47  ;;  %v7883_v24 = vmul.f32 %v7860_v9, %v7798_v8  ;;  %v709_v50 = vld [vmem:[%s9232_s23 + $0xe98] sm:$0xff]  ;;  %v8459_v54 = vcombine.low %v701_v37, %v705_v39  ;;  %v8466_v38 = vcombine.high %v708_v46, %v712_v49  ;;  %v720_v57 = vld [vmem:[%s9232_s23 + $0xef0] sm:$0xff] }
 0x2ee   : > { %v7882_v22 = vmul.f32 %v7856_v60, %v7797_v23  ;;  %7276 = vmatpush1.bf16.msra.mxu0 %v8433_v14  ;;  %7604 = vmatpush1.bf16.msra.mxu1 %v8435_v6  ;;  %v7884_v40 = vmul.f32 %v7864_v28, %v7799_v25  ;;  %v8468_v55 = vcombine.high %v709_v50, %v713_v52  ;;  %v717_v60 = vld [vmem:[%s9232_s23 + $0xed8] sm:$0xff]  ;;  %v724_v4 = vld [vmem:[%s9232_s23 + $0xf10] sm:$0xff] }
 0x2ef   : > { %7277 = vmatprep.subr.bf16.mxu0 %v8442_v7  ;;  %7605 = vmatprep.subr.bf16.mxu1 %v8444_v11  ;;  %v8465_v62 = vcombine.low %v708_v46, %v712_v49  ;;  %v8467_v14 = vcombine.low %v709_v50, %v713_v52  ;;  %v8474_v47 = vcombine.high %v716_v21, %v720_v57  ;;  %v728_v5 = vld [vmem:[%s9232_s23 + $0xf30] sm:$0xff]  ;;  %v725_v6 = vld [vmem:[%s9232_s23 + $0xf18] sm:$0xff] }
 0x2f0   : > { %v7889_v34 = vadd.f32 %v7882_v22, %v7881_v15  ;;  %v8476_v63 = vcombine.high %v717_v60, %v721_v61  ;;  %v729_v7 = vld [vmem:[%s9232_s23 + $0xf38] sm:$0xff]  ;;  %v8473_v8 = vcombine.low %v716_v21, %v720_v57  ;;  %v8475_v9 = vcombine.low %v717_v60, %v721_v61  ;;  %v732_v11 = vld [vmem:[%s9232_s23 + $0xf50] sm:$0xff] }
 0x2f1   : > { %v8482_v23 = vcombine.high %v724_v4, %v728_v5  ;;  %v8484_v26 = vcombine.high %v725_v6, %v729_v7  ;;  %v736_v12 = vld [vmem:[%s9232_s23 + $0xf70] sm:$0xff]  ;;  %v737_v15 = vld [vmem:[%s9232_s23 + $0xf78] sm:$0xff]  ;;  %v8481_v19 = vcombine.low %v724_v4, %v728_v5  ;;  %v8483_v20 = vcombine.low %v725_v6, %v729_v7 }
 0x2f2   : > { %v7890_v33 = vadd.f32 %v7889_v34, %v7883_v24  ;;  %7278 = vmatpush1.bf16.msra.mxu0 %v8441_v30  ;;  %7606 = vmatpush1.bf16.msra.mxu1 %v8443_v31  ;;  %v8490_v22 = vcombine.high %v732_v11, %v736_v12  ;;  %v8492_v25 = vcombine.high %v733_v13, %v737_v15  ;;  %v740_v28 = vld [vmem:[%s9232_s23 + $0xf90] sm:$0xff]  ;;  %v741_v31 = vld [vmem:[%s9232_s23 + $0xf98] sm:$0xff] }
 0x2f3   : > { %7279 = vmatprep.subr.bf16.mxu0 %v8450_v51  ;;  %7607 = vmatprep.subr.bf16.mxu1 %v8452_v35  ;;  %v744_v30 = vld [vmem:[%s9232_s23 + $0xfb0] sm:$0xff]  ;;  %v745_v51 = vld [vmem:[%s9232_s23 + $0xfb8] sm:$0xff]  ;;  %v8489_v24 = vcombine.low %v732_v11, %v736_v12  ;;  %v8491_v34 = vcombine.low %v733_v13, %v737_v15 }
 0x2f4   : > { %v10172_v45 = vadd.f32 %v7890_v33, %v7884_v40  ;;  %v8498_v35 = vcombine.high %v740_v28, %v744_v30  ;;  %v8500_v36 = vcombine.high %v741_v31, %v745_v51  ;;  %v748_v1 = vld [vmem:[%s9232_s23 + $0xfd0] sm:$0xff]  ;;  %v749_v39 = vld [vmem:[%s9232_s23 + $0xfd8] sm:$0xff]  ;;  %v8497_v33 = vcombine.low %v740_v28, %v744_v30 }
 0x2f5   : > { %v752_v37 = vld [vmem:[%s9232_s23 + $0xff0] sm:$0xff]  ;;  %v753_v40 = vld [vmem:[%s9232_s23 + $0xff8] sm:$0xff] }
 0x2f6   : > { %7280 = vmatpush1.bf16.msra.mxu0 %v8449_v42  ;;  %7608 = vmatpush1.bf16.msra.mxu1 %v8451_v43  ;;  %v8499_v42 = vcombine.low %v741_v31, %v745_v51  ;;  %v8506_v43 = vcombine.high %v748_v1, %v752_v37  ;;  %v760_v46 = vld [vmem:[%s9232_s23 + $0x1030] sm:$0xff]  ;;  %v757_v49 = vld [vmem:[%s9232_s23 + $0x1018] sm:$0xff]  ;;  %v8505_v52 = vcombine.low %v748_v1, %v752_v37 }
 0x2f7   : > { %7281 = vmatprep.subr.bf16.mxu0 %v8458_v44  ;;  %7609 = vmatprep.subr.bf16.mxu1 %v8460_v27  ;;  %v8508_v44 = vcombine.high %v749_v39, %v753_v40  ;;  %v756_v27 = vld [vmem:[%s9232_s23 + $0x1010] sm:$0xff]  ;;  %v761_v50 = vld [vmem:[%s9232_s23 + $0x1038] sm:$0xff] }
 0x2f8   : > { %v768_v21 = vld [vmem:[%s9232_s23 + $0x1070] sm:$0xff]  ;;  %v765_v57 = vld [vmem:[%s9232_s23 + $0x1058] sm:$0xff]  ;;  %v8513_v61 = vcombine.low %v756_v27, %v760_v46 }
 0x2f9   : > { %v769_v60 = vld [vmem:[%s9232_s23 + $0x1078] sm:$0xff]  ;;  %v776_v4 = vld [vmem:[%s9232_s23 + $0x10b0] sm:$0xff] }
 0x2fa   : > { %7282 = vmatpush1.bf16.msra.mxu0 %v8457_v53  ;;  %7610 = vmatpush1.bf16.msra.mxu1 %v8459_v54  ;;  %v8507_v53 = vcombine.low %v749_v39, %v753_v40  ;;  %v8514_v54 = vcombine.high %v756_v27, %v760_v46  ;;  %v773_v5 = vld [vmem:[%s9232_s23 + $0x1098] sm:$0xff]  ;;  %v784_v11 = vld [vmem:[%s9232_s23 + $0x10f0] sm:$0xff] }
 0x2fb   : > { %7283 = vmatprep.subr.bf16.mxu0 %v8466_v38  ;;  %7611 = vmatprep.subr.bf16.mxu1 %v8468_v55  ;;  %v8516_v38 = vcombine.high %v757_v49, %v761_v50  ;;  %v764_v55 = vld [vmem:[%s9232_s23 + $0x1050] sm:$0xff]  ;;  %v777_v6 = vld [vmem:[%s9232_s23 + $0x10b8] sm:$0xff] }
 0x2fc   : > { %v8521_v7 = vcombine.low %v764_v55, %v768_v21  ;;  %v781_v12 = vld [vmem:[%s9232_s23 + $0x10d8] sm:$0xff]  ;;  %v8531_v15 = vcombine.low %v773_v5, %v777_v6 }
 0x2fd   : > { %v785_v13 = vld [vmem:[%s9232_s23 + $0x10f8] sm:$0xff] }
 0x2fe   : > { %7284 = vmatpush1.bf16.msra.mxu0 %v8465_v62  ;;  %7612 = vmatpush1.bf16.msra.mxu1 %v8467_v14  ;;  %v8515_v62 = vcombine.low %v757_v49, %v761_v50  ;;  %v8522_v14 = vcombine.high %v764_v55, %v768_v21  ;;  %v789_v28 = vld [vmem:[%s9232_s23 + $0x1118] sm:$0xff] }
 0x2ff   : > { %7285 = vmatprep.subr.bf16.mxu0 %v8474_v47  ;;  %7613 = vmatprep.subr.bf16.mxu1 %v8476_v63  ;;  %v8524_v47 = vcombine.high %v765_v57, %v769_v60  ;;  %v772_v63 = vld [vmem:[%s9232_s23 + $0x1090] sm:$0xff]  ;;  %v793_v30 = vld [vmem:[%s9232_s23 + $0x1138] sm:$0xff] }
 0x300   : > { %v801_v1 = vld [vmem:[%s9232_s23 + $0x1178] sm:$0xff]  ;;  %v8547_v39 = vcombine.low %v789_v28, %v793_v30 }
 0x301   : > { %v809_v27 = vld [vmem:[%s9232_s23 + $0x11b8] sm:$0xff] }
 0x302   : > { %7286 = vmatpush1.bf16.msra.mxu0 %v8473_v8  ;;  %7614 = vmatpush1.bf16.msra.mxu1 %v8475_v9  ;;  %v8523_v8 = vcombine.low %v765_v57, %v769_v60  ;;  %v8530_v9 = vcombine.high %v772_v63, %v776_v4  ;;  %v817_v55 = vld [vmem:[%s9232_s23 + $0x11f8] sm:$0xff] }
 0x303   : > { %7287 = vmatprep.subr.bf16.mxu0 %v8482_v23  ;;  %7615 = vmatprep.subr.bf16.mxu1 %v8484_v26  ;;  %v8532_v23 = vcombine.high %v773_v5, %v777_v6  ;;  %v780_v26 = vld [vmem:[%s9232_s23 + $0x10d0] sm:$0xff] }
 0x304   : > { %v8537_v31 = vcombine.low %v780_v26, %v784_v11 }
 0x306   : > { %7288 = vmatpush1.bf16.msra.mxu0 %v8481_v19  ;;  %7616 = vmatpush1.bf16.msra.mxu1 %v8483_v20  ;;  %v8538_v19 = vcombine.high %v780_v26, %v784_v11  ;;  %v8540_v20 = vcombine.high %v781_v12, %v785_v13  ;;  %v833_v26 = vld [vmem:[%s9232_s23 + $0x1278] sm:$0xff] }
 0x307   : > { %7289 = vmatprep.subr.bf16.mxu0 %v8490_v22  ;;  %7617 = vmatprep.subr.bf16.mxu1 %v8492_v25  ;;  %v788_v22 = vld [vmem:[%s9232_s23 + $0x1110] sm:$0xff] }
 0x308   : > { %v792_v25 = vld [vmem:[%s9232_s23 + $0x1130] sm:$0xff] }
 0x309   : > { %v8546_v51 = vcombine.high %v788_v22, %v792_v25  ;;  %v8545_v37 = vcombine.low %v788_v22, %v792_v25  ;;  %v841_v22 = vld [vmem:[%s9232_s23 + $0x12b8] sm:$0xff] }
 0x30a   : > { %7290 = vmatpush1.bf16.msra.mxu0 %v8489_v24  ;;  %7618 = vmatpush1.bf16.msra.mxu1 %v8491_v34  ;;  %v8548_v24 = vcombine.high %v789_v28, %v793_v30  ;;  %v796_v34 = vld [vmem:[%s9232_s23 + $0x1150] sm:$0xff] }
 0x30b   : > { %7291 = vmatprep.subr.bf16.mxu0 %v8498_v35  ;;  %7619 = vmatprep.subr.bf16.mxu1 %v8500_v36  ;;  %v800_v35 = vld [vmem:[%s9232_s23 + $0x1170] sm:$0xff]  ;;  %v797_v36 = vld [vmem:[%s9232_s23 + $0x1158] sm:$0xff] }
 0x30c   : > { %v8554_v40 = vcombine.high %v796_v34, %v800_v35  ;;  %v8553_v46 = vcombine.low %v796_v34, %v800_v35  ;;  %v8555_v49 = vcombine.low %v797_v36, %v801_v1  ;;  %v849_v34 = vld [vmem:[%s9232_s23 + $0x12f8] sm:$0xff] }
 0x30e   : > { %7292 = vmatpush1.bf16.msra.mxu0 %v8497_v33  ;;  %7620 = vmatpush1.bf16.msra.mxu1 %v8499_v42  ;;  %v8556_v33 = vcombine.high %v797_v36, %v801_v1  ;;  %v804_v42 = vld [vmem:[%s9232_s23 + $0x1190] sm:$0xff] }
 0x30f   : > { %7293 = vmatprep.subr.bf16.mxu0 %v8506_v43  ;;  %7621 = vmatprep.subr.bf16.mxu1 %v8508_v44  ;;  %v808_v43 = vld [vmem:[%s9232_s23 + $0x11b0] sm:$0xff]  ;;  %v805_v44 = vld [vmem:[%s9232_s23 + $0x1198] sm:$0xff] }
 0x310   : > { %v8562_v50 = vcombine.high %v804_v42, %v808_v43  ;;  %v8561_v21 = vcombine.low %v804_v42, %v808_v43  ;;  %v8563_v57 = vcombine.low %v805_v44, %v809_v27  ;;  %v857_v42 = vld [vmem:[%s9232_s23 + $0x1338] sm:$0xff] }
 0x312   : > { %7294 = vmatpush1.bf16.msra.mxu0 %v8505_v52  ;;  %7622 = vmatpush1.bf16.msra.mxu1 %v8507_v53  ;;  %v8564_v52 = vcombine.high %v805_v44, %v809_v27  ;;  %v812_v53 = vld [vmem:[%s9232_s23 + $0x11d0] sm:$0xff] }
 0x313   : > { %7304 = vmatprep.subr.bf16.mxu0 %v8514_v54  ;;  %7632 = vmatprep.subr.bf16.mxu1 %v8516_v38  ;;  %v816_v54 = vld [vmem:[%s9232_s23 + $0x11f0] sm:$0xff]  ;;  %v813_v38 = vld [vmem:[%s9232_s23 + $0x11d8] sm:$0xff] }
 0x314   : > { %v8570_v60 = vcombine.high %v812_v53, %v816_v54  ;;  %v8571_v5 = vcombine.low %v813_v38, %v817_v55 }
 0x315   : > { %7296 = vmatmul.mubr.bf16.vlgmr.msra.gmra.mrb[4].mxu0 %v9549_v56  ;;  %7624 = vmatmul.mubr.bf16.vlgmr.msra.gmra.mrb[4].mxu1 %v9549_v56  ;;  %v8529_v56 = vcombine.low %v772_v63, %v776_v4  ;;  %v825_v63 = vld [vmem:[%s9232_s23 + $0x1238] sm:$0xff]  ;;  %v8569_v4 = vcombine.low %v812_v53, %v816_v54 }
 0x316   : > { %7305 = vmatpush1.bf16.msra.mxu0 %v8513_v61  ;;  %7633 = vmatpush1.bf16.msra.mxu1 %v8515_v62  ;;  %v8572_v61 = vcombine.high %v813_v38, %v817_v55  ;;  %v820_v62 = vld [vmem:[%s9232_s23 + $0x1210] sm:$0xff]  ;;  %v865_v53 = vld [vmem:[%s9232_s23 + $0x1378] sm:$0xff] }
 0x317   : > { %7306 = vmatprep.subr.bf16.mxu0 %v8522_v14  ;;  %7634 = vmatprep.subr.bf16.mxu1 %v8524_v47  ;;  %v824_v14 = vld [vmem:[%s9232_s23 + $0x1230] sm:$0xff]  ;;  %v821_v47 = vld [vmem:[%s9232_s23 + $0x1218] sm:$0xff] }
 0x318   : > { %7336 = vmatprep.mubr.bf16.mxu0 %v9562_v3  ;;  %7664 = vmatprep.mubr.bf16.mxu1 %v9562_v3  ;;  %v8539_v3 = vcombine.low %v781_v12, %v785_v13  ;;  %v8578_v6 = vcombine.high %v820_v62, %v824_v14  ;;  %v8577_v11 = vcombine.low %v820_v62, %v824_v14  ;;  %v873_v62 = vld [vmem:[%s9232_s23 + $0x13b8] sm:$0xff] }
 0x319   : > { %v8579_v12 = vcombine.low %v821_v47, %v825_v63 }
 0x31a   : > { %7307 = vmatpush1.bf16.msra.mxu0 %v8521_v7  ;;  %7635 = vmatpush1.bf16.msra.mxu1 %v8523_v8  ;;  %v8580_v7 = vcombine.high %v821_v47, %v825_v63  ;;  %v828_v8 = vld [vmem:[%s9232_s23 + $0x1250] sm:$0xff] }
 0x31b   : > { %7308 = vmatprep.subr.bf16.mxu0 %v8530_v9  ;;  %7636 = vmatprep.subr.bf16.mxu1 %v8532_v23  ;;  %v832_v9 = vld [vmem:[%s9232_s23 + $0x1270] sm:$0xff]  ;;  %v829_v23 = vld [vmem:[%s9232_s23 + $0x1258] sm:$0xff] }
 0x31c   : > { %v8586_v13 = vcombine.high %v828_v8, %v832_v9  ;;  %v8585_v25 = vcombine.low %v828_v8, %v832_v9  ;;  %v8587_v28 = vcombine.low %v829_v23, %v833_v26  ;;  %v881_v8 = vld [vmem:[%s9232_s23 + $0x13f8] sm:$0xff] }
 0x31e   : > { %7309 = vmatpush1.bf16.msra.mxu0 %v8529_v56  ;;  %7637 = vmatpush1.bf16.msra.mxu1 %v8531_v15  ;;  %v8588_v56 = vcombine.high %v829_v23, %v833_v26  ;;  %v836_v15 = vld [vmem:[%s9232_s23 + $0x1290] sm:$0xff] }
 0x31f   : > { %7310 = vmatprep.subr.bf16.mxu0 %v8538_v19  ;;  %7638 = vmatprep.subr.bf16.mxu1 %v8540_v20  ;;  %v840_v19 = vld [vmem:[%s9232_s23 + $0x12b0] sm:$0xff]  ;;  %v837_v20 = vld [vmem:[%s9232_s23 + $0x1298] sm:$0xff] }
 0x320   : > { %v8594_v30 = vcombine.high %v836_v15, %v840_v19  ;;  %v8593_v35 = vcombine.low %v836_v15, %v840_v19  ;;  %v8595_v36 = vcombine.low %v837_v20, %v841_v22  ;;  %v889_v15 = vld [vmem:[%s9232_s23 + $0x1438] sm:$0xff] }
 0x322   : > { %7311 = vmatpush1.bf16.msra.mxu0 %v8537_v31  ;;  %7639 = vmatpush1.bf16.msra.mxu1 %v8539_v3  ;;  %v8596_v31 = vcombine.high %v837_v20, %v841_v22  ;;  %v844_v3 = vld [vmem:[%s9232_s23 + $0x12d0] sm:$0xff] }
 0x323   : > { %7312 = vmatprep.subr.bf16.mxu0 %v8546_v51  ;;  %7640 = vmatprep.subr.bf16.mxu1 %v8548_v24  ;;  %v848_v51 = vld [vmem:[%s9232_s23 + $0x12f0] sm:$0xff]  ;;  %v845_v24 = vld [vmem:[%s9232_s23 + $0x12d8] sm:$0xff] }
 0x324   : > { %v8602_v1 = vcombine.high %v844_v3, %v848_v51  ;;  %v8601_v43 = vcombine.low %v844_v3, %v848_v51  ;;  %v8603_v44 = vcombine.low %v845_v24, %v849_v34  ;;  %v897_v3 = vld [vmem:[%s9232_s23 + $0x1478] sm:$0xff] }
 0x326   : > { %7313 = vmatpush1.bf16.msra.mxu0 %v8545_v37  ;;  %7641 = vmatpush1.bf16.msra.mxu1 %v8547_v39  ;;  %v8604_v37 = vcombine.high %v845_v24, %v849_v34  ;;  %v852_v39 = vld [vmem:[%s9232_s23 + $0x1310] sm:$0xff] }
 0x327   : > { %7314 = vmatprep.subr.bf16.mxu0 %v8554_v40  ;;  %7642 = vmatprep.subr.bf16.mxu1 %v8556_v33  ;;  %v856_v40 = vld [vmem:[%s9232_s23 + $0x1330] sm:$0xff]  ;;  %v853_v33 = vld [vmem:[%s9232_s23 + $0x1318] sm:$0xff] }
 0x328   : > { %v8610_v27 = vcombine.high %v852_v39, %v856_v40  ;;  %v8609_v54 = vcombine.low %v852_v39, %v856_v40  ;;  %v8611_v38 = vcombine.low %v853_v33, %v857_v42  ;;  %v905_v39 = vld [vmem:[%s9232_s23 + $0x14b8] sm:$0xff] }
 0x32a   : > { %7315 = vmatpush1.bf16.msra.mxu0 %v8553_v46  ;;  %7643 = vmatpush1.bf16.msra.mxu1 %v8555_v49  ;;  %v8612_v46 = vcombine.high %v853_v33, %v857_v42  ;;  %v860_v49 = vld [vmem:[%s9232_s23 + $0x1350] sm:$0xff] }
 0x32b   : > { %7316 = vmatprep.subr.bf16.mxu0 %v8562_v50  ;;  %7644 = vmatprep.subr.bf16.mxu1 %v8564_v52  ;;  %v864_v50 = vld [vmem:[%s9232_s23 + $0x1370] sm:$0xff]  ;;  %v861_v52 = vld [vmem:[%s9232_s23 + $0x1358] sm:$0xff] }
 0x32c   : > { %v8618_v55 = vcombine.high %v860_v49, %v864_v50  ;;  %v8617_v14 = vcombine.low %v860_v49, %v864_v50  ;;  %v8619_v47 = vcombine.low %v861_v52, %v865_v53  ;;  %v913_v49 = vld [vmem:[%s9232_s23 + $0x14f8] sm:$0xff] }
 0x32e   : > { %7317 = vmatpush1.bf16.msra.mxu0 %v8561_v21  ;;  %7645 = vmatpush1.bf16.msra.mxu1 %v8563_v57  ;;  %v8620_v21 = vcombine.high %v861_v52, %v865_v53  ;;  %v868_v57 = vld [vmem:[%s9232_s23 + $0x1390] sm:$0xff] }
 0x32f   : > { %7318 = vmatprep.subr.bf16.mxu0 %v8570_v60  ;;  %7646 = vmatprep.subr.bf16.mxu1 %v8572_v61  ;;  %v872_v60 = vld [vmem:[%s9232_s23 + $0x13b0] sm:$0xff]  ;;  %v869_v61 = vld [vmem:[%s9232_s23 + $0x1398] sm:$0xff] }
 0x330   : > { %v8626_v63 = vcombine.high %v868_v57, %v872_v60  ;;  %v8625_v9 = vcombine.low %v868_v57, %v872_v60  ;;  %v8627_v23 = vcombine.low %v869_v61, %v873_v62 }
 0x332   : > { %7319 = vmatpush1.bf16.msra.mxu0 %v8569_v4  ;;  %7647 = vmatpush1.bf16.msra.mxu1 %v8571_v5  ;;  %v8628_v4 = vcombine.high %v869_v61, %v873_v62  ;;  %v876_v5 = vld [vmem:[%s9232_s23 + $0x13d0] sm:$0xff] }
 0x333   : > { %7320 = vmatprep.subr.bf16.mxu0 %v8578_v6  ;;  %7648 = vmatprep.subr.bf16.mxu1 %v8580_v7  ;;  %v880_v6 = vld [vmem:[%s9232_s23 + $0x13f0] sm:$0xff]  ;;  %v877_v7 = vld [vmem:[%s9232_s23 + $0x13d8] sm:$0xff] }
 0x334   : > { %v8634_v26 = vcombine.high %v876_v5, %v880_v6  ;;  %v8633_v19 = vcombine.low %v876_v5, %v880_v6  ;;  %v8635_v20 = vcombine.low %v877_v7, %v881_v8  ;;  %v924_v62 = vld [vmem:[%s9232_s23 + $0x1550] sm:$0xff] }
 0x336   : > { %7321 = vmatpush1.bf16.msra.mxu0 %v8577_v11  ;;  %7649 = vmatpush1.bf16.msra.mxu1 %v8579_v12  ;;  %v8636_v11 = vcombine.high %v877_v7, %v881_v8  ;;  %v884_v12 = vld [vmem:[%s9232_s23 + $0x1410] sm:$0xff] }
 0x337   : > { %7322 = vmatprep.subr.bf16.mxu0 %v8586_v13  ;;  %7650 = vmatprep.subr.bf16.mxu1 %v8588_v56  ;;  %v888_v13 = vld [vmem:[%s9232_s23 + $0x1430] sm:$0xff]  ;;  %v885_v56 = vld [vmem:[%s9232_s23 + $0x1418] sm:$0xff] }
 0x338   : > { %v8642_v22 = vcombine.high %v884_v12, %v888_v13  ;;  %v8641_v51 = vcombine.low %v884_v12, %v888_v13  ;;  %v8643_v24 = vcombine.low %v885_v56, %v889_v15  ;;  %v932_v8 = vld [vmem:[%s9232_s23 + $0x1590] sm:$0xff] }
 0x33a   : > { %7323 = vmatpush1.bf16.msra.mxu0 %v8585_v25  ;;  %7651 = vmatpush1.bf16.msra.mxu1 %v8587_v28  ;;  %v8644_v25 = vcombine.high %v885_v56, %v889_v15  ;;  %v892_v28 = vld [vmem:[%s9232_s23 + $0x1450] sm:$0xff] }
 0x33b   : > { %7324 = vmatprep.subr.bf16.mxu0 %v8594_v30  ;;  %7652 = vmatprep.subr.bf16.mxu1 %v8596_v31  ;;  %v896_v30 = vld [vmem:[%s9232_s23 + $0x1470] sm:$0xff]  ;;  %v893_v31 = vld [vmem:[%s9232_s23 + $0x1458] sm:$0xff] }
 0x33c   : > { %v8650_v34 = vcombine.high %v892_v28, %v896_v30  ;;  %v8649_v40 = vcombine.low %v892_v28, %v896_v30  ;;  %v8651_v33 = vcombine.low %v893_v31, %v897_v3  ;;  %v940_v15 = vld [vmem:[%s9232_s23 + $0x15d0] sm:$0xff] }
 0x33e   : > { %7325 = vmatpush1.bf16.msra.mxu0 %v8593_v35  ;;  %7653 = vmatpush1.bf16.msra.mxu1 %v8595_v36  ;;  %v8652_v35 = vcombine.high %v893_v31, %v897_v3  ;;  %v900_v36 = vld [vmem:[%s9232_s23 + $0x1490] sm:$0xff] }
 0x33f   : > { %7326 = vmatprep.subr.bf16.mxu0 %v8602_v1  ;;  %7654 = vmatprep.subr.bf16.mxu1 %v8604_v37  ;;  %v904_v1 = vld [vmem:[%s9232_s23 + $0x14b0] sm:$0xff]  ;;  %v901_v37 = vld [vmem:[%s9232_s23 + $0x1498] sm:$0xff] }
 0x340   : > { %v8658_v42 = vcombine.high %v900_v36, %v904_v1  ;;  %v8659_v50 = vcombine.low %v901_v37, %v905_v39  ;;  %v948_v3 = vld [vmem:[%s9232_s23 + $0x1610] sm:$0xff] }
 0x342   : > { %7327 = vmatpush1.bf16.msra.mxu0 %v8601_v43  ;;  %7655 = vmatpush1.bf16.msra.mxu1 %v8603_v44  ;;  %v8660_v43 = vcombine.high %v901_v37, %v905_v39  ;;  %v908_v44 = vld [vmem:[%s9232_s23 + $0x14d0] sm:$0xff] }
 0x343   : > { %7328 = vmatprep.subr.bf16.mxu0 %v8610_v27  ;;  %7656 = vmatprep.subr.bf16.mxu1 %v8612_v46  ;;  %v912_v27 = vld [vmem:[%s9232_s23 + $0x14f0] sm:$0xff]  ;;  %v909_v46 = vld [vmem:[%s9232_s23 + $0x14d8] sm:$0xff] }
 0x344   : > { %v8666_v52 = vcombine.high %v908_v44, %v912_v27  ;;  %v8668_v53 = vcombine.high %v909_v46, %v913_v49  ;;  %v8665_v57 = vcombine.low %v908_v44, %v912_v27  ;;  %v956_v39 = vld [vmem:[%s9232_s23 + $0x1650] sm:$0xff] }
 0x346   : > { %7329 = vmatpush1.bf16.msra.mxu0 %v8609_v54  ;;  %7657 = vmatpush1.bf16.msra.mxu1 %v8611_v38  ;;  %v916_v54 = vld [vmem:[%s9232_s23 + $0x1510] sm:$0xff] }
 0x347   : > { %7330 = vmatprep.subr.bf16.mxu0 %v8618_v55  ;;  %7658 = vmatprep.subr.bf16.mxu1 %v8620_v21  ;;  %v920_v38 = vld [vmem:[%s9232_s23 + $0x1530] sm:$0xff]  ;;  %v917_v55 = vld [vmem:[%s9232_s23 + $0x1518] sm:$0xff] }
 0x348   : > { %v921_v21 = vld [vmem:[%s9232_s23 + $0x1538] sm:$0xff]  ;;  %v8674_v60 = vcombine.high %v916_v54, %v920_v38 }
 0x349   : > { %v8676_v61 = vcombine.high %v917_v55, %v921_v21  ;;  %v8675_v5 = vcombine.low %v917_v55, %v921_v21  ;;  %v972_v21 = vld [vmem:[%s9232_s23 + $0x16d0] sm:$0xff] }
 0x34a   : > { %7331 = vmatpush1.bf16.msra.mxu0 %v8617_v14  ;;  %7659 = vmatpush1.bf16.msra.mxu1 %v8619_v47  ;;  %v928_v14 = vld [vmem:[%s9232_s23 + $0x1570] sm:$0xff]  ;;  %v925_v47 = vld [vmem:[%s9232_s23 + $0x1558] sm:$0xff] }
 0x34b   : > { %7332 = vmatprep.subr.bf16.mxu0 %v8626_v63  ;;  %7660 = vmatprep.subr.bf16.mxu1 %v8628_v4  ;;  %v929_v63 = vld [vmem:[%s9232_s23 + $0x1578] sm:$0xff]  ;;  %v8673_v4 = vcombine.low %v916_v54, %v920_v38  ;;  %v8682_v6 = vcombine.high %v924_v62, %v928_v14 }
 0x34c   : > { %v8684_v7 = vcombine.high %v925_v47, %v929_v63  ;;  %v8683_v12 = vcombine.low %v925_v47, %v929_v63  ;;  %v980_v63 = vld [vmem:[%s9232_s23 + $0x1710] sm:$0xff] }
 0x34e   : > { %7333 = vmatpush1.bf16.msra.mxu0 %v8625_v9  ;;  %7661 = vmatpush1.bf16.msra.mxu1 %v8627_v23  ;;  %v936_v9 = vld [vmem:[%s9232_s23 + $0x15b0] sm:$0xff]  ;;  %v933_v23 = vld [vmem:[%s9232_s23 + $0x1598] sm:$0xff] }
 0x34f   : > { %7334 = vmatprep.subr.bf16.mxu0 %v8634_v26  ;;  %7662 = vmatprep.subr.bf16.mxu1 %v8636_v11  ;;  %v937_v26 = vld [vmem:[%s9232_s23 + $0x15b8] sm:$0xff]  ;;  %v8681_v11 = vcombine.low %v924_v62, %v928_v14  ;;  %v8690_v13 = vcombine.high %v932_v8, %v936_v9 }
 0x350   : > { %v8692_v56 = vcombine.high %v933_v23, %v937_v26  ;;  %v8691_v28 = vcombine.low %v933_v23, %v937_v26  ;;  %v988_v26 = vld [vmem:[%s9232_s23 + $0x1750] sm:$0xff] }
 0x352   : > { %7335 = vmatpush1.bf16.msra.mxu0 %v8633_v19  ;;  %7663 = vmatpush1.bf16.msra.mxu1 %v8635_v20  ;;  %v944_v19 = vld [vmem:[%s9232_s23 + $0x15f0] sm:$0xff]  ;;  %v941_v20 = vld [vmem:[%s9232_s23 + $0x15d8] sm:$0xff] }
 0x353   : > { %7345 = vmatprep.subr.bf16.mxu0 %v8642_v22  ;;  %7673 = vmatprep.subr.bf16.mxu1 %v8644_v25  ;;  %v945_v22 = vld [vmem:[%s9232_s23 + $0x15f8] sm:$0xff]  ;;  %v8689_v25 = vcombine.low %v932_v8, %v936_v9  ;;  %v8698_v30 = vcombine.high %v940_v15, %v944_v19 }
 0x354   : > { %v8700_v31 = vcombine.high %v941_v20, %v945_v22 }
 0x355   : > { %7337 = vmatmul.mubr.bf16.vlgmr.msra.gmra.mrb[4].mxu0 %v9630_v18  ;;  %7665 = vmatmul.mubr.bf16.vlgmr.msra.gmra.mrb[4].mxu1 %v9630_v18  ;;  %v8657_v18 = vcombine.low %v900_v36, %v904_v1  ;;  %v8699_v36 = vcombine.low %v941_v20, %v945_v22  ;;  %v996_v22 = vld [vmem:[%s9232_s23 + $0x1790] sm:$0xff] }
 0x356   : > { %7346 = vmatpush1.bf16.msra.mxu0 %v8641_v51  ;;  %7674 = vmatpush1.bf16.msra.mxu1 %v8643_v24  ;;  %v952_v51 = vld [vmem:[%s9232_s23 + $0x1630] sm:$0xff]  ;;  %v949_v24 = vld [vmem:[%s9232_s23 + $0x1618] sm:$0xff] }
 0x357   : > { %7347 = vmatprep.subr.bf16.mxu0 %v8650_v34  ;;  %7675 = vmatprep.subr.bf16.mxu1 %v8652_v35  ;;  %v953_v34 = vld [vmem:[%s9232_s23 + $0x1638] sm:$0xff]  ;;  %v8697_v35 = vcombine.low %v940_v15, %v944_v19  ;;  %v8706_v1 = vcombine.high %v948_v3, %v952_v51 }
 0x358   : > { %7377 = vmatprep.mubr.bf16.mxu0 %v9643_v29  ;;  %7705 = vmatprep.mubr.bf16.mxu1 %v9643_v29  ;;  %v8667_v29 = vcombine.low %v909_v46, %v913_v49  ;;  %v8708_v37 = vcombine.high %v949_v24, %v953_v34  ;;  %v8707_v44 = vcombine.low %v949_v24, %v953_v34  ;;  %v964_v49 = vld [vmem:[%s9232_s23 + $0x1690] sm:$0xff] }
 0x359   : > { %v1004_v34 = vld [vmem:[%s9232_s23 + $0x17d0] sm:$0xff] }
 0x35a   : > { %7348 = vmatpush1.bf16.msra.mxu0 %v8649_v40  ;;  %7676 = vmatpush1.bf16.msra.mxu1 %v8651_v33  ;;  %v960_v40 = vld [vmem:[%s9232_s23 + $0x1670] sm:$0xff]  ;;  %v957_v33 = vld [vmem:[%s9232_s23 + $0x1658] sm:$0xff] }
 0x35b   : > { %7349 = vmatprep.subr.bf16.mxu0 %v8658_v42  ;;  %7677 = vmatprep.subr.bf16.mxu1 %v8660_v43  ;;  %v961_v42 = vld [vmem:[%s9232_s23 + $0x1678] sm:$0xff]  ;;  %v8705_v43 = vcombine.low %v948_v3, %v952_v51  ;;  %v8714_v27 = vcombine.high %v956_v39, %v960_v40 }
 0x35c   : > { %v8716_v46 = vcombine.high %v957_v33, %v961_v42  ;;  %v8715_v54 = vcombine.low %v957_v33, %v961_v42  ;;  %v1012_v42 = vld [vmem:[%s9232_s23 + $0x1810] sm:$0xff] }
 0x35e   : > { %7350 = vmatpush1.bf16.msra.mxu0 %v8657_v18  ;;  %7678 = vmatpush1.bf16.msra.mxu1 %v8659_v50  ;;  %v968_v18 = vld [vmem:[%s9232_s23 + $0x16b0] sm:$0xff]  ;;  %v965_v50 = vld [vmem:[%s9232_s23 + $0x1698] sm:$0xff] }
 0x35f   : > { %7351 = vmatprep.subr.bf16.mxu0 %v8666_v52  ;;  %7679 = vmatprep.subr.bf16.mxu1 %v8668_v53  ;;  %v969_v52 = vld [vmem:[%s9232_s23 + $0x16b8] sm:$0xff]  ;;  %v8713_v53 = vcombine.low %v956_v39, %v960_v40  ;;  %v8722_v38 = vcombine.high %v964_v49, %v968_v18 }
 0x360   : > { %v8724_v55 = vcombine.high %v965_v50, %v969_v52  ;;  %v8723_v62 = vcombine.low %v965_v50, %v969_v52  ;;  %v1020_v52 = vld [vmem:[%s9232_s23 + $0x1850] sm:$0xff] }
 0x362   : > { %7352 = vmatpush1.bf16.msra.mxu0 %v8665_v57  ;;  %7680 = vmatpush1.bf16.msra.mxu1 %v8667_v29  ;;  %v976_v57 = vld [vmem:[%s9232_s23 + $0x16f0] sm:$0xff]  ;;  %v973_v29 = vld [vmem:[%s9232_s23 + $0x16d8] sm:$0xff] }
 0x363   : > { %7353 = vmatprep.subr.bf16.mxu0 %v8674_v60  ;;  %7681 = vmatprep.subr.bf16.mxu1 %v8676_v61  ;;  %v977_v60 = vld [vmem:[%s9232_s23 + $0x16f8] sm:$0xff]  ;;  %v8721_v61 = vcombine.low %v964_v49, %v968_v18  ;;  %v8730_v14 = vcombine.high %v972_v21, %v976_v57 }
 0x364   : > { %v8732_v47 = vcombine.high %v973_v29, %v977_v60  ;;  %v8731_v8 = vcombine.low %v973_v29, %v977_v60  ;;  %v1028_v60 = vld [vmem:[%s9232_s23 + $0x1890] sm:$0xff] }
 0x366   : > { %7354 = vmatpush1.bf16.msra.mxu0 %v8673_v4  ;;  %7682 = vmatpush1.bf16.msra.mxu1 %v8675_v5  ;;  %v984_v4 = vld [vmem:[%s9232_s23 + $0x1730] sm:$0xff]  ;;  %v981_v5 = vld [vmem:[%s9232_s23 + $0x1718] sm:$0xff] }
 0x367   : > { %7355 = vmatprep.subr.bf16.mxu0 %v8682_v6  ;;  %7683 = vmatprep.subr.bf16.mxu1 %v8684_v7  ;;  %v985_v6 = vld [vmem:[%s9232_s23 + $0x1738] sm:$0xff]  ;;  %v8729_v7 = vcombine.low %v972_v21, %v976_v57  ;;  %v8738_v9 = vcombine.high %v980_v63, %v984_v4 }
 0x368   : > { %v8740_v23 = vcombine.high %v981_v5, %v985_v6  ;;  %v8739_v15 = vcombine.low %v981_v5, %v985_v6  ;;  %v1036_v6 = vld [vmem:[%s9232_s23 + $0x18d0] sm:$0xff] }
 0x36a   : > { %7356 = vmatpush1.bf16.msra.mxu0 %v8681_v11  ;;  %7684 = vmatpush1.bf16.msra.mxu1 %v8683_v12  ;;  %v992_v11 = vld [vmem:[%s9232_s23 + $0x1770] sm:$0xff]  ;;  %v989_v12 = vld [vmem:[%s9232_s23 + $0x1758] sm:$0xff] }
 0x36b   : > { %7357 = vmatprep.subr.bf16.mxu0 %v8690_v13  ;;  %7685 = vmatprep.subr.bf16.mxu1 %v8692_v56  ;;  %v993_v13 = vld [vmem:[%s9232_s23 + $0x1778] sm:$0xff]  ;;  %v8737_v56 = vcombine.low %v980_v63, %v984_v4  ;;  %v8746_v19 = vcombine.high %v988_v26, %v992_v11 }
 0x36c   : > { %v8748_v20 = vcombine.high %v989_v12, %v993_v13  ;;  %v8747_v3 = vcombine.low %v989_v12, %v993_v13  ;;  %v1044_v12 = vld [vmem:[%s9232_s23 + $0x1910] sm:$0xff] }
 0x36d   : > { %v1048_v13 = vld [vmem:[%s9232_s23 + $0x1930] sm:$0xff] }
 0x36e   : > { %7358 = vmatpush1.bf16.msra.mxu0 %v8689_v25  ;;  %7686 = vmatpush1.bf16.msra.mxu1 %v8691_v28  ;;  %v1000_v25 = vld [vmem:[%s9232_s23 + $0x17b0] sm:$0xff]  ;;  %v997_v28 = vld [vmem:[%s9232_s23 + $0x1798] sm:$0xff] }
 0x36f   : > { %7359 = vmatprep.subr.bf16.mxu0 %v8698_v30  ;;  %7687 = vmatprep.subr.bf16.mxu1 %v8700_v31  ;;  %v1001_v30 = vld [vmem:[%s9232_s23 + $0x17b8] sm:$0xff]  ;;  %v8745_v31 = vcombine.low %v988_v26, %v992_v11  ;;  %v8754_v51 = vcombine.high %v996_v22, %v1000_v25 }
 0x370   : > { %v8756_v24 = vcombine.high %v997_v28, %v1001_v30  ;;  %v8755_v39 = vcombine.low %v997_v28, %v1001_v30  ;;  %v1056_v28 = vld [vmem:[%s9232_s23 + $0x1970] sm:$0xff]  ;;  %v1053_v30 = vld [vmem:[%s9232_s23 + $0x1958] sm:$0xff] }
 0x372   : > { %7360 = vmatpush1.bf16.msra.mxu0 %v8697_v35  ;;  %7688 = vmatpush1.bf16.msra.mxu1 %v8699_v36  ;;  %v1008_v35 = vld [vmem:[%s9232_s23 + $0x17f0] sm:$0xff]  ;;  %v1005_v36 = vld [vmem:[%s9232_s23 + $0x17d8] sm:$0xff] }
 0x373   : > { %7361 = vmatprep.subr.bf16.mxu0 %v8706_v1  ;;  %7689 = vmatprep.subr.bf16.mxu1 %v8708_v37  ;;  %v1009_v1 = vld [vmem:[%s9232_s23 + $0x17f8] sm:$0xff]  ;;  %v8753_v37 = vcombine.low %v996_v22, %v1000_v25  ;;  %v8762_v40 = vcombine.high %v1004_v34, %v1008_v35  ;;  %v1052_v25 = vld [vmem:[%s9232_s23 + $0x1950] sm:$0xff] }
 0x374   : > { %v8764_v33 = vcombine.high %v1005_v36, %v1009_v1  ;;  %v8763_v49 = vcombine.low %v1005_v36, %v1009_v1  ;;  %v1064_v36 = vld [vmem:[%s9232_s23 + $0x19b0] sm:$0xff]  ;;  %v1061_v1 = vld [vmem:[%s9232_s23 + $0x1998] sm:$0xff] }
 0x376   : > { %7362 = vmatpush1.bf16.msra.mxu0 %v8705_v43  ;;  %7690 = vmatpush1.bf16.msra.mxu1 %v8707_v44  ;;  %v1016_v43 = vld [vmem:[%s9232_s23 + $0x1830] sm:$0xff]  ;;  %v1013_v44 = vld [vmem:[%s9232_s23 + $0x1818] sm:$0xff] }
 0x377   : > { %7363 = vmatprep.subr.bf16.mxu0 %v8714_v27  ;;  %7691 = vmatprep.subr.bf16.mxu1 %v8716_v46  ;;  %v1017_v27 = vld [vmem:[%s9232_s23 + $0x1838] sm:$0xff]  ;;  %v8761_v46 = vcombine.low %v1004_v34, %v1008_v35  ;;  %v8770_v18 = vcombine.high %v1012_v42, %v1016_v43  ;;  %v1060_v35 = vld [vmem:[%s9232_s23 + $0x1990] sm:$0xff] }
 0x378   : > { %v8772_v50 = vcombine.high %v1013_v44, %v1017_v27  ;;  %v8771_v21 = vcombine.low %v1013_v44, %v1017_v27  ;;  %v1072_v44 = vld [vmem:[%s9232_s23 + $0x19f0] sm:$0xff]  ;;  %v1069_v27 = vld [vmem:[%s9232_s23 + $0x19d8] sm:$0xff] }
 0x37a   : > { %7364 = vmatpush1.bf16.msra.mxu0 %v8713_v53  ;;  %7692 = vmatpush1.bf16.msra.mxu1 %v8715_v54  ;;  %v1024_v53 = vld [vmem:[%s9232_s23 + $0x1870] sm:$0xff]  ;;  %v1021_v54 = vld [vmem:[%s9232_s23 + $0x1858] sm:$0xff] }
 0x37b   : > { %7365 = vmatprep.subr.bf16.mxu0 %v8722_v38  ;;  %7693 = vmatprep.subr.bf16.mxu1 %v8724_v55  ;;  %v1025_v38 = vld [vmem:[%s9232_s23 + $0x1878] sm:$0xff]  ;;  %v8769_v55 = vcombine.low %v1012_v42, %v1016_v43  ;;  %v8778_v57 = vcombine.high %v1020_v52, %v1024_v53  ;;  %v1068_v43 = vld [vmem:[%s9232_s23 + $0x19d0] sm:$0xff] }
 0x37c   : > { %v8780_v29 = vcombine.high %v1021_v54, %v1025_v38  ;;  %v8779_v63 = vcombine.low %v1021_v54, %v1025_v38  ;;  %v1080_v54 = vld [vmem:[%s9232_s23 + $0x1a30] sm:$0xff]  ;;  %v1077_v38 = vld [vmem:[%s9232_s23 + $0x1a18] sm:$0xff] }
 0x37e   : > { %7366 = vmatpush1.bf16.msra.mxu0 %v8721_v61  ;;  %7694 = vmatpush1.bf16.msra.mxu1 %v8723_v62  ;;  %v1032_v61 = vld [vmem:[%s9232_s23 + $0x18b0] sm:$0xff]  ;;  %v1029_v62 = vld [vmem:[%s9232_s23 + $0x1898] sm:$0xff] }
 0x37f   : > { %7367 = vmatprep.subr.bf16.mxu0 %v8730_v14  ;;  %7695 = vmatprep.subr.bf16.mxu1 %v8732_v47  ;;  %v1033_v14 = vld [vmem:[%s9232_s23 + $0x18b8] sm:$0xff]  ;;  %v8777_v47 = vcombine.low %v1020_v52, %v1024_v53  ;;  %v8786_v4 = vcombine.high %v1028_v60, %v1032_v61  ;;  %v1076_v53 = vld [vmem:[%s9232_s23 + $0x1a10] sm:$0xff] }
 0x380   : > { %v8788_v5 = vcombine.high %v1029_v62, %v1033_v14 }
 0x382   : > { %7368 = vmatpush1.bf16.msra.mxu0 %v8729_v7  ;;  %7696 = vmatpush1.bf16.msra.mxu1 %v8731_v8  ;;  %v1040_v7 = vld [vmem:[%s9232_s23 + $0x18f0] sm:$0xff]  ;;  %v1037_v8 = vld [vmem:[%s9232_s23 + $0x18d8] sm:$0xff] }
 0x383   : > { %7369 = vmatprep.subr.bf16.mxu0 %v8738_v9  ;;  %7697 = vmatprep.subr.bf16.mxu1 %v8740_v23  ;;  %v1041_v9 = vld [vmem:[%s9232_s23 + $0x18f8] sm:$0xff]  ;;  %v8787_v23 = vcombine.low %v1029_v62, %v1033_v14  ;;  %v8794_v26 = vcombine.high %v1036_v6, %v1040_v7  ;;  %v1088_v62 = vld [vmem:[%s9232_s23 + $0x1a70] sm:$0xff] }
 0x384   : > { %v8796_v11 = vcombine.high %v1037_v8, %v1041_v9  ;;  %v1085_v14 = vld [vmem:[%s9232_s23 + $0x1a58] sm:$0xff] }
 0x386   : > { %7370 = vmatpush1.bf16.msra.mxu0 %v8737_v56  ;;  %7698 = vmatpush1.bf16.msra.mxu1 %v8739_v15  ;;  %v1045_v56 = vld [vmem:[%s9232_s23 + $0x1918] sm:$0xff] }
 0x387   : > { %7371 = vmatprep.subr.bf16.mxu0 %v8746_v19  ;;  %7699 = vmatprep.subr.bf16.mxu1 %v8748_v20  ;;  %v1049_v15 = vld [vmem:[%s9232_s23 + $0x1938] sm:$0xff]  ;;  %v8793_v19 = vcombine.low %v1036_v6, %v1040_v7  ;;  %v8802_v20 = vcombine.high %v1044_v12, %v1048_v13  ;;  %v1092_v7 = vld [vmem:[%s9232_s23 + $0x1a90] sm:$0xff] }
 0x388   : > { %v8804_v22 = vcombine.high %v1045_v56, %v1049_v15 }
 0x38a   : > { %7372 = vmatpush1.bf16.msra.mxu0 %v8745_v31  ;;  %7700 = vmatpush1.bf16.msra.mxu1 %v8747_v3  ;;  %v1057_v31 = vld [vmem:[%s9232_s23 + $0x1978] sm:$0xff]  ;;  %v8801_v3 = vcombine.low %v1044_v12, %v1048_v13  ;;  %v1100_v13 = vld [vmem:[%s9232_s23 + $0x1ad0] sm:$0xff] }
 0x38b   : > { %7373 = vmatprep.subr.bf16.mxu0 %v8754_v51  ;;  %7701 = vmatprep.subr.bf16.mxu1 %v8756_v24  ;;  %v8803_v51 = vcombine.low %v1045_v56, %v1049_v15  ;;  %v8810_v24 = vcombine.high %v1052_v25, %v1056_v28  ;;  %v8812_v34 = vcombine.high %v1053_v30, %v1057_v31  ;;  %v1104_v56 = vld [vmem:[%s9232_s23 + $0x1af0] sm:$0xff]  ;;  %v1101_v15 = vld [vmem:[%s9232_s23 + $0x1ad8] sm:$0xff] }
 0x38e   : > { %7374 = vmatpush1.bf16.msra.mxu0 %v8753_v37  ;;  %7702 = vmatpush1.bf16.msra.mxu1 %v8755_v39  ;;  %v1065_v37 = vld [vmem:[%s9232_s23 + $0x19b8] sm:$0xff]  ;;  %v8809_v39 = vcombine.low %v1052_v25, %v1056_v28  ;;  %v1108_v28 = vld [vmem:[%s9232_s23 + $0x1b10] sm:$0xff] }
 0x38f   : > { %7375 = vmatprep.subr.bf16.mxu0 %v8762_v40  ;;  %7703 = vmatprep.subr.bf16.mxu1 %v8764_v33  ;;  %v8811_v40 = vcombine.low %v1053_v30, %v1057_v31  ;;  %v8818_v33 = vcombine.high %v1060_v35, %v1064_v36  ;;  %v8820_v42 = vcombine.high %v1061_v1, %v1065_v37  ;;  %v1112_v30 = vld [vmem:[%s9232_s23 + $0x1b30] sm:$0xff]  ;;  %v1109_v31 = vld [vmem:[%s9232_s23 + $0x1b18] sm:$0xff] }
 0x392   : > { %7376 = vmatpush1.bf16.msra.mxu0 %v8761_v46  ;;  %7704 = vmatpush1.bf16.msra.mxu1 %v8763_v49  ;;  %v1073_v46 = vld [vmem:[%s9232_s23 + $0x19f8] sm:$0xff]  ;;  %v8817_v49 = vcombine.low %v1060_v35, %v1064_v36  ;;  %v1116_v36 = vld [vmem:[%s9232_s23 + $0x1b50] sm:$0xff] }
 0x393   : > { %7386 = vmatprep.subr.bf16.mxu0 %v8770_v18  ;;  %7714 = vmatprep.subr.bf16.mxu1 %v8772_v50  ;;  %v8819_v18 = vcombine.low %v1061_v1, %v1065_v37  ;;  %v8826_v50 = vcombine.high %v1068_v43, %v1072_v44  ;;  %v8828_v52 = vcombine.high %v1069_v27, %v1073_v46  ;;  %v1120_v1 = vld [vmem:[%s9232_s23 + $0x1b70] sm:$0xff]  ;;  %v1117_v37 = vld [vmem:[%s9232_s23 + $0x1b58] sm:$0xff] }
 0x395   : > { %7378 = vmatmul.mubr.bf16.vlgmr.msra.gmra.mrb[4].mxu0 %v9711_v48  ;;  %7706 = vmatmul.mubr.bf16.vlgmr.msra.gmra.mrb[4].mxu1 %v9711_v48  ;;  %v8785_v48 = vcombine.low %v1028_v60, %v1032_v61  ;;  %v1084_v61 = vld [vmem:[%s9232_s23 + $0x1a50] sm:$0xff] }
 0x396   : > { %7387 = vmatpush1.bf16.msra.mxu0 %v8769_v55  ;;  %7715 = vmatpush1.bf16.msra.mxu1 %v8771_v21  ;;  %v1081_v55 = vld [vmem:[%s9232_s23 + $0x1a38] sm:$0xff]  ;;  %v8825_v21 = vcombine.low %v1068_v43, %v1072_v44  ;;  %v1124_v44 = vld [vmem:[%s9232_s23 + $0x1b90] sm:$0xff] }
 0x397   : > { %7388 = vmatprep.subr.bf16.mxu0 %v8778_v57  ;;  %7716 = vmatprep.subr.bf16.mxu1 %v8780_v29  ;;  %v8827_v57 = vcombine.low %v1069_v27, %v1073_v46  ;;  %v8834_v29 = vcombine.high %v1076_v53, %v1080_v54  ;;  %v8836_v60 = vcombine.high %v1077_v38, %v1081_v55  ;;  %v1128_v27 = vld [vmem:[%s9232_s23 + $0x1bb0] sm:$0xff]  ;;  %v1125_v46 = vld [vmem:[%s9232_s23 + $0x1b98] sm:$0xff] }
 0x398   : > { %7418 = vmatprep.mubr.bf16.mxu0 %v9724_v58  ;;  %7746 = vmatprep.mubr.bf16.mxu1 %v9724_v58  ;;  %v8795_v58 = vcombine.low %v1037_v8, %v1041_v9  ;;  %v1096_v8 = vld [vmem:[%s9232_s23 + $0x1ab0] sm:$0xff]  ;;  %v1093_v9 = vld [vmem:[%s9232_s23 + $0x1a98] sm:$0xff] }
 0x39a   : > { %7389 = vmatpush1.bf16.msra.mxu0 %v8777_v47  ;;  %7717 = vmatpush1.bf16.msra.mxu1 %v8779_v63  ;;  %v1089_v47 = vld [vmem:[%s9232_s23 + $0x1a78] sm:$0xff]  ;;  %v8833_v63 = vcombine.low %v1076_v53, %v1080_v54  ;;  %v1132_v54 = vld [vmem:[%s9232_s23 + $0x1bd0] sm:$0xff] }
 0x39b   : > { %7390 = vmatprep.subr.bf16.mxu0 %v8786_v4  ;;  %7718 = vmatprep.subr.bf16.mxu1 %v8788_v5  ;;  %v8835_v4 = vcombine.low %v1077_v38, %v1081_v55  ;;  %v8842_v5 = vcombine.high %v1084_v61, %v1088_v62  ;;  %v8844_v6 = vcombine.high %v1085_v14, %v1089_v47  ;;  %v1136_v38 = vld [vmem:[%s9232_s23 + $0x1bf0] sm:$0xff]  ;;  %v1133_v55 = vld [vmem:[%s9232_s23 + $0x1bd8] sm:$0xff] }
 0x39e   : > { %7391 = vmatpush1.bf16.msra.mxu0 %v8785_v48  ;;  %7719 = vmatpush1.bf16.msra.mxu1 %v8787_v23  ;;  %v1097_v48 = vld [vmem:[%s9232_s23 + $0x1ab8] sm:$0xff]  ;;  %v8841_v23 = vcombine.low %v1084_v61, %v1088_v62  ;;  %v1140_v62 = vld [vmem:[%s9232_s23 + $0x1c10] sm:$0xff] }
 0x39f   : > { %7392 = vmatprep.subr.bf16.mxu0 %v8794_v26  ;;  %7720 = vmatprep.subr.bf16.mxu1 %v8796_v11  ;;  %v8843_v26 = vcombine.low %v1085_v14, %v1089_v47  ;;  %v8850_v11 = vcombine.high %v1092_v7, %v1096_v8  ;;  %v8852_v12 = vcombine.high %v1093_v9, %v1097_v48  ;;  %v1144_v14 = vld [vmem:[%s9232_s23 + $0x1c30] sm:$0xff]  ;;  %v1141_v47 = vld [vmem:[%s9232_s23 + $0x1c18] sm:$0xff] }
 0x3a2   : > { %7393 = vmatpush1.bf16.msra.mxu0 %v8793_v19  ;;  %7721 = vmatpush1.bf16.msra.mxu1 %v8795_v58  ;;  %v1105_v19 = vld [vmem:[%s9232_s23 + $0x1af8] sm:$0xff]  ;;  %v8849_v58 = vcombine.low %v1092_v7, %v1096_v8  ;;  %v1148_v8 = vld [vmem:[%s9232_s23 + $0x1c50] sm:$0xff] }
 0x3a3   : > { %7394 = vmatprep.subr.bf16.mxu0 %v8802_v20  ;;  %7722 = vmatprep.subr.bf16.mxu1 %v8804_v22  ;;  %v8851_v20 = vcombine.low %v1093_v9, %v1097_v48  ;;  %v8858_v22 = vcombine.high %v1100_v13, %v1104_v56  ;;  %v8860_v25 = vcombine.high %v1101_v15, %v1105_v19  ;;  %v1152_v9 = vld [vmem:[%s9232_s23 + $0x1c70] sm:$0xff]  ;;  %v1149_v48 = vld [vmem:[%s9232_s23 + $0x1c58] sm:$0xff] }
 0x3a6   : > { %7395 = vmatpush1.bf16.msra.mxu0 %v8801_v3  ;;  %7723 = vmatpush1.bf16.msra.mxu1 %v8803_v51  ;;  %v1113_v3 = vld [vmem:[%s9232_s23 + $0x1b38] sm:$0xff]  ;;  %v8857_v51 = vcombine.low %v1100_v13, %v1104_v56  ;;  %v1156_v56 = vld [vmem:[%s9232_s23 + $0x1c90] sm:$0xff] }
 0x3a7   : > { %7396 = vmatprep.subr.bf16.mxu0 %v8810_v24  ;;  %7724 = vmatprep.subr.bf16.mxu1 %v8812_v34  ;;  %v8859_v24 = vcombine.low %v1101_v15, %v1105_v19  ;;  %v8866_v34 = vcombine.high %v1108_v28, %v1112_v30  ;;  %v8868_v35 = vcombine.high %v1109_v31, %v1113_v3  ;;  %v1160_v15 = vld [vmem:[%s9232_s23 + $0x1cb0] sm:$0xff]  ;;  %v1157_v19 = vld [vmem:[%s9232_s23 + $0x1c98] sm:$0xff] }
 0x3aa   : > { %7397 = vmatpush1.bf16.msra.mxu0 %v8809_v39  ;;  %7725 = vmatpush1.bf16.msra.mxu1 %v8811_v40  ;;  %v1121_v39 = vld [vmem:[%s9232_s23 + $0x1b78] sm:$0xff]  ;;  %v8865_v40 = vcombine.low %v1108_v28, %v1112_v30  ;;  %v1164_v30 = vld [vmem:[%s9232_s23 + $0x1cd0] sm:$0xff] }
 0x3ab   : > { %7398 = vmatprep.subr.bf16.mxu0 %v8818_v33  ;;  %7726 = vmatprep.subr.bf16.mxu1 %v8820_v42  ;;  %v8867_v33 = vcombine.low %v1109_v31, %v1113_v3  ;;  %v8874_v42 = vcombine.high %v1116_v36, %v1120_v1  ;;  %v8876_v43 = vcombine.high %v1117_v37, %v1121_v39  ;;  %v1168_v31 = vld [vmem:[%s9232_s23 + $0x1cf0] sm:$0xff]  ;;  %v1165_v3 = vld [vmem:[%s9232_s23 + $0x1cd8] sm:$0xff] }
 0x3ae   : > { %7399 = vmatpush1.bf16.msra.mxu0 %v8817_v49  ;;  %7727 = vmatpush1.bf16.msra.mxu1 %v8819_v18  ;;  %v1129_v49 = vld [vmem:[%s9232_s23 + $0x1bb8] sm:$0xff]  ;;  %v8873_v18 = vcombine.low %v1116_v36, %v1120_v1  ;;  %v1172_v36 = vld [vmem:[%s9232_s23 + $0x1d10] sm:$0xff] }
 0x3af   : > { %7400 = vmatprep.subr.bf16.mxu0 %v8826_v50  ;;  %7728 = vmatprep.subr.bf16.mxu1 %v8828_v52  ;;  %v8875_v50 = vcombine.low %v1117_v37, %v1121_v39  ;;  %v8882_v52 = vcombine.high %v1124_v44, %v1128_v27  ;;  %v8884_v53 = vcombine.high %v1125_v46, %v1129_v49  ;;  %v1176_v1 = vld [vmem:[%s9232_s23 + $0x1d30] sm:$0xff]  ;;  %v1173_v37 = vld [vmem:[%s9232_s23 + $0x1d18] sm:$0xff] }
 0x3b0   : > { %v1177_v39 = vld [vmem:[%s9232_s23 + $0x1d38] sm:$0xff] }
 0x3b2   : > { %7401 = vmatpush1.bf16.msra.mxu0 %v8825_v21  ;;  %7729 = vmatpush1.bf16.msra.mxu1 %v8827_v57  ;;  %v1137_v21 = vld [vmem:[%s9232_s23 + $0x1bf8] sm:$0xff]  ;;  %v8881_v57 = vcombine.low %v1124_v44, %v1128_v27  ;;  %v1184_v44 = vld [vmem:[%s9232_s23 + $0x1d70] sm:$0xff] }
 0x3b3   : > { %7402 = vmatprep.subr.bf16.mxu0 %v8834_v29  ;;  %7730 = vmatprep.subr.bf16.mxu1 %v8836_v60  ;;  %v8883_v29 = vcombine.low %v1125_v46, %v1129_v49  ;;  %v8890_v60 = vcombine.high %v1132_v54, %v1136_v38  ;;  %v8892_v61 = vcombine.high %v1133_v55, %v1137_v21  ;;  %v1181_v27 = vld [vmem:[%s9232_s23 + $0x1d58] sm:$0xff] }
 0x3b4   : > { %v1185_v46 = vld [vmem:[%s9232_s23 + $0x1d78] sm:$0xff]  ;;  %v8929_v49 = vcombine.low %v1172_v36, %v1176_v1 }
 0x3b6   : > { %7403 = vmatpush1.bf16.msra.mxu0 %v8833_v63  ;;  %7731 = vmatpush1.bf16.msra.mxu1 %v8835_v4  ;;  %v1145_v63 = vld [vmem:[%s9232_s23 + $0x1c38] sm:$0xff]  ;;  %v8889_v4 = vcombine.low %v1132_v54, %v1136_v38  ;;  %v1192_v54 = vld [vmem:[%s9232_s23 + $0x1db0] sm:$0xff] }
 0x3b7   : > { %7404 = vmatprep.subr.bf16.mxu0 %v8842_v5  ;;  %7732 = vmatprep.subr.bf16.mxu1 %v8844_v6  ;;  %v8891_v5 = vcombine.low %v1133_v55, %v1137_v21  ;;  %v8898_v6 = vcombine.high %v1140_v62, %v1144_v14  ;;  %v8900_v7 = vcombine.high %v1141_v47, %v1145_v63  ;;  %v1189_v38 = vld [vmem:[%s9232_s23 + $0x1d98] sm:$0xff] }
 0x3b8   : > { %v1193_v55 = vld [vmem:[%s9232_s23 + $0x1db8] sm:$0xff] }
 0x3ba   : > { %7405 = vmatpush1.bf16.msra.mxu0 %v8841_v23  ;;  %7733 = vmatpush1.bf16.msra.mxu1 %v8843_v26  ;;  %v1153_v23 = vld [vmem:[%s9232_s23 + $0x1c78] sm:$0xff]  ;;  %v8897_v26 = vcombine.low %v1140_v62, %v1144_v14  ;;  %v1200_v62 = vld [vmem:[%s9232_s23 + $0x1df0] sm:$0xff] }
 0x3bb   : > { %7406 = vmatprep.subr.bf16.mxu0 %v8850_v11  ;;  %7734 = vmatprep.subr.bf16.mxu1 %v8852_v12  ;;  %v8899_v11 = vcombine.low %v1141_v47, %v1145_v63  ;;  %v8906_v12 = vcombine.high %v1148_v8, %v1152_v9  ;;  %v8908_v13 = vcombine.high %v1149_v48, %v1153_v23  ;;  %v1197_v14 = vld [vmem:[%s9232_s23 + $0x1dd8] sm:$0xff] }
 0x3bc   : > { %v1201_v47 = vld [vmem:[%s9232_s23 + $0x1df8] sm:$0xff] }
 0x3be   : > { %7407 = vmatpush1.bf16.msra.mxu0 %v8849_v58  ;;  %7735 = vmatpush1.bf16.msra.mxu1 %v8851_v20  ;;  %v1161_v58 = vld [vmem:[%s9232_s23 + $0x1cb8] sm:$0xff]  ;;  %v8905_v20 = vcombine.low %v1148_v8, %v1152_v9  ;;  %v1208_v8 = vld [vmem:[%s9232_s23 + $0x1e30] sm:$0xff] }
 0x3bf   : > { %7408 = vmatprep.subr.bf16.mxu0 %v8858_v22  ;;  %7736 = vmatprep.subr.bf16.mxu1 %v8860_v25  ;;  %v8907_v22 = vcombine.low %v1149_v48, %v1153_v23  ;;  %v8914_v25 = vcombine.high %v1156_v56, %v1160_v15  ;;  %v8916_v28 = vcombine.high %v1157_v19, %v1161_v58  ;;  %v1205_v9 = vld [vmem:[%s9232_s23 + $0x1e18] sm:$0xff] }
 0x3c0   : > { %v1209_v48 = vld [vmem:[%s9232_s23 + $0x1e38] sm:$0xff] }
 0x3c2   : > { %7409 = vmatpush1.bf16.msra.mxu0 %v8857_v51  ;;  %7737 = vmatpush1.bf16.msra.mxu1 %v8859_v24  ;;  %v1169_v51 = vld [vmem:[%s9232_s23 + $0x1cf8] sm:$0xff]  ;;  %v8915_v24 = vcombine.low %v1157_v19, %v1161_v58 }
 0x3c3   : > { %7410 = vmatprep.subr.bf16.mxu0 %v8866_v34  ;;  %7738 = vmatprep.subr.bf16.mxu1 %v8868_v35  ;;  %v8922_v34 = vcombine.high %v1164_v30, %v1168_v31  ;;  %v8924_v35 = vcombine.high %v1165_v3, %v1169_v51  ;;  %v1217_v19 = vld [vmem:[%s9232_s23 + $0x1e78] sm:$0xff] }
 0x3c6   : > { %7411 = vmatpush1.bf16.msra.mxu0 %v8865_v40  ;;  %7739 = vmatpush1.bf16.msra.mxu1 %v8867_v33  ;;  %v8921_v40 = vcombine.low %v1164_v30, %v1168_v31  ;;  %v8930_v33 = vcombine.high %v1172_v36, %v1176_v1  ;;  %v1224_v30 = vld [vmem:[%s9232_s23 + $0x1eb0] sm:$0xff]  ;;  %v1221_v31 = vld [vmem:[%s9232_s23 + $0x1e98] sm:$0xff] }
 0x3c7   : > { %7412 = vmatprep.subr.bf16.mxu0 %v8874_v42  ;;  %7740 = vmatprep.subr.bf16.mxu1 %v8876_v43  ;;  %v8932_v42 = vcombine.high %v1173_v37, %v1177_v39  ;;  %v1180_v43 = vld [vmem:[%s9232_s23 + $0x1d50] sm:$0xff]  ;;  %v1229_v1 = vld [vmem:[%s9232_s23 + $0x1ed8] sm:$0xff] }
 0x3c8   : > { %v8937_v21 = vcombine.low %v1180_v43, %v1184_v44  ;;  %v1232_v36 = vld [vmem:[%s9232_s23 + $0x1ef0] sm:$0xff] }
 0x3ca   : > { %7413 = vmatpush1.bf16.msra.mxu0 %v8873_v18  ;;  %7741 = vmatpush1.bf16.msra.mxu1 %v8875_v50  ;;  %v8931_v18 = vcombine.low %v1173_v37, %v1177_v39  ;;  %v8938_v50 = vcombine.high %v1180_v43, %v1184_v44  ;;  %v1233_v37 = vld [vmem:[%s9232_s23 + $0x1ef8] sm:$0xff]  ;;  %v1240_v43 = vld [vmem:[%s9232_s23 + $0x1f30] sm:$0xff] }
 0x3cb   : > { %7414 = vmatprep.subr.bf16.mxu0 %v8882_v52  ;;  %7742 = vmatprep.subr.bf16.mxu1 %v8884_v53  ;;  %v8940_v52 = vcombine.high %v1181_v27, %v1185_v46  ;;  %v1188_v53 = vld [vmem:[%s9232_s23 + $0x1d90] sm:$0xff]  ;;  %v1237_v44 = vld [vmem:[%s9232_s23 + $0x1f18] sm:$0xff] }
 0x3cc   : > { %v8945_v63 = vcombine.low %v1188_v53, %v1192_v54 }
 0x3ce   : > { %7415 = vmatpush1.bf16.msra.mxu0 %v8881_v57  ;;  %7743 = vmatpush1.bf16.msra.mxu1 %v8883_v29  ;;  %v8939_v57 = vcombine.low %v1181_v27, %v1185_v46  ;;  %v8946_v29 = vcombine.high %v1188_v53, %v1192_v54  ;;  %v1241_v27 = vld [vmem:[%s9232_s23 + $0x1f38] sm:$0xff]  ;;  %v1248_v53 = vld [vmem:[%s9232_s23 + $0x1f70] sm:$0xff] }
 0x3cf   : > { %7416 = vmatprep.subr.bf16.mxu0 %v8890_v60  ;;  %7744 = vmatprep.subr.bf16.mxu1 %v8892_v61  ;;  %v8948_v60 = vcombine.high %v1189_v38, %v1193_v55  ;;  %v1196_v61 = vld [vmem:[%s9232_s23 + $0x1dd0] sm:$0xff]  ;;  %v1245_v54 = vld [vmem:[%s9232_s23 + $0x1f58] sm:$0xff] }
 0x3d0   : > { %v8953_v23 = vcombine.low %v1196_v61, %v1200_v62 }
 0x3d2   : > { %7417 = vmatpush1.bf16.msra.mxu0 %v8889_v4  ;;  %7745 = vmatpush1.bf16.msra.mxu1 %v8891_v5  ;;  %v8947_v4 = vcombine.low %v1189_v38, %v1193_v55  ;;  %v8954_v5 = vcombine.high %v1196_v61, %v1200_v62  ;;  %v1249_v38 = vld [vmem:[%s9232_s23 + $0x1f78] sm:$0xff]  ;;  %v1256_v61 = vld [vmem:[%s9232_s23 + $0x1fb0] sm:$0xff] }
 0x3d3   : > { %7427 = vmatprep.subr.bf16.mxu0 %v8898_v6  ;;  %7755 = vmatprep.subr.bf16.mxu1 %v8900_v7  ;;  %v8956_v6 = vcombine.high %v1197_v14, %v1201_v47  ;;  %v1204_v7 = vld [vmem:[%s9232_s23 + $0x1e10] sm:$0xff]  ;;  %v1253_v62 = vld [vmem:[%s9232_s23 + $0x1f98] sm:$0xff] }
 0x3d4   : > { %v8961_v58 = vcombine.low %v1204_v7, %v1208_v8 }
 0x3d5   : > { %7419 = vmatmul.mubr.bf16.vlgmr.msra.gmra.mrb[4].mxu0 %v9792_v0  ;;  %7747 = vmatmul.mubr.bf16.vlgmr.msra.gmra.mrb[4].mxu1 %v9792_v0  ;;  %v8913_v0 = vcombine.low %v1156_v56, %v1160_v15  ;;  %v1216_v56 = vld [vmem:[%s9232_s23 + $0x1e70] sm:$0xff]  ;;  %v1213_v15 = vld [vmem:[%s9232_s23 + $0x1e58] sm:$0xff] }
 0x3d6   : > { %7428 = vmatpush1.bf16.msra.mxu0 %v8897_v26  ;;  %7756 = vmatpush1.bf16.msra.mxu1 %v8899_v11  ;;  %v8955_v26 = vcombine.low %v1197_v14, %v1201_v47  ;;  %v8962_v11 = vcombine.high %v1204_v7, %v1208_v8  ;;  %v1257_v14 = vld [vmem:[%s9232_s23 + $0x1fb8] sm:$0xff]  ;;  %v1264_v7 = vld [vmem:[%s9232_s23 + $0x1ff0] sm:$0xff] }
 0x3d7   : > { %7429 = vmatprep.subr.bf16.mxu0 %v8906_v12  ;;  %7757 = vmatprep.subr.bf16.mxu1 %v8908_v13  ;;  %v8964_v12 = vcombine.high %v1205_v9, %v1209_v48  ;;  %v1212_v13 = vld [vmem:[%s9232_s23 + $0x1e50] sm:$0xff]  ;;  %v1261_v8 = vld [vmem:[%s9232_s23 + $0x1fd8] sm:$0xff] }
 0x3d8   : > { %7459 = vmatprep.mubr.bf16.mxu0 %v9805_v32  ;;  %7787 = vmatprep.mubr.bf16.mxu1 %v9805_v32  ;;  %v8923_v32 = vcombine.low %v1165_v3, %v1169_v51  ;;  %v1225_v3 = vld [vmem:[%s9232_s23 + $0x1eb8] sm:$0xff]  ;;  %v8969_v51 = vcombine.low %v1212_v13, %v1216_v56 }
 0x3da   : > { %7430 = vmatpush1.bf16.msra.mxu0 %v8905_v20  ;;  %7758 = vmatpush1.bf16.msra.mxu1 %v8907_v22  ;;  %v8963_v20 = vcombine.low %v1205_v9, %v1209_v48  ;;  %v8970_v22 = vcombine.high %v1212_v13, %v1216_v56  ;;  %v1265_v9 = vld [vmem:[%s9232_s23 + $0x1ff8] sm:$0xff]  ;;  %v9168_v56 = vld [vmem:[%s10106_s17] sm:$0xff] }
 0x3db   : > { %7431 = vmatprep.subr.bf16.mxu0 %v8914_v25  ;;  %7759 = vmatprep.subr.bf16.mxu1 %v8916_v28  ;;  %v8972_v25 = vcombine.high %v1213_v15, %v1217_v19  ;;  %v1220_v28 = vld [vmem:[%s9232_s23 + $0x1e90] sm:$0xff]  ;;  %v9019_v13 = vcombine.low %v1261_v8, %v1265_v9 }
 0x3dc   : > { %v8977_v39 = vcombine.low %v1220_v28, %v1224_v30 }
 0x3de   : > { %7432 = vmatpush1.bf16.msra.mxu0 %v8913_v0  ;;  %7760 = vmatpush1.bf16.msra.mxu1 %v8915_v24  ;;  %v8971_v0 = vcombine.low %v1213_v15, %v1217_v19  ;;  %v8978_v24 = vcombine.high %v1220_v28, %v1224_v30  ;;  %v7806_v15 = vunpack.c.h.bf16 %v9168_v56  ;;  %v1290_v19 = vsub.s32 5, %v10112_v2 }
 0x3df   : > { %7433 = vmatprep.subr.bf16.mxu0 %v8922_v34  ;;  %7761 = vmatprep.subr.bf16.mxu1 %v8924_v35  ;;  %v8980_v34 = vcombine.high %v1221_v31, %v1225_v3  ;;  %v1228_v35 = vld [vmem:[%s9232_s23 + $0x1ed0] sm:$0xff] }
 0x3e0   : > { %v8985_v46 = vcombine.low %v1228_v35, %v1232_v36 }
 0x3e2   : > { %7434 = vmatpush1.bf16.msra.mxu0 %v8921_v40  ;;  %7762 = vmatpush1.bf16.msra.mxu1 %v8923_v32  ;;  %v8979_v40 = vcombine.low %v1221_v31, %v1225_v3  ;;  %v8986_v32 = vcombine.high %v1228_v35, %v1232_v36  ;;  %v7832_v31 = vrot.slane %v7806_v15, %v10132_v16 }
 0x3e3   : > { %7435 = vmatprep.subr.bf16.mxu0 %v8930_v33  ;;  %7763 = vmatprep.subr.bf16.mxu1 %v8932_v42  ;;  %v8988_v33 = vcombine.high %v1229_v1, %v1233_v37  ;;  %v1236_v42 = vld [vmem:[%s9232_s23 + $0x1f10] sm:$0xff]  ;;  %v7840_v16 = vrot.slane %v7806_v15, %v10145_v17 }
 0x3e4   : > { %v8993_v55 = vcombine.low %v1236_v42, %v1240_v43 }
 0x3e6   : > { %7436 = vmatpush1.bf16.msra.mxu0 %v8929_v49  ;;  %7764 = vmatpush1.bf16.msra.mxu1 %v8931_v18  ;;  %v8987_v49 = vcombine.low %v1229_v1, %v1233_v37  ;;  %v8994_v18 = vcombine.high %v1236_v42, %v1240_v43  ;;  %v7872_v1 = vrot.slane %v7832_v31, %v10124_v10 }
 0x3e7   : > { %7437 = vmatprep.subr.bf16.mxu0 %v8938_v50  ;;  %7765 = vmatprep.subr.bf16.mxu1 %v8940_v52  ;;  %v8996_v50 = vcombine.high %v1237_v44, %v1241_v27  ;;  %v1244_v52 = vld [vmem:[%s9232_s23 + $0x1f50] sm:$0xff] }
 0x3e8   : > { %v9001_v47 = vcombine.low %v1244_v52, %v1248_v53 }
 0x3ea   : > { %7438 = vmatpush1.bf16.msra.mxu0 %v8937_v21  ;;  %7766 = vmatpush1.bf16.msra.mxu1 %v8939_v57  ;;  %v8995_v21 = vcombine.low %v1237_v44, %v1241_v27  ;;  %v9002_v57 = vcombine.high %v1244_v52, %v1248_v53  ;;  %v7880_v52 = vrot.slane %v7840_v16, %v10124_v10 }
 0x3eb   : > { %7439 = vmatprep.subr.bf16.mxu0 %v8946_v29  ;;  %7767 = vmatprep.subr.bf16.mxu1 %v8948_v60  ;;  %v9004_v29 = vcombine.high %v1245_v54, %v1249_v38  ;;  %v1252_v60 = vld [vmem:[%s9232_s23 + $0x1f90] sm:$0xff] }
 0x3ec   : > { %v9009_v48 = vcombine.low %v1252_v60, %v1256_v61 }
 0x3ee   : > { %7440 = vmatpush1.bf16.msra.mxu0 %v8945_v63  ;;  %7768 = vmatpush1.bf16.msra.mxu1 %v8947_v4  ;;  %v9003_v63 = vcombine.low %v1245_v54, %v1249_v38  ;;  %v9010_v4 = vcombine.high %v1252_v60, %v1256_v61 }
 0x3ef   : > { %7441 = vmatprep.subr.bf16.mxu0 %v8954_v5  ;;  %7769 = vmatprep.subr.bf16.mxu1 %v8956_v6  ;;  %v9012_v5 = vcombine.high %v1253_v62, %v1257_v14  ;;  %v1260_v6 = vld [vmem:[%s9232_s23 + $0x1fd0] sm:$0xff] }
 0x3f2   : > { %7442 = vmatpush1.bf16.msra.mxu0 %v8953_v23  ;;  %7770 = vmatpush1.bf16.msra.mxu1 %v8955_v26  ;;  %v9011_v23 = vcombine.low %v1253_v62, %v1257_v14  ;;  %v9018_v26 = vcombine.high %v1260_v6, %v1264_v7 }
 0x3f3   : > { %7443 = vmatprep.subr.bf16.mxu0 %v8962_v11  ;;  %7771 = vmatprep.subr.bf16.mxu1 %v8964_v12  ;;  %v9020_v11 = vcombine.high %v1261_v8, %v1265_v9  ;;  %v9017_v12 = vcombine.low %v1260_v6, %v1264_v7 }
 0x3f6   : > { %7444 = vmatpush1.bf16.msra.mxu0 %v8961_v58  ;;  %7772 = vmatpush1.bf16.msra.mxu1 %v8963_v20  ;;  %v1298_v58 = vsub.s32 7, %v10112_v2  ;;  %v9169_v20 = vld [vmem:[%s10119_s21] sm:$0xff] }
 0x3f7   : > { %7445 = vmatprep.subr.bf16.mxu0 %v8970_v22  ;;  %7773 = vmatprep.subr.bf16.mxu1 %v8972_v25  ;;  %v1287_v22 = vrot.slane %v9169_v20, %v10137_v59  ;;  %v7828_v25 = vrot.slane %v7806_v15, %v10124_v10  ;;  %v1295_v28 = vrot.slane %v9169_v20, %v10145_v17 }
 0x3f8   : > { %v1291_v30 = vrot.slane %v9169_v20, %v1290_v19  ;;  %v1299_v3 = vrot.slane %v9169_v20, %v1298_v58 }
 0x3fa   : > { %7446 = vmatpush1.bf16.msra.mxu0 %v8969_v51  ;;  %7774 = vmatpush1.bf16.msra.mxu1 %v8971_v0 }
 0x3fb   : > { %7447 = vmatprep.subr.bf16.mxu0 %v8978_v24  ;;  %7775 = vmatprep.subr.bf16.mxu1 %v8980_v34  ;;  %v7836_v34 = vrot.slane %v7806_v15, %v10137_v59 }
 0x3fd   : > { %v7876_v59 = vrot.slane %v7836_v34, %v10124_v10 }
 0x3fe   : > { %7448 = vmatpush1.bf16.msra.mxu0 %v8977_v39  ;;  %7776 = vmatpush1.bf16.msra.mxu1 %v8979_v40 }
 0x3ff   : > { %7449 = vmatprep.subr.bf16.mxu0 %v8986_v32  ;;  %7777 = vmatprep.subr.bf16.mxu1 %v8988_v33 }
 0x402   : > { %7450 = vmatpush1.bf16.msra.mxu0 %v8985_v46  ;;  %7778 = vmatpush1.bf16.msra.mxu1 %v8987_v49 }
 0x403   : > { %7451 = vmatprep.subr.bf16.mxu0 %v8994_v18  ;;  %7779 = vmatprep.subr.bf16.mxu1 %v8996_v50 }
 0x406   : > { %7452 = vmatpush1.bf16.msra.mxu0 %v8993_v55  ;;  %7780 = vmatpush1.bf16.msra.mxu1 %v8995_v21 }
 0x407   : > { %7453 = vmatprep.subr.bf16.mxu0 %v9002_v57  ;;  %7781 = vmatprep.subr.bf16.mxu1 %v9004_v29 }
 0x40a   : > { %7454 = vmatpush1.bf16.msra.mxu0 %v9001_v47  ;;  %7782 = vmatpush1.bf16.msra.mxu1 %v9003_v63 }
 0x40b   : > { %7455 = vmatprep.subr.bf16.mxu0 %v9010_v4  ;;  %7783 = vmatprep.subr.bf16.mxu1 %v9012_v5 }
 0x40e   : > { %7456 = vmatpush1.bf16.msra.mxu0 %v9009_v48  ;;  %7784 = vmatpush1.bf16.msra.mxu1 %v9011_v23 }
 0x40f   : > { %7457 = vmatprep.subr.bf16.mxu0 %v9018_v26  ;;  %7785 = vmatprep.subr.bf16.mxu1 %v9020_v11 }
 0x412   : > { %7458 = vmatpush1.bf16.msra.mxu0 %v9017_v12  ;;  %7786 = vmatpush1.bf16.msra.mxu1 %v9019_v13 }
 0x415   : > { %7460 = vmatmul.mubr.bf16.vlgmr.msra.gmra.mrb[4].mxu0 %v9873_v41  ;;  %7788 = vmatmul.mubr.bf16.vlgmr.msra.gmra.mrb[4].mxu1 %v9873_v41  ;;  %v7868_v41 = vrot.slane %v7828_v25, %v10124_v10 }
 0x4e8   : > { %v7461_v51 = vpop.f32.mrb[4].mxu0  ;;  %v7789_v24 = vpop.f32.mrb[4].mxu1 }
 0x4e9   : > { %v9028_v0 = vadd.f32 %v7461_v51, %v1287_v22  ;;  %v7463_v35 = vpop.f32.mrb[5].mxu0  ;;  %v9030_v2 = vadd.f32 %v7789_v24, %v1295_v28  ;;  %v7791_v37 = vpop.f32.mrb[5].mxu1 }
 0x4ea   : > { %v9029_v36 = vadd.f32 %v7463_v35, %v1291_v30  ;;  %v7465_v39 = vpop.f32.mrb[6].mxu0  ;;  %v9031_v32 = vadd.f32 %v7791_v37, %v1299_v3  ;;  %v7793_v33 = vpop.f32.mrb[6].mxu1 }
 0x4eb   : > { %v7800_v40 = vmax.f32 %v9028_v0, 0.0  ;;  %v7466_v42 = vpop.f32.mrb[7].mxu0  ;;  %v7794_v44 = vpop.f32.mrb[7].mxu1  ;;  %v7802_v46 = vmax.f32 %v9030_v2, 0.0 }
 0x4ec   : > { %v7801_v43 = vmax.f32 %v9029_v36, 0.0  ;;  %v7803_v50 = vmax.f32 %v9031_v32, 0.0 }
 0x4ed   : > { %v7885_v27 = vmul.f32 %v7868_v41, %v7800_v40  ;;  %v7887_v53 = vmul.f32 %v7876_v59, %v7802_v46 }
 0x4ee   : > { %v7886_v49 = vmul.f32 %v7872_v1, %v7801_v43  ;;  %v7888_v38 = vmul.f32 %v7880_v52, %v7803_v50 }
 0x4ef   : > { %v7892_v18 = vadd.f32 %v10172_v45, %v7885_v27 }
 0x4f1   : > { %v7893_v54 = vadd.f32 %v7892_v18, %v7886_v49 }
 0x4f3   : > { %v7894_v55 = vadd.f32 %v7893_v54, %v7887_v53 }
 0x4f5   : > { %v7895_v21 = vadd.f32 %v7894_v55, %v7888_v38 }
 0x4f7   : > { %7896 = vadd.xlane.f32.xlu0 %v7895_v21 }
 0x584   : > { %v7897_v17 = vpop.xlane.xlu0 %7896 }
 0x585   : > { %7899 = vst.msk [vmem:[%s233_s25] sm:$0xff] %vm7898_vm0, %v7897_v17 }
 0x586 PF: > { %s14_s15 = sadd.s32 1, %s9176_s15  }
 0x587   : > { %p11_p5 = scmp.ge.s32.totalorder %s14_s15, 4  }
 0x589   :  { %13 = sbr.rel (!%p11_p5) target bundleno = 1 (0x1), region = 72 }

// kernel: production_evaluator_forward.2
= control target key start
LH: loop header
LB: loop body
LE: loop exit
PB: predicated region body
PF: predicated region fallthrough
CT: control target
= control target key end

     0   :  { %s13153_s0 = inlined_call_operand.vmem [shape: bf16[8,256], index: 0, kind: input, shape index: {}]   ;;  %s13154_s1 = inlined_call_operand.hbm [shape: bf16[256,2048], index: 1, kind: input, shape index: {}]   ;;  %s13155_s2 = inlined_call_operand.hbm [shape: f32[1,2048], index: 2, kind: input, shape index: {}]   ;;  %s13156_s3 = inlined_call_operand.hbm [shape: bf16[2,2048,1024], index: 3, kind: input, shape index: {}]   ;;  %s13157_s4 = inlined_call_operand.hbm [shape: f32[1,2048], index: 4, kind: input, shape index: {}]   ;;  %s13158_s5 = inlined_call_operand.vmem [shape: bf16[8,2048], index: 5, kind: output, shape index: {}]  }
   0x1   :  { %13166 = sst [smem:[#allocation11_spill]] %s13154_s1 }
   0x2   :  { %10 = vsyncpa [#allocation3], 0 }
   0x3   :  { %11 = vsyncpa [#allocation5], 0  ;;  %s11648_s18 = smov 0   ;;  %s11650_s19 = smov 0  }
   0x4   :  { %s11652_s20 = smov 0   ;;  %s11654_s21 = smov 0  }
   0x5 LB: > { %s11667_s22 = sadd.s32 4294967295, %s11608_s21   ;;  %s11670_s23 = sadd.s32 1, %s11608_s21   ;;  %s11608_s21 = sphi %s11654_s21, %s13189_s21   ;;  %s11604_s20 = sphi %s11652_s20, %s13188_s20   ;;  %s11600_s19 = sphi %s11650_s19, %s13187_s19   ;;  %s11596_s18 = sphi %s11648_s18, %s13186_s18  }
   0x6   : > { %s84_s24 = ssub.s32 %s11608_s21, %s11670_s23  ;;  %s87_s25 = sadd.s32 1, %s11604_s20 }
   0x7   : > { %p85_p0 = scmp.eq.s32.totalorder %s84_s24, 0  ;;  %p94_p1 = scmp.ne.s32.totalorder %s11604_s20, %s11600_s19 }
   0x8   : > { %p95_p2 = scmp.eq.s32.totalorder %s11608_s21, 0  ;;  %p100_p3 = scmp.ne.s32.totalorder %s11600_s19, %s11596_s18 }
   0x9   : > { %s11680_s26 = scalar_select %p85_p0, %s11604_s20, %s87_s25  }
   0xa   : > { %p11682_p4 = por %p95_p2, %p94_p1  ;;  %p13159_p5 = scmp.eq.s32.totalorder %s11667_s22, 0 }
   0xb   : > { %p9945_p6 = scmp.ge.s32.totalorder %s11608_s21, 1  ;;  %p163_p7 = scmp.lt.s32.totalorder %s11608_s21, 3 }
   0xc   : > { %p11691_p8 = por %p13159_p5, %p100_p3  ;;  %s11610_s30 = smov [#allocation2]  }
   0xd   : > { %p11695_p9 = pnand %p9945_p6, %p163_p7  ;;  %s178_s6 = sshll.u32 %s11610_s30, 4  ;;  %s179_s6 = int_to_ptr.vmem [resolvable:$true] %s178_s6 }
   0xe   : > { %s13168_s28 = scalar_select %p11691_p8, 1, 0 }
   0xf   : > { %s13169_s29 = scalar_select %p11695_p9, 1, 0 }
  0x10   : > { %p11388_p10 = pneg %p11695_p9  ;;  %p11404_p12 = scmp.lt.s32.totalorder %s11608_s21, 2 }
  0x11   : > { %s203_s8 = sand.u32 1, %s11608_s21   ;;  %s205_s9 = sand.u32 1, %s11604_s20  }
  0x12   : > { %p11703_p11 = pnand %p11388_p10, %p13159_p5  ;;  %p11712_p13 = pnand %p11404_p12, %p11682_p4 }
  0x13   : > { %s13172_s1 = sld [smem:[#allocation11_spill]] }
  0x14   : > { %s13171_s10 = scalar_select %p11712_p13, 1, 0 }
  0x15   : > { %p13163_p1 = pneg %p11703_p11 }
  0x19   : > { %s11450_s13 = scalar_lea.hbm %s13172_s1, 32768 }
  0x1a   : > { %p11451_p0 = scmp.ne.s32.totalorder %s13172_s1, %s11450_s13  ;;  %p11457_p4 = scmp.lt.u32.totalorder %s11450_s13, %s13172_s1 }
  0x1c   : > { %p11453_p2 = pnand %p13163_p1, %p11451_p0 }
  0x1e   : > { %p11454_p3 = pneg %p11453_p2 }
  0x20   : > { %p11459_p6 = pnand %p11457_p4, %p11454_p3 }
  0x22   : > { %11462 = shalt.err (!%p11459_p6)
}
  0x23   : > { %s11463_s18 = scalar_lea.vmem %s179_s6, 32768  ;;  %p11471_p5 = scmp.lt.s32.totalorder %s179_s6, %s179_s6 }
  0x24   : > { %p11464_p7 = scmp.ne.s32.totalorder %s179_s6, %s11463_s18  ;;  %p11472_p8 = scmp.lt.s32.totalorder %s11463_s18, %s11463_s18 }
  0x26   : > { %p11466_p10 = pnand %p11464_p7, %p13163_p1  ;;  %p11473_p9 = por %p11472_p8, %p11471_p5 }
  0x28   : > { %p11467_p12 = pneg %p11466_p10 }
  0x2a   : > { %p11474_p13 = pnand %p11473_p9, %p11467_p12 }
  0x2c   : > { %11477 = shalt.err (!%p11474_p13)
}
  0x2d   : > { %s11611_s24 = smov 1024   ;;  %s11612_s25 = smov 64  }
  0x2e   : > { %11391 = dma.hbm_to_vmem [thread:$0]  (!%p11703_p11), %s13172_s1, 32768, %s179_s6, [#allocation3], %s11611_s24, %s11611_s24, %s11612_s25  }
  0x2f   : > { %s9949_s11 = sshll.u32 %s205_s9, 13  ;;  %s11250_s12 = sshll.u32 %s11608_s21, 17 }
  0x30   : > { %s11744_s15 = scalar_lea.hbm %s13156_s3, %s11250_s12  ;;  %s207_s16 = scalar_lea.vmem [#allocation6], %s9949_s11 }
  0x31   : > { %s214_s17 = sshll.u32 %s207_s16, 4  ;;  %s11748_s18 = scalar_lea.sflag [#allocation3], %s203_s8  ;;  %s11746_s17 = int_to_ptr.vmem [resolvable:$true] %s214_s17 }
  0x32   : > { %s11478_s27 = scalar_lea.hbm %s11744_s15, 131072  ;;  %p13173_p8 = scmp.ne.s32.totalorder %s13171_s10, 0 }
  0x33   : > { %p11479_p5 = scmp.ne.s32.totalorder %s11744_s15, %s11478_s27  ;;  %s11483_s25 = scalar_lea.hbm %s13156_s3, 262144 }
  0x34   : > { %p13164_p9 = pneg %p13173_p8  ;;  %p11484_p2 = scmp.lt.u32.totalorder %s11744_s15, %s13156_s3 }
  0x35   : > { %p11485_p3 = scmp.lt.u32.totalorder %s11483_s25, %s11478_s27  ;;  %p11487_p6 = scmp.lt.u32.totalorder %s11478_s27, %s11744_s15 }
  0x36   : > { %p11481_p13 = pnand %p13164_p9, %p11479_p5 }
  0x37   : > { %p11486_p4 = por %p11485_p3, %p11484_p2 }
  0x38   : > { %p11482_p0 = pneg %p11481_p13 }
  0x39   : > { %p11488_p7 = por %p11487_p6, %p11486_p4 }
  0x3b   : > { %p11489_p10 = pnand %p11488_p7, %p11482_p0 }
  0x3d   : > { %11492 = shalt.err (!%p11489_p10)
}
  0x3e   : > { %s11493_s8 = scalar_lea.vmem %s11746_s17, 131072  ;;  %s11613_s11 = smov [#allocation6]  }
  0x3f   : > { %p11494_p12 = scmp.ne.s32.totalorder %s11746_s17, %s11493_s8  ;;  %s11498_s13 = sshll.u32 %s11613_s11, 4  ;;  %s11499_s13 = int_to_ptr.vmem [resolvable:$false] %s11498_s13 }
  0x40   : > { %s11500_s14 = scalar_lea.vmem %s11499_s13, 262144  ;;  %p11501_p1 = scmp.lt.s32.totalorder %s11746_s17, %s11499_s13 }
  0x41   : > { %p11496_p5 = pnand %p11494_p12, %p13164_p9  ;;  %p11502_p2 = scmp.lt.s32.totalorder %s11500_s14, %s11493_s8 }
  0x43   : > { %p11497_p13 = pneg %p11496_p5  ;;  %p11503_p3 = por %p11502_p2, %p11501_p1 }
  0x45   : > { %p11504_p4 = pnand %p11503_p3, %p11497_p13 }
  0x47   : > { %11507 = shalt.err (!%p11504_p4)
}
  0x48   : > { %s11614_s16 = smov 512   ;;  %s11615_s27 = smov 32  }
  0x49   : > { %11398 = dma.hbm_to_vmem [thread:$0]  (!%p13173_p8), %s11744_s15, 131072, %s11746_s17, %s11748_s18, %s11614_s16, %s11614_s16, %s11615_s27  }
  0x4a   : > { %s9952_s6 = sshll.u32 %s205_s9, 3  ;;  %s11616_s24 = smov [#allocation4]  }
  0x4b   : > { %s192_s25 = sshll.u32 %s11616_s24, 4  ;;  %s11251_s30 = sshll.u32 %s11608_s21, 7  ;;  %s193_s25 = int_to_ptr.vmem [resolvable:$true] %s192_s25 }
  0x4c   : > { %s11508_s11 = scalar_lea.hbm %s13155_s2, 256  ;;  %p13174_p0 = pneg %p11703_p11 }
  0x4d   : > { %p11509_p1 = scmp.ne.s32.totalorder %s13155_s2, %s11508_s11  ;;  %p11515_p10 = scmp.lt.u32.totalorder %s11508_s11, %s13155_s2 }
  0x4f   : > { %p11511_p6 = pnand %p11509_p1, %p13174_p0 }
  0x51   : > { %p11512_p7 = pneg %p11511_p6 }
  0x53   : > { %p11517_p12 = pnand %p11515_p10, %p11512_p7 }
  0x55   : > { %11520 = shalt.err (!%p11517_p12)
}
  0x56   : > { %s11521_s9 = scalar_lea.vmem %s193_s25, 256  ;;  %p13175_p13 = pmov %p13174_p0 }
  0x57   : > { %p11522_p5 = scmp.ne.s32.totalorder %s193_s25, %s11521_s9  ;;  %p11529_p4 = scmp.lt.s32.totalorder %s193_s25, %s193_s25 }
  0x58   : > { %p11530_p9 = scmp.lt.s32.totalorder %s11521_s9, %s11521_s9 }
  0x59   : > { %p11524_p2 = pnand %p11522_p5, %p13175_p13 }
  0x5a   : > { %p11531_p8 = por %p11530_p9, %p11529_p4 }
  0x5b   : > { %p11525_p3 = pneg %p11524_p2 }
  0x5d   : > { %p11532_p0 = pnand %p11531_p8, %p11525_p3 }
  0x5f   : > { %11535 = shalt.err (!%p11532_p0)
}
  0x60   : > { %11394 = dma.hbm_to_vmem [thread:$0]  (!%p11703_p11), %s13155_s2, 256, %s193_s25, [#allocation5]  }
  0x61   : > { %s11802_s27 = scalar_lea.hbm %s13157_s4, %s11251_s30  ;;  %s228_s24 = scalar_lea.vmem [#allocation7], %s9952_s6 }
  0x62   : > { %s236_s12 = sshll.u32 %s228_s24, 4  ;;  %s11536_s8 = scalar_lea.hbm %s11802_s27, 128  ;;  %s237_s12 = int_to_ptr.vmem [resolvable:$true] %s236_s12 }
  0x63   : > { %p11537_p8 = scmp.ne.s32.totalorder %s11802_s27, %s11536_s8  ;;  %p13176_p9 = scmp.ne.s32.totalorder %s13171_s10, 0 }
  0x64   : > { %s11541_s11 = scalar_lea.hbm %s13157_s4, 256  ;;  %p11542_p11 = scmp.lt.u32.totalorder %s11802_s27, %s13157_s4 }
  0x65   : > { %p13177_p1 = pneg %p13176_p9  ;;  %p11543_p10 = scmp.lt.u32.totalorder %s11541_s11, %s11536_s8 }
  0x66   : > { %p11545_p5 = scmp.lt.u32.totalorder %s11536_s8, %s11802_s27 }
  0x67   : > { %p11539_p6 = pnand %p11537_p8, %p13177_p1  ;;  %p11544_p12 = por %p11543_p10, %p11542_p11 }
  0x69   : > { %p11540_p7 = pneg %p11539_p6  ;;  %p11546_p13 = por %p11545_p5, %p11544_p12 }
  0x6b   : > { %p11547_p2 = pnand %p11546_p13, %p11540_p7 }
  0x6d   : > { %11550 = shalt.err (!%p11547_p2)
}
  0x6e   : > { %s11551_s6 = scalar_lea.vmem %s237_s12, 128  ;;  %p13178_p4 = pmov %p13177_p1 }
  0x6f   : > { %p11552_p3 = scmp.ne.s32.totalorder %s237_s12, %s11551_s6  ;;  %s11617_s14 = smov [#allocation7]  }
  0x70   : > { %s11556_s15 = sshll.u32 %s11617_s14, 4  ;;  %s11557_s15 = int_to_ptr.vmem [resolvable:$false] %s11556_s15 }
  0x71   : > { %p11554_p0 = pnand %p11552_p3, %p13178_p4  ;;  %s11558_s9 = scalar_lea.vmem %s11557_s15, 256 }
  0x72   : > { %p11559_p1 = scmp.lt.s32.totalorder %s237_s12, %s11557_s15  ;;  %p11560_p6 = scmp.lt.s32.totalorder %s11558_s9, %s11551_s6 }
  0x73   : > { %p11555_p8 = pneg %p11554_p0 }
  0x74   : > { %p11561_p10 = por %p11560_p6, %p11559_p1 }
  0x76   : > { %p11562_p11 = pnand %p11561_p10, %p11555_p8 }
  0x78   : > { %11565 = shalt.err (!%p11562_p11)
}
  0x79   : > { %11401 = dma.hbm_to_vmem [thread:$0]  (!%p13176_p9), %s11802_s27, 128, %s237_s12, %s11748_s18  }
  0x7a   : > { %p13179_p7 = scmp.ne.s32.totalorder %s13169_s29, 0 }
  0x7b   : > { %p13180_p12 = scmp.eq.s32.totalorder (!%p13179_p7), %s11667_s22, 0 }
  0x7c   : > { %245 = sbr.rel (%p13179_p7) target bundleno = 1646 (0x66e), region = 40 }
  0x83   : > { %11583 = dma.done.wait (%p13180_p12), [#allocation3], 32768   ;;  %p13181_p5 = pmov %p13180_p12 }
  0x85   : > { %11585 = vsyncadd (%p13181_p5), [#allocation3], 4294934528  ;;  %p13182_p13 = pmov %p13181_p5 }
  0x86   : > { %p13183_p2 = pmov %p13181_p5 }
  0x87   : > { %11587 = dma.done.wait (%p13182_p13), [#allocation5], 256  }
  0x88   : > { %11589 = vsyncadd (%p13183_p2), [#allocation5], 4294967040  ;;  %s255_s10 = sand.u32 1, %s11667_s22   ;;  %s257_s18 = sand.u32 1, %s11600_s19  }
  0x89   : > { %s9958_s29 = sshll.u32 %s257_s18, 13  ;;  %s256_s21 = scalar_lea.sflag [#allocation3], %s255_s10 }
  0x8a   : > { %s11838_s17 = scalar_lea.vmem [#allocation6], %s9958_s29  ;;  %p13184_p9 = scmp.ne.s32.totalorder %s13168_s28, 0 }
  0x8c   : > { %11591 = dma.done.wait (%p13184_p9), %s256_s21, 131200  }
  0x8d   : > { %11593 = vsyncadd (%p13184_p9), %s256_s21, 4294836096  ;;  %v308_v0 = vld [vmem:[#allocation2] sm:$0xff]  ;;  %v309_v2 = vld [vmem:[#allocation2 + $0x8] sm:$0xff]  ;;  %s12786_s16 = sshll.u32 %s257_s18, 3  ;;  %s9960_s27 = sshll.u32 %s11667_s22, 3 }
  0x8e   : > { %v316_v1 = vld [vmem:[#allocation2 + $0x40] sm:$0xff]  ;;  %v317_v4 = vld [vmem:[#allocation2 + $0x48] sm:$0xff]  ;;  %s268_s24 = scalar_lea.vmem [#allocation7], %s12786_s16  ;;  %p12798_p3 = scmp.lt.s32.totalorder %s9960_s27, 15 }
  0x8f   : > { %v9965_v3 = vcombine.high %v308_v0, %v316_v1  ;;  %v9964_v5 = vcombine.low %v308_v0, %v316_v1  ;;  %v324_v6 = vld [vmem:[#allocation2 + $0x80] sm:$0xff]  ;;  %v9967_v8 = vcombine.high %v309_v2, %v317_v4  ;;  %v9966_v9 = vcombine.low %v309_v2, %v317_v4  ;;  %v325_v11 = vld [vmem:[#allocation2 + $0x88] sm:$0xff] }
  0x90   : > { %v332_v7 = vld [vmem:[#allocation2 + $0xc0] sm:$0xff]  ;;  %v333_v12 = vld [vmem:[#allocation2 + $0xc8] sm:$0xff]  ;;  %s13191_s27 = smov (!%p12798_p3, %s9960_s27), 15 }
  0x91   : > { %v9981_v10 = vcombine.high %v324_v6, %v332_v7  ;;  %v340_v13 = vld [vmem:[#allocation2 + $0x100] sm:$0xff]  ;;  %1935 = vmatprep.subr.bf16.mxu0 %v9965_v3  ;;  %v9983_v14 = vcombine.high %v325_v11, %v333_v12  ;;  %v341_v16 = vld [vmem:[#allocation2 + $0x108] sm:$0xff]  ;;  %1976 = vmatprep.subr.bf16.mxu1 %v9967_v8  ;;  %v9980_v18 = vcombine.low %v324_v6, %v332_v7  ;;  %s9961_s22 = sshll.u32 %s13191_s27, 2 }
  0x92   : > { %v348_v15 = vld [vmem:[#allocation2 + $0x140] sm:$0xff]  ;;  %v349_v17 = vld [vmem:[#allocation2 + $0x148] sm:$0xff]  ;;  %1936 = vmatpush1.bf16.msra.mxu0 %v9964_v5  ;;  %1977 = vmatpush1.bf16.msra.mxu1 %v9966_v9  ;;  %v9982_v19 = vcombine.low %v325_v11, %v333_v12  ;;  %s12824_s25 = scalar_lea.vmem %s13158_s5, %s9961_s22 }
  0x93   : > { %1937 = vmatprep.subr.bf16.mxu0 %v9981_v10  ;;  %v9997_v20 = vcombine.high %v340_v13, %v348_v15  ;;  %1978 = vmatprep.subr.bf16.mxu1 %v9983_v14  ;;  %v9999_v21 = vcombine.high %v341_v16, %v349_v17  ;;  %v356_v22 = vld [vmem:[#allocation2 + $0x180] sm:$0xff]  ;;  %v357_v24 = vld [vmem:[#allocation2 + $0x188] sm:$0xff]  ;;  %v9996_v26 = vcombine.low %v340_v13, %v348_v15 }
  0x94   : > { %v364_v23 = vld [vmem:[#allocation2 + $0x1c0] sm:$0xff]  ;;  %v365_v25 = vld [vmem:[#allocation2 + $0x1c8] sm:$0xff]  ;;  %v9998_v27 = vcombine.low %v341_v16, %v349_v17 }
  0x95   : > { %v10013_v28 = vcombine.high %v356_v22, %v364_v23  ;;  %v10015_v29 = vcombine.high %v357_v24, %v365_v25  ;;  %v372_v30 = vld [vmem:[#allocation2 + $0x200] sm:$0xff]  ;;  %v373_v32 = vld [vmem:[#allocation2 + $0x208] sm:$0xff]  ;;  %v10012_v34 = vcombine.low %v356_v22, %v364_v23  ;;  %v10014_v35 = vcombine.low %v357_v24, %v365_v25 }
  0x96   : > { %1938 = vmatpush1.bf16.msra.mxu0 %v9980_v18  ;;  %1979 = vmatpush1.bf16.msra.mxu1 %v9982_v19  ;;  %v380_v31 = vld [vmem:[#allocation2 + $0x240] sm:$0xff]  ;;  %v381_v33 = vld [vmem:[#allocation2 + $0x248] sm:$0xff] }
  0x97   : > { %1939 = vmatprep.subr.bf16.mxu0 %v9997_v20  ;;  %1980 = vmatprep.subr.bf16.mxu1 %v9999_v21  ;;  %v10029_v36 = vcombine.high %v372_v30, %v380_v31  ;;  %v10031_v37 = vcombine.high %v373_v32, %v381_v33  ;;  %v388_v38 = vld [vmem:[#allocation2 + $0x280] sm:$0xff]  ;;  %v389_v40 = vld [vmem:[#allocation2 + $0x288] sm:$0xff]  ;;  %v10028_v42 = vcombine.low %v372_v30, %v380_v31 }
  0x98   : > { %v396_v39 = vld [vmem:[#allocation2 + $0x2c0] sm:$0xff]  ;;  %v397_v41 = vld [vmem:[#allocation2 + $0x2c8] sm:$0xff]  ;;  %v10030_v43 = vcombine.low %v373_v32, %v381_v33 }
  0x99   : > { %v10045_v44 = vcombine.high %v388_v38, %v396_v39  ;;  %v10047_v45 = vcombine.high %v389_v40, %v397_v41  ;;  %v404_v46 = vld [vmem:[#allocation2 + $0x300] sm:$0xff]  ;;  %v405_v48 = vld [vmem:[#allocation2 + $0x308] sm:$0xff]  ;;  %v10044_v50 = vcombine.low %v388_v38, %v396_v39  ;;  %v10046_v51 = vcombine.low %v389_v40, %v397_v41 }
  0x9a   : > { %1940 = vmatpush1.bf16.msra.mxu0 %v9996_v26  ;;  %1981 = vmatpush1.bf16.msra.mxu1 %v9998_v27  ;;  %v412_v47 = vld [vmem:[#allocation2 + $0x340] sm:$0xff]  ;;  %v413_v49 = vld [vmem:[#allocation2 + $0x348] sm:$0xff] }
  0x9b   : > { %1941 = vmatprep.subr.bf16.mxu0 %v10013_v28  ;;  %1982 = vmatprep.subr.bf16.mxu1 %v10015_v29  ;;  %v10061_v52 = vcombine.high %v404_v46, %v412_v47  ;;  %v11847_v53 = vld [vmem:[%s13153_s0] sm:$0xff]  ;;  %v10063_v54 = vcombine.high %v405_v48, %v413_v49  ;;  %v421_v58 = vld [vmem:[#allocation2 + $0x388] sm:$0xff]  ;;  %v10060_v60 = vcombine.low %v404_v46, %v412_v47 }
  0x9c   : > { %v420_v55 = vld [vmem:[#allocation2 + $0x380] sm:$0xff]  ;;  %v11851_v57 = vcombine.high %v11847_v53, %v11847_v53  ;;  %v429_v59 = vld [vmem:[#allocation2 + $0x3c8] sm:$0xff]  ;;  %v10062_v61 = vcombine.low %v405_v48, %v413_v49 }
  0x9d   : > { %v428_v56 = vld [vmem:[#allocation2 + $0x3c0] sm:$0xff]  ;;  %v10079_v63 = vcombine.high %v421_v58, %v429_v59  ;;  %v437_v2 = vld [vmem:[#allocation2 + $0x408] sm:$0xff]  ;;  %v10078_v5 = vcombine.low %v421_v58, %v429_v59 }
  0x9e   : > { %1942 = vmatpush1.bf16.msra.mxu0 %v10012_v34  ;;  %1983 = vmatpush1.bf16.msra.mxu1 %v10014_v35  ;;  %v10077_v62 = vcombine.high %v420_v55, %v428_v56  ;;  %v436_v0 = vld [vmem:[#allocation2 + $0x400] sm:$0xff]  ;;  %v445_v3 = vld [vmem:[#allocation2 + $0x448] sm:$0xff]  ;;  %v10076_v4 = vcombine.low %v420_v55, %v428_v56 }
  0x9f   : > { %1943 = vmatprep.subr.bf16.mxu0 %v10029_v36  ;;  %1984 = vmatprep.subr.bf16.mxu1 %v10031_v37  ;;  %v444_v1 = vld [vmem:[#allocation2 + $0x440] sm:$0xff]  ;;  %v10095_v7 = vcombine.high %v437_v2, %v445_v3  ;;  %v453_v10 = vld [vmem:[#allocation2 + $0x488] sm:$0xff]  ;;  %v10094_v13 = vcombine.low %v437_v2, %v445_v3  ;;  %v310_v2 = vld [vmem:[#allocation2 + $0x10] sm:$0xff] }
  0xa0   : > { %1967 = vmatprep.mubr.bf16.mxu0 %v11851_v57  ;;  %2008 = vmatprep.mubr.bf16.mxu1 %v11851_v57  ;;  %v10093_v6 = vcombine.high %v436_v0, %v444_v1  ;;  %v452_v8 = vld [vmem:[#allocation2 + $0x480] sm:$0xff]  ;;  %v461_v11 = vld [vmem:[#allocation2 + $0x4c8] sm:$0xff]  ;;  %v10092_v12 = vcombine.low %v436_v0, %v444_v1  ;;  %v318_v3 = vld [vmem:[#allocation2 + $0x50] sm:$0xff] }
  0xa1   : > { %v460_v9 = vld [vmem:[#allocation2 + $0x4c0] sm:$0xff]  ;;  %v10111_v15 = vcombine.high %v453_v10, %v461_v11  ;;  %v469_v18 = vld [vmem:[#allocation2 + $0x508] sm:$0xff]  ;;  %v10110_v21 = vcombine.low %v453_v10, %v461_v11  ;;  %v326_v10 = vld [vmem:[#allocation2 + $0x90] sm:$0xff] }
  0xa2   : > { %1944 = vmatpush1.bf16.msra.mxu0 %v10028_v42  ;;  %1985 = vmatpush1.bf16.msra.mxu1 %v10030_v43  ;;  %v10109_v14 = vcombine.high %v452_v8, %v460_v9  ;;  %v468_v16 = vld [vmem:[#allocation2 + $0x500] sm:$0xff]  ;;  %v477_v19 = vld [vmem:[#allocation2 + $0x548] sm:$0xff]  ;;  %v10108_v20 = vcombine.low %v452_v8, %v460_v9  ;;  %v9969_v8 = vcombine.high %v310_v2, %v318_v3  ;;  %v334_v11 = vld [vmem:[#allocation2 + $0xd0] sm:$0xff] }
  0xa3   : > { %1945 = vmatprep.subr.bf16.mxu0 %v10045_v44  ;;  %1986 = vmatprep.subr.bf16.mxu1 %v10047_v45  ;;  %v476_v17 = vld [vmem:[#allocation2 + $0x540] sm:$0xff]  ;;  %v10127_v23 = vcombine.high %v469_v18, %v477_v19  ;;  %v485_v26 = vld [vmem:[#allocation2 + $0x588] sm:$0xff]  ;;  %v10126_v29 = vcombine.low %v469_v18, %v477_v19  ;;  %v342_v19 = vld [vmem:[#allocation2 + $0x110] sm:$0xff] }
  0xa4   : > { %v10125_v22 = vcombine.high %v468_v16, %v476_v17  ;;  %v484_v24 = vld [vmem:[#allocation2 + $0x580] sm:$0xff]  ;;  %v493_v27 = vld [vmem:[#allocation2 + $0x5c8] sm:$0xff]  ;;  %v10124_v28 = vcombine.low %v468_v16, %v476_v17  ;;  %v9985_v17 = vcombine.high %v326_v10, %v334_v11 }
  0xa5   : > { %v492_v25 = vld [vmem:[#allocation2 + $0x5c0] sm:$0xff]  ;;  %v10143_v31 = vcombine.high %v485_v26, %v493_v27  ;;  %v501_v34 = vld [vmem:[#allocation2 + $0x608] sm:$0xff]  ;;  %v10142_v37 = vcombine.low %v485_v26, %v493_v27  ;;  %v358_v26 = vld [vmem:[#allocation2 + $0x190] sm:$0xff] }
  0xa6   : > { %1946 = vmatpush1.bf16.msra.mxu0 %v10044_v50  ;;  %1987 = vmatpush1.bf16.msra.mxu1 %v10046_v51  ;;  %v10141_v30 = vcombine.high %v484_v24, %v492_v25  ;;  %v500_v32 = vld [vmem:[#allocation2 + $0x600] sm:$0xff]  ;;  %v509_v35 = vld [vmem:[#allocation2 + $0x648] sm:$0xff]  ;;  %v10140_v36 = vcombine.low %v484_v24, %v492_v25  ;;  %v366_v27 = vld [vmem:[#allocation2 + $0x1d0] sm:$0xff] }
  0xa7   : > { %1947 = vmatprep.subr.bf16.mxu0 %v10061_v52  ;;  %1988 = vmatprep.subr.bf16.mxu1 %v10063_v54  ;;  %v508_v33 = vld [vmem:[#allocation2 + $0x640] sm:$0xff]  ;;  %v10159_v39 = vcombine.high %v501_v34, %v509_v35  ;;  %v517_v42 = vld [vmem:[#allocation2 + $0x688] sm:$0xff]  ;;  %v10158_v45 = vcombine.low %v501_v34, %v509_v35  ;;  %v374_v34 = vld [vmem:[#allocation2 + $0x210] sm:$0xff] }
  0xa8   : > { %v10157_v38 = vcombine.high %v500_v32, %v508_v33  ;;  %v516_v40 = vld [vmem:[#allocation2 + $0x680] sm:$0xff]  ;;  %v525_v43 = vld [vmem:[#allocation2 + $0x6c8] sm:$0xff]  ;;  %v10156_v44 = vcombine.low %v500_v32, %v508_v33  ;;  %v10017_v32 = vcombine.high %v358_v26, %v366_v27  ;;  %v382_v35 = vld [vmem:[#allocation2 + $0x250] sm:$0xff] }
  0xa9   : > { %v524_v41 = vld [vmem:[#allocation2 + $0x6c0] sm:$0xff]  ;;  %v10175_v47 = vcombine.high %v517_v42, %v525_v43  ;;  %v533_v50 = vld [vmem:[#allocation2 + $0x708] sm:$0xff]  ;;  %v10174_v54 = vcombine.low %v517_v42, %v525_v43  ;;  %v390_v42 = vld [vmem:[#allocation2 + $0x290] sm:$0xff] }
  0xaa   : > { %1948 = vmatpush1.bf16.msra.mxu0 %v10060_v60  ;;  %1989 = vmatpush1.bf16.msra.mxu1 %v10062_v61  ;;  %v10173_v46 = vcombine.high %v516_v40, %v524_v41  ;;  %v532_v48 = vld [vmem:[#allocation2 + $0x700] sm:$0xff]  ;;  %v541_v51 = vld [vmem:[#allocation2 + $0x748] sm:$0xff]  ;;  %v10172_v52 = vcombine.low %v516_v40, %v524_v41  ;;  %v10033_v40 = vcombine.high %v374_v34, %v382_v35  ;;  %v398_v43 = vld [vmem:[#allocation2 + $0x2d0] sm:$0xff] }
  0xab   : > { %1949 = vmatprep.subr.bf16.mxu0 %v10077_v62  ;;  %1990 = vmatprep.subr.bf16.mxu1 %v10079_v63  ;;  %v540_v49 = vld [vmem:[#allocation2 + $0x740] sm:$0xff]  ;;  %v10191_v56 = vcombine.high %v533_v50, %v541_v51  ;;  %v549_v60 = vld [vmem:[#allocation2 + $0x788] sm:$0xff]  ;;  %v10190_v63 = vcombine.low %v533_v50, %v541_v51  ;;  %v406_v50 = vld [vmem:[#allocation2 + $0x310] sm:$0xff] }
  0xac   : > { %v10189_v55 = vcombine.high %v532_v48, %v540_v49  ;;  %v548_v58 = vld [vmem:[#allocation2 + $0x780] sm:$0xff]  ;;  %v557_v61 = vld [vmem:[#allocation2 + $0x7c8] sm:$0xff]  ;;  %v10188_v62 = vcombine.low %v532_v48, %v540_v49  ;;  %v10049_v48 = vcombine.high %v390_v42, %v398_v43  ;;  %v414_v51 = vld [vmem:[#allocation2 + $0x350] sm:$0xff] }
  0xad   : > { %v556_v59 = vld [vmem:[#allocation2 + $0x7c0] sm:$0xff]  ;;  %v10207_v1 = vcombine.high %v549_v60, %v557_v61 }
  0xae   : > { %1950 = vmatpush1.bf16.msra.mxu0 %v10076_v4  ;;  %1991 = vmatpush1.bf16.msra.mxu1 %v10078_v5  ;;  %v10205_v0 = vcombine.high %v548_v58, %v556_v59  ;;  %v311_v4 = vld [vmem:[#allocation2 + $0x18] sm:$0xff] }
  0xaf   : > { %1951 = vmatprep.subr.bf16.mxu0 %v10093_v6  ;;  %1992 = vmatprep.subr.bf16.mxu1 %v10095_v7  ;;  %v319_v5 = vld [vmem:[#allocation2 + $0x58] sm:$0xff]  ;;  %v10204_v6 = vcombine.low %v548_v58, %v556_v59  ;;  %v10206_v7 = vcombine.low %v549_v60, %v557_v61  ;;  %v10065_v58 = vcombine.high %v406_v50, %v414_v51  ;;  %v422_v60 = vld [vmem:[#allocation2 + $0x390] sm:$0xff] }
  0xb0   : > { %v9971_v9 = vcombine.high %v311_v4, %v319_v5  ;;  %v9970_v16 = vcombine.low %v311_v4, %v319_v5  ;;  %v430_v61 = vld [vmem:[#allocation2 + $0x3d0] sm:$0xff] }
  0xb1   : > { %v438_v4 = vld [vmem:[#allocation2 + $0x410] sm:$0xff] }
  0xb2   : > { %1952 = vmatpush1.bf16.msra.mxu0 %v10092_v12  ;;  %1993 = vmatpush1.bf16.msra.mxu1 %v10094_v13  ;;  %v11857_v12 = vcombine.low %v11847_v53, %v11847_v53  ;;  %v327_v13 = vld [vmem:[#allocation2 + $0x98] sm:$0xff]  ;;  %v9984_v53 = vcombine.low %v326_v10, %v334_v11  ;;  %v446_v5 = vld [vmem:[#allocation2 + $0x450] sm:$0xff] }
  0xb3   : > { %1953 = vmatprep.subr.bf16.mxu0 %v10109_v14  ;;  %1994 = vmatprep.subr.bf16.mxu1 %v10111_v15  ;;  %v335_v14 = vld [vmem:[#allocation2 + $0xd8] sm:$0xff]  ;;  %v9968_v15 = vcombine.low %v310_v2, %v318_v3  ;;  %v10081_v2 = vcombine.high %v422_v60, %v430_v61  ;;  %v10097_v10 = vcombine.high %v438_v4, %v446_v5 }
  0xb4   : > { %v9987_v18 = vcombine.high %v327_v13, %v335_v14 }
  0xb6   : > { %1954 = vmatpush1.bf16.msra.mxu0 %v10108_v20  ;;  %1995 = vmatpush1.bf16.msra.mxu1 %v10110_v21  ;;  %v350_v20 = vld [vmem:[#allocation2 + $0x150] sm:$0xff]  ;;  %v343_v21 = vld [vmem:[#allocation2 + $0x118] sm:$0xff] }
  0xb7   : > { %1955 = vmatprep.subr.bf16.mxu0 %v10125_v22  ;;  %1996 = vmatprep.subr.bf16.mxu1 %v10127_v23  ;;  %v351_v22 = vld [vmem:[#allocation2 + $0x158] sm:$0xff]  ;;  %v9986_v23 = vcombine.low %v327_v13, %v335_v14  ;;  %v10001_v24 = vcombine.high %v342_v19, %v350_v20  ;;  %v454_v13 = vld [vmem:[#allocation2 + $0x490] sm:$0xff] }
  0xb8   : > { %v10003_v25 = vcombine.high %v343_v21, %v351_v22  ;;  %v462_v14 = vld [vmem:[#allocation2 + $0x4d0] sm:$0xff] }
  0xba   : > { %1956 = vmatpush1.bf16.msra.mxu0 %v10124_v28  ;;  %1997 = vmatpush1.bf16.msra.mxu1 %v10126_v29  ;;  %v359_v28 = vld [vmem:[#allocation2 + $0x198] sm:$0xff] }
  0xbb   : > { %1957 = vmatprep.subr.bf16.mxu0 %v10141_v30  ;;  %1998 = vmatprep.subr.bf16.mxu1 %v10143_v31  ;;  %v367_v29 = vld [vmem:[#allocation2 + $0x1d8] sm:$0xff]  ;;  %v10000_v30 = vcombine.low %v342_v19, %v350_v20  ;;  %v10002_v31 = vcombine.low %v343_v21, %v351_v22  ;;  %v10113_v19 = vcombine.high %v454_v13, %v462_v14  ;;  %v470_v21 = vld [vmem:[#allocation2 + $0x510] sm:$0xff] }
  0xbc   : > { %v10019_v33 = vcombine.high %v359_v28, %v367_v29  ;;  %v478_v22 = vld [vmem:[#allocation2 + $0x550] sm:$0xff] }
  0xbe   : > { %1958 = vmatpush1.bf16.msra.mxu0 %v10140_v36  ;;  %1999 = vmatpush1.bf16.msra.mxu1 %v10142_v37  ;;  %v375_v36 = vld [vmem:[#allocation2 + $0x218] sm:$0xff] }
  0xbf   : > { %1959 = vmatprep.subr.bf16.mxu0 %v10157_v38  ;;  %2000 = vmatprep.subr.bf16.mxu1 %v10159_v39  ;;  %v383_v37 = vld [vmem:[#allocation2 + $0x258] sm:$0xff]  ;;  %v10016_v38 = vcombine.low %v358_v26, %v366_v27  ;;  %v10018_v39 = vcombine.low %v359_v28, %v367_v29  ;;  %v10129_v26 = vcombine.high %v470_v21, %v478_v22  ;;  %v486_v28 = vld [vmem:[#allocation2 + $0x590] sm:$0xff] }
  0xc0   : > { %v10035_v41 = vcombine.high %v375_v36, %v383_v37  ;;  %v494_v29 = vld [vmem:[#allocation2 + $0x5d0] sm:$0xff] }
  0xc2   : > { %1960 = vmatpush1.bf16.msra.mxu0 %v10156_v44  ;;  %2001 = vmatpush1.bf16.msra.mxu1 %v10158_v45  ;;  %v391_v44 = vld [vmem:[#allocation2 + $0x298] sm:$0xff] }
  0xc3   : > { %1961 = vmatprep.subr.bf16.mxu0 %v10173_v46  ;;  %2002 = vmatprep.subr.bf16.mxu1 %v10175_v47  ;;  %v399_v45 = vld [vmem:[#allocation2 + $0x2d8] sm:$0xff]  ;;  %v10032_v46 = vcombine.low %v374_v34, %v382_v35  ;;  %v10034_v47 = vcombine.low %v375_v36, %v383_v37  ;;  %v10145_v34 = vcombine.high %v486_v28, %v494_v29  ;;  %v502_v36 = vld [vmem:[#allocation2 + $0x610] sm:$0xff] }
  0xc4   : > { %v10051_v49 = vcombine.high %v391_v44, %v399_v45  ;;  %v510_v37 = vld [vmem:[#allocation2 + $0x650] sm:$0xff] }
  0xc6   : > { %1962 = vmatpush1.bf16.msra.mxu0 %v10172_v52  ;;  %2003 = vmatpush1.bf16.msra.mxu1 %v10174_v54  ;;  %v407_v52 = vld [vmem:[#allocation2 + $0x318] sm:$0xff] }
  0xc7   : > { %1963 = vmatprep.subr.bf16.mxu0 %v10189_v55  ;;  %2004 = vmatprep.subr.bf16.mxu1 %v10191_v56  ;;  %v415_v54 = vld [vmem:[#allocation2 + $0x358] sm:$0xff]  ;;  %v10048_v55 = vcombine.low %v390_v42, %v398_v43  ;;  %v10050_v56 = vcombine.low %v391_v44, %v399_v45  ;;  %v10161_v42 = vcombine.high %v502_v36, %v510_v37  ;;  %v518_v44 = vld [vmem:[#allocation2 + $0x690] sm:$0xff] }
  0xc8   : > { %v10067_v59 = vcombine.high %v407_v52, %v415_v54  ;;  %v526_v45 = vld [vmem:[#allocation2 + $0x6d0] sm:$0xff] }
  0xca   : > { %1964 = vmatpush1.bf16.msra.mxu0 %v10188_v62  ;;  %2005 = vmatpush1.bf16.msra.mxu1 %v10190_v63  ;;  %v423_v62 = vld [vmem:[#allocation2 + $0x398] sm:$0xff] }
  0xcb   : > { %1965 = vmatprep.subr.bf16.mxu0 %v10205_v0  ;;  %2006 = vmatprep.subr.bf16.mxu1 %v10207_v1  ;;  %v431_v63 = vld [vmem:[#allocation2 + $0x3d8] sm:$0xff]  ;;  %v10064_v0 = vcombine.low %v406_v50, %v414_v51  ;;  %v10066_v1 = vcombine.low %v407_v52, %v415_v54  ;;  %v10177_v50 = vcombine.high %v518_v44, %v526_v45  ;;  %v534_v52 = vld [vmem:[#allocation2 + $0x710] sm:$0xff] }
  0xcc   : > { %v10083_v3 = vcombine.high %v423_v62, %v431_v63  ;;  %v542_v54 = vld [vmem:[#allocation2 + $0x750] sm:$0xff] }
  0xce   : > { %1966 = vmatpush1.bf16.msra.mxu0 %v10204_v6  ;;  %2007 = vmatpush1.bf16.msra.mxu1 %v10206_v7  ;;  %v439_v6 = vld [vmem:[#allocation2 + $0x418] sm:$0xff] }
  0xcf   : > { %2017 = vmatprep.subr.bf16.mxu0 %v9969_v8  ;;  %2058 = vmatprep.subr.bf16.mxu1 %v9971_v9  ;;  %v447_v7 = vld [vmem:[#allocation2 + $0x458] sm:$0xff]  ;;  %v10080_v8 = vcombine.low %v422_v60, %v430_v61  ;;  %v10082_v9 = vcombine.low %v423_v62, %v431_v63  ;;  %v10193_v60 = vcombine.high %v534_v52, %v542_v54  ;;  %v550_v62 = vld [vmem:[#allocation2 + $0x790] sm:$0xff] }
  0xd0   : > { %v10099_v11 = vcombine.high %v439_v6, %v447_v7  ;;  %v558_v63 = vld [vmem:[#allocation2 + $0x7d0] sm:$0xff] }
  0xd1   : > { %1968 = vmatmul.mubr.bf16.vlgmr.msra.gmra.mrb[0].mxu0 %v11857_v12  ;;  %2009 = vmatmul.mubr.bf16.vlgmr.msra.gmra.mrb[0].mxu1 %v11857_v12 }
  0xd2   : > { %2018 = vmatpush1.bf16.msra.mxu0 %v9968_v15  ;;  %2059 = vmatpush1.bf16.msra.mxu1 %v9970_v16  ;;  %v455_v15 = vld [vmem:[#allocation2 + $0x498] sm:$0xff] }
  0xd3   : > { %2019 = vmatprep.subr.bf16.mxu0 %v9985_v17  ;;  %2060 = vmatprep.subr.bf16.mxu1 %v9987_v18  ;;  %v463_v16 = vld [vmem:[#allocation2 + $0x4d8] sm:$0xff]  ;;  %v10096_v17 = vcombine.low %v438_v4, %v446_v5  ;;  %v10098_v18 = vcombine.low %v439_v6, %v447_v7  ;;  %v10209_v4 = vcombine.high %v550_v62, %v558_v63  ;;  %v312_v6 = vld [vmem:[#allocation2 + $0x20] sm:$0xff] }
  0xd4   : > { %2049 = vmatprep.mubr.bf16.mxu0 %v11851_v57  ;;  %2090 = vmatprep.mubr.bf16.mxu1 %v11851_v57  ;;  %v10115_v20 = vcombine.high %v455_v15, %v463_v16  ;;  %v320_v7 = vld [vmem:[#allocation2 + $0x60] sm:$0xff] }
  0xd6   : > { %2020 = vmatpush1.bf16.msra.mxu0 %v9984_v53  ;;  %2061 = vmatpush1.bf16.msra.mxu1 %v9986_v23  ;;  %v471_v53 = vld [vmem:[#allocation2 + $0x518] sm:$0xff] }
  0xd7   : > { %2021 = vmatprep.subr.bf16.mxu0 %v10001_v24  ;;  %2062 = vmatprep.subr.bf16.mxu1 %v10003_v25  ;;  %v479_v23 = vld [vmem:[#allocation2 + $0x558] sm:$0xff]  ;;  %v10112_v24 = vcombine.low %v454_v13, %v462_v14  ;;  %v10114_v25 = vcombine.low %v455_v15, %v463_v16  ;;  %v9973_v13 = vcombine.high %v312_v6, %v320_v7  ;;  %v328_v15 = vld [vmem:[#allocation2 + $0xa0] sm:$0xff] }
  0xd8   : > { %v10131_v27 = vcombine.high %v471_v53, %v479_v23  ;;  %v336_v16 = vld [vmem:[#allocation2 + $0xe0] sm:$0xff] }
  0xda   : > { %2022 = vmatpush1.bf16.msra.mxu0 %v10000_v30  ;;  %2063 = vmatpush1.bf16.msra.mxu1 %v10002_v31  ;;  %v487_v30 = vld [vmem:[#allocation2 + $0x598] sm:$0xff] }
  0xdb   : > { %2023 = vmatprep.subr.bf16.mxu0 %v10017_v32  ;;  %2064 = vmatprep.subr.bf16.mxu1 %v10019_v33  ;;  %v495_v31 = vld [vmem:[#allocation2 + $0x5d8] sm:$0xff]  ;;  %v10128_v32 = vcombine.low %v470_v21, %v478_v22  ;;  %v10130_v33 = vcombine.low %v471_v53, %v479_v23  ;;  %v9989_v21 = vcombine.high %v328_v15, %v336_v16  ;;  %v344_v53 = vld [vmem:[#allocation2 + $0x120] sm:$0xff] }
  0xdc   : > { %v10147_v35 = vcombine.high %v487_v30, %v495_v31  ;;  %v352_v23 = vld [vmem:[#allocation2 + $0x160] sm:$0xff] }
  0xde   : > { %2024 = vmatpush1.bf16.msra.mxu0 %v10016_v38  ;;  %2065 = vmatpush1.bf16.msra.mxu1 %v10018_v39  ;;  %v503_v38 = vld [vmem:[#allocation2 + $0x618] sm:$0xff] }
  0xdf   : > { %2025 = vmatprep.subr.bf16.mxu0 %v10033_v40  ;;  %2066 = vmatprep.subr.bf16.mxu1 %v10035_v41  ;;  %v511_v39 = vld [vmem:[#allocation2 + $0x658] sm:$0xff]  ;;  %v10144_v40 = vcombine.low %v486_v28, %v494_v29  ;;  %v10146_v41 = vcombine.low %v487_v30, %v495_v31  ;;  %v10005_v28 = vcombine.high %v344_v53, %v352_v23  ;;  %v360_v30 = vld [vmem:[#allocation2 + $0x1a0] sm:$0xff] }
  0xe0   : > { %v10163_v43 = vcombine.high %v503_v38, %v511_v39  ;;  %v368_v31 = vld [vmem:[#allocation2 + $0x1e0] sm:$0xff] }
  0xe2   : > { %2026 = vmatpush1.bf16.msra.mxu0 %v10032_v46  ;;  %2067 = vmatpush1.bf16.msra.mxu1 %v10034_v47  ;;  %v519_v46 = vld [vmem:[#allocation2 + $0x698] sm:$0xff] }
  0xe3   : > { %2027 = vmatprep.subr.bf16.mxu0 %v10049_v48  ;;  %2068 = vmatprep.subr.bf16.mxu1 %v10051_v49  ;;  %v527_v47 = vld [vmem:[#allocation2 + $0x6d8] sm:$0xff]  ;;  %v10160_v48 = vcombine.low %v502_v36, %v510_v37  ;;  %v10162_v49 = vcombine.low %v503_v38, %v511_v39  ;;  %v10021_v36 = vcombine.high %v360_v30, %v368_v31  ;;  %v376_v38 = vld [vmem:[#allocation2 + $0x220] sm:$0xff] }
  0xe4   : > { %v10179_v51 = vcombine.high %v519_v46, %v527_v47  ;;  %v384_v39 = vld [vmem:[#allocation2 + $0x260] sm:$0xff] }
  0xe6   : > { %2028 = vmatpush1.bf16.msra.mxu0 %v10048_v55  ;;  %2069 = vmatpush1.bf16.msra.mxu1 %v10050_v56  ;;  %v535_v55 = vld [vmem:[#allocation2 + $0x718] sm:$0xff] }
  0xe7   : > { %2029 = vmatprep.subr.bf16.mxu0 %v10065_v58  ;;  %2070 = vmatprep.subr.bf16.mxu1 %v10067_v59  ;;  %v543_v56 = vld [vmem:[#allocation2 + $0x758] sm:$0xff]  ;;  %v10176_v58 = vcombine.low %v518_v44, %v526_v45  ;;  %v10178_v59 = vcombine.low %v519_v46, %v527_v47  ;;  %v10037_v44 = vcombine.high %v376_v38, %v384_v39  ;;  %v392_v46 = vld [vmem:[#allocation2 + $0x2a0] sm:$0xff] }
  0xe8   : > { %v10195_v61 = vcombine.high %v535_v55, %v543_v56  ;;  %v400_v47 = vld [vmem:[#allocation2 + $0x2e0] sm:$0xff] }
  0xea   : > { %2030 = vmatpush1.bf16.msra.mxu0 %v10064_v0  ;;  %2071 = vmatpush1.bf16.msra.mxu1 %v10066_v1  ;;  %v551_v0 = vld [vmem:[#allocation2 + $0x798] sm:$0xff] }
  0xeb   : > { %2031 = vmatprep.subr.bf16.mxu0 %v10081_v2  ;;  %2072 = vmatprep.subr.bf16.mxu1 %v10083_v3  ;;  %v559_v1 = vld [vmem:[#allocation2 + $0x7d8] sm:$0xff]  ;;  %v10192_v2 = vcombine.low %v534_v52, %v542_v54  ;;  %v10194_v3 = vcombine.low %v535_v55, %v543_v56  ;;  %v10053_v52 = vcombine.high %v392_v46, %v400_v47  ;;  %v408_v55 = vld [vmem:[#allocation2 + $0x320] sm:$0xff] }
  0xec   : > { %v10211_v5 = vcombine.high %v551_v0, %v559_v1  ;;  %v416_v56 = vld [vmem:[#allocation2 + $0x360] sm:$0xff] }
  0xee   : > { %2032 = vmatpush1.bf16.msra.mxu0 %v10080_v8  ;;  %2073 = vmatpush1.bf16.msra.mxu1 %v10082_v9  ;;  %v313_v8 = vld [vmem:[#allocation2 + $0x28] sm:$0xff] }
  0xef   : > { %2033 = vmatprep.subr.bf16.mxu0 %v10097_v10  ;;  %2074 = vmatprep.subr.bf16.mxu1 %v10099_v11  ;;  %v321_v9 = vld [vmem:[#allocation2 + $0x68] sm:$0xff]  ;;  %v10208_v10 = vcombine.low %v550_v62, %v558_v63  ;;  %v10210_v11 = vcombine.low %v551_v0, %v559_v1  ;;  %v10069_v62 = vcombine.high %v408_v55, %v416_v56  ;;  %v424_v0 = vld [vmem:[#allocation2 + $0x3a0] sm:$0xff] }
  0xf0   : > { %v9975_v14 = vcombine.high %v313_v8, %v321_v9  ;;  %v432_v1 = vld [vmem:[#allocation2 + $0x3e0] sm:$0xff] }
  0xf2   : > { %2034 = vmatpush1.bf16.msra.mxu0 %v10096_v17  ;;  %2075 = vmatpush1.bf16.msra.mxu1 %v10098_v18  ;;  %v329_v17 = vld [vmem:[#allocation2 + $0xa8] sm:$0xff] }
  0xf3   : > { %2035 = vmatprep.subr.bf16.mxu0 %v10113_v19  ;;  %2076 = vmatprep.subr.bf16.mxu1 %v10115_v20  ;;  %v337_v18 = vld [vmem:[#allocation2 + $0xe8] sm:$0xff]  ;;  %v9972_v19 = vcombine.low %v312_v6, %v320_v7  ;;  %v9974_v20 = vcombine.low %v313_v8, %v321_v9  ;;  %v10085_v6 = vcombine.high %v424_v0, %v432_v1  ;;  %v440_v8 = vld [vmem:[#allocation2 + $0x420] sm:$0xff] }
  0xf4   : > { %v9991_v22 = vcombine.high %v329_v17, %v337_v18  ;;  %v448_v9 = vld [vmem:[#allocation2 + $0x460] sm:$0xff] }
  0xf6   : > { %2036 = vmatpush1.bf16.msra.mxu0 %v10112_v24  ;;  %2077 = vmatpush1.bf16.msra.mxu1 %v10114_v25  ;;  %v345_v24 = vld [vmem:[#allocation2 + $0x128] sm:$0xff] }
  0xf7   : > { %2037 = vmatprep.subr.bf16.mxu0 %v10129_v26  ;;  %2078 = vmatprep.subr.bf16.mxu1 %v10131_v27  ;;  %v353_v25 = vld [vmem:[#allocation2 + $0x168] sm:$0xff]  ;;  %v9988_v26 = vcombine.low %v328_v15, %v336_v16  ;;  %v9990_v27 = vcombine.low %v329_v17, %v337_v18  ;;  %v10101_v15 = vcombine.high %v440_v8, %v448_v9  ;;  %v456_v17 = vld [vmem:[#allocation2 + $0x4a0] sm:$0xff] }
  0xf8   : > { %v10007_v29 = vcombine.high %v345_v24, %v353_v25  ;;  %v464_v18 = vld [vmem:[#allocation2 + $0x4e0] sm:$0xff] }
  0xfa   : > { %2038 = vmatpush1.bf16.msra.mxu0 %v10128_v32  ;;  %2079 = vmatpush1.bf16.msra.mxu1 %v10130_v33  ;;  %v361_v32 = vld [vmem:[#allocation2 + $0x1a8] sm:$0xff] }
  0xfb   : > { %2039 = vmatprep.subr.bf16.mxu0 %v10145_v34  ;;  %2080 = vmatprep.subr.bf16.mxu1 %v10147_v35  ;;  %v369_v33 = vld [vmem:[#allocation2 + $0x1e8] sm:$0xff]  ;;  %v10004_v34 = vcombine.low %v344_v53, %v352_v23  ;;  %v10006_v35 = vcombine.low %v345_v24, %v353_v25  ;;  %v10117_v53 = vcombine.high %v456_v17, %v464_v18  ;;  %v472_v24 = vld [vmem:[#allocation2 + $0x520] sm:$0xff] }
  0xfc   : > { %v10023_v37 = vcombine.high %v361_v32, %v369_v33  ;;  %v480_v25 = vld [vmem:[#allocation2 + $0x560] sm:$0xff] }
  0xfe   : > { %2040 = vmatpush1.bf16.msra.mxu0 %v10144_v40  ;;  %2081 = vmatpush1.bf16.msra.mxu1 %v10146_v41  ;;  %v377_v40 = vld [vmem:[#allocation2 + $0x228] sm:$0xff] }
  0xff   : > { %2041 = vmatprep.subr.bf16.mxu0 %v10161_v42  ;;  %2082 = vmatprep.subr.bf16.mxu1 %v10163_v43  ;;  %v385_v41 = vld [vmem:[#allocation2 + $0x268] sm:$0xff]  ;;  %v10020_v42 = vcombine.low %v360_v30, %v368_v31  ;;  %v10022_v43 = vcombine.low %v361_v32, %v369_v33  ;;  %v10133_v30 = vcombine.high %v472_v24, %v480_v25  ;;  %v488_v32 = vld [vmem:[#allocation2 + $0x5a0] sm:$0xff] }
 0x100   : > { %v10039_v45 = vcombine.high %v377_v40, %v385_v41  ;;  %v496_v33 = vld [vmem:[#allocation2 + $0x5e0] sm:$0xff] }
 0x102   : > { %2042 = vmatpush1.bf16.msra.mxu0 %v10160_v48  ;;  %2083 = vmatpush1.bf16.msra.mxu1 %v10162_v49  ;;  %v393_v48 = vld [vmem:[#allocation2 + $0x2a8] sm:$0xff] }
 0x103   : > { %2043 = vmatprep.subr.bf16.mxu0 %v10177_v50  ;;  %2084 = vmatprep.subr.bf16.mxu1 %v10179_v51  ;;  %v401_v49 = vld [vmem:[#allocation2 + $0x2e8] sm:$0xff]  ;;  %v10036_v50 = vcombine.low %v376_v38, %v384_v39  ;;  %v10038_v51 = vcombine.low %v377_v40, %v385_v41  ;;  %v10149_v38 = vcombine.high %v488_v32, %v496_v33  ;;  %v504_v40 = vld [vmem:[#allocation2 + $0x620] sm:$0xff] }
 0x104   : > { %v10055_v54 = vcombine.high %v393_v48, %v401_v49  ;;  %v512_v41 = vld [vmem:[#allocation2 + $0x660] sm:$0xff] }
 0x106   : > { %2044 = vmatpush1.bf16.msra.mxu0 %v10176_v58  ;;  %2085 = vmatpush1.bf16.msra.mxu1 %v10178_v59  ;;  %v409_v58 = vld [vmem:[#allocation2 + $0x328] sm:$0xff] }
 0x107   : > { %2045 = vmatprep.subr.bf16.mxu0 %v10193_v60  ;;  %2086 = vmatprep.subr.bf16.mxu1 %v10195_v61  ;;  %v417_v59 = vld [vmem:[#allocation2 + $0x368] sm:$0xff]  ;;  %v10052_v60 = vcombine.low %v392_v46, %v400_v47  ;;  %v10054_v61 = vcombine.low %v393_v48, %v401_v49  ;;  %v10165_v46 = vcombine.high %v504_v40, %v512_v41  ;;  %v520_v48 = vld [vmem:[#allocation2 + $0x6a0] sm:$0xff] }
 0x108   : > { %v10071_v63 = vcombine.high %v409_v58, %v417_v59  ;;  %v528_v49 = vld [vmem:[#allocation2 + $0x6e0] sm:$0xff] }
 0x10a   : > { %2046 = vmatpush1.bf16.msra.mxu0 %v10192_v2  ;;  %2087 = vmatpush1.bf16.msra.mxu1 %v10194_v3  ;;  %v425_v2 = vld [vmem:[#allocation2 + $0x3a8] sm:$0xff] }
 0x10b   : > { %2047 = vmatprep.subr.bf16.mxu0 %v10209_v4  ;;  %2088 = vmatprep.subr.bf16.mxu1 %v10211_v5  ;;  %v433_v3 = vld [vmem:[#allocation2 + $0x3e8] sm:$0xff]  ;;  %v10068_v4 = vcombine.low %v408_v55, %v416_v56  ;;  %v10070_v5 = vcombine.low %v409_v58, %v417_v59  ;;  %v10181_v55 = vcombine.high %v520_v48, %v528_v49  ;;  %v536_v58 = vld [vmem:[#allocation2 + $0x720] sm:$0xff] }
 0x10c   : > { %v10087_v7 = vcombine.high %v425_v2, %v433_v3  ;;  %v544_v59 = vld [vmem:[#allocation2 + $0x760] sm:$0xff] }
 0x10e   : > { %2048 = vmatpush1.bf16.msra.mxu0 %v10208_v10  ;;  %2089 = vmatpush1.bf16.msra.mxu1 %v10210_v11  ;;  %v441_v10 = vld [vmem:[#allocation2 + $0x428] sm:$0xff] }
 0x10f   : > { %2099 = vmatprep.subr.bf16.mxu0 %v9973_v13  ;;  %2140 = vmatprep.subr.bf16.mxu1 %v9975_v14  ;;  %v449_v11 = vld [vmem:[#allocation2 + $0x468] sm:$0xff]  ;;  %v10084_v13 = vcombine.low %v424_v0, %v432_v1  ;;  %v10086_v14 = vcombine.low %v425_v2, %v433_v3  ;;  %v10197_v0 = vcombine.high %v536_v58, %v544_v59  ;;  %v552_v2 = vld [vmem:[#allocation2 + $0x7a0] sm:$0xff] }
 0x110   : > { %v10103_v16 = vcombine.high %v441_v10, %v449_v11  ;;  %v560_v3 = vld [vmem:[#allocation2 + $0x7e0] sm:$0xff] }
 0x111   : > { %2050 = vmatmul.mubr.bf16.vlgmr.msra.gmra.mrb[4].mxu0 %v11857_v12  ;;  %2091 = vmatmul.mubr.bf16.vlgmr.msra.gmra.mrb[4].mxu1 %v11857_v12 }
 0x112   : > { %2100 = vmatpush1.bf16.msra.mxu0 %v9972_v19  ;;  %2141 = vmatpush1.bf16.msra.mxu1 %v9974_v20  ;;  %v457_v19 = vld [vmem:[#allocation2 + $0x4a8] sm:$0xff] }
 0x113   : > { %2101 = vmatprep.subr.bf16.mxu0 %v9989_v21  ;;  %2142 = vmatprep.subr.bf16.mxu1 %v9991_v22  ;;  %v465_v20 = vld [vmem:[#allocation2 + $0x4e8] sm:$0xff]  ;;  %v10100_v21 = vcombine.low %v440_v8, %v448_v9  ;;  %v10102_v22 = vcombine.low %v441_v10, %v449_v11  ;;  %v10213_v8 = vcombine.high %v552_v2, %v560_v3  ;;  %v314_v10 = vld [vmem:[#allocation2 + $0x30] sm:$0xff] }
 0x114   : > { %2131 = vmatprep.mubr.bf16.mxu0 %v11851_v57  ;;  %2172 = vmatprep.mubr.bf16.mxu1 %v11851_v57  ;;  %v10119_v23 = vcombine.high %v457_v19, %v465_v20  ;;  %v322_v11 = vld [vmem:[#allocation2 + $0x70] sm:$0xff] }
 0x116   : > { %2102 = vmatpush1.bf16.msra.mxu0 %v9988_v26  ;;  %2143 = vmatpush1.bf16.msra.mxu1 %v9990_v27  ;;  %v473_v26 = vld [vmem:[#allocation2 + $0x528] sm:$0xff] }
 0x117   : > { %2103 = vmatprep.subr.bf16.mxu0 %v10005_v28  ;;  %2144 = vmatprep.subr.bf16.mxu1 %v10007_v29  ;;  %v481_v27 = vld [vmem:[#allocation2 + $0x568] sm:$0xff]  ;;  %v10116_v28 = vcombine.low %v456_v17, %v464_v18  ;;  %v10118_v29 = vcombine.low %v457_v19, %v465_v20  ;;  %v9977_v17 = vcombine.high %v314_v10, %v322_v11  ;;  %v330_v19 = vld [vmem:[#allocation2 + $0xb0] sm:$0xff] }
 0x118   : > { %v10135_v31 = vcombine.high %v473_v26, %v481_v27  ;;  %v338_v20 = vld [vmem:[#allocation2 + $0xf0] sm:$0xff] }
 0x11a   : > { %2104 = vmatpush1.bf16.msra.mxu0 %v10004_v34  ;;  %2145 = vmatpush1.bf16.msra.mxu1 %v10006_v35  ;;  %v489_v34 = vld [vmem:[#allocation2 + $0x5a8] sm:$0xff] }
 0x11b   : > { %2105 = vmatprep.subr.bf16.mxu0 %v10021_v36  ;;  %2146 = vmatprep.subr.bf16.mxu1 %v10023_v37  ;;  %v497_v35 = vld [vmem:[#allocation2 + $0x5e8] sm:$0xff]  ;;  %v10132_v36 = vcombine.low %v472_v24, %v480_v25  ;;  %v10134_v37 = vcombine.low %v473_v26, %v481_v27  ;;  %v9993_v24 = vcombine.high %v330_v19, %v338_v20  ;;  %v346_v26 = vld [vmem:[#allocation2 + $0x130] sm:$0xff] }
 0x11c   : > { %v10151_v39 = vcombine.high %v489_v34, %v497_v35  ;;  %v354_v27 = vld [vmem:[#allocation2 + $0x170] sm:$0xff] }
 0x11e   : > { %2106 = vmatpush1.bf16.msra.mxu0 %v10020_v42  ;;  %2147 = vmatpush1.bf16.msra.mxu1 %v10022_v43  ;;  %v505_v42 = vld [vmem:[#allocation2 + $0x628] sm:$0xff] }
 0x11f   : > { %2107 = vmatprep.subr.bf16.mxu0 %v10037_v44  ;;  %2148 = vmatprep.subr.bf16.mxu1 %v10039_v45  ;;  %v513_v43 = vld [vmem:[#allocation2 + $0x668] sm:$0xff]  ;;  %v10148_v44 = vcombine.low %v488_v32, %v496_v33  ;;  %v10150_v45 = vcombine.low %v489_v34, %v497_v35  ;;  %v10009_v32 = vcombine.high %v346_v26, %v354_v27  ;;  %v362_v34 = vld [vmem:[#allocation2 + $0x1b0] sm:$0xff] }
 0x120   : > { %v10167_v47 = vcombine.high %v505_v42, %v513_v43  ;;  %v370_v35 = vld [vmem:[#allocation2 + $0x1f0] sm:$0xff] }
 0x122   : > { %2108 = vmatpush1.bf16.msra.mxu0 %v10036_v50  ;;  %2149 = vmatpush1.bf16.msra.mxu1 %v10038_v51  ;;  %v521_v50 = vld [vmem:[#allocation2 + $0x6a8] sm:$0xff] }
 0x123   : > { %2109 = vmatprep.subr.bf16.mxu0 %v10053_v52  ;;  %2150 = vmatprep.subr.bf16.mxu1 %v10055_v54  ;;  %v529_v51 = vld [vmem:[#allocation2 + $0x6e8] sm:$0xff]  ;;  %v10164_v52 = vcombine.low %v504_v40, %v512_v41  ;;  %v10166_v54 = vcombine.low %v505_v42, %v513_v43  ;;  %v10025_v40 = vcombine.high %v362_v34, %v370_v35  ;;  %v378_v42 = vld [vmem:[#allocation2 + $0x230] sm:$0xff] }
 0x124   : > { %v10183_v56 = vcombine.high %v521_v50, %v529_v51  ;;  %v386_v43 = vld [vmem:[#allocation2 + $0x270] sm:$0xff] }
 0x126   : > { %2110 = vmatpush1.bf16.msra.mxu0 %v10052_v60  ;;  %2151 = vmatpush1.bf16.msra.mxu1 %v10054_v61  ;;  %v537_v60 = vld [vmem:[#allocation2 + $0x728] sm:$0xff] }
 0x127   : > { %2111 = vmatprep.subr.bf16.mxu0 %v10069_v62  ;;  %2152 = vmatprep.subr.bf16.mxu1 %v10071_v63  ;;  %v545_v61 = vld [vmem:[#allocation2 + $0x768] sm:$0xff]  ;;  %v10180_v62 = vcombine.low %v520_v48, %v528_v49  ;;  %v10182_v63 = vcombine.low %v521_v50, %v529_v51  ;;  %v10041_v48 = vcombine.high %v378_v42, %v386_v43  ;;  %v394_v49 = vld [vmem:[#allocation2 + $0x2b0] sm:$0xff]  ;;  %v395_v51 = vld [vmem:[#allocation2 + $0x2b8] sm:$0xff] }
 0x128   : > { %v10199_v1 = vcombine.high %v537_v60, %v545_v61  ;;  %v402_v50 = vld [vmem:[#allocation2 + $0x2f0] sm:$0xff] }
 0x12a   : > { %2112 = vmatpush1.bf16.msra.mxu0 %v10068_v4  ;;  %2153 = vmatpush1.bf16.msra.mxu1 %v10070_v5  ;;  %v553_v4 = vld [vmem:[#allocation2 + $0x7a8] sm:$0xff] }
 0x12b   : > { %2113 = vmatprep.subr.bf16.mxu0 %v10085_v6  ;;  %2154 = vmatprep.subr.bf16.mxu1 %v10087_v7  ;;  %v561_v5 = vld [vmem:[#allocation2 + $0x7e8] sm:$0xff]  ;;  %v10196_v6 = vcombine.low %v536_v58, %v544_v59  ;;  %v10198_v7 = vcombine.low %v537_v60, %v545_v61  ;;  %v410_v59 = vld [vmem:[#allocation2 + $0x330] sm:$0xff]  ;;  %v411_v61 = vld [vmem:[#allocation2 + $0x338] sm:$0xff] }
 0x12c   : > { %v10215_v9 = vcombine.high %v553_v4, %v561_v5  ;;  %v418_v60 = vld [vmem:[#allocation2 + $0x370] sm:$0xff] }
 0x12e   : > { %2114 = vmatpush1.bf16.msra.mxu0 %v10084_v13  ;;  %2155 = vmatpush1.bf16.msra.mxu1 %v10086_v14  ;;  %v315_v13 = vld [vmem:[#allocation2 + $0x38] sm:$0xff] }
 0x12f   : > { %2115 = vmatprep.subr.bf16.mxu0 %v10101_v15  ;;  %2156 = vmatprep.subr.bf16.mxu1 %v10103_v16  ;;  %v323_v14 = vld [vmem:[#allocation2 + $0x78] sm:$0xff]  ;;  %v10212_v15 = vcombine.low %v552_v2, %v560_v3  ;;  %v10214_v16 = vcombine.low %v553_v4, %v561_v5  ;;  %v426_v3 = vld [vmem:[#allocation2 + $0x3b0] sm:$0xff] }
 0x130   : > { %v9979_v18 = vcombine.high %v315_v13, %v323_v14  ;;  %v434_v4 = vld [vmem:[#allocation2 + $0x3f0] sm:$0xff]  ;;  %v427_v5 = vld [vmem:[#allocation2 + $0x3b8] sm:$0xff] }
 0x132   : > { %2116 = vmatpush1.bf16.msra.mxu0 %v10100_v21  ;;  %2157 = vmatpush1.bf16.msra.mxu1 %v10102_v22  ;;  %v331_v21 = vld [vmem:[#allocation2 + $0xb8] sm:$0xff] }
 0x133   : > { %2117 = vmatprep.subr.bf16.mxu0 %v10117_v53  ;;  %2158 = vmatprep.subr.bf16.mxu1 %v10119_v23  ;;  %v339_v22 = vld [vmem:[#allocation2 + $0xf8] sm:$0xff]  ;;  %v9976_v53 = vcombine.low %v314_v10, %v322_v11  ;;  %v9978_v23 = vcombine.low %v315_v13, %v323_v14  ;;  %v442_v11 = vld [vmem:[#allocation2 + $0x430] sm:$0xff] }
 0x134   : > { %v9995_v25 = vcombine.high %v331_v21, %v339_v22  ;;  %v450_v13 = vld [vmem:[#allocation2 + $0x470] sm:$0xff]  ;;  %v443_v14 = vld [vmem:[#allocation2 + $0x438] sm:$0xff] }
 0x136   : > { %2118 = vmatpush1.bf16.msra.mxu0 %v10116_v28  ;;  %2159 = vmatpush1.bf16.msra.mxu1 %v10118_v29  ;;  %v347_v28 = vld [vmem:[#allocation2 + $0x138] sm:$0xff] }
 0x137   : > { %2119 = vmatprep.subr.bf16.mxu0 %v10133_v30  ;;  %2160 = vmatprep.subr.bf16.mxu1 %v10135_v31  ;;  %v355_v29 = vld [vmem:[#allocation2 + $0x178] sm:$0xff]  ;;  %v9992_v30 = vcombine.low %v330_v19, %v338_v20  ;;  %v9994_v31 = vcombine.low %v331_v21, %v339_v22  ;;  %v458_v20 = vld [vmem:[#allocation2 + $0x4b0] sm:$0xff] }
 0x138   : > { %v10011_v33 = vcombine.high %v347_v28, %v355_v29  ;;  %v466_v21 = vld [vmem:[#allocation2 + $0x4f0] sm:$0xff]  ;;  %v459_v22 = vld [vmem:[#allocation2 + $0x4b8] sm:$0xff] }
 0x13a   : > { %2120 = vmatpush1.bf16.msra.mxu0 %v10132_v36  ;;  %2161 = vmatpush1.bf16.msra.mxu1 %v10134_v37  ;;  %v363_v36 = vld [vmem:[#allocation2 + $0x1b8] sm:$0xff] }
 0x13b   : > { %2121 = vmatprep.subr.bf16.mxu0 %v10149_v38  ;;  %2162 = vmatprep.subr.bf16.mxu1 %v10151_v39  ;;  %v371_v37 = vld [vmem:[#allocation2 + $0x1f8] sm:$0xff]  ;;  %v10008_v38 = vcombine.low %v346_v26, %v354_v27  ;;  %v10010_v39 = vcombine.low %v347_v28, %v355_v29  ;;  %v474_v27 = vld [vmem:[#allocation2 + $0x530] sm:$0xff] }
 0x13c   : > { %v10027_v41 = vcombine.high %v363_v36, %v371_v37  ;;  %v482_v28 = vld [vmem:[#allocation2 + $0x570] sm:$0xff]  ;;  %v475_v29 = vld [vmem:[#allocation2 + $0x538] sm:$0xff] }
 0x13e   : > { %2122 = vmatpush1.bf16.msra.mxu0 %v10148_v44  ;;  %2163 = vmatpush1.bf16.msra.mxu1 %v10150_v45  ;;  %v379_v44 = vld [vmem:[#allocation2 + $0x238] sm:$0xff] }
 0x13f   : > { %2123 = vmatprep.subr.bf16.mxu0 %v10165_v46  ;;  %2164 = vmatprep.subr.bf16.mxu1 %v10167_v47  ;;  %v387_v45 = vld [vmem:[#allocation2 + $0x278] sm:$0xff]  ;;  %v10024_v46 = vcombine.low %v362_v34, %v370_v35  ;;  %v10026_v47 = vcombine.low %v363_v36, %v371_v37  ;;  %v490_v35 = vld [vmem:[#allocation2 + $0x5b0] sm:$0xff] }
 0x140   : > { %v498_v36 = vld [vmem:[#allocation2 + $0x5f0] sm:$0xff]  ;;  %v491_v37 = vld [vmem:[#allocation2 + $0x5b8] sm:$0xff] }
 0x142   : > { %2124 = vmatpush1.bf16.msra.mxu0 %v10164_v52  ;;  %2165 = vmatpush1.bf16.msra.mxu1 %v10166_v54  ;;  %v403_v52 = vld [vmem:[#allocation2 + $0x2f8] sm:$0xff]  ;;  %v10040_v54 = vcombine.low %v378_v42, %v386_v43  ;;  %v506_v43 = vld [vmem:[#allocation2 + $0x630] sm:$0xff] }
 0x143   : > { %2125 = vmatprep.subr.bf16.mxu0 %v10181_v55  ;;  %2166 = vmatprep.subr.bf16.mxu1 %v10183_v56  ;;  %v10042_v55 = vcombine.low %v379_v44, %v387_v45  ;;  %v10057_v56 = vcombine.high %v394_v49, %v402_v50  ;;  %v10059_v58 = vcombine.high %v395_v51, %v403_v52 }
 0x146   : > { %2126 = vmatpush1.bf16.msra.mxu0 %v10180_v62  ;;  %2167 = vmatpush1.bf16.msra.mxu1 %v10182_v63  ;;  %v419_v62 = vld [vmem:[#allocation2 + $0x378] sm:$0xff]  ;;  %v10056_v63 = vcombine.low %v394_v49, %v402_v50  ;;  %v522_v50 = vld [vmem:[#allocation2 + $0x6b0] sm:$0xff] }
 0x147   : > { %2127 = vmatprep.subr.bf16.mxu0 %v10197_v0  ;;  %2168 = vmatprep.subr.bf16.mxu1 %v10199_v1  ;;  %v10058_v0 = vcombine.low %v395_v51, %v403_v52  ;;  %v10073_v1 = vcombine.high %v410_v59, %v418_v60  ;;  %v10075_v2 = vcombine.high %v411_v61, %v419_v62  ;;  %v530_v51 = vld [vmem:[#allocation2 + $0x6f0] sm:$0xff]  ;;  %v523_v52 = vld [vmem:[#allocation2 + $0x6b8] sm:$0xff] }
 0x14a   : > { %2128 = vmatpush1.bf16.msra.mxu0 %v10196_v6  ;;  %2169 = vmatpush1.bf16.msra.mxu1 %v10198_v7  ;;  %v435_v6 = vld [vmem:[#allocation2 + $0x3f8] sm:$0xff]  ;;  %v10072_v7 = vcombine.low %v410_v59, %v418_v60  ;;  %v538_v60 = vld [vmem:[#allocation2 + $0x730] sm:$0xff] }
 0x14b   : > { %2129 = vmatprep.subr.bf16.mxu0 %v10213_v8  ;;  %2170 = vmatprep.subr.bf16.mxu1 %v10215_v9  ;;  %v10074_v8 = vcombine.low %v411_v61, %v419_v62  ;;  %v10089_v9 = vcombine.high %v426_v3, %v434_v4  ;;  %v10091_v10 = vcombine.high %v427_v5, %v435_v6  ;;  %v546_v61 = vld [vmem:[#allocation2 + $0x770] sm:$0xff]  ;;  %v539_v62 = vld [vmem:[#allocation2 + $0x738] sm:$0xff] }
 0x14e   : > { %2130 = vmatpush1.bf16.msra.mxu0 %v10212_v15  ;;  %2171 = vmatpush1.bf16.msra.mxu1 %v10214_v16  ;;  %v451_v15 = vld [vmem:[#allocation2 + $0x478] sm:$0xff]  ;;  %v10088_v16 = vcombine.low %v426_v3, %v434_v4  ;;  %v554_v4 = vld [vmem:[#allocation2 + $0x7b0] sm:$0xff] }
 0x14f   : > { %2181 = vmatprep.subr.bf16.mxu0 %v9977_v17  ;;  %2222 = vmatprep.subr.bf16.mxu1 %v9979_v18  ;;  %v10090_v17 = vcombine.low %v427_v5, %v435_v6  ;;  %v10105_v18 = vcombine.high %v442_v11, %v450_v13  ;;  %v10107_v19 = vcombine.high %v443_v14, %v451_v15  ;;  %v562_v5 = vld [vmem:[#allocation2 + $0x7f0] sm:$0xff]  ;;  %v555_v6 = vld [vmem:[#allocation2 + $0x7b8] sm:$0xff] }
 0x151   : > { %2132 = vmatmul.mubr.bf16.vlgmr.msra.gmra.mrb[8].mxu0 %v11857_v12  ;;  %2173 = vmatmul.mubr.bf16.vlgmr.msra.gmra.mrb[8].mxu1 %v11857_v12 }
 0x152   : > { %2182 = vmatpush1.bf16.msra.mxu0 %v9976_v53  ;;  %2223 = vmatpush1.bf16.msra.mxu1 %v9978_v23  ;;  %v467_v53 = vld [vmem:[#allocation2 + $0x4f8] sm:$0xff]  ;;  %v10104_v23 = vcombine.low %v442_v11, %v450_v13  ;;  %v2295_v13 = vld [vmem:[%s11838_s17] sm:$0xff] }
 0x153   : > { %2183 = vmatprep.subr.bf16.mxu0 %v9993_v24  ;;  %2224 = vmatprep.subr.bf16.mxu1 %v9995_v25  ;;  %v10106_v24 = vcombine.low %v443_v14, %v451_v15  ;;  %v10121_v25 = vcombine.high %v458_v20, %v466_v21  ;;  %v10123_v26 = vcombine.high %v459_v22, %v467_v53  ;;  %v2299_v14 = vld [vmem:[%s11838_s17 + $0x20] sm:$0xff]  ;;  %v2296_v15 = vld [vmem:[%s11838_s17 + $0x8] sm:$0xff] }
 0x154   : > { %2213 = vmatprep.mubr.bf16.mxu0 %v11851_v57  ;;  %2254 = vmatprep.mubr.bf16.mxu1 %v11851_v57  ;;  %v10043_v57 = vcombine.high %v379_v44, %v387_v45  ;;  %v514_v44 = vld [vmem:[#allocation2 + $0x670] sm:$0xff]  ;;  %v507_v45 = vld [vmem:[#allocation2 + $0x638] sm:$0xff] }
 0x156   : > { %2184 = vmatpush1.bf16.msra.mxu0 %v9992_v30  ;;  %2225 = vmatpush1.bf16.msra.mxu1 %v9994_v31  ;;  %v483_v30 = vld [vmem:[#allocation2 + $0x578] sm:$0xff]  ;;  %v10120_v31 = vcombine.low %v458_v20, %v466_v21  ;;  %v2303_v21 = vld [vmem:[%s11838_s17 + $0x40] sm:$0xff] }
 0x157   : > { %2185 = vmatprep.subr.bf16.mxu0 %v10009_v32  ;;  %2226 = vmatprep.subr.bf16.mxu1 %v10011_v33  ;;  %v10122_v32 = vcombine.low %v459_v22, %v467_v53  ;;  %v10137_v33 = vcombine.high %v474_v27, %v482_v28  ;;  %v10139_v34 = vcombine.high %v475_v29, %v483_v30  ;;  %v2307_v22 = vld [vmem:[%s11838_s17 + $0x60] sm:$0xff]  ;;  %v2304_v53 = vld [vmem:[%s11838_s17 + $0x48] sm:$0xff] }
 0x15a   : > { %2186 = vmatpush1.bf16.msra.mxu0 %v10008_v38  ;;  %2227 = vmatpush1.bf16.msra.mxu1 %v10010_v39  ;;  %v499_v38 = vld [vmem:[#allocation2 + $0x5f8] sm:$0xff]  ;;  %v10136_v39 = vcombine.low %v474_v27, %v482_v28  ;;  %v2311_v28 = vld [vmem:[%s11838_s17 + $0x80] sm:$0xff] }
 0x15b   : > { %2187 = vmatprep.subr.bf16.mxu0 %v10025_v40  ;;  %2228 = vmatprep.subr.bf16.mxu1 %v10027_v41  ;;  %v10138_v40 = vcombine.low %v475_v29, %v483_v30  ;;  %v10153_v41 = vcombine.high %v490_v35, %v498_v36  ;;  %v10155_v42 = vcombine.high %v491_v37, %v499_v38  ;;  %v2315_v29 = vld [vmem:[%s11838_s17 + $0xa0] sm:$0xff]  ;;  %v2312_v30 = vld [vmem:[%s11838_s17 + $0x88] sm:$0xff] }
 0x15e   : > { %2188 = vmatpush1.bf16.msra.mxu0 %v10024_v46  ;;  %2229 = vmatpush1.bf16.msra.mxu1 %v10026_v47  ;;  %v515_v46 = vld [vmem:[#allocation2 + $0x678] sm:$0xff]  ;;  %v10152_v47 = vcombine.low %v490_v35, %v498_v36  ;;  %v2319_v36 = vld [vmem:[%s11838_s17 + $0xc0] sm:$0xff] }
 0x15f   : > { %2189 = vmatprep.subr.bf16.mxu0 %v10041_v48  ;;  %2230 = vmatprep.subr.bf16.mxu1 %v10043_v57  ;;  %v10154_v48 = vcombine.low %v491_v37, %v499_v38  ;;  %v10169_v57 = vcombine.high %v506_v43, %v514_v44  ;;  %v10171_v49 = vcombine.high %v507_v45, %v515_v46  ;;  %v2323_v37 = vld [vmem:[%s11838_s17 + $0xe0] sm:$0xff]  ;;  %v2320_v38 = vld [vmem:[%s11838_s17 + $0xc8] sm:$0xff] }
 0x162   : > { %2190 = vmatpush1.bf16.msra.mxu0 %v10040_v54  ;;  %2231 = vmatpush1.bf16.msra.mxu1 %v10042_v55  ;;  %v531_v54 = vld [vmem:[#allocation2 + $0x6f8] sm:$0xff]  ;;  %v10168_v55 = vcombine.low %v506_v43, %v514_v44  ;;  %v2327_v44 = vld [vmem:[%s11838_s17 + $0x100] sm:$0xff] }
 0x163   : > { %2191 = vmatprep.subr.bf16.mxu0 %v10057_v56  ;;  %2232 = vmatprep.subr.bf16.mxu1 %v10059_v58  ;;  %v10170_v56 = vcombine.low %v507_v45, %v515_v46  ;;  %v10185_v58 = vcombine.high %v522_v50, %v530_v51  ;;  %v10187_v59 = vcombine.high %v523_v52, %v531_v54  ;;  %v2331_v45 = vld [vmem:[%s11838_s17 + $0x120] sm:$0xff]  ;;  %v2328_v46 = vld [vmem:[%s11838_s17 + $0x108] sm:$0xff] }
 0x166   : > { %2192 = vmatpush1.bf16.msra.mxu0 %v10056_v63  ;;  %2233 = vmatpush1.bf16.msra.mxu1 %v10058_v0  ;;  %v547_v63 = vld [vmem:[#allocation2 + $0x778] sm:$0xff]  ;;  %v10184_v0 = vcombine.low %v522_v50, %v530_v51  ;;  %v10253_v50 = vcombine.high %v2327_v44, %v2331_v45 }
 0x167   : > { %2193 = vmatprep.subr.bf16.mxu0 %v10073_v1  ;;  %2234 = vmatprep.subr.bf16.mxu1 %v10075_v2  ;;  %v10186_v1 = vcombine.low %v523_v52, %v531_v54  ;;  %v10201_v2 = vcombine.high %v538_v60, %v546_v61  ;;  %v10203_v3 = vcombine.high %v539_v62, %v547_v63  ;;  %v2335_v52 = vld [vmem:[%s11838_s17 + $0x140] sm:$0xff] }
 0x168   : > { %v2339_v54 = vld [vmem:[%s11838_s17 + $0x160] sm:$0xff] }
 0x16a   : > { %2194 = vmatpush1.bf16.msra.mxu0 %v10072_v7  ;;  %2235 = vmatpush1.bf16.msra.mxu1 %v10074_v8  ;;  %v563_v7 = vld [vmem:[#allocation2 + $0x7f8] sm:$0xff]  ;;  %v10200_v8 = vcombine.low %v538_v60, %v546_v61  ;;  %v11902_v61 = vld [vmem:[#allocation4] sm:$0xff] }
 0x16b   : > { %2195 = vmatprep.subr.bf16.mxu0 %v10089_v9  ;;  %2236 = vmatprep.subr.bf16.mxu1 %v10091_v10  ;;  %v10202_v9 = vcombine.low %v539_v62, %v547_v63  ;;  %v10217_v10 = vcombine.high %v554_v4, %v562_v5  ;;  %v10219_v11 = vcombine.high %v555_v6, %v563_v7 }
 0x16c   : > { %v10261_v62 = vcombine.high %v2335_v52, %v2339_v54 }
 0x16e   : > { %2196 = vmatpush1.bf16.msra.mxu0 %v10088_v16  ;;  %2237 = vmatpush1.bf16.msra.mxu1 %v10090_v17  ;;  %v2300_v16 = vld [vmem:[%s11838_s17 + $0x28] sm:$0xff]  ;;  %v10216_v17 = vcombine.low %v554_v4, %v562_v5  ;;  %v10260_v5 = vcombine.low %v2335_v52, %v2339_v54  ;;  %v2387_v52 = vld [vmem:[%s11838_s17 + $0x2e0] sm:$0xff] }
 0x16f   : > { %2197 = vmatprep.subr.bf16.mxu0 %v10105_v18  ;;  %2238 = vmatprep.subr.bf16.mxu1 %v10107_v19  ;;  %v10218_v18 = vcombine.low %v555_v6, %v563_v7  ;;  %v10221_v19 = vcombine.high %v2295_v13, %v2299_v14  ;;  %v10223_v20 = vcombine.high %v2296_v15, %v2300_v16  ;;  %v2384_v54 = vld [vmem:[%s11838_s17 + $0x2c8] sm:$0xff] }
 0x172   : > { %2198 = vmatpush1.bf16.msra.mxu0 %v10104_v23  ;;  %2239 = vmatpush1.bf16.msra.mxu1 %v10106_v24  ;;  %v2308_v23 = vld [vmem:[%s11838_s17 + $0x68] sm:$0xff]  ;;  %v10220_v24 = vcombine.low %v2295_v13, %v2299_v14 }
 0x173   : > { %2199 = vmatprep.subr.bf16.mxu0 %v10121_v25  ;;  %2240 = vmatprep.subr.bf16.mxu1 %v10123_v26  ;;  %v10222_v25 = vcombine.low %v2296_v15, %v2300_v16  ;;  %v10229_v26 = vcombine.high %v2303_v21, %v2307_v22  ;;  %v10231_v27 = vcombine.high %v2304_v53, %v2308_v23 }
 0x176   : > { %2200 = vmatpush1.bf16.msra.mxu0 %v10120_v31  ;;  %2241 = vmatpush1.bf16.msra.mxu1 %v10122_v32  ;;  %v2316_v31 = vld [vmem:[%s11838_s17 + $0xa8] sm:$0xff]  ;;  %v10228_v32 = vcombine.low %v2303_v21, %v2307_v22 }
 0x177   : > { %2201 = vmatprep.subr.bf16.mxu0 %v10137_v33  ;;  %2242 = vmatprep.subr.bf16.mxu1 %v10139_v34  ;;  %v10230_v33 = vcombine.low %v2304_v53, %v2308_v23  ;;  %v10237_v34 = vcombine.high %v2311_v28, %v2315_v29  ;;  %v10239_v35 = vcombine.high %v2312_v30, %v2316_v31 }
 0x17a   : > { %2202 = vmatpush1.bf16.msra.mxu0 %v10136_v39  ;;  %2243 = vmatpush1.bf16.msra.mxu1 %v10138_v40  ;;  %v2324_v39 = vld [vmem:[%s11838_s17 + $0xe8] sm:$0xff]  ;;  %v10236_v40 = vcombine.low %v2311_v28, %v2315_v29 }
 0x17b   : > { %2203 = vmatprep.subr.bf16.mxu0 %v10153_v41  ;;  %2244 = vmatprep.subr.bf16.mxu1 %v10155_v42  ;;  %v568_v41 = vlaneseq  ;;  %v10245_v42 = vcombine.high %v2319_v36, %v2323_v37  ;;  %v10247_v43 = vcombine.high %v2320_v38, %v2324_v39  ;;  %v2360_v29 = vld [vmem:[%s11838_s17 + $0x208] sm:$0xff] }
 0x17e   : > { %2204 = vmatpush1.bf16.msra.mxu0 %v10152_v47  ;;  %2245 = vmatpush1.bf16.msra.mxu1 %v10154_v48  ;;  %v2332_v47 = vld [vmem:[%s11838_s17 + $0x128] sm:$0xff]  ;;  %v10244_v48 = vcombine.low %v2319_v36, %v2323_v37  ;;  %v2367_v36 = vld [vmem:[%s11838_s17 + $0x240] sm:$0xff] }
 0x17f   : > { %2205 = vmatprep.subr.bf16.mxu0 %v10169_v57  ;;  %2246 = vmatprep.subr.bf16.mxu1 %v10171_v49  ;;  %v11893_v57 = vshrl.u32 %v568_v41, 7  ;;  %v10246_v49 = vcombine.low %v2320_v38, %v2324_v39  ;;  %v10255_v51 = vcombine.high %v2328_v46, %v2332_v47  ;;  %v10254_v60 = vcombine.low %v2328_v46, %v2332_v47  ;;  %v2371_v37 = vld [vmem:[%s11838_s17 + $0x260] sm:$0xff]  ;;  %v2368_v38 = vld [vmem:[%s11838_s17 + $0x248] sm:$0xff] }
 0x180   : > { %v2372_v39 = vld [vmem:[%s11838_s17 + $0x268] sm:$0xff]  ;;  %v10292_v47 = vcombine.low %v2367_v36, %v2371_v37 }
 0x181   : > { %v2380_v46 = vld [vmem:[%s11838_s17 + $0x2a8] sm:$0xff] }
 0x182   : > { %2206 = vmatpush1.bf16.msra.mxu0 %v10168_v55  ;;  %2247 = vmatpush1.bf16.msra.mxu1 %v10170_v56  ;;  %v2336_v55 = vld [vmem:[%s11838_s17 + $0x148] sm:$0xff] }
 0x183   : > { %2207 = vmatprep.subr.bf16.mxu0 %v10185_v58  ;;  %2248 = vmatprep.subr.bf16.mxu1 %v10187_v59  ;;  %v2340_v56 = vld [vmem:[%s11838_s17 + $0x168] sm:$0xff]  ;;  %v10252_v58 = vcombine.low %v2327_v44, %v2331_v45  ;;  %v11900_v59 = vsub.s32 1, %v11893_v57  ;;  %v2379_v44 = vld [vmem:[%s11838_s17 + $0x2a0] sm:$0xff] }
 0x184   : > { %v10263_v63 = vcombine.high %v2336_v55, %v2340_v56  ;;  %v10262_v6 = vcombine.low %v2336_v55, %v2340_v56  ;;  %v2376_v45 = vld [vmem:[%s11838_s17 + $0x288] sm:$0xff] }
 0x185   : > { %v575_v4 = vrot.slane %v11902_v61, %v11900_v59  ;;  %v2388_v55 = vld [vmem:[%s11838_s17 + $0x2e8] sm:$0xff] }
 0x186   : > { %2208 = vmatpush1.bf16.msra.mxu0 %v10184_v0  ;;  %2249 = vmatpush1.bf16.msra.mxu1 %v10186_v1  ;;  %v2343_v0 = vld [vmem:[%s11838_s17 + $0x180] sm:$0xff] }
 0x187   : > { %2209 = vmatprep.subr.bf16.mxu0 %v10201_v2  ;;  %2250 = vmatprep.subr.bf16.mxu1 %v10203_v3  ;;  %v2347_v1 = vld [vmem:[%s11838_s17 + $0x1a0] sm:$0xff]  ;;  %v2344_v2 = vld [vmem:[%s11838_s17 + $0x188] sm:$0xff] }
 0x188   : > { %v2348_v3 = vld [vmem:[%s11838_s17 + $0x1a8] sm:$0xff]  ;;  %v10269_v7 = vcombine.high %v2343_v0, %v2347_v1 }
 0x189   : > { %v10270_v53 = vcombine.low %v2344_v2, %v2348_v3 }
 0x18a   : > { %2210 = vmatpush1.bf16.msra.mxu0 %v10200_v8  ;;  %2251 = vmatpush1.bf16.msra.mxu1 %v10202_v9  ;;  %v10271_v9 = vcombine.high %v2344_v2, %v2348_v3  ;;  %v2396_v2 = vld [vmem:[%s11838_s17 + $0x328] sm:$0xff] }
 0x18b   : > { %2211 = vmatprep.subr.bf16.mxu0 %v10217_v10  ;;  %2252 = vmatprep.subr.bf16.mxu1 %v10219_v11  ;;  %v2351_v10 = vld [vmem:[%s11838_s17 + $0x1c0] sm:$0xff] }
 0x18c   : > { %v2355_v11 = vld [vmem:[%s11838_s17 + $0x1e0] sm:$0xff] }
 0x18d   : > { %v10277_v23 = vcombine.high %v2351_v10, %v2355_v11 }
 0x18e   : > { %2212 = vmatpush1.bf16.msra.mxu0 %v10216_v17  ;;  %2253 = vmatpush1.bf16.msra.mxu1 %v10218_v18  ;;  %v10268_v18 = vcombine.low %v2343_v0, %v2347_v1  ;;  %v2395_v0 = vld [vmem:[%s11838_s17 + $0x320] sm:$0xff]  ;;  %v2392_v1 = vld [vmem:[%s11838_s17 + $0x308] sm:$0xff] }
 0x18f   : > { %8481 = vmatprep.subr.bf16.mxu0 %v10221_v19  ;;  %8809 = vmatprep.subr.bf16.mxu1 %v10223_v20  ;;  %v2352_v19 = vld [vmem:[%s11838_s17 + $0x1c8] sm:$0xff] }
 0x190   : > { %v2356_v20 = vld [vmem:[%s11838_s17 + $0x1e8] sm:$0xff] }
 0x191   : > { %2214 = vmatmul.mubr.bf16.vlgmr.msra.gmra.mrb[12].mxu0 %v11857_v12  ;;  %2255 = vmatmul.mubr.bf16.vlgmr.msra.gmra.mrb[12].mxu1 %v11857_v12  ;;  %v10238_v12 = vcombine.low %v2312_v30, %v2316_v31  ;;  %v10279_v28 = vcombine.high %v2352_v19, %v2356_v20  ;;  %v2364_v30 = vld [vmem:[%s11838_s17 + $0x228] sm:$0xff] }
 0x192   : > { %8482 = vmatpush1.bf16.msra.mxu0 %v10220_v24  ;;  %8810 = vmatpush1.bf16.msra.mxu1 %v10222_v25  ;;  %v10286_v41 = vcombine.low %v2360_v29, %v2364_v30 }
 0x193   : > { %8483 = vmatprep.subr.bf16.mxu0 %v10229_v26  ;;  %8811 = vmatprep.subr.bf16.mxu1 %v10231_v27  ;;  %v2359_v26 = vld [vmem:[%s11838_s17 + $0x200] sm:$0xff] }
 0x194   : > { %v2363_v27 = vld [vmem:[%s11838_s17 + $0x220] sm:$0xff] }
 0x196   : > { %8484 = vmatpush1.bf16.msra.mxu0 %v10228_v32  ;;  %8812 = vmatpush1.bf16.msra.mxu1 %v10230_v33  ;;  %v10276_v32 = vcombine.low %v2351_v10, %v2355_v11  ;;  %v10278_v33 = vcombine.low %v2352_v19, %v2356_v20  ;;  %v2400_v10 = vld [vmem:[%s11838_s17 + $0x348] sm:$0xff]  ;;  %v2407_v20 = vld [vmem:[%s11838_s17 + $0x380] sm:$0xff] }
 0x197   : > { %8485 = vmatprep.subr.bf16.mxu0 %v10237_v34  ;;  %8813 = vmatprep.subr.bf16.mxu1 %v10239_v35  ;;  %v10285_v34 = vcombine.high %v2359_v26, %v2363_v27  ;;  %v10287_v35 = vcombine.high %v2360_v29, %v2364_v30  ;;  %v2404_v11 = vld [vmem:[%s11838_s17 + $0x368] sm:$0xff]  ;;  %v2415_v29 = vld [vmem:[%s11838_s17 + $0x3c0] sm:$0xff] }
 0x198   : > { %v10327_v19 = vcombine.high %v2400_v10, %v2404_v11  ;;  %v2419_v30 = vld [vmem:[%s11838_s17 + $0x3e0] sm:$0xff] }
 0x19a   : > { %8486 = vmatpush1.bf16.msra.mxu0 %v10236_v40  ;;  %8814 = vmatpush1.bf16.msra.mxu1 %v10238_v12  ;;  %v10284_v40 = vcombine.low %v2359_v26, %v2363_v27  ;;  %v10293_v12 = vcombine.high %v2367_v36, %v2371_v37  ;;  %v10326_v26 = vcombine.low %v2400_v10, %v2404_v11  ;;  %v2452_v10 = vld [vmem:[%s11838_s17 + $0x4e8] sm:$0xff] }
 0x19b   : > { %8487 = vmatprep.subr.bf16.mxu0 %v10245_v42  ;;  %8815 = vmatprep.subr.bf16.mxu1 %v10247_v43  ;;  %v10295_v42 = vcombine.high %v2368_v38, %v2372_v39  ;;  %v2375_v43 = vld [vmem:[%s11838_s17 + $0x280] sm:$0xff] }
 0x19c   : > { %v10300_v56 = vcombine.low %v2375_v43, %v2379_v44 }
 0x19e   : > { %8488 = vmatpush1.bf16.msra.mxu0 %v10244_v48  ;;  %8816 = vmatpush1.bf16.msra.mxu1 %v10246_v49  ;;  %v10294_v48 = vcombine.low %v2368_v38, %v2372_v39  ;;  %v10301_v49 = vcombine.high %v2375_v43, %v2379_v44  ;;  %v10341_v38 = vcombine.high %v2415_v29, %v2419_v30  ;;  %v2428_v43 = vld [vmem:[%s11838_s17 + $0x428] sm:$0xff] }
 0x19f   : > { %8489 = vmatprep.subr.bf16.mxu0 %v10253_v50  ;;  %8817 = vmatprep.subr.bf16.mxu1 %v10255_v51  ;;  %v10303_v50 = vcombine.high %v2376_v45, %v2380_v46  ;;  %v2383_v51 = vld [vmem:[%s11838_s17 + $0x2c0] sm:$0xff]  ;;  %v10340_v44 = vcombine.low %v2415_v29, %v2419_v30  ;;  %v2464_v29 = vld [vmem:[%s11838_s17 + $0x548] sm:$0xff] }
 0x1a0   : > { %v10308_v3 = vcombine.low %v2383_v51, %v2387_v52  ;;  %v2468_v30 = vld [vmem:[%s11838_s17 + $0x568] sm:$0xff] }
 0x1a2   : > { %8490 = vmatpush1.bf16.msra.mxu0 %v10252_v58  ;;  %8818 = vmatpush1.bf16.msra.mxu1 %v10254_v60  ;;  %v10302_v58 = vcombine.low %v2376_v45, %v2380_v46  ;;  %v10309_v60 = vcombine.high %v2383_v51, %v2387_v52  ;;  %v2432_v51 = vld [vmem:[%s11838_s17 + $0x448] sm:$0xff] }
 0x1a3   : > { %8491 = vmatprep.subr.bf16.mxu0 %v10261_v62  ;;  %8819 = vmatprep.subr.bf16.mxu1 %v10263_v63  ;;  %v10311_v62 = vcombine.high %v2384_v54, %v2388_v55  ;;  %v2391_v63 = vld [vmem:[%s11838_s17 + $0x300] sm:$0xff]  ;;  %v2436_v52 = vld [vmem:[%s11838_s17 + $0x468] sm:$0xff] }
 0x1a4   : > { %v11910_v8 = vpop.f32.mrb[0].mxu0  ;;  %v11914_v13 = vpop.f32.mrb[0].mxu1 }
 0x1a5   : > { %v1971_v14 = vpop.f32.mrb[1].mxu0  ;;  %v11916_v16 = vpop.f32.mrb[1].mxu1 }
 0x1a6   : > { %v1972_v15 = vadd.f32 %v1971_v14, %v575_v4  ;;  %v1973_v17 = vpop.f32.mrb[2].mxu0  ;;  %8492 = vmatpush1.bf16.msra.mxu0 %v10260_v5  ;;  %v2014_v21 = vpop.f32.mrb[2].mxu1  ;;  %8820 = vmatpush1.bf16.msra.mxu1 %v10262_v6  ;;  %v10310_v4 = vcombine.low %v2384_v54, %v2388_v55  ;;  %v10317_v5 = vcombine.high %v2391_v63, %v2395_v0 }
 0x1a7   : > { %v1974_v22 = vpop.f32.mrb[3].mxu0  ;;  %8493 = vmatprep.subr.bf16.mxu0 %v10269_v7  ;;  %v2015_v25 = vpop.f32.mrb[3].mxu1  ;;  %8821 = vmatprep.subr.bf16.mxu1 %v10271_v9  ;;  %v10319_v6 = vcombine.high %v2392_v1, %v2396_v2  ;;  %v2399_v7 = vld [vmem:[%s11838_s17 + $0x340] sm:$0xff]  ;;  %v10316_v14 = vcombine.low %v2391_v63, %v2395_v0  ;;  %v10318_v17 = vcombine.low %v2392_v1, %v2396_v2  ;;  %v2440_v0 = vld [vmem:[%s11838_s17 + $0x488] sm:$0xff] }
 0x1a8   : > { %v2264_v24 = vmax.f32 %v1972_v15, 0.0  ;;  %v2403_v9 = vld [vmem:[%s11838_s17 + $0x360] sm:$0xff]  ;;  %v11949_v15 = vsub.s32 0, %v11893_v57  ;;  %v11954_v22 = vsub.s32 3, %v11893_v57  ;;  %v10359_v63 = vcombine.high %v2432_v51, %v2436_v52  ;;  %v2444_v1 = vld [vmem:[%s11838_s17 + $0x4a8] sm:$0xff] }
 0x1a9   : > { %v2411_v21 = vld [vmem:[%s11838_s17 + $0x3a0] sm:$0xff] }
 0x1aa   : > { %v11924_v31 = vpack.c.bf16 %v2264_v24, %v2264_v24  ;;  %8494 = vmatpush1.bf16.msra.mxu0 %v10268_v18  ;;  %8822 = vmatpush1.bf16.msra.mxu1 %v10270_v53  ;;  %v10325_v18 = vcombine.high %v2399_v7, %v2403_v9  ;;  %v2408_v53 = vld [vmem:[%s11838_s17 + $0x388] sm:$0xff]  ;;  %v10324_v24 = vcombine.low %v2399_v7, %v2403_v9  ;;  %v2451_v7 = vld [vmem:[%s11838_s17 + $0x4e0] sm:$0xff] }
 0x1ab   : > { %8495 = vmatprep.subr.bf16.mxu0 %v10277_v23  ;;  %8823 = vmatprep.subr.bf16.mxu1 %v10279_v28  ;;  %v2412_v23 = vld [vmem:[%s11838_s17 + $0x3a8] sm:$0xff]  ;;  %v571_v25 = vrot.slane %v11902_v61, %v11949_v15  ;;  %v10333_v27 = vcombine.high %v2407_v20, %v2411_v21 }
 0x1ac   : > { %8513 = vmatprep.mubr.bf16.mxu0 %v11924_v31  ;;  %8841 = vmatprep.mubr.bf16.mxu1 %v11924_v31  ;;  %v10335_v28 = vcombine.high %v2408_v53, %v2412_v23  ;;  %v10334_v37 = vcombine.low %v2408_v53, %v2412_v23  ;;  %v2448_v9 = vld [vmem:[%s11838_s17 + $0x4c8] sm:$0xff] }
 0x1ad   : > { %v1970_v36 = vadd.f32 %v11910_v8, %v571_v25  ;;  %v2460_v53 = vld [vmem:[%s11838_s17 + $0x528] sm:$0xff] }
 0x1ae   : > { %8496 = vmatpush1.bf16.msra.mxu0 %v10276_v32  ;;  %8824 = vmatpush1.bf16.msra.mxu1 %v10278_v33  ;;  %v583_v32 = vrot.slane %v11902_v61, %v11954_v22  ;;  %v2416_v33 = vld [vmem:[%s11838_s17 + $0x3c8] sm:$0xff] }
 0x1af   : > { %8497 = vmatprep.subr.bf16.mxu0 %v10285_v34  ;;  %8825 = vmatprep.subr.bf16.mxu1 %v10287_v35  ;;  %v2420_v34 = vld [vmem:[%s11838_s17 + $0x3e8] sm:$0xff]  ;;  %v10332_v35 = vcombine.low %v2407_v20, %v2411_v21  ;;  %v2263_v45 = vmax.f32 %v1970_v36, 0.0  ;;  %v2459_v20 = vld [vmem:[%s11838_s17 + $0x520] sm:$0xff] }
 0x1b0   : > { %v10343_v39 = vcombine.high %v2416_v33, %v2420_v34  ;;  %v10342_v8 = vcombine.low %v2416_v33, %v2420_v34  ;;  %v2456_v21 = vld [vmem:[%s11838_s17 + $0x508] sm:$0xff]  ;;  %v2471_v36 = vld [vmem:[%s11838_s17 + $0x580] sm:$0xff] }
 0x1b1   : > { %v11976_v54 = vpack.c.bf16 %v2263_v45, %v2263_v45  ;;  %v10382_v33 = vcombine.low %v2456_v21, %v2460_v53  ;;  %v2483_v45 = vld [vmem:[%s11838_s17 + $0x5e0] sm:$0xff] }
 0x1b2   : > { %8498 = vmatpush1.bf16.msra.mxu0 %v10284_v40  ;;  %8826 = vmatpush1.bf16.msra.mxu1 %v10286_v41  ;;  %v2423_v40 = vld [vmem:[%s11838_s17 + $0x400] sm:$0xff] }
 0x1b3   : > { %8499 = vmatprep.subr.bf16.mxu0 %v10293_v12  ;;  %8827 = vmatprep.subr.bf16.mxu1 %v10295_v42  ;;  %v2427_v41 = vld [vmem:[%s11838_s17 + $0x420] sm:$0xff]  ;;  %v2013_v12 = vadd.f32 %v11916_v16, %v583_v32  ;;  %v2424_v42 = vld [vmem:[%s11838_s17 + $0x408] sm:$0xff] }
 0x1b4   : > { %v10349_v46 = vcombine.high %v2423_v40, %v2427_v41  ;;  %v10348_v16 = vcombine.low %v2423_v40, %v2427_v41  ;;  %v10350_v55 = vcombine.low %v2424_v42, %v2428_v43  ;;  %v10390_v41 = vcombine.low %v2464_v29, %v2468_v30 }
 0x1b6   : > { %8500 = vmatpush1.bf16.msra.mxu0 %v10292_v47  ;;  %8828 = vmatpush1.bf16.msra.mxu1 %v10294_v48  ;;  %v10351_v47 = vcombine.high %v2424_v42, %v2428_v43  ;;  %v2266_v48 = vmax.f32 %v2013_v12, 0.0 }
 0x1b7   : > { %8501 = vmatprep.subr.bf16.mxu0 %v10301_v49  ;;  %8829 = vmatprep.subr.bf16.mxu1 %v10303_v50  ;;  %v2431_v49 = vld [vmem:[%s11838_s17 + $0x440] sm:$0xff] }
 0x1b8   : > { %v2435_v50 = vld [vmem:[%s11838_s17 + $0x460] sm:$0xff] }
 0x1b9   : > { %v10356_v2 = vcombine.low %v2431_v49, %v2435_v50 }
 0x1ba   : > { %8502 = vmatpush1.bf16.msra.mxu0 %v10300_v56  ;;  %8830 = vmatpush1.bf16.msra.mxu1 %v10302_v58  ;;  %v10357_v56 = vcombine.high %v2431_v49, %v2435_v50  ;;  %v2439_v58 = vld [vmem:[%s11838_s17 + $0x480] sm:$0xff] }
 0x1bb   : > { %8503 = vmatprep.subr.bf16.mxu0 %v10309_v60  ;;  %8831 = vmatprep.subr.bf16.mxu1 %v10311_v62  ;;  %v2443_v60 = vld [vmem:[%s11838_s17 + $0x4a0] sm:$0xff]  ;;  %v11980_v62 = vpack.c.bf16 %v2266_v48, %v2266_v48  ;;  %v2484_v48 = vld [vmem:[%s11838_s17 + $0x5e8] sm:$0xff] }
 0x1bc   : > { %v10364_v11 = vcombine.low %v2439_v58, %v2443_v60 }
 0x1be   : > { %8504 = vmatpush1.bf16.msra.mxu0 %v10308_v3  ;;  %8832 = vmatpush1.bf16.msra.mxu1 %v10310_v4  ;;  %v10358_v3 = vcombine.low %v2432_v51, %v2436_v52  ;;  %v10365_v4 = vcombine.high %v2439_v58, %v2443_v60 }
 0x1bf   : > { %8505 = vmatprep.subr.bf16.mxu0 %v10317_v5  ;;  %8833 = vmatprep.subr.bf16.mxu1 %v10319_v6  ;;  %v10367_v5 = vcombine.high %v2440_v0, %v2444_v1  ;;  %v2447_v6 = vld [vmem:[%s11838_s17 + $0x4c0] sm:$0xff] }
 0x1c0   : > { %v10372_v23 = vcombine.low %v2447_v6, %v2451_v7 }
 0x1c2   : > { %8506 = vmatpush1.bf16.msra.mxu0 %v10316_v14  ;;  %8834 = vmatpush1.bf16.msra.mxu1 %v10318_v17  ;;  %v10366_v14 = vcombine.low %v2440_v0, %v2444_v1  ;;  %v10373_v17 = vcombine.high %v2447_v6, %v2451_v7  ;;  %v2491_v0 = vld [vmem:[%s11838_s17 + $0x620] sm:$0xff]  ;;  %v2488_v1 = vld [vmem:[%s11838_s17 + $0x608] sm:$0xff] }
 0x1c3   : > { %8507 = vmatprep.subr.bf16.mxu0 %v10325_v18  ;;  %8835 = vmatprep.subr.bf16.mxu1 %v10327_v19  ;;  %v10375_v18 = vcombine.high %v2448_v9, %v2452_v10  ;;  %v2455_v19 = vld [vmem:[%s11838_s17 + $0x500] sm:$0xff] }
 0x1c4   : > { %v10381_v25 = vcombine.high %v2455_v19, %v2459_v20  ;;  %v10380_v32 = vcombine.low %v2455_v19, %v2459_v20  ;;  %v2495_v7 = vld [vmem:[%s11838_s17 + $0x640] sm:$0xff] }
 0x1c5   : > { %v2503_v20 = vld [vmem:[%s11838_s17 + $0x680] sm:$0xff] }
 0x1c6   : > { %8508 = vmatpush1.bf16.msra.mxu0 %v10324_v24  ;;  %8836 = vmatpush1.bf16.msra.mxu1 %v10326_v26  ;;  %v10374_v24 = vcombine.low %v2448_v9, %v2452_v10  ;;  %v10383_v26 = vcombine.high %v2456_v21, %v2460_v53  ;;  %v2499_v9 = vld [vmem:[%s11838_s17 + $0x660] sm:$0xff]  ;;  %v2496_v10 = vld [vmem:[%s11838_s17 + $0x648] sm:$0xff] }
 0x1c7   : > { %8509 = vmatprep.subr.bf16.mxu0 %v10333_v27  ;;  %8837 = vmatprep.subr.bf16.mxu1 %v10335_v28  ;;  %v2463_v27 = vld [vmem:[%s11838_s17 + $0x540] sm:$0xff]  ;;  %v2504_v53 = vld [vmem:[%s11838_s17 + $0x688] sm:$0xff] }
 0x1c8   : > { %v2467_v28 = vld [vmem:[%s11838_s17 + $0x560] sm:$0xff] }
 0x1c9   : > { %v10389_v34 = vcombine.high %v2463_v27, %v2467_v28  ;;  %v10388_v40 = vcombine.low %v2463_v27, %v2467_v28  ;;  %v2507_v21 = vld [vmem:[%s11838_s17 + $0x6a0] sm:$0xff] }
 0x1ca   : > { %8510 = vmatpush1.bf16.msra.mxu0 %v10332_v35  ;;  %8838 = vmatpush1.bf16.msra.mxu1 %v10334_v37  ;;  %v10391_v35 = vcombine.high %v2464_v29, %v2468_v30  ;;  %v2475_v37 = vld [vmem:[%s11838_s17 + $0x5a0] sm:$0xff]  ;;  %v2512_v30 = vld [vmem:[%s11838_s17 + $0x6c8] sm:$0xff] }
 0x1cb   : > { %8511 = vmatprep.subr.bf16.mxu0 %v10341_v38  ;;  %8839 = vmatprep.subr.bf16.mxu1 %v10343_v39  ;;  %v2472_v38 = vld [vmem:[%s11838_s17 + $0x588] sm:$0xff]  ;;  %v10397_v12 = vcombine.high %v2471_v36, %v2475_v37  ;;  %v2511_v28 = vld [vmem:[%s11838_s17 + $0x6c0] sm:$0xff] }
 0x1cc   : > { %v2476_v39 = vld [vmem:[%s11838_s17 + $0x5a8] sm:$0xff]  ;;  %v2515_v29 = vld [vmem:[%s11838_s17 + $0x6e0] sm:$0xff] }
 0x1cd   : > { %v10399_v43 = vcombine.high %v2472_v38, %v2476_v39 }
 0x1ce   : > { %8512 = vmatpush1.bf16.msra.mxu0 %v10340_v44  ;;  %8840 = vmatpush1.bf16.msra.mxu1 %v10342_v8  ;;  %v2479_v44 = vld [vmem:[%s11838_s17 + $0x5c0] sm:$0xff] }
 0x1cf   : > { %8522 = vmatprep.subr.bf16.mxu0 %v10349_v46  ;;  %8850 = vmatprep.subr.bf16.mxu1 %v10351_v47  ;;  %v2480_v47 = vld [vmem:[%s11838_s17 + $0x5c8] sm:$0xff] }
 0x1d0   : > { %v10407_v60 = vcombine.high %v2480_v47, %v2484_v48 }
 0x1d1   : > { %8514 = vmatmul.mubr.bf16.vlgmr.msra.gmra.mrb[16].mxu0 %v11976_v54  ;;  %8842 = vmatmul.mubr.bf16.vlgmr.msra.gmra.mrb[16].mxu1 %v11976_v54 }
 0x1d2   : > { %8523 = vmatpush1.bf16.msra.mxu0 %v10348_v16  ;;  %8554 = vmatprep.mubr.bf16.mxu0 %v11980_v62  ;;  %v10396_v16 = vcombine.low %v2471_v36, %v2475_v37  ;;  %v2519_v37 = vld [vmem:[%s11838_s17 + $0x700] sm:$0xff] }
 0x1d3   : > { %8851 = vmatpush1.bf16.msra.mxu1 %v10350_v55  ;;  %8882 = vmatprep.mubr.bf16.mxu1 %v11980_v62  ;;  %v10398_v55 = vcombine.low %v2472_v38, %v2476_v39  ;;  %v2523_v38 = vld [vmem:[%s11838_s17 + $0x720] sm:$0xff]  ;;  %v2520_v39 = vld [vmem:[%s11838_s17 + $0x708] sm:$0xff] }
 0x1d4   : > { %8524 = vmatprep.subr.bf16.mxu0 %v10357_v56  ;;  %8852 = vmatprep.subr.bf16.mxu1 %v10359_v63  ;;  %v10405_v56 = vcombine.high %v2479_v44, %v2483_v45  ;;  %v2487_v63 = vld [vmem:[%s11838_s17 + $0x600] sm:$0xff] }
 0x1d6   : > { %8525 = vmatpush1.bf16.msra.mxu0 %v10356_v2  ;;  %v2492_v2 = vld [vmem:[%s11838_s17 + $0x628] sm:$0xff] }
 0x1d7   : > { %8853 = vmatpush1.bf16.msra.mxu1 %v10358_v3  ;;  %8526 = vmatprep.subr.bf16.mxu0 %v10365_v4  ;;  %v10404_v3 = vcombine.low %v2479_v44, %v2483_v45  ;;  %v10406_v4 = vcombine.low %v2480_v47, %v2484_v48  ;;  %v10415_v6 = vcombine.high %v2488_v1, %v2492_v2  ;;  %v2527_v45 = vld [vmem:[%s11838_s17 + $0x740] sm:$0xff]  ;;  %v2528_v48 = vld [vmem:[%s11838_s17 + $0x748] sm:$0xff] }
 0x1d8   : > { %8854 = vmatprep.subr.bf16.mxu1 %v10367_v5  ;;  %v10413_v5 = vcombine.high %v2487_v63, %v2491_v0  ;;  %v2531_v47 = vld [vmem:[%s11838_s17 + $0x760] sm:$0xff] }
 0x1da   : > { %8527 = vmatpush1.bf16.msra.mxu0 %v10364_v11  ;;  %v2500_v11 = vld [vmem:[%s11838_s17 + $0x668] sm:$0xff] }
 0x1db   : > { %8855 = vmatpush1.bf16.msra.mxu1 %v10366_v14  ;;  %8528 = vmatprep.subr.bf16.mxu0 %v10373_v17  ;;  %v10412_v14 = vcombine.low %v2487_v63, %v2491_v0  ;;  %v10414_v17 = vcombine.low %v2488_v1, %v2492_v2  ;;  %v10423_v19 = vcombine.high %v2496_v10, %v2500_v11  ;;  %v12046_v63 = vsub.s32 5, %v11893_v57  ;;  %v2536_v0 = vld [vmem:[%s11838_s17 + $0x788] sm:$0xff] }
 0x1dc   : > { %8856 = vmatprep.subr.bf16.mxu1 %v10375_v18  ;;  %v10421_v18 = vcombine.high %v2495_v7, %v2499_v9  ;;  %v2540_v1 = vld [vmem:[%s11838_s17 + $0x7a8] sm:$0xff]  ;;  %v10452_v2 = vcombine.low %v2527_v45, %v2531_v47 }
 0x1de   : > { %8529 = vmatpush1.bf16.msra.mxu0 %v10372_v23  ;;  %v2508_v23 = vld [vmem:[%s11838_s17 + $0x6a8] sm:$0xff] }
 0x1df   : > { %8857 = vmatpush1.bf16.msra.mxu1 %v10374_v24  ;;  %8530 = vmatprep.subr.bf16.mxu0 %v10381_v25  ;;  %v10420_v24 = vcombine.low %v2495_v7, %v2499_v9  ;;  %v10422_v25 = vcombine.low %v2496_v10, %v2500_v11  ;;  %v10431_v27 = vcombine.high %v2504_v53, %v2508_v23  ;;  %v2543_v7 = vld [vmem:[%s11838_s17 + $0x7c0] sm:$0xff]  ;;  %v2544_v11 = vld [vmem:[%s11838_s17 + $0x7c8] sm:$0xff] }
 0x1e0   : > { %8858 = vmatprep.subr.bf16.mxu1 %v10383_v26  ;;  %v10429_v26 = vcombine.high %v2503_v20, %v2507_v21  ;;  %v2547_v9 = vld [vmem:[%s11838_s17 + $0x7e0] sm:$0xff]  ;;  %v591_v10 = vrot.slane %v11902_v61, %v12046_v63 }
 0x1e2   : > { %8531 = vmatpush1.bf16.msra.mxu0 %v10380_v32  ;;  %v2516_v32 = vld [vmem:[%s11838_s17 + $0x6e8] sm:$0xff] }
 0x1e3   : > { %8859 = vmatpush1.bf16.msra.mxu1 %v10382_v33  ;;  %8532 = vmatprep.subr.bf16.mxu0 %v10389_v34  ;;  %v10428_v33 = vcombine.low %v2503_v20, %v2507_v21  ;;  %v10430_v34 = vcombine.low %v2504_v53, %v2508_v23  ;;  %v10439_v36 = vcombine.high %v2512_v30, %v2516_v32  ;;  %v2551_v53 = vld [vmem:[%s11838_s17 + $0x800] sm:$0xff] }
 0x1e4   : > { %v12004_v42 = vpop.f32.mrb[4].mxu0  ;;  %8860 = vmatprep.subr.bf16.mxu1 %v10391_v35  ;;  %v12008_v8 = vpop.f32.mrb[4].mxu1  ;;  %v10437_v35 = vcombine.high %v2511_v28, %v2515_v29  ;;  %v10469_v20 = vcombine.high %v2543_v7, %v2547_v9  ;;  %v2555_v23 = vld [vmem:[%s11838_s17 + $0x820] sm:$0xff] }
 0x1e5   : > { %v12010_v46 = vpop.f32.mrb[5].mxu0  ;;  %v12014_v49 = vpop.f32.mrb[5].mxu1 }
 0x1e6   : > { %v2055_v50 = vpop.f32.mrb[6].mxu0  ;;  %8533 = vmatpush1.bf16.msra.mxu0 %v10388_v40  ;;  %v2096_v51 = vpop.f32.mrb[6].mxu1  ;;  %v2524_v40 = vld [vmem:[%s11838_s17 + $0x728] sm:$0xff] }
 0x1e7   : > { %8861 = vmatpush1.bf16.msra.mxu1 %v10390_v41  ;;  %v2056_v52 = vpop.f32.mrb[7].mxu0  ;;  %8534 = vmatprep.subr.bf16.mxu0 %v10397_v12  ;;  %v2097_v58 = vpop.f32.mrb[7].mxu1  ;;  %v10436_v41 = vcombine.low %v2511_v28, %v2515_v29  ;;  %v10438_v12 = vcombine.low %v2512_v30, %v2516_v32  ;;  %v10447_v44 = vcombine.high %v2520_v39, %v2524_v40  ;;  %v2532_v50 = vld [vmem:[%s11838_s17 + $0x768] sm:$0xff]  ;;  %v12041_v51 = vsub.s32 2, %v11893_v57  ;;  %v2559_v32 = vld [vmem:[%s11838_s17 + $0x840] sm:$0xff] }
 0x1e8   : > { %8862 = vmatprep.subr.bf16.mxu1 %v10399_v43  ;;  %v10445_v43 = vcombine.high %v2519_v37, %v2523_v38  ;;  %v10446_v52 = vcombine.low %v2520_v39, %v2524_v40  ;;  %v2535_v58 = vld [vmem:[%s11838_s17 + $0x780] sm:$0xff]  ;;  %v10477_v28 = vcombine.high %v2551_v53, %v2555_v23 }
 0x1e9   : > { %v2567_v39 = vld [vmem:[%s11838_s17 + $0x880] sm:$0xff] }
 0x1ea   : > { %8535 = vmatpush1.bf16.msra.mxu0 %v10396_v16  ;;  %v10444_v16 = vcombine.low %v2519_v37, %v2523_v38  ;;  %v2571_v40 = vld [vmem:[%s11838_s17 + $0x8a0] sm:$0xff] }
 0x1eb   : > { %8863 = vmatpush1.bf16.msra.mxu1 %v10398_v55  ;;  %8536 = vmatprep.subr.bf16.mxu0 %v10405_v56  ;;  %v10453_v55 = vcombine.high %v2527_v45, %v2531_v47  ;;  %v10455_v56 = vcombine.high %v2528_v48, %v2532_v50 }
 0x1ec   : > { %8864 = vmatprep.subr.bf16.mxu1 %v10407_v60  ;;  %v2539_v60 = vld [vmem:[%s11838_s17 + $0x7a0] sm:$0xff] }
 0x1ee   : > { %8537 = vmatpush1.bf16.msra.mxu0 %v10404_v3  ;;  %v579_v3 = vrot.slane %v11902_v61, %v12041_v51  ;;  %v2552_v61 = vld [vmem:[%s11838_s17 + $0x808] sm:$0xff] }
 0x1ef   : > { %8865 = vmatpush1.bf16.msra.mxu1 %v10406_v4  ;;  %8538 = vmatprep.subr.bf16.mxu0 %v10413_v5  ;;  %v10454_v4 = vcombine.low %v2528_v48, %v2532_v50  ;;  %v10461_v5 = vcombine.high %v2535_v58, %v2539_v60  ;;  %v10493_v48 = vcombine.high %v2567_v39, %v2571_v40 }
 0x1f0   : > { %8866 = vmatprep.subr.bf16.mxu1 %v10415_v6  ;;  %v10463_v6 = vcombine.high %v2536_v0, %v2540_v1 }
 0x1f2   : > { %8539 = vmatpush1.bf16.msra.mxu0 %v10412_v14  ;;  %v2548_v14 = vld [vmem:[%s11838_s17 + $0x7e8] sm:$0xff] }
 0x1f3   : > { %8867 = vmatpush1.bf16.msra.mxu1 %v10414_v17  ;;  %8540 = vmatprep.subr.bf16.mxu0 %v10421_v18  ;;  %v10460_v17 = vcombine.low %v2535_v58, %v2539_v60  ;;  %v2011_v18 = vadd.f32 %v11914_v13, %v579_v3  ;;  %v10471_v21 = vcombine.high %v2544_v11, %v2548_v14  ;;  %v2587_v3 = vld [vmem:[%s11838_s17 + $0x920] sm:$0xff] }
 0x1f4   : > { %8868 = vmatprep.subr.bf16.mxu1 %v10423_v19  ;;  %v10462_v19 = vcombine.low %v2536_v0, %v2540_v1  ;;  %v10470_v13 = vcombine.low %v2544_v11, %v2548_v14  ;;  %v10492_v58 = vcombine.low %v2567_v39, %v2571_v40  ;;  %v2591_v11 = vld [vmem:[%s11838_s17 + $0x940] sm:$0xff] }
 0x1f5   : > { %v2595_v14 = vld [vmem:[%s11838_s17 + $0x960] sm:$0xff] }
 0x1f6   : > { %8541 = vmatpush1.bf16.msra.mxu0 %v10420_v24  ;;  %v2054_v24 = vadd.f32 %v12010_v46, %v591_v10  ;;  %v10476_v46 = vcombine.low %v2551_v53, %v2555_v23  ;;  %v2599_v23 = vld [vmem:[%s11838_s17 + $0x980] sm:$0xff] }
 0x1f7   : > { %8869 = vmatpush1.bf16.msra.mxu1 %v10422_v25  ;;  %8542 = vmatprep.subr.bf16.mxu0 %v10429_v26  ;;  %v2556_v25 = vld [vmem:[%s11838_s17 + $0x828] sm:$0xff]  ;;  %v10468_v26 = vcombine.low %v2543_v7, %v2547_v9 }
 0x1f8   : > { %8870 = vmatprep.subr.bf16.mxu1 %v10431_v27  ;;  %v2265_v27 = vmax.f32 %v2011_v18, 0.0  ;;  %v10479_v29 = vcombine.high %v2552_v61, %v2556_v25  ;;  %v2268_v30 = vmax.f32 %v2054_v24, 0.0  ;;  %v10478_v37 = vcombine.low %v2552_v61, %v2556_v25  ;;  %v2596_v18 = vld [vmem:[%s11838_s17 + $0x968] sm:$0xff]  ;;  %v2603_v24 = vld [vmem:[%s11838_s17 + $0x9a0] sm:$0xff] }
 0x1f9   : > { %v2600_v61 = vld [vmem:[%s11838_s17 + $0x988] sm:$0xff]  ;;  %v10524_v39 = vcombine.low %v2599_v23, %v2603_v24 }
 0x1fa   : > { %8543 = vmatpush1.bf16.msra.mxu0 %v10428_v33  ;;  %v2563_v33 = vld [vmem:[%s11838_s17 + $0x860] sm:$0xff]  ;;  %v2604_v25 = vld [vmem:[%s11838_s17 + $0x9a8] sm:$0xff] }
 0x1fb   : > { %8871 = vmatpush1.bf16.msra.mxu1 %v10430_v34  ;;  %8544 = vmatprep.subr.bf16.mxu0 %v10437_v35  ;;  %v2560_v34 = vld [vmem:[%s11838_s17 + $0x848] sm:$0xff]  ;;  %v10485_v38 = vcombine.high %v2559_v32, %v2563_v33  ;;  %v10484_v45 = vcombine.low %v2559_v32, %v2563_v33  ;;  %v2611_v32 = vld [vmem:[%s11838_s17 + $0x9e0] sm:$0xff] }
 0x1fc   : > { %8872 = vmatprep.subr.bf16.mxu1 %v10439_v36  ;;  %v2564_v35 = vld [vmem:[%s11838_s17 + $0x868] sm:$0xff]  ;;  %v12068_v36 = vpack.c.bf16 %v2265_v27, %v2265_v27 }
 0x1fd   : > { %v10486_v47 = vcombine.low %v2560_v34, %v2564_v35 }
 0x1fe   : > { %8545 = vmatpush1.bf16.msra.mxu0 %v10436_v41  ;;  %v12072_v41 = vpack.c.bf16 %v2268_v30, %v2268_v30  ;;  %v2607_v30 = vld [vmem:[%s11838_s17 + $0x9c0] sm:$0xff] }
 0x1ff   : > { %8873 = vmatpush1.bf16.msra.mxu1 %v10438_v12  ;;  %8546 = vmatprep.subr.bf16.mxu0 %v10445_v43  ;;  %v10487_v12 = vcombine.high %v2560_v34, %v2564_v35  ;;  %v2568_v43 = vld [vmem:[%s11838_s17 + $0x888] sm:$0xff] }
 0x200   : > { %8874 = vmatprep.subr.bf16.mxu1 %v10447_v44  ;;  %v2572_v44 = vld [vmem:[%s11838_s17 + $0x8a8] sm:$0xff] }
 0x201   : > { %v10495_v50 = vcombine.high %v2568_v43, %v2572_v44  ;;  %v10494_v60 = vcombine.low %v2568_v43, %v2572_v44  ;;  %v2608_v34 = vld [vmem:[%s11838_s17 + $0x9c8] sm:$0xff]  ;;  %v10526_v43 = vcombine.low %v2600_v61, %v2604_v25  ;;  %v10533_v44 = vcombine.high %v2607_v30, %v2611_v32 }
 0x202   : > { %8547 = vmatpush1.bf16.msra.mxu0 %v10444_v16  ;;  %v2575_v16 = vld [vmem:[%s11838_s17 + $0x8c0] sm:$0xff]  ;;  %v2612_v35 = vld [vmem:[%s11838_s17 + $0x9e8] sm:$0xff] }
 0x203   : > { %8875 = vmatpush1.bf16.msra.mxu1 %v10446_v52  ;;  %8548 = vmatprep.subr.bf16.mxu0 %v10453_v55  ;;  %v2579_v52 = vld [vmem:[%s11838_s17 + $0x8e0] sm:$0xff]  ;;  %v2576_v55 = vld [vmem:[%s11838_s17 + $0x8c8] sm:$0xff] }
 0x204   : > { %8876 = vmatprep.subr.bf16.mxu1 %v10455_v56  ;;  %v2580_v56 = vld [vmem:[%s11838_s17 + $0x8e8] sm:$0xff]  ;;  %v10501_v0 = vcombine.high %v2575_v16, %v2579_v52 }
 0x205   : > { %v10503_v1 = vcombine.high %v2576_v55, %v2580_v56  ;;  %v10502_v7 = vcombine.low %v2576_v55, %v2580_v56  ;;  %v10532_v55 = vcombine.low %v2607_v30, %v2611_v32  ;;  %v10534_v56 = vcombine.low %v2608_v34, %v2612_v35  ;;  %v2648_v30 = vld [vmem:[%s11838_s17 + $0xb08] sm:$0xff] }
 0x206   : > { %8549 = vmatpush1.bf16.msra.mxu0 %v10452_v2  ;;  %v2583_v2 = vld [vmem:[%s11838_s17 + $0x900] sm:$0xff]  ;;  %v2652_v32 = vld [vmem:[%s11838_s17 + $0xb28] sm:$0xff] }
 0x207   : > { %8877 = vmatpush1.bf16.msra.mxu1 %v10454_v4  ;;  %8550 = vmatprep.subr.bf16.mxu0 %v10461_v5  ;;  %v2584_v4 = vld [vmem:[%s11838_s17 + $0x908] sm:$0xff]  ;;  %v10509_v9 = vcombine.high %v2583_v2, %v2587_v3 }
 0x208   : > { %8878 = vmatprep.subr.bf16.mxu1 %v10463_v6  ;;  %v2588_v5 = vld [vmem:[%s11838_s17 + $0x928] sm:$0xff]  ;;  %v10500_v6 = vcombine.low %v2575_v16, %v2579_v52 }
 0x209   : > { %v10511_v10 = vcombine.high %v2584_v4, %v2588_v5  ;;  %v2616_v16 = vld [vmem:[%s11838_s17 + $0xa08] sm:$0xff] }
 0x20a   : > { %8551 = vmatpush1.bf16.msra.mxu0 %v10460_v17  ;;  %v2592_v17 = vld [vmem:[%s11838_s17 + $0x948] sm:$0xff] }
 0x20b   : > { %8879 = vmatpush1.bf16.msra.mxu1 %v10462_v19  ;;  %8552 = vmatprep.subr.bf16.mxu0 %v10469_v20  ;;  %v10508_v19 = vcombine.low %v2583_v2, %v2587_v3  ;;  %v10510_v20 = vcombine.low %v2584_v4, %v2588_v5  ;;  %v10519_v53 = vcombine.high %v2592_v17, %v2596_v18  ;;  %v2620_v52 = vld [vmem:[%s11838_s17 + $0xa28] sm:$0xff] }
 0x20c   : > { %8880 = vmatprep.subr.bf16.mxu1 %v10471_v21  ;;  %v10517_v21 = vcombine.high %v2591_v11, %v2595_v14  ;;  %v10518_v27 = vcombine.low %v2592_v17, %v2596_v18  ;;  %v2624_v2 = vld [vmem:[%s11838_s17 + $0xa48] sm:$0xff]  ;;  %v10542_v5 = vcombine.low %v2616_v16, %v2620_v52 }
 0x20d   : > { %v2628_v3 = vld [vmem:[%s11838_s17 + $0xa68] sm:$0xff] }
 0x20e   : > { %8553 = vmatpush1.bf16.msra.mxu0 %v10468_v26  ;;  %v10516_v26 = vcombine.low %v2591_v11, %v2595_v14  ;;  %v2632_v11 = vld [vmem:[%s11838_s17 + $0xa88] sm:$0xff]  ;;  %v10550_v18 = vcombine.low %v2624_v2, %v2628_v3 }
 0x20f   : > { %8881 = vmatpush1.bf16.msra.mxu1 %v10470_v13  ;;  %8563 = vmatprep.subr.bf16.mxu0 %v10477_v28  ;;  %v10525_v13 = vcombine.high %v2599_v23, %v2603_v24  ;;  %v2636_v14 = vld [vmem:[%s11838_s17 + $0xaa8] sm:$0xff] }
 0x210   : > { %8891 = vmatprep.subr.bf16.mxu1 %v10479_v29  ;;  %v10527_v29 = vcombine.high %v2600_v61, %v2604_v25  ;;  %v2640_v23 = vld [vmem:[%s11838_s17 + $0xac8] sm:$0xff]  ;;  %v10558_v25 = vcombine.low %v2632_v11, %v2636_v14 }
 0x211   : > { %8555 = vmatmul.mubr.bf16.vlgmr.msra.gmra.mrb[16].mxu0 %v12068_v36  ;;  %v2644_v24 = vld [vmem:[%s11838_s17 + $0xae8] sm:$0xff] }
 0x212   : > { %8883 = vmatmul.mubr.bf16.vlgmr.msra.gmra.mrb[16].mxu1 %v12068_v36  ;;  %8564 = vmatpush1.bf16.msra.mxu0 %v10476_v46 }
 0x213   : > { %8595 = vmatprep.mubr.bf16.mxu0 %v12072_v41  ;;  %8892 = vmatpush1.bf16.msra.mxu1 %v10478_v37 }
 0x214   : > { %8923 = vmatprep.mubr.bf16.mxu1 %v12072_v41  ;;  %8565 = vmatprep.subr.bf16.mxu0 %v10485_v38 }
 0x215   : > { %8893 = vmatprep.subr.bf16.mxu1 %v10487_v12 }
 0x216   : > { %8566 = vmatpush1.bf16.msra.mxu0 %v10484_v45 }
 0x217   : > { %8894 = vmatpush1.bf16.msra.mxu1 %v10486_v47  ;;  %8567 = vmatprep.subr.bf16.mxu0 %v10493_v48  ;;  %v10535_v47 = vcombine.high %v2608_v34, %v2612_v35  ;;  %v2615_v48 = vld [vmem:[%s11838_s17 + $0xa00] sm:$0xff]  ;;  %v10566_v35 = vcombine.low %v2640_v23, %v2644_v24 }
 0x218   : > { %8895 = vmatprep.subr.bf16.mxu1 %v10495_v50  ;;  %v2619_v50 = vld [vmem:[%s11838_s17 + $0xa20] sm:$0xff] }
 0x219   : > { %v10540_v4 = vcombine.low %v2615_v48, %v2619_v50 }
 0x21a   : > { %8568 = vmatpush1.bf16.msra.mxu0 %v10492_v58  ;;  %v10541_v58 = vcombine.high %v2615_v48, %v2619_v50  ;;  %v10574_v48 = vcombine.low %v2648_v30, %v2652_v32 }
 0x21b   : > { %8896 = vmatpush1.bf16.msra.mxu1 %v10494_v60  ;;  %8569 = vmatprep.subr.bf16.mxu0 %v10501_v0  ;;  %v10543_v60 = vcombine.high %v2616_v16, %v2620_v52  ;;  %v2623_v0 = vld [vmem:[%s11838_s17 + $0xa40] sm:$0xff] }
 0x21c   : > { %8897 = vmatprep.subr.bf16.mxu1 %v10503_v1  ;;  %v2627_v1 = vld [vmem:[%s11838_s17 + $0xa60] sm:$0xff] }
 0x21d   : > { %v10548_v17 = vcombine.low %v2623_v0, %v2627_v1  ;;  %v2663_v52 = vld [vmem:[%s11838_s17 + $0xb80] sm:$0xff] }
 0x21e   : > { %8570 = vmatpush1.bf16.msra.mxu0 %v10500_v6  ;;  %v10549_v6 = vcombine.high %v2623_v0, %v2627_v1  ;;  %v12142_v1 = vld [vmem:[#allocation4] sm:$0xff] }
 0x21f   : > { %8898 = vmatpush1.bf16.msra.mxu1 %v10502_v7  ;;  %8571 = vmatprep.subr.bf16.mxu0 %v10509_v9  ;;  %v10551_v7 = vcombine.high %v2624_v2, %v2628_v3  ;;  %v2631_v9 = vld [vmem:[%s11838_s17 + $0xa80] sm:$0xff] }
 0x220   : > { %8899 = vmatprep.subr.bf16.mxu1 %v10511_v10  ;;  %v2635_v10 = vld [vmem:[%s11838_s17 + $0xaa0] sm:$0xff] }
 0x221   : > { %v10556_v61 = vcombine.low %v2631_v9, %v2635_v10 }
 0x222   : > { %8572 = vmatpush1.bf16.msra.mxu0 %v10508_v19  ;;  %v10557_v19 = vcombine.high %v2631_v9, %v2635_v10  ;;  %v2672_v10 = vld [vmem:[%s11838_s17 + $0xbc8] sm:$0xff] }
 0x223   : > { %8900 = vmatpush1.bf16.msra.mxu1 %v10510_v20  ;;  %8573 = vmatprep.subr.bf16.mxu0 %v10517_v21  ;;  %v10559_v20 = vcombine.high %v2632_v11, %v2636_v14  ;;  %v2639_v21 = vld [vmem:[%s11838_s17 + $0xac0] sm:$0xff]  ;;  %v2676_v11 = vld [vmem:[%s11838_s17 + $0xbe8] sm:$0xff] }
 0x224   : > { %v12096_v28 = vpop.f32.mrb[8].mxu0  ;;  %8901 = vmatprep.subr.bf16.mxu1 %v10519_v53  ;;  %v12100_v33 = vpop.f32.mrb[8].mxu1  ;;  %v2643_v53 = vld [vmem:[%s11838_s17 + $0xae0] sm:$0xff] }
 0x225   : > { %v12102_v46 = vpop.f32.mrb[9].mxu0  ;;  %v12106_v37 = vpop.f32.mrb[9].mxu1  ;;  %v10564_v34 = vcombine.low %v2639_v21, %v2643_v53 }
 0x226   : > { %v2137_v38 = vpop.f32.mrb[10].mxu0  ;;  %8574 = vmatpush1.bf16.msra.mxu0 %v10516_v26  ;;  %v2178_v40 = vpop.f32.mrb[10].mxu1  ;;  %v10565_v26 = vcombine.high %v2639_v21, %v2643_v53  ;;  %v2679_v21 = vld [vmem:[%s11838_s17 + $0xc00] sm:$0xff] }
 0x227   : > { %8902 = vmatpush1.bf16.msra.mxu1 %v10518_v27  ;;  %v2138_v12 = vpop.f32.mrb[11].mxu0  ;;  %8575 = vmatprep.subr.bf16.mxu0 %v10525_v13  ;;  %v2179_v45 = vpop.f32.mrb[11].mxu1  ;;  %v10567_v27 = vcombine.high %v2640_v23, %v2644_v24  ;;  %v2647_v13 = vld [vmem:[%s11838_s17 + $0xb00] sm:$0xff]  ;;  %v2680_v24 = vld [vmem:[%s11838_s17 + $0xc08] sm:$0xff] }
 0x228   : > { %8903 = vmatprep.subr.bf16.mxu1 %v10527_v29  ;;  %v2651_v29 = vld [vmem:[%s11838_s17 + $0xb20] sm:$0xff] }
 0x229   : > { %v10573_v38 = vcombine.high %v2647_v13, %v2651_v29  ;;  %v2655_v40 = vld [vmem:[%s11838_s17 + $0xb40] sm:$0xff]  ;;  %v10572_v45 = vcombine.low %v2647_v13, %v2651_v29 }
 0x22a   : > { %8576 = vmatpush1.bf16.msra.mxu0 %v10524_v39  ;;  %v10575_v39 = vcombine.high %v2648_v30, %v2652_v32  ;;  %v2659_v12 = vld [vmem:[%s11838_s17 + $0xb60] sm:$0xff] }
 0x22b   : > { %8904 = vmatpush1.bf16.msra.mxu1 %v10526_v43  ;;  %8577 = vmatprep.subr.bf16.mxu0 %v10533_v44  ;;  %v2656_v43 = vld [vmem:[%s11838_s17 + $0xb48] sm:$0xff]  ;;  %v10581_v50 = vcombine.high %v2655_v40, %v2659_v12  ;;  %v10580_v0 = vcombine.low %v2655_v40, %v2659_v12  ;;  %v2683_v53 = vld [vmem:[%s11838_s17 + $0xc20] sm:$0xff] }
 0x22c   : > { %8905 = vmatprep.subr.bf16.mxu1 %v10535_v47  ;;  %v2660_v44 = vld [vmem:[%s11838_s17 + $0xb68] sm:$0xff]  ;;  %v12133_v47 = vsub.s32 4, %v11893_v57  ;;  %v2687_v30 = vld [vmem:[%s11838_s17 + $0xc40] sm:$0xff] }
 0x22d   : > { %v10583_v16 = vcombine.high %v2656_v43, %v2660_v44  ;;  %v10582_v3 = vcombine.low %v2656_v43, %v2660_v44  ;;  %v2691_v32 = vld [vmem:[%s11838_s17 + $0xc60] sm:$0xff] }
 0x22e   : > { %8578 = vmatpush1.bf16.msra.mxu0 %v10532_v55  ;;  %v2667_v55 = vld [vmem:[%s11838_s17 + $0xba0] sm:$0xff]  ;;  %v587_v2 = vrot.slane %v12142_v1, %v12133_v47  ;;  %v10613_v40 = vcombine.high %v2687_v30, %v2691_v32 }
 0x22f   : > { %8906 = vmatpush1.bf16.msra.mxu1 %v10534_v56  ;;  %8579 = vmatprep.subr.bf16.mxu0 %v10541_v58  ;;  %v12138_v56 = vsub.s32 7, %v11893_v57  ;;  %v2664_v58 = vld [vmem:[%s11838_s17 + $0xb88] sm:$0xff]  ;;  %v10588_v14 = vcombine.low %v2663_v52, %v2667_v55  ;;  %v2695_v12 = vld [vmem:[%s11838_s17 + $0xc80] sm:$0xff] }
 0x230   : > { %8907 = vmatprep.subr.bf16.mxu1 %v10543_v60  ;;  %v2668_v60 = vld [vmem:[%s11838_s17 + $0xba8] sm:$0xff]  ;;  %v2699_v43 = vld [vmem:[%s11838_s17 + $0xca0] sm:$0xff] }
 0x231   : > { %v599_v9 = vrot.slane %v12142_v1, %v12138_v56 }
 0x232   : > { %8580 = vmatpush1.bf16.msra.mxu0 %v10540_v4  ;;  %v10589_v4 = vcombine.high %v2663_v52, %v2667_v55  ;;  %v10621_v55 = vcombine.high %v2695_v12, %v2699_v43 }
 0x233   : > { %8908 = vmatpush1.bf16.msra.mxu1 %v10542_v5  ;;  %8581 = vmatprep.subr.bf16.mxu0 %v10549_v6  ;;  %v10591_v5 = vcombine.high %v2664_v58, %v2668_v60  ;;  %v2671_v6 = vld [vmem:[%s11838_s17 + $0xbc0] sm:$0xff]  ;;  %v2095_v23 = vadd.f32 %v12014_v49, %v599_v9  ;;  %v10604_v49 = vcombine.low %v2679_v21, %v2683_v53 }
 0x234   : > { %8909 = vmatprep.subr.bf16.mxu1 %v10551_v7  ;;  %v2675_v7 = vld [vmem:[%s11838_s17 + $0xbe0] sm:$0xff] }
 0x235   : > { %v2270_v29 = vmax.f32 %v2095_v23, 0.0  ;;  %v2711_v9 = vld [vmem:[%s11838_s17 + $0xd00] sm:$0xff]  ;;  %v2720_v23 = vld [vmem:[%s11838_s17 + $0xd48] sm:$0xff] }
 0x236   : > { %8582 = vmatpush1.bf16.msra.mxu0 %v10548_v17  ;;  %v2052_v17 = vadd.f32 %v12004_v42, %v587_v2  ;;  %v10598_v42 = vcombine.low %v2672_v10, %v2676_v11  ;;  %v2704_v2 = vld [vmem:[%s11838_s17 + $0xcc8] sm:$0xff] }
 0x237   : > { %8910 = vmatpush1.bf16.msra.mxu1 %v10550_v18  ;;  %8583 = vmatprep.subr.bf16.mxu0 %v10557_v19  ;;  %v10590_v18 = vcombine.low %v2664_v58, %v2668_v60  ;;  %v10597_v19 = vcombine.high %v2671_v6, %v2675_v7  ;;  %v12166_v44 = vpack.c.bf16 %v2270_v29, %v2270_v29  ;;  %v2703_v60 = vld [vmem:[%s11838_s17 + $0xcc0] sm:$0xff]  ;;  %v2728_v29 = vld [vmem:[%s11838_s17 + $0xd88] sm:$0xff] }
 0x238   : > { %8911 = vmatprep.subr.bf16.mxu1 %v10559_v20  ;;  %v10599_v20 = vcombine.high %v2672_v10, %v2676_v11  ;;  %v2715_v10 = vld [vmem:[%s11838_s17 + $0xd20] sm:$0xff]  ;;  %v2712_v11 = vld [vmem:[%s11838_s17 + $0xd08] sm:$0xff] }
 0x23a   : > { %8584 = vmatpush1.bf16.msra.mxu0 %v10556_v61  ;;  %v2684_v61 = vld [vmem:[%s11838_s17 + $0xc28] sm:$0xff] }
 0x23b   : > { %8912 = vmatpush1.bf16.msra.mxu1 %v10558_v25  ;;  %8585 = vmatprep.subr.bf16.mxu0 %v10565_v26  ;;  %v10596_v25 = vcombine.low %v2671_v6, %v2675_v7  ;;  %v2267_v26 = vmax.f32 %v2052_v17, 0.0  ;;  %v10607_v13 = vcombine.high %v2680_v24, %v2684_v61 }
 0x23c   : > { %8913 = vmatprep.subr.bf16.mxu1 %v10567_v27  ;;  %v10605_v27 = vcombine.high %v2679_v21, %v2683_v53  ;;  %v2719_v21 = vld [vmem:[%s11838_s17 + $0xd40] sm:$0xff] }
 0x23d   : > { %v2723_v53 = vld [vmem:[%s11838_s17 + $0xd60] sm:$0xff] }
 0x23e   : > { %8586 = vmatpush1.bf16.msra.mxu0 %v10564_v34  ;;  %v2688_v34 = vld [vmem:[%s11838_s17 + $0xc48] sm:$0xff] }
 0x23f   : > { %8914 = vmatpush1.bf16.msra.mxu1 %v10566_v35  ;;  %8587 = vmatprep.subr.bf16.mxu0 %v10573_v38  ;;  %v2692_v35 = vld [vmem:[%s11838_s17 + $0xc68] sm:$0xff]  ;;  %v12162_v38 = vpack.c.bf16 %v2267_v26, %v2267_v26  ;;  %v10645_v26 = vcombine.high %v2719_v21, %v2723_v53 }
 0x240   : > { %8915 = vmatprep.subr.bf16.mxu1 %v10575_v39  ;;  %v10606_v39 = vcombine.low %v2680_v24, %v2684_v61  ;;  %v10614_v52 = vcombine.low %v2688_v34, %v2692_v35  ;;  %v2724_v24 = vld [vmem:[%s11838_s17 + $0xd68] sm:$0xff]  ;;  %v10636_v61 = vcombine.low %v2711_v9, %v2715_v10 }
 0x242   : > { %8588 = vmatpush1.bf16.msra.mxu0 %v10572_v45  ;;  %v10615_v45 = vcombine.high %v2688_v34, %v2692_v35 }
 0x243   : > { %8916 = vmatpush1.bf16.msra.mxu1 %v10574_v48  ;;  %8589 = vmatprep.subr.bf16.mxu0 %v10581_v50  ;;  %v2696_v48 = vld [vmem:[%s11838_s17 + $0xc88] sm:$0xff] }
 0x244   : > { %8917 = vmatprep.subr.bf16.mxu1 %v10583_v16  ;;  %v2700_v50 = vld [vmem:[%s11838_s17 + $0xca8] sm:$0xff]  ;;  %v10612_v16 = vcombine.low %v2687_v30, %v2691_v32  ;;  %v10644_v32 = vcombine.low %v2719_v21, %v2723_v53 }
 0x245   : > { %v10623_v58 = vcombine.high %v2696_v48, %v2700_v50  ;;  %v2732_v30 = vld [vmem:[%s11838_s17 + $0xda8] sm:$0xff] }
 0x246   : > { %8590 = vmatpush1.bf16.msra.mxu0 %v10580_v0  ;;  %v2707_v0 = vld [vmem:[%s11838_s17 + $0xce0] sm:$0xff]  ;;  %v2756_v21 = vld [vmem:[%s11838_s17 + $0xe68] sm:$0xff] }
 0x247   : > { %8918 = vmatpush1.bf16.msra.mxu1 %v10582_v3  ;;  %8591 = vmatprep.subr.bf16.mxu0 %v10589_v4  ;;  %v2708_v3 = vld [vmem:[%s11838_s17 + $0xce8] sm:$0xff]  ;;  %v10620_v4 = vcombine.low %v2695_v12, %v2699_v43  ;;  %v10629_v6 = vcombine.high %v2703_v60, %v2707_v0  ;;  %v10628_v17 = vcombine.low %v2703_v60, %v2707_v0  ;;  %v2739_v12 = vld [vmem:[%s11838_s17 + $0xde0] sm:$0xff] }
 0x248   : > { %8919 = vmatprep.subr.bf16.mxu1 %v10591_v5  ;;  %v10622_v5 = vcombine.low %v2696_v48, %v2700_v50  ;;  %v10631_v7 = vcombine.high %v2704_v2, %v2708_v3  ;;  %v2736_v48 = vld [vmem:[%s11838_s17 + $0xdc8] sm:$0xff]  ;;  %v10654_v0 = vcombine.low %v2728_v29, %v2732_v30 }
 0x249   : > { %v2740_v50 = vld [vmem:[%s11838_s17 + $0xde8] sm:$0xff] }
 0x24a   : > { %8592 = vmatpush1.bf16.msra.mxu0 %v10588_v14  ;;  %v2716_v14 = vld [vmem:[%s11838_s17 + $0xd28] sm:$0xff] }
 0x24b   : > { %8920 = vmatpush1.bf16.msra.mxu1 %v10590_v18  ;;  %8593 = vmatprep.subr.bf16.mxu0 %v10597_v19  ;;  %v10630_v18 = vcombine.low %v2704_v2, %v2708_v3  ;;  %v10637_v19 = vcombine.high %v2711_v9, %v2715_v10  ;;  %v2748_v9 = vld [vmem:[%s11838_s17 + $0xe28] sm:$0xff] }
 0x24c   : > { %8921 = vmatprep.subr.bf16.mxu1 %v10599_v20  ;;  %v10639_v20 = vcombine.high %v2712_v11, %v2716_v14 }
 0x24e   : > { %8594 = vmatpush1.bf16.msra.mxu0 %v10596_v25  ;;  %v10638_v25 = vcombine.low %v2712_v11, %v2716_v14  ;;  %v10662_v11 = vcombine.low %v2736_v48, %v2740_v50 }
 0x24f   : > { %8922 = vmatpush1.bf16.msra.mxu1 %v10598_v42  ;;  %8604 = vmatprep.subr.bf16.mxu0 %v10605_v27  ;;  %v10647_v42 = vcombine.high %v2720_v23, %v2724_v24  ;;  %v2727_v27 = vld [vmem:[%s11838_s17 + $0xd80] sm:$0xff] }
 0x250   : > { %8932 = vmatprep.subr.bf16.mxu1 %v10607_v13  ;;  %v2731_v13 = vld [vmem:[%s11838_s17 + $0xda0] sm:$0xff] }
 0x251   : > { %8596 = vmatmul.mubr.bf16.vlgmr.msra.gmra.mrb[16].mxu0 %v12162_v38  ;;  %v10653_v34 = vcombine.high %v2727_v27, %v2731_v13 }
 0x252   : > { %8924 = vmatmul.mubr.bf16.vlgmr.msra.gmra.mrb[16].mxu1 %v12162_v38  ;;  %8605 = vmatpush1.bf16.msra.mxu0 %v10604_v49  ;;  %v10646_v49 = vcombine.low %v2720_v23, %v2724_v24 }
 0x253   : > { %8636 = vmatprep.mubr.bf16.mxu0 %v12166_v44  ;;  %8933 = vmatpush1.bf16.msra.mxu1 %v10606_v39  ;;  %v10655_v39 = vcombine.high %v2728_v29, %v2732_v30 }
 0x254   : > { %8964 = vmatprep.mubr.bf16.mxu1 %v12166_v44  ;;  %8606 = vmatprep.subr.bf16.mxu0 %v10613_v40  ;;  %v2735_v40 = vld [vmem:[%s11838_s17 + $0xdc0] sm:$0xff] }
 0x255   : > { %8934 = vmatprep.subr.bf16.mxu1 %v10615_v45  ;;  %v10661_v2 = vcombine.high %v2735_v40, %v2739_v12  ;;  %v10660_v10 = vcombine.low %v2735_v40, %v2739_v12  ;;  %v2772_v40 = vld [vmem:[%s11838_s17 + $0xee8] sm:$0xff] }
 0x256   : > { %8607 = vmatpush1.bf16.msra.mxu0 %v10612_v16 }
 0x257   : > { %8935 = vmatpush1.bf16.msra.mxu1 %v10614_v52  ;;  %8608 = vmatprep.subr.bf16.mxu0 %v10621_v55  ;;  %v10652_v55 = vcombine.low %v2727_v27, %v2731_v13  ;;  %v2764_v27 = vld [vmem:[%s11838_s17 + $0xea8] sm:$0xff] }
 0x258   : > { %8936 = vmatprep.subr.bf16.mxu1 %v10623_v58 }
 0x25a   : > { %8609 = vmatpush1.bf16.msra.mxu0 %v10620_v4  ;;  %v10663_v4 = vcombine.high %v2736_v48, %v2740_v50 }
 0x25b   : > { %8937 = vmatpush1.bf16.msra.mxu1 %v10622_v5  ;;  %8610 = vmatprep.subr.bf16.mxu0 %v10629_v6  ;;  %v2743_v5 = vld [vmem:[%s11838_s17 + $0xe00] sm:$0xff] }
 0x25c   : > { %8938 = vmatprep.subr.bf16.mxu1 %v10631_v7  ;;  %v2747_v6 = vld [vmem:[%s11838_s17 + $0xe20] sm:$0xff]  ;;  %v2744_v7 = vld [vmem:[%s11838_s17 + $0xe08] sm:$0xff] }
 0x25d   : > { %v10669_v14 = vcombine.high %v2743_v5, %v2747_v6  ;;  %v10668_v53 = vcombine.low %v2743_v5, %v2747_v6  ;;  %v10670_v23 = vcombine.low %v2744_v7, %v2748_v9  ;;  %v2783_v6 = vld [vmem:[%s11838_s17 + $0xf40] sm:$0xff] }
 0x25e   : > { %8611 = vmatpush1.bf16.msra.mxu0 %v10628_v17  ;;  %v10671_v17 = vcombine.high %v2744_v7, %v2748_v9  ;;  %v2787_v7 = vld [vmem:[%s11838_s17 + $0xf60] sm:$0xff]  ;;  %v2784_v9 = vld [vmem:[%s11838_s17 + $0xf48] sm:$0xff] }
 0x25f   : > { %8939 = vmatpush1.bf16.msra.mxu1 %v10630_v18  ;;  %8612 = vmatprep.subr.bf16.mxu0 %v10637_v19  ;;  %v2751_v18 = vld [vmem:[%s11838_s17 + $0xe40] sm:$0xff] }
 0x260   : > { %8940 = vmatprep.subr.bf16.mxu1 %v10639_v20  ;;  %v2755_v19 = vld [vmem:[%s11838_s17 + $0xe60] sm:$0xff]  ;;  %v2752_v20 = vld [vmem:[%s11838_s17 + $0xe48] sm:$0xff] }
 0x261   : > { %v10677_v24 = vcombine.high %v2751_v18, %v2755_v19  ;;  %v10676_v13 = vcombine.low %v2751_v18, %v2755_v19  ;;  %v10678_v29 = vcombine.low %v2752_v20, %v2756_v21  ;;  %v10709_v18 = vcombine.high %v2783_v6, %v2787_v7 }
 0x262   : > { %8613 = vmatpush1.bf16.msra.mxu0 %v10636_v61  ;;  %v10679_v61 = vcombine.high %v2752_v20, %v2756_v21  ;;  %v2791_v20 = vld [vmem:[%s11838_s17 + $0xf80] sm:$0xff] }
 0x263   : > { %8941 = vmatpush1.bf16.msra.mxu1 %v10638_v25  ;;  %8614 = vmatprep.subr.bf16.mxu0 %v10645_v26  ;;  %v2759_v25 = vld [vmem:[%s11838_s17 + $0xe80] sm:$0xff] }
 0x264   : > { %v12190_v35 = vpop.f32.mrb[12].mxu0  ;;  %8942 = vmatprep.subr.bf16.mxu1 %v10647_v42  ;;  %v12194_v43 = vpop.f32.mrb[12].mxu1  ;;  %v2763_v26 = vld [vmem:[%s11838_s17 + $0xea0] sm:$0xff]  ;;  %v2760_v42 = vld [vmem:[%s11838_s17 + $0xe88] sm:$0xff] }
 0x265   : > { %v12196_v45 = vpop.f32.mrb[13].mxu0  ;;  %v12200_v16 = vpop.f32.mrb[13].mxu1  ;;  %v10685_v30 = vcombine.high %v2759_v25, %v2763_v26  ;;  %v10684_v12 = vcombine.low %v2759_v25, %v2763_v26  ;;  %v10686_v48 = vcombine.low %v2760_v42, %v2764_v27  ;;  %v2795_v21 = vld [vmem:[%s11838_s17 + $0xfa0] sm:$0xff] }
 0x266   : > { %v2219_v52 = vpop.f32.mrb[14].mxu0  ;;  %8615 = vmatpush1.bf16.msra.mxu0 %v10644_v32  ;;  %v2260_v58 = vpop.f32.mrb[14].mxu1  ;;  %v10687_v32 = vcombine.high %v2760_v42, %v2764_v27  ;;  %v10717_v26 = vcombine.high %v2791_v20, %v2795_v21  ;;  %v2799_v27 = vld [vmem:[%s11838_s17 + $0xfc0] sm:$0xff] }
 0x267   : > { %8943 = vmatpush1.bf16.msra.mxu1 %v10646_v49  ;;  %v2220_v60 = vpop.f32.mrb[15].mxu0  ;;  %8616 = vmatprep.subr.bf16.mxu0 %v10653_v34  ;;  %v2261_v3 = vpop.f32.mrb[15].mxu1  ;;  %v2767_v49 = vld [vmem:[%s11838_s17 + $0xec0] sm:$0xff] }
 0x268   : > { %8944 = vmatprep.subr.bf16.mxu1 %v10655_v39  ;;  %v2771_v34 = vld [vmem:[%s11838_s17 + $0xee0] sm:$0xff]  ;;  %v2768_v39 = vld [vmem:[%s11838_s17 + $0xec8] sm:$0xff] }
 0x269   : > { %v10693_v50 = vcombine.high %v2767_v49, %v2771_v34  ;;  %v10695_v52 = vcombine.high %v2768_v39, %v2772_v40  ;;  %v2779_v58 = vld [vmem:[%s11838_s17 + $0xf20] sm:$0xff]  ;;  %v2776_v60 = vld [vmem:[%s11838_s17 + $0xf08] sm:$0xff]  ;;  %v10694_v3 = vcombine.low %v2768_v39, %v2772_v40 }
 0x26a   : > { %8617 = vmatpush1.bf16.msra.mxu0 %v10652_v55  ;;  %v2775_v55 = vld [vmem:[%s11838_s17 + $0xf00] sm:$0xff] }
 0x26b   : > { %8945 = vmatpush1.bf16.msra.mxu1 %v10654_v0  ;;  %8618 = vmatprep.subr.bf16.mxu0 %v10661_v2  ;;  %v2780_v0 = vld [vmem:[%s11838_s17 + $0xf28] sm:$0xff]  ;;  %v10692_v2 = vcombine.low %v2767_v49, %v2771_v34  ;;  %v10716_v49 = vcombine.low %v2791_v20, %v2795_v21 }
 0x26c   : > { %8946 = vmatprep.subr.bf16.mxu1 %v10663_v4  ;;  %v10701_v4 = vcombine.high %v2775_v55, %v2779_v58  ;;  %v10703_v5 = vcombine.high %v2776_v60, %v2780_v0  ;;  %v2824_v21 = vld [vmem:[%s11838_s17 + $0x1088] sm:$0xff] }
 0x26e   : > { %8619 = vmatpush1.bf16.msra.mxu0 %v10660_v10  ;;  %v2788_v10 = vld [vmem:[%s11838_s17 + $0xf68] sm:$0xff] }
 0x26f   : > { %8947 = vmatpush1.bf16.msra.mxu1 %v10662_v11  ;;  %8620 = vmatprep.subr.bf16.mxu0 %v10669_v14  ;;  %v10700_v11 = vcombine.low %v2775_v55, %v2779_v58  ;;  %v12227_v14 = vsub.s32 6, %v11893_v57  ;;  %v10711_v19 = vcombine.high %v2784_v9, %v2788_v10  ;;  %v10710_v25 = vcombine.low %v2784_v9, %v2788_v10  ;;  %v2812_v55 = vld [vmem:[%s11838_s17 + $0x1028] sm:$0xff] }
 0x270   : > { %8948 = vmatprep.subr.bf16.mxu1 %v10671_v17  ;;  %v10702_v17 = vcombine.low %v2776_v60, %v2780_v0 }
 0x271   : > { %v595_v57 = vrot.slane %v12142_v1, %v12227_v14 }
 0x272   : > { %8621 = vmatpush1.bf16.msra.mxu0 %v10668_v53  ;;  %v2792_v53 = vld [vmem:[%s11838_s17 + $0xf88] sm:$0xff] }
 0x273   : > { %8949 = vmatpush1.bf16.msra.mxu1 %v10670_v23  ;;  %8622 = vmatprep.subr.bf16.mxu0 %v10677_v24  ;;  %v2796_v23 = vld [vmem:[%s11838_s17 + $0xfa8] sm:$0xff]  ;;  %v12233_v24 = vld [vmem:[#allocation4 + $0x8] sm:$0xff]  ;;  %v2093_v1 = vadd.f32 %v12008_v8, %v595_v57 }
 0x274   : > { %8950 = vmatprep.subr.bf16.mxu1 %v10679_v61  ;;  %v10708_v61 = vcombine.low %v2783_v6, %v2787_v7  ;;  %v10719_v42 = vcombine.high %v2792_v53, %v2796_v23  ;;  %v10718_v34 = vcombine.low %v2792_v53, %v2796_v23  ;;  %v2816_v6 = vld [vmem:[%s11838_s17 + $0x1048] sm:$0xff] }
 0x275   : > { %v2269_v60 = vmax.f32 %v2093_v1, 0.0  ;;  %v2820_v7 = vld [vmem:[%s11838_s17 + $0x1068] sm:$0xff]  ;;  %v2839_v1 = vld [vmem:[%s11838_s17 + $0x1100] sm:$0xff] }
 0x276   : > { %8623 = vmatpush1.bf16.msra.mxu0 %v10676_v13  ;;  %v2803_v13 = vld [vmem:[%s11838_s17 + $0xfe0] sm:$0xff]  ;;  %v10743_v20 = vcombine.high %v2816_v6, %v2820_v7  ;;  %v2828_v53 = vld [vmem:[%s11838_s17 + $0x10a8] sm:$0xff] }
 0x277   : > { %8951 = vmatpush1.bf16.msra.mxu1 %v10678_v29  ;;  %8624 = vmatprep.subr.bf16.mxu0 %v10685_v30  ;;  %v607_v29 = vrot.slane %v12233_v24, %v11900_v59  ;;  %v2800_v30 = vld [vmem:[%s11838_s17 + $0xfc8] sm:$0xff]  ;;  %v10725_v39 = vcombine.high %v2799_v27, %v2803_v13  ;;  %v10724_v58 = vcombine.low %v2799_v27, %v2803_v13 }
 0x278   : > { %8952 = vmatprep.subr.bf16.mxu1 %v10687_v32  ;;  %v2804_v32 = vld [vmem:[%s11838_s17 + $0xfe8] sm:$0xff]  ;;  %v12253_v9 = vpack.c.bf16 %v2269_v60, %v2269_v60 }
 0x279   : > { %v10727_v40 = vcombine.high %v2800_v30, %v2804_v32  ;;  %v10726_v8 = vcombine.low %v2800_v30, %v2804_v32  ;;  %v2832_v27 = vld [vmem:[%s11838_s17 + $0x10c8] sm:$0xff]  ;;  %v10750_v30 = vcombine.low %v2824_v21, %v2828_v53 }
 0x27a   : > { %8625 = vmatpush1.bf16.msra.mxu0 %v10684_v12  ;;  %v2807_v12 = vld [vmem:[%s11838_s17 + $0x1000] sm:$0xff]  ;;  %v2836_v13 = vld [vmem:[%s11838_s17 + $0x10e8] sm:$0xff] }
 0x27b   : > { %8953 = vmatpush1.bf16.msra.mxu1 %v10686_v48  ;;  %8626 = vmatprep.subr.bf16.mxu0 %v10693_v50  ;;  %v2811_v48 = vld [vmem:[%s11838_s17 + $0x1020] sm:$0xff]  ;;  %v2136_v50 = vadd.f32 %v12102_v46, %v607_v29  ;;  %v2848_v60 = vld [vmem:[%s11838_s17 + $0x1148] sm:$0xff] }
 0x27c   : > { %8954 = vmatprep.subr.bf16.mxu1 %v10695_v52  ;;  %v2808_v52 = vld [vmem:[%s11838_s17 + $0x1008] sm:$0xff]  ;;  %v10733_v0 = vcombine.high %v2807_v12, %v2811_v48  ;;  %v10732_v46 = vcombine.low %v2807_v12, %v2811_v48  ;;  %v10758_v48 = vcombine.low %v2832_v27, %v2836_v13 }
 0x27d   : > { %v10734_v10 = vcombine.low %v2808_v52, %v2812_v55 }
 0x27e   : > { %8627 = vmatpush1.bf16.msra.mxu0 %v10692_v2  ;;  %v10735_v2 = vcombine.high %v2808_v52, %v2812_v55  ;;  %v2847_v55 = vld [vmem:[%s11838_s17 + $0x1140] sm:$0xff] }
 0x27f   : > { %8955 = vmatpush1.bf16.msra.mxu1 %v10694_v3  ;;  %8628 = vmatprep.subr.bf16.mxu0 %v10701_v4  ;;  %v2272_v3 = vmax.f32 %v2136_v50, 0.0  ;;  %v2815_v4 = vld [vmem:[%s11838_s17 + $0x1040] sm:$0xff] }
 0x280   : > { %8956 = vmatprep.subr.bf16.mxu1 %v10703_v5  ;;  %v2819_v5 = vld [vmem:[%s11838_s17 + $0x1060] sm:$0xff] }
 0x281   : > { %v10740_v23 = vcombine.low %v2815_v4, %v2819_v5 }
 0x282   : > { %8629 = vmatpush1.bf16.msra.mxu0 %v10700_v11  ;;  %v10741_v11 = vcombine.high %v2815_v4, %v2819_v5  ;;  %v2855_v5 = vld [vmem:[%s11838_s17 + $0x1180] sm:$0xff] }
 0x283   : > { %8957 = vmatpush1.bf16.msra.mxu1 %v10702_v17  ;;  %8630 = vmatprep.subr.bf16.mxu0 %v10709_v18  ;;  %v2823_v17 = vld [vmem:[%s11838_s17 + $0x1080] sm:$0xff] }
 0x284   : > { %8958 = vmatprep.subr.bf16.mxu1 %v10711_v19  ;;  %v2827_v18 = vld [vmem:[%s11838_s17 + $0x10a0] sm:$0xff]  ;;  %v12257_v19 = vpack.c.bf16 %v2272_v3, %v2272_v3 }
 0x285   : > { %v10749_v57 = vcombine.high %v2823_v17, %v2827_v18  ;;  %v10748_v29 = vcombine.low %v2823_v17, %v2827_v18 }
 0x286   : > { %8631 = vmatpush1.bf16.msra.mxu0 %v10708_v61  ;;  %v10742_v61 = vcombine.low %v2816_v6, %v2820_v7  ;;  %v2856_v6 = vld [vmem:[%s11838_s17 + $0x1188] sm:$0xff] }
 0x287   : > { %8959 = vmatpush1.bf16.msra.mxu1 %v10710_v25  ;;  %8632 = vmatprep.subr.bf16.mxu0 %v10717_v26  ;;  %v10751_v25 = vcombine.high %v2824_v21, %v2828_v53  ;;  %v2831_v26 = vld [vmem:[%s11838_s17 + $0x10c0] sm:$0xff]  ;;  %v2860_v7 = vld [vmem:[%s11838_s17 + $0x11a8] sm:$0xff] }
 0x288   : > { %8960 = vmatprep.subr.bf16.mxu1 %v10719_v42  ;;  %v2835_v42 = vld [vmem:[%s11838_s17 + $0x10e0] sm:$0xff]  ;;  %v10783_v18 = vcombine.high %v2856_v6, %v2860_v7  ;;  %v2864_v53 = vld [vmem:[%s11838_s17 + $0x11c8] sm:$0xff] }
 0x289   : > { %v10757_v32 = vcombine.high %v2831_v26, %v2835_v42  ;;  %v10756_v12 = vcombine.low %v2831_v26, %v2835_v42  ;;  %v2867_v21 = vld [vmem:[%s11838_s17 + $0x11e0] sm:$0xff] }
 0x28a   : > { %8633 = vmatpush1.bf16.msra.mxu0 %v10716_v49  ;;  %v10759_v49 = vcombine.high %v2832_v27, %v2836_v13  ;;  %v2871_v42 = vld [vmem:[%s11838_s17 + $0x1200] sm:$0xff]  ;;  %v2872_v13 = vld [vmem:[%s11838_s17 + $0x1208] sm:$0xff] }
 0x28b   : > { %8961 = vmatpush1.bf16.msra.mxu1 %v10718_v34  ;;  %8634 = vmatprep.subr.bf16.mxu0 %v10725_v39  ;;  %v2843_v34 = vld [vmem:[%s11838_s17 + $0x1120] sm:$0xff]  ;;  %v2840_v39 = vld [vmem:[%s11838_s17 + $0x1108] sm:$0xff] }
 0x28c   : > { %8962 = vmatprep.subr.bf16.mxu1 %v10727_v40  ;;  %v2844_v40 = vld [vmem:[%s11838_s17 + $0x1128] sm:$0xff]  ;;  %v10765_v50 = vcombine.high %v2839_v1, %v2843_v34  ;;  %v2875_v27 = vld [vmem:[%s11838_s17 + $0x1220] sm:$0xff] }
 0x28d   : > { %v10767_v52 = vcombine.high %v2840_v39, %v2844_v40 }
 0x28e   : > { %8635 = vmatpush1.bf16.msra.mxu0 %v10724_v58  ;;  %v2851_v58 = vld [vmem:[%s11838_s17 + $0x1160] sm:$0xff] }
 0x28f   : > { %8963 = vmatpush1.bf16.msra.mxu1 %v10726_v8  ;;  %8645 = vmatprep.subr.bf16.mxu0 %v10733_v0  ;;  %v2852_v8 = vld [vmem:[%s11838_s17 + $0x1168] sm:$0xff]  ;;  %v10764_v0 = vcombine.low %v2839_v1, %v2843_v34  ;;  %v10773_v3 = vcombine.high %v2847_v55, %v2851_v58  ;;  %v2879_v34 = vld [vmem:[%s11838_s17 + $0x1240] sm:$0xff] }
 0x290   : > { %8973 = vmatprep.subr.bf16.mxu1 %v10735_v2  ;;  %v10766_v2 = vcombine.low %v2840_v39, %v2844_v40  ;;  %v10775_v4 = vcombine.high %v2848_v60, %v2852_v8  ;;  %v2883_v39 = vld [vmem:[%s11838_s17 + $0x1260] sm:$0xff]  ;;  %v2880_v40 = vld [vmem:[%s11838_s17 + $0x1248] sm:$0xff] }
 0x291   : > { %8637 = vmatmul.mubr.bf16.vlgmr.msra.gmra.mrb[16].mxu0 %v12253_v9 }
 0x292   : > { %8965 = vmatmul.mubr.bf16.vlgmr.msra.gmra.mrb[16].mxu1 %v12253_v9  ;;  %8646 = vmatpush1.bf16.msra.mxu0 %v10732_v46  ;;  %v2859_v46 = vld [vmem:[%s11838_s17 + $0x11a0] sm:$0xff] }
 0x293   : > { %8677 = vmatprep.mubr.bf16.mxu0 %v12257_v19  ;;  %8974 = vmatpush1.bf16.msra.mxu1 %v10734_v10  ;;  %v10772_v10 = vcombine.low %v2847_v55, %v2851_v58  ;;  %v10781_v17 = vcombine.high %v2855_v5, %v2859_v46  ;;  %v2887_v58 = vld [vmem:[%s11838_s17 + $0x1280] sm:$0xff] }
 0x294   : > { %9005 = vmatprep.mubr.bf16.mxu1 %v12257_v19  ;;  %8647 = vmatprep.subr.bf16.mxu0 %v10741_v11  ;;  %v10774_v11 = vcombine.low %v2848_v60, %v2852_v8  ;;  %v2891_v60 = vld [vmem:[%s11838_s17 + $0x12a0] sm:$0xff]  ;;  %v2888_v8 = vld [vmem:[%s11838_s17 + $0x1288] sm:$0xff] }
 0x295   : > { %8975 = vmatprep.subr.bf16.mxu1 %v10743_v20  ;;  %v2863_v20 = vld [vmem:[%s11838_s17 + $0x11c0] sm:$0xff] }
 0x296   : > { %8648 = vmatpush1.bf16.msra.mxu0 %v10740_v23  ;;  %v2868_v23 = vld [vmem:[%s11838_s17 + $0x11e8] sm:$0xff] }
 0x297   : > { %8976 = vmatpush1.bf16.msra.mxu1 %v10742_v61  ;;  %8649 = vmatprep.subr.bf16.mxu0 %v10749_v57  ;;  %v10780_v61 = vcombine.low %v2855_v5, %v2859_v46  ;;  %v10782_v57 = vcombine.low %v2856_v6, %v2860_v7  ;;  %v10791_v26 = vcombine.high %v2864_v53, %v2868_v23  ;;  %v2895_v46 = vld [vmem:[%s11838_s17 + $0x12c0] sm:$0xff]  ;;  %v2896_v7 = vld [vmem:[%s11838_s17 + $0x12c8] sm:$0xff] }
 0x298   : > { %8977 = vmatprep.subr.bf16.mxu1 %v10751_v25  ;;  %v10789_v25 = vcombine.high %v2863_v20, %v2867_v21  ;;  %v2899_v6 = vld [vmem:[%s11838_s17 + $0x12e0] sm:$0xff] }
 0x29a   : > { %8650 = vmatpush1.bf16.msra.mxu0 %v10748_v29  ;;  %v2876_v29 = vld [vmem:[%s11838_s17 + $0x1228] sm:$0xff] }
 0x29b   : > { %8978 = vmatpush1.bf16.msra.mxu1 %v10750_v30  ;;  %8651 = vmatprep.subr.bf16.mxu0 %v10757_v32  ;;  %v10788_v30 = vcombine.low %v2863_v20, %v2867_v21  ;;  %v10790_v32 = vcombine.low %v2864_v53, %v2868_v23  ;;  %v10799_v1 = vcombine.high %v2872_v13, %v2876_v29  ;;  %v2903_v21 = vld [vmem:[%s11838_s17 + $0x1300] sm:$0xff]  ;;  %v2904_v23 = vld [vmem:[%s11838_s17 + $0x1308] sm:$0xff] }
 0x29c   : > { %8979 = vmatprep.subr.bf16.mxu1 %v10759_v49  ;;  %v10797_v49 = vcombine.high %v2871_v42, %v2875_v27  ;;  %v2907_v53 = vld [vmem:[%s11838_s17 + $0x1320] sm:$0xff] }
 0x29e   : > { %8652 = vmatpush1.bf16.msra.mxu0 %v10756_v12  ;;  %v2884_v12 = vld [vmem:[%s11838_s17 + $0x1268] sm:$0xff] }
 0x29f   : > { %8980 = vmatpush1.bf16.msra.mxu1 %v10758_v48  ;;  %8653 = vmatprep.subr.bf16.mxu0 %v10765_v50  ;;  %v10796_v48 = vcombine.low %v2871_v42, %v2875_v27  ;;  %v10798_v50 = vcombine.low %v2872_v13, %v2876_v29  ;;  %v10807_v55 = vcombine.high %v2880_v40, %v2884_v12  ;;  %v2911_v27 = vld [vmem:[%s11838_s17 + $0x1340] sm:$0xff]  ;;  %v2912_v29 = vld [vmem:[%s11838_s17 + $0x1348] sm:$0xff] }
 0x2a0   : > { %8981 = vmatprep.subr.bf16.mxu1 %v10767_v52  ;;  %v10805_v52 = vcombine.high %v2879_v34, %v2883_v39  ;;  %v2915_v13 = vld [vmem:[%s11838_s17 + $0x1360] sm:$0xff] }
 0x2a2   : > { %8654 = vmatpush1.bf16.msra.mxu0 %v10764_v0  ;;  %v2892_v0 = vld [vmem:[%s11838_s17 + $0x12a8] sm:$0xff] }
 0x2a3   : > { %8982 = vmatpush1.bf16.msra.mxu1 %v10766_v2  ;;  %8655 = vmatprep.subr.bf16.mxu0 %v10773_v3  ;;  %v10804_v2 = vcombine.low %v2879_v34, %v2883_v39  ;;  %v10806_v3 = vcombine.low %v2880_v40, %v2884_v12  ;;  %v10815_v5 = vcombine.high %v2888_v8, %v2892_v0  ;;  %v2919_v39 = vld [vmem:[%s11838_s17 + $0x1380] sm:$0xff]  ;;  %v2920_v12 = vld [vmem:[%s11838_s17 + $0x1388] sm:$0xff] }
 0x2a4   : > { %8983 = vmatprep.subr.bf16.mxu1 %v10775_v4  ;;  %v10813_v4 = vcombine.high %v2887_v58, %v2891_v60  ;;  %v2923_v40 = vld [vmem:[%s11838_s17 + $0x13a0] sm:$0xff] }
 0x2a6   : > { %8656 = vmatpush1.bf16.msra.mxu0 %v10772_v10  ;;  %v2900_v10 = vld [vmem:[%s11838_s17 + $0x12e8] sm:$0xff] }
 0x2a7   : > { %8984 = vmatpush1.bf16.msra.mxu1 %v10774_v11  ;;  %8657 = vmatprep.subr.bf16.mxu0 %v10781_v17  ;;  %v10812_v11 = vcombine.low %v2887_v58, %v2891_v60  ;;  %v10814_v17 = vcombine.low %v2888_v8, %v2892_v0  ;;  %v10823_v20 = vcombine.high %v2896_v7, %v2900_v10  ;;  %v2927_v8 = vld [vmem:[%s11838_s17 + $0x13c0] sm:$0xff] }
 0x2a8   : > { %8985 = vmatprep.subr.bf16.mxu1 %v10783_v18  ;;  %v10821_v18 = vcombine.high %v2895_v46, %v2899_v6  ;;  %v10845_v58 = vcombine.high %v2919_v39, %v2923_v40  ;;  %v2931_v0 = vld [vmem:[%s11838_s17 + $0x13e0] sm:$0xff] }
 0x2aa   : > { %8658 = vmatpush1.bf16.msra.mxu0 %v10780_v61  ;;  %v2908_v61 = vld [vmem:[%s11838_s17 + $0x1328] sm:$0xff] }
 0x2ab   : > { %8986 = vmatpush1.bf16.msra.mxu1 %v10782_v57  ;;  %8659 = vmatprep.subr.bf16.mxu0 %v10789_v25  ;;  %v10820_v57 = vcombine.low %v2895_v46, %v2899_v6  ;;  %v10822_v25 = vcombine.low %v2896_v7, %v2900_v10  ;;  %v10831_v42 = vcombine.high %v2904_v23, %v2908_v61 }
 0x2ac   : > { %8987 = vmatprep.subr.bf16.mxu1 %v10791_v26  ;;  %v10829_v26 = vcombine.high %v2903_v21, %v2907_v53  ;;  %v10853_v7 = vcombine.high %v2927_v8, %v2931_v0 }
 0x2ae   : > { %8660 = vmatpush1.bf16.msra.mxu0 %v10788_v30  ;;  %v2916_v30 = vld [vmem:[%s11838_s17 + $0x1368] sm:$0xff] }
 0x2af   : > { %8988 = vmatpush1.bf16.msra.mxu1 %v10790_v32  ;;  %8661 = vmatprep.subr.bf16.mxu0 %v10797_v49  ;;  %v10828_v32 = vcombine.low %v2903_v21, %v2907_v53  ;;  %v10830_v49 = vcombine.low %v2904_v23, %v2908_v61  ;;  %v10839_v34 = vcombine.high %v2912_v29, %v2916_v30  ;;  %v2940_v21 = vld [vmem:[%s11838_s17 + $0x1428] sm:$0xff] }
 0x2b0   : > { %8989 = vmatprep.subr.bf16.mxu1 %v10799_v1  ;;  %v10837_v1 = vcombine.high %v2911_v27, %v2915_v13  ;;  %v10852_v53 = vcombine.low %v2927_v8, %v2931_v0  ;;  %v2960_v8 = vld [vmem:[%s11838_s17 + $0x14c8] sm:$0xff] }
 0x2b1   : > { %v2964_v0 = vld [vmem:[%s11838_s17 + $0x14e8] sm:$0xff] }
 0x2b2   : > { %8662 = vmatpush1.bf16.msra.mxu0 %v10796_v48  ;;  %v2924_v48 = vld [vmem:[%s11838_s17 + $0x13a8] sm:$0xff] }
 0x2b3   : > { %8990 = vmatpush1.bf16.msra.mxu1 %v10798_v50  ;;  %8663 = vmatprep.subr.bf16.mxu0 %v10805_v52  ;;  %v10836_v50 = vcombine.low %v2911_v27, %v2915_v13  ;;  %v603_v52 = vrot.slane %v12233_v24, %v11949_v15  ;;  %v10847_v60 = vcombine.high %v2920_v12, %v2924_v48  ;;  %v2944_v27 = vld [vmem:[%s11838_s17 + $0x1448] sm:$0xff] }
 0x2b4   : > { %8991 = vmatprep.subr.bf16.mxu1 %v10807_v55  ;;  %v10838_v55 = vcombine.low %v2912_v29, %v2916_v30  ;;  %v10846_v6 = vcombine.low %v2920_v12, %v2924_v48  ;;  %v2948_v13 = vld [vmem:[%s11838_s17 + $0x1468] sm:$0xff] }
 0x2b5   : > { %v2134_v46 = vadd.f32 %v12096_v28, %v603_v52  ;;  %v2956_v12 = vld [vmem:[%s11838_s17 + $0x14a8] sm:$0xff] }
 0x2b6   : > { %8664 = vmatpush1.bf16.msra.mxu0 %v10804_v2  ;;  %v615_v2 = vrot.slane %v12233_v24, %v11954_v22 }
 0x2b7   : > { %8992 = vmatpush1.bf16.msra.mxu1 %v10806_v3  ;;  %8665 = vmatprep.subr.bf16.mxu0 %v10813_v4  ;;  %v2928_v3 = vld [vmem:[%s11838_s17 + $0x13c8] sm:$0xff]  ;;  %v2271_v23 = vmax.f32 %v2134_v46, 0.0  ;;  %v2967_v46 = vld [vmem:[%s11838_s17 + $0x1500] sm:$0xff] }
 0x2b8   : > { %8993 = vmatprep.subr.bf16.mxu1 %v10815_v5  ;;  %v2932_v4 = vld [vmem:[%s11838_s17 + $0x13e8] sm:$0xff]  ;;  %v10844_v5 = vcombine.low %v2919_v39, %v2923_v40  ;;  %v10871_v39 = vcombine.high %v2944_v27, %v2948_v13 }
 0x2b9   : > { %v10855_v10 = vcombine.high %v2928_v3, %v2932_v4  ;;  %v10854_v28 = vcombine.low %v2928_v3, %v2932_v4  ;;  %v12331_v29 = vpack.c.bf16 %v2271_v23, %v2271_v23  ;;  %v2952_v40 = vld [vmem:[%s11838_s17 + $0x1488] sm:$0xff] }
 0x2ba   : > { %8666 = vmatpush1.bf16.msra.mxu0 %v10812_v11  ;;  %v2935_v11 = vld [vmem:[%s11838_s17 + $0x1400] sm:$0xff]  ;;  %v10878_v3 = vcombine.low %v2952_v40, %v2956_v12  ;;  %v2976_v23 = vld [vmem:[%s11838_s17 + $0x1548] sm:$0xff] }
 0x2bb   : > { %8994 = vmatpush1.bf16.msra.mxu1 %v10814_v17  ;;  %8667 = vmatprep.subr.bf16.mxu0 %v10821_v18  ;;  %v2939_v17 = vld [vmem:[%s11838_s17 + $0x1420] sm:$0xff]  ;;  %v2177_v18 = vadd.f32 %v12106_v37, %v615_v2 }
 0x2bc   : > { %8995 = vmatprep.subr.bf16.mxu1 %v10823_v20  ;;  %v2936_v20 = vld [vmem:[%s11838_s17 + $0x1408] sm:$0xff]  ;;  %v10861_v61 = vcombine.high %v2935_v11, %v2939_v17  ;;  %v10860_v37 = vcombine.low %v2935_v11, %v2939_v17  ;;  %v10886_v17 = vcombine.low %v2960_v8, %v2964_v0 }
 0x2bd   : > { %v10862_v30 = vcombine.low %v2936_v20, %v2940_v21 }
 0x2be   : > { %8668 = vmatpush1.bf16.msra.mxu0 %v10820_v57  ;;  %v10863_v57 = vcombine.high %v2936_v20, %v2940_v21  ;;  %v2975_v21 = vld [vmem:[%s11838_s17 + $0x1540] sm:$0xff] }
 0x2bf   : > { %8996 = vmatpush1.bf16.msra.mxu1 %v10822_v25  ;;  %8669 = vmatprep.subr.bf16.mxu0 %v10829_v26  ;;  %v2274_v25 = vmax.f32 %v2177_v18, 0.0  ;;  %v2943_v26 = vld [vmem:[%s11838_s17 + $0x1440] sm:$0xff] }
 0x2c0   : > { %8997 = vmatprep.subr.bf16.mxu1 %v10831_v42  ;;  %v2947_v42 = vld [vmem:[%s11838_s17 + $0x1460] sm:$0xff] }
 0x2c1   : > { %v10868_v48 = vcombine.low %v2943_v26, %v2947_v42 }
 0x2c2   : > { %8670 = vmatpush1.bf16.msra.mxu0 %v10828_v32  ;;  %v10869_v32 = vcombine.high %v2943_v26, %v2947_v42  ;;  %v2983_v42 = vld [vmem:[%s11838_s17 + $0x1580] sm:$0xff] }
 0x2c3   : > { %8998 = vmatpush1.bf16.msra.mxu1 %v10830_v49  ;;  %8671 = vmatprep.subr.bf16.mxu0 %v10837_v1  ;;  %v2951_v49 = vld [vmem:[%s11838_s17 + $0x1480] sm:$0xff] }
 0x2c4   : > { %8999 = vmatprep.subr.bf16.mxu1 %v10839_v34  ;;  %v2955_v1 = vld [vmem:[%s11838_s17 + $0x14a0] sm:$0xff]  ;;  %v12335_v34 = vpack.c.bf16 %v2274_v25, %v2274_v25 }
 0x2c5   : > { %v10877_v52 = vcombine.high %v2951_v49, %v2955_v1  ;;  %v10876_v2 = vcombine.low %v2951_v49, %v2955_v1 }
 0x2c6   : > { %8672 = vmatpush1.bf16.msra.mxu0 %v10836_v50  ;;  %v10870_v50 = vcombine.low %v2944_v27, %v2948_v13  ;;  %v2984_v27 = vld [vmem:[%s11838_s17 + $0x1588] sm:$0xff] }
 0x2c7   : > { %9000 = vmatpush1.bf16.msra.mxu1 %v10838_v55  ;;  %8673 = vmatprep.subr.bf16.mxu0 %v10845_v58  ;;  %v10879_v55 = vcombine.high %v2952_v40, %v2956_v12  ;;  %v2959_v58 = vld [vmem:[%s11838_s17 + $0x14c0] sm:$0xff]  ;;  %v2988_v13 = vld [vmem:[%s11838_s17 + $0x15a8] sm:$0xff] }
 0x2c8   : > { %9001 = vmatprep.subr.bf16.mxu1 %v10847_v60  ;;  %v2963_v60 = vld [vmem:[%s11838_s17 + $0x14e0] sm:$0xff]  ;;  %v10911_v1 = vcombine.high %v2984_v27, %v2988_v13  ;;  %v2992_v12 = vld [vmem:[%s11838_s17 + $0x15c8] sm:$0xff] }
 0x2c9   : > { %v10885_v4 = vcombine.high %v2959_v58, %v2963_v60  ;;  %v10884_v11 = vcombine.low %v2959_v58, %v2963_v60  ;;  %v2995_v40 = vld [vmem:[%s11838_s17 + $0x15e0] sm:$0xff] }
 0x2ca   : > { %8674 = vmatpush1.bf16.msra.mxu0 %v10844_v5  ;;  %v10887_v5 = vcombine.high %v2960_v8, %v2964_v0  ;;  %v2999_v60 = vld [vmem:[%s11838_s17 + $0x1600] sm:$0xff]  ;;  %v3000_v0 = vld [vmem:[%s11838_s17 + $0x1608] sm:$0xff] }
 0x2cb   : > { %9002 = vmatpush1.bf16.msra.mxu1 %v10846_v6  ;;  %8675 = vmatprep.subr.bf16.mxu0 %v10853_v7  ;;  %v2971_v6 = vld [vmem:[%s11838_s17 + $0x1520] sm:$0xff]  ;;  %v2968_v7 = vld [vmem:[%s11838_s17 + $0x1508] sm:$0xff] }
 0x2cc   : > { %9003 = vmatprep.subr.bf16.mxu1 %v10855_v10  ;;  %v2972_v10 = vld [vmem:[%s11838_s17 + $0x1528] sm:$0xff]  ;;  %v10893_v18 = vcombine.high %v2967_v46, %v2971_v6  ;;  %v3003_v8 = vld [vmem:[%s11838_s17 + $0x1620] sm:$0xff] }
 0x2cd   : > { %v10895_v20 = vcombine.high %v2968_v7, %v2972_v10 }
 0x2ce   : > { %8676 = vmatpush1.bf16.msra.mxu0 %v10852_v53  ;;  %v2979_v53 = vld [vmem:[%s11838_s17 + $0x1560] sm:$0xff] }
 0x2cf   : > { %9004 = vmatpush1.bf16.msra.mxu1 %v10854_v28  ;;  %8686 = vmatprep.subr.bf16.mxu0 %v10861_v61  ;;  %v2980_v28 = vld [vmem:[%s11838_s17 + $0x1568] sm:$0xff]  ;;  %v10892_v61 = vcombine.low %v2967_v46, %v2971_v6  ;;  %v10901_v25 = vcombine.high %v2975_v21, %v2979_v53  ;;  %v3007_v6 = vld [vmem:[%s11838_s17 + $0x1640] sm:$0xff] }
 0x2d0   : > { %9014 = vmatprep.subr.bf16.mxu1 %v10863_v57  ;;  %v10894_v57 = vcombine.low %v2968_v7, %v2972_v10  ;;  %v10903_v26 = vcombine.high %v2976_v23, %v2980_v28  ;;  %v3011_v7 = vld [vmem:[%s11838_s17 + $0x1660] sm:$0xff]  ;;  %v3008_v10 = vld [vmem:[%s11838_s17 + $0x1648] sm:$0xff] }
 0x2d1   : > { %8678 = vmatmul.mubr.bf16.vlgmr.msra.gmra.mrb[16].mxu0 %v12331_v29 }
 0x2d2   : > { %9006 = vmatmul.mubr.bf16.vlgmr.msra.gmra.mrb[16].mxu1 %v12331_v29  ;;  %8687 = vmatpush1.bf16.msra.mxu0 %v10860_v37  ;;  %v2987_v37 = vld [vmem:[%s11838_s17 + $0x15a0] sm:$0xff] }
 0x2d3   : > { %8718 = vmatprep.mubr.bf16.mxu0 %v12335_v34  ;;  %9015 = vmatpush1.bf16.msra.mxu1 %v10862_v30  ;;  %v10900_v30 = vcombine.low %v2975_v21, %v2979_v53  ;;  %v10909_v49 = vcombine.high %v2983_v42, %v2987_v37  ;;  %v3015_v53 = vld [vmem:[%s11838_s17 + $0x1680] sm:$0xff] }
 0x2d4   : > { %9046 = vmatprep.mubr.bf16.mxu1 %v12335_v34  ;;  %8688 = vmatprep.subr.bf16.mxu0 %v10869_v32  ;;  %v10902_v32 = vcombine.low %v2976_v23, %v2980_v28  ;;  %v3019_v23 = vld [vmem:[%s11838_s17 + $0x16a0] sm:$0xff]  ;;  %v3016_v28 = vld [vmem:[%s11838_s17 + $0x1688] sm:$0xff] }
 0x2d5   : > { %9016 = vmatprep.subr.bf16.mxu1 %v10871_v39  ;;  %v2991_v39 = vld [vmem:[%s11838_s17 + $0x15c0] sm:$0xff] }
 0x2d6   : > { %8689 = vmatpush1.bf16.msra.mxu0 %v10868_v48  ;;  %v2996_v48 = vld [vmem:[%s11838_s17 + $0x15e8] sm:$0xff] }
 0x2d7   : > { %9017 = vmatpush1.bf16.msra.mxu1 %v10870_v50  ;;  %8690 = vmatprep.subr.bf16.mxu0 %v10877_v52  ;;  %v10908_v50 = vcombine.low %v2983_v42, %v2987_v37  ;;  %v10910_v52 = vcombine.low %v2984_v27, %v2988_v13  ;;  %v10919_v58 = vcombine.high %v2992_v12, %v2996_v48  ;;  %v3023_v37 = vld [vmem:[%s11838_s17 + $0x16c0] sm:$0xff]  ;;  %v3024_v13 = vld [vmem:[%s11838_s17 + $0x16c8] sm:$0xff] }
 0x2d8   : > { %9018 = vmatprep.subr.bf16.mxu1 %v10879_v55  ;;  %v10917_v55 = vcombine.high %v2991_v39, %v2995_v40  ;;  %v3027_v27 = vld [vmem:[%s11838_s17 + $0x16e0] sm:$0xff] }
 0x2da   : > { %8691 = vmatpush1.bf16.msra.mxu0 %v10876_v2  ;;  %v3004_v2 = vld [vmem:[%s11838_s17 + $0x1628] sm:$0xff] }
 0x2db   : > { %9019 = vmatpush1.bf16.msra.mxu1 %v10878_v3  ;;  %8692 = vmatprep.subr.bf16.mxu0 %v10885_v4  ;;  %v10916_v3 = vcombine.low %v2991_v39, %v2995_v40  ;;  %v10918_v4 = vcombine.low %v2992_v12, %v2996_v48  ;;  %v10927_v46 = vcombine.high %v3000_v0, %v3004_v2  ;;  %v3031_v40 = vld [vmem:[%s11838_s17 + $0x1700] sm:$0xff]  ;;  %v3032_v48 = vld [vmem:[%s11838_s17 + $0x1708] sm:$0xff] }
 0x2dc   : > { %9020 = vmatprep.subr.bf16.mxu1 %v10887_v5  ;;  %v10925_v5 = vcombine.high %v2999_v60, %v3003_v8  ;;  %v3035_v12 = vld [vmem:[%s11838_s17 + $0x1720] sm:$0xff] }
 0x2de   : > { %8693 = vmatpush1.bf16.msra.mxu0 %v10884_v11  ;;  %v3012_v11 = vld [vmem:[%s11838_s17 + $0x1668] sm:$0xff] }
 0x2df   : > { %9021 = vmatpush1.bf16.msra.mxu1 %v10886_v17  ;;  %8694 = vmatprep.subr.bf16.mxu0 %v10893_v18  ;;  %v10924_v17 = vcombine.low %v2999_v60, %v3003_v8  ;;  %v10926_v18 = vcombine.low %v3000_v0, %v3004_v2  ;;  %v10935_v21 = vcombine.high %v3008_v10, %v3012_v11  ;;  %v3039_v8 = vld [vmem:[%s11838_s17 + $0x1740] sm:$0xff]  ;;  %v3040_v2 = vld [vmem:[%s11838_s17 + $0x1748] sm:$0xff] }
 0x2e0   : > { %9022 = vmatprep.subr.bf16.mxu1 %v10895_v20  ;;  %v10933_v20 = vcombine.high %v3007_v6, %v3011_v7  ;;  %v3043_v0 = vld [vmem:[%s11838_s17 + $0x1760] sm:$0xff] }
 0x2e2   : > { %8695 = vmatpush1.bf16.msra.mxu0 %v10892_v61  ;;  %v3020_v61 = vld [vmem:[%s11838_s17 + $0x16a8] sm:$0xff] }
 0x2e3   : > { %9023 = vmatpush1.bf16.msra.mxu1 %v10894_v57  ;;  %8696 = vmatprep.subr.bf16.mxu0 %v10901_v25  ;;  %v10932_v57 = vcombine.low %v3007_v6, %v3011_v7  ;;  %v10934_v25 = vcombine.low %v3008_v10, %v3012_v11  ;;  %v10943_v42 = vcombine.high %v3016_v28, %v3020_v61  ;;  %v3047_v7 = vld [vmem:[%s11838_s17 + $0x1780] sm:$0xff]  ;;  %v3048_v11 = vld [vmem:[%s11838_s17 + $0x1788] sm:$0xff] }
 0x2e4   : > { %9024 = vmatprep.subr.bf16.mxu1 %v10903_v26  ;;  %v10941_v26 = vcombine.high %v3015_v53, %v3019_v23  ;;  %v3051_v10 = vld [vmem:[%s11838_s17 + $0x17a0] sm:$0xff] }
 0x2e6   : > { %8697 = vmatpush1.bf16.msra.mxu0 %v10900_v30  ;;  %v3028_v30 = vld [vmem:[%s11838_s17 + $0x16e8] sm:$0xff] }
 0x2e7   : > { %9025 = vmatpush1.bf16.msra.mxu1 %v10902_v32  ;;  %8698 = vmatprep.subr.bf16.mxu0 %v10909_v49  ;;  %v10940_v32 = vcombine.low %v3015_v53, %v3019_v23  ;;  %v10942_v49 = vcombine.low %v3016_v28, %v3020_v61  ;;  %v10951_v39 = vcombine.high %v3024_v13, %v3028_v30  ;;  %v3055_v28 = vld [vmem:[%s11838_s17 + $0x17c0] sm:$0xff] }
 0x2e8   : > { %9026 = vmatprep.subr.bf16.mxu1 %v10911_v1  ;;  %v10949_v1 = vcombine.high %v3023_v37, %v3027_v27  ;;  %v10973_v53 = vcombine.high %v3047_v7, %v3051_v10  ;;  %v3059_v61 = vld [vmem:[%s11838_s17 + $0x17e0] sm:$0xff] }
 0x2ea   : > { %8699 = vmatpush1.bf16.msra.mxu0 %v10908_v50  ;;  %v3036_v50 = vld [vmem:[%s11838_s17 + $0x1728] sm:$0xff] }
 0x2eb   : > { %9027 = vmatpush1.bf16.msra.mxu1 %v10910_v52  ;;  %8700 = vmatprep.subr.bf16.mxu0 %v10917_v55  ;;  %v10948_v52 = vcombine.low %v3023_v37, %v3027_v27  ;;  %v10950_v55 = vcombine.low %v3024_v13, %v3028_v30  ;;  %v10959_v60 = vcombine.high %v3032_v48, %v3036_v50 }
 0x2ec   : > { %9028 = vmatprep.subr.bf16.mxu1 %v10919_v58  ;;  %v10957_v58 = vcombine.high %v3031_v40, %v3035_v12  ;;  %v10981_v13 = vcombine.high %v3055_v28, %v3059_v61 }
 0x2ee   : > { %8701 = vmatpush1.bf16.msra.mxu0 %v10916_v3  ;;  %v3044_v3 = vld [vmem:[%s11838_s17 + $0x1768] sm:$0xff] }
 0x2ef   : > { %9029 = vmatpush1.bf16.msra.mxu1 %v10918_v4  ;;  %8702 = vmatprep.subr.bf16.mxu0 %v10925_v5  ;;  %v10956_v4 = vcombine.low %v3031_v40, %v3035_v12  ;;  %v10958_v5 = vcombine.low %v3032_v48, %v3036_v50  ;;  %v10967_v6 = vcombine.high %v3040_v2, %v3044_v3 }
 0x2f0   : > { %9030 = vmatprep.subr.bf16.mxu1 %v10927_v46  ;;  %v10965_v46 = vcombine.high %v3039_v8, %v3043_v0  ;;  %v10980_v40 = vcombine.low %v3055_v28, %v3059_v61  ;;  %v3092_v28 = vld [vmem:[%s11838_s17 + $0x18e8] sm:$0xff] }
 0x2f2   : > { %8703 = vmatpush1.bf16.msra.mxu0 %v10924_v17  ;;  %v3052_v17 = vld [vmem:[%s11838_s17 + $0x17a8] sm:$0xff] }
 0x2f3   : > { %9031 = vmatpush1.bf16.msra.mxu1 %v10926_v18  ;;  %8704 = vmatprep.subr.bf16.mxu0 %v10933_v20  ;;  %v10964_v18 = vcombine.low %v3039_v8, %v3043_v0  ;;  %v611_v20 = vrot.slane %v12233_v24, %v12041_v51  ;;  %v10975_v23 = vcombine.high %v3048_v11, %v3052_v17  ;;  %v3076_v8 = vld [vmem:[%s11838_s17 + $0x1868] sm:$0xff] }
 0x2f4   : > { %9032 = vmatprep.subr.bf16.mxu1 %v10935_v21  ;;  %v10966_v21 = vcombine.low %v3040_v2, %v3044_v3  ;;  %v10974_v27 = vcombine.low %v3048_v11, %v3052_v17 }
 0x2f5   : > { %v2175_v37 = vadd.f32 %v12100_v33, %v611_v20 }
 0x2f6   : > { %8705 = vmatpush1.bf16.msra.mxu0 %v10932_v57  ;;  %v623_v57 = vrot.slane %v12233_v24, %v12046_v63  ;;  %v3064_v24 = vld [vmem:[%s11838_s17 + $0x1808] sm:$0xff] }
 0x2f7   : > { %9033 = vmatpush1.bf16.msra.mxu1 %v10934_v25  ;;  %8706 = vmatprep.subr.bf16.mxu0 %v10941_v26  ;;  %v3056_v25 = vld [vmem:[%s11838_s17 + $0x17c8] sm:$0xff]  ;;  %v2273_v12 = vmax.f32 %v2175_v37, 0.0  ;;  %v3099_v37 = vld [vmem:[%s11838_s17 + $0x1920] sm:$0xff] }
 0x2f8   : > { %9034 = vmatprep.subr.bf16.mxu1 %v10943_v42  ;;  %v3060_v26 = vld [vmem:[%s11838_s17 + $0x17e8] sm:$0xff]  ;;  %v10972_v42 = vcombine.low %v3047_v7, %v3051_v10 }
 0x2f9   : > { %v10983_v30 = vcombine.high %v3056_v25, %v3060_v26  ;;  %v10982_v33 = vcombine.low %v3056_v25, %v3060_v26  ;;  %v12409_v0 = vpack.c.bf16 %v2273_v12, %v2273_v12  ;;  %v3080_v7 = vld [vmem:[%s11838_s17 + $0x1888] sm:$0xff] }
 0x2fa   : > { %8707 = vmatpush1.bf16.msra.mxu0 %v10940_v32  ;;  %v3063_v32 = vld [vmem:[%s11838_s17 + $0x1800] sm:$0xff]  ;;  %v3084_v10 = vld [vmem:[%s11838_s17 + $0x18a8] sm:$0xff] }
 0x2fb   : > { %9035 = vmatpush1.bf16.msra.mxu1 %v10942_v49  ;;  %8708 = vmatprep.subr.bf16.mxu0 %v10949_v1  ;;  %v3067_v49 = vld [vmem:[%s11838_s17 + $0x1820] sm:$0xff]  ;;  %v2218_v1 = vadd.f32 %v12196_v45, %v623_v57  ;;  %v11007_v20 = vcombine.high %v3080_v7, %v3084_v10  ;;  %v11006_v57 = vcombine.low %v3080_v7, %v3084_v10  ;;  %v3108_v12 = vld [vmem:[%s11838_s17 + $0x1968] sm:$0xff] }
 0x2fc   : > { %9036 = vmatprep.subr.bf16.mxu1 %v10951_v39  ;;  %v3068_v39 = vld [vmem:[%s11838_s17 + $0x1828] sm:$0xff]  ;;  %v10989_v48 = vcombine.high %v3063_v32, %v3067_v49  ;;  %v10988_v45 = vcombine.low %v3063_v32, %v3067_v49 }
 0x2fd   : > { %v10991_v50 = vcombine.high %v3064_v24, %v3068_v39  ;;  %v10990_v2 = vcombine.low %v3064_v24, %v3068_v39  ;;  %v3103_v24 = vld [vmem:[%s11838_s17 + $0x1940] sm:$0xff]  ;;  %v3120_v7 = vld [vmem:[%s11838_s17 + $0x19c8] sm:$0xff] }
 0x2fe   : > { %8709 = vmatpush1.bf16.msra.mxu0 %v10948_v52  ;;  %v2276_v52 = vmax.f32 %v2218_v1, 0.0  ;;  %v3107_v39 = vld [vmem:[%s11838_s17 + $0x1960] sm:$0xff]  ;;  %v3124_v10 = vld [vmem:[%s11838_s17 + $0x19e8] sm:$0xff] }
 0x2ff   : > { %9037 = vmatpush1.bf16.msra.mxu1 %v10950_v55  ;;  %8710 = vmatprep.subr.bf16.mxu0 %v10957_v58  ;;  %v3071_v55 = vld [vmem:[%s11838_s17 + $0x1840] sm:$0xff] }
 0x300   : > { %9038 = vmatprep.subr.bf16.mxu1 %v10959_v60  ;;  %v3075_v58 = vld [vmem:[%s11838_s17 + $0x1860] sm:$0xff]  ;;  %v3072_v60 = vld [vmem:[%s11838_s17 + $0x1848] sm:$0xff] }
 0x301   : > { %v10997_v3 = vcombine.high %v3071_v55, %v3075_v58  ;;  %v10996_v11 = vcombine.low %v3071_v55, %v3075_v58  ;;  %v10998_v17 = vcombine.low %v3072_v60, %v3076_v8  ;;  %v3111_v55 = vld [vmem:[%s11838_s17 + $0x1980] sm:$0xff] }
 0x302   : > { %8711 = vmatpush1.bf16.msra.mxu0 %v10956_v4  ;;  %v3079_v4 = vld [vmem:[%s11838_s17 + $0x1880] sm:$0xff] }
 0x303   : > { %9039 = vmatpush1.bf16.msra.mxu1 %v10958_v5  ;;  %8712 = vmatprep.subr.bf16.mxu0 %v10965_v46  ;;  %v3083_v5 = vld [vmem:[%s11838_s17 + $0x18a0] sm:$0xff]  ;;  %v12413_v46 = vpack.c.bf16 %v2276_v52, %v2276_v52 }
 0x304   : > { %9040 = vmatprep.subr.bf16.mxu1 %v10967_v6  ;;  %v10999_v6 = vcombine.high %v3072_v60, %v3076_v8  ;;  %v11004_v61 = vcombine.low %v3079_v4, %v3083_v5  ;;  %v3115_v58 = vld [vmem:[%s11838_s17 + $0x19a0] sm:$0xff]  ;;  %v3116_v60 = vld [vmem:[%s11838_s17 + $0x19a8] sm:$0xff]  ;;  %v11028_v8 = vcombine.low %v3103_v24, %v3107_v39 }
 0x306   : > { %8713 = vmatpush1.bf16.msra.mxu0 %v10964_v18  ;;  %v11005_v18 = vcombine.high %v3079_v4, %v3083_v5  ;;  %v3119_v5 = vld [vmem:[%s11838_s17 + $0x19c0] sm:$0xff] }
 0x307   : > { %9041 = vmatpush1.bf16.msra.mxu1 %v10966_v21  ;;  %8714 = vmatprep.subr.bf16.mxu0 %v10973_v53  ;;  %v3087_v21 = vld [vmem:[%s11838_s17 + $0x18c0] sm:$0xff] }
 0x308   : > { %9042 = vmatprep.subr.bf16.mxu1 %v10975_v23  ;;  %v3091_v53 = vld [vmem:[%s11838_s17 + $0x18e0] sm:$0xff]  ;;  %v3088_v23 = vld [vmem:[%s11838_s17 + $0x18c8] sm:$0xff] }
 0x309   : > { %v11013_v25 = vcombine.high %v3087_v21, %v3091_v53  ;;  %v11015_v26 = vcombine.high %v3088_v23, %v3092_v28  ;;  %v11014_v32 = vcombine.low %v3088_v23, %v3092_v28  ;;  %v3128_v23 = vld [vmem:[%s11838_s17 + $0x1a08] sm:$0xff] }
 0x30a   : > { %8715 = vmatpush1.bf16.msra.mxu0 %v10972_v42  ;;  %v3095_v42 = vld [vmem:[%s11838_s17 + $0x1900] sm:$0xff]  ;;  %v3132_v28 = vld [vmem:[%s11838_s17 + $0x1a28] sm:$0xff] }
 0x30b   : > { %9043 = vmatpush1.bf16.msra.mxu1 %v10974_v27  ;;  %8716 = vmatprep.subr.bf16.mxu0 %v10981_v13  ;;  %v3096_v27 = vld [vmem:[%s11838_s17 + $0x1908] sm:$0xff]  ;;  %v11021_v49 = vcombine.high %v3095_v42, %v3099_v37 }
 0x30c   : > { %9044 = vmatprep.subr.bf16.mxu1 %v10983_v30  ;;  %v3100_v13 = vld [vmem:[%s11838_s17 + $0x1928] sm:$0xff]  ;;  %v11012_v30 = vcombine.low %v3087_v21, %v3091_v53  ;;  %v3127_v21 = vld [vmem:[%s11838_s17 + $0x1a00] sm:$0xff] }
 0x30d   : > { %v11023_v1 = vcombine.high %v3096_v27, %v3100_v13  ;;  %v3131_v53 = vld [vmem:[%s11838_s17 + $0x1a20] sm:$0xff] }
 0x30e   : > { %8717 = vmatpush1.bf16.msra.mxu0 %v10980_v40  ;;  %v3104_v40 = vld [vmem:[%s11838_s17 + $0x1948] sm:$0xff] }
 0x30f   : > { %9045 = vmatpush1.bf16.msra.mxu1 %v10982_v33  ;;  %8727 = vmatprep.subr.bf16.mxu0 %v10989_v48  ;;  %v11020_v33 = vcombine.low %v3095_v42, %v3099_v37  ;;  %v11022_v48 = vcombine.low %v3096_v27, %v3100_v13  ;;  %v11031_v52 = vcombine.high %v3104_v40, %v3108_v12  ;;  %v3135_v42 = vld [vmem:[%s11838_s17 + $0x1a40] sm:$0xff]  ;;  %v3136_v27 = vld [vmem:[%s11838_s17 + $0x1a48] sm:$0xff] }
 0x310   : > { %9055 = vmatprep.subr.bf16.mxu1 %v10991_v50  ;;  %v11029_v50 = vcombine.high %v3103_v24, %v3107_v39  ;;  %v3139_v37 = vld [vmem:[%s11838_s17 + $0x1a60] sm:$0xff]  ;;  %v3140_v13 = vld [vmem:[%s11838_s17 + $0x1a68] sm:$0xff] }
 0x311   : > { %8719 = vmatmul.mubr.bf16.vlgmr.msra.gmra.mrb[16].mxu0 %v12409_v0  ;;  %v3143_v24 = vld [vmem:[%s11838_s17 + $0x1a80] sm:$0xff] }
 0x312   : > { %9047 = vmatmul.mubr.bf16.vlgmr.msra.gmra.mrb[16].mxu1 %v12409_v0  ;;  %8728 = vmatpush1.bf16.msra.mxu0 %v10988_v45  ;;  %v3112_v45 = vld [vmem:[%s11838_s17 + $0x1988] sm:$0xff]  ;;  %v3147_v39 = vld [vmem:[%s11838_s17 + $0x1aa0] sm:$0xff] }
 0x313   : > { %8759 = vmatprep.mubr.bf16.mxu0 %v12413_v46  ;;  %9056 = vmatpush1.bf16.msra.mxu1 %v10990_v2  ;;  %v11030_v2 = vcombine.low %v3104_v40, %v3108_v12  ;;  %v11039_v4 = vcombine.high %v3112_v45, %v3116_v60  ;;  %v3144_v40 = vld [vmem:[%s11838_s17 + $0x1a88] sm:$0xff] }
 0x314   : > { %9087 = vmatprep.mubr.bf16.mxu1 %v12413_v46  ;;  %8729 = vmatprep.subr.bf16.mxu0 %v10997_v3  ;;  %v11037_v3 = vcombine.high %v3111_v55, %v3115_v58  ;;  %v3148_v12 = vld [vmem:[%s11838_s17 + $0x1aa8] sm:$0xff] }
 0x315   : > { %9057 = vmatprep.subr.bf16.mxu1 %v10999_v6  ;;  %v3123_v6 = vld [vmem:[%s11838_s17 + $0x19e0] sm:$0xff] }
 0x316   : > { %8730 = vmatpush1.bf16.msra.mxu0 %v10996_v11  ;;  %v11036_v11 = vcombine.low %v3111_v55, %v3115_v58  ;;  %v3151_v55 = vld [vmem:[%s11838_s17 + $0x1ac0] sm:$0xff] }
 0x317   : > { %9058 = vmatpush1.bf16.msra.mxu1 %v10998_v17  ;;  %8731 = vmatprep.subr.bf16.mxu0 %v11005_v18  ;;  %v11038_v17 = vcombine.low %v3112_v45, %v3116_v60  ;;  %v11045_v18 = vcombine.high %v3119_v5, %v3123_v6  ;;  %v3155_v58 = vld [vmem:[%s11838_s17 + $0x1ae0] sm:$0xff]  ;;  %v3152_v45 = vld [vmem:[%s11838_s17 + $0x1ac8] sm:$0xff] }
 0x318   : > { %9059 = vmatprep.subr.bf16.mxu1 %v11007_v20  ;;  %v11047_v20 = vcombine.high %v3120_v7, %v3124_v10  ;;  %v3156_v60 = vld [vmem:[%s11838_s17 + $0x1ae8] sm:$0xff] }
 0x31a   : > { %8732 = vmatpush1.bf16.msra.mxu0 %v11004_v61  ;;  %v11044_v61 = vcombine.low %v3119_v5, %v3123_v6  ;;  %v3159_v5 = vld [vmem:[%s11838_s17 + $0x1b00] sm:$0xff] }
 0x31b   : > { %9060 = vmatpush1.bf16.msra.mxu1 %v11006_v57  ;;  %8733 = vmatprep.subr.bf16.mxu0 %v11013_v25  ;;  %v11046_v57 = vcombine.low %v3120_v7, %v3124_v10  ;;  %v11053_v25 = vcombine.high %v3127_v21, %v3131_v53  ;;  %v3163_v6 = vld [vmem:[%s11838_s17 + $0x1b20] sm:$0xff]  ;;  %v3160_v7 = vld [vmem:[%s11838_s17 + $0x1b08] sm:$0xff] }
 0x31c   : > { %9061 = vmatprep.subr.bf16.mxu1 %v11015_v26  ;;  %v11055_v26 = vcombine.high %v3128_v23, %v3132_v28  ;;  %v3164_v10 = vld [vmem:[%s11838_s17 + $0x1b28] sm:$0xff] }
 0x31e   : > { %8734 = vmatpush1.bf16.msra.mxu0 %v11012_v30  ;;  %v11052_v30 = vcombine.low %v3127_v21, %v3131_v53  ;;  %v3167_v21 = vld [vmem:[%s11838_s17 + $0x1b40] sm:$0xff] }
 0x31f   : > { %9062 = vmatpush1.bf16.msra.mxu1 %v11014_v32  ;;  %8735 = vmatprep.subr.bf16.mxu0 %v11021_v49  ;;  %v11054_v32 = vcombine.low %v3128_v23, %v3132_v28  ;;  %v11061_v49 = vcombine.high %v3135_v42, %v3139_v37  ;;  %v3171_v53 = vld [vmem:[%s11838_s17 + $0x1b60] sm:$0xff]  ;;  %v3168_v23 = vld [vmem:[%s11838_s17 + $0x1b48] sm:$0xff] }
 0x320   : > { %9063 = vmatprep.subr.bf16.mxu1 %v11023_v1  ;;  %v11063_v1 = vcombine.high %v3136_v27, %v3140_v13  ;;  %v3172_v28 = vld [vmem:[%s11838_s17 + $0x1b68] sm:$0xff] }
 0x322   : > { %8736 = vmatpush1.bf16.msra.mxu0 %v11020_v33  ;;  %v11060_v33 = vcombine.low %v3135_v42, %v3139_v37  ;;  %v3175_v42 = vld [vmem:[%s11838_s17 + $0x1b80] sm:$0xff] }
 0x323   : > { %9064 = vmatpush1.bf16.msra.mxu1 %v11022_v48  ;;  %8737 = vmatprep.subr.bf16.mxu0 %v11029_v50  ;;  %v11062_v48 = vcombine.low %v3136_v27, %v3140_v13  ;;  %v11069_v50 = vcombine.high %v3143_v24, %v3147_v39  ;;  %v3179_v37 = vld [vmem:[%s11838_s17 + $0x1ba0] sm:$0xff]  ;;  %v3176_v27 = vld [vmem:[%s11838_s17 + $0x1b88] sm:$0xff] }
 0x324   : > { %9065 = vmatprep.subr.bf16.mxu1 %v11031_v52  ;;  %v11071_v52 = vcombine.high %v3144_v40, %v3148_v12  ;;  %v3180_v13 = vld [vmem:[%s11838_s17 + $0x1ba8] sm:$0xff] }
 0x326   : > { %8738 = vmatpush1.bf16.msra.mxu0 %v11028_v8  ;;  %v11068_v8 = vcombine.low %v3143_v24, %v3147_v39  ;;  %v11101_v24 = vcombine.high %v3175_v42, %v3179_v37  ;;  %v11103_v39 = vcombine.high %v3176_v27, %v3180_v13 }
 0x327   : > { %9066 = vmatpush1.bf16.msra.mxu1 %v11030_v2  ;;  %8739 = vmatprep.subr.bf16.mxu0 %v11037_v3  ;;  %v11070_v2 = vcombine.low %v3144_v40, %v3148_v12  ;;  %v11077_v3 = vcombine.high %v3151_v55, %v3155_v58  ;;  %v3183_v40 = vld [vmem:[%s11838_s17 + $0x1bc0] sm:$0xff] }
 0x328   : > { %9067 = vmatprep.subr.bf16.mxu1 %v11039_v4  ;;  %v11079_v4 = vcombine.high %v3152_v45, %v3156_v60  ;;  %v3187_v12 = vld [vmem:[%s11838_s17 + $0x1be0] sm:$0xff] }
 0x32a   : > { %8740 = vmatpush1.bf16.msra.mxu0 %v11036_v11  ;;  %v11076_v11 = vcombine.low %v3151_v55, %v3155_v58  ;;  %v11102_v58 = vcombine.low %v3176_v27, %v3180_v13  ;;  %v3212_v27 = vld [vmem:[%s11838_s17 + $0x1ca8] sm:$0xff] }
 0x32b   : > { %9068 = vmatpush1.bf16.msra.mxu1 %v11038_v17  ;;  %8741 = vmatprep.subr.bf16.mxu0 %v11045_v18  ;;  %v11078_v17 = vcombine.low %v3152_v45, %v3156_v60  ;;  %v11085_v18 = vcombine.high %v3159_v5, %v3163_v6  ;;  %v11109_v45 = vcombine.high %v3183_v40, %v3187_v12 }
 0x32c   : > { %9069 = vmatprep.subr.bf16.mxu1 %v11047_v20  ;;  %v11087_v20 = vcombine.high %v3160_v7, %v3164_v10 }
 0x32e   : > { %8742 = vmatpush1.bf16.msra.mxu0 %v11044_v61  ;;  %v11084_v61 = vcombine.low %v3159_v5, %v3163_v6  ;;  %v3196_v5 = vld [vmem:[%s11838_s17 + $0x1c28] sm:$0xff]  ;;  %v11108_v6 = vcombine.low %v3183_v40, %v3187_v12 }
 0x32f   : > { %9070 = vmatpush1.bf16.msra.mxu1 %v11046_v57  ;;  %8743 = vmatprep.subr.bf16.mxu0 %v11053_v25  ;;  %v11086_v57 = vcombine.low %v3160_v7, %v3164_v10  ;;  %v11093_v25 = vcombine.high %v3167_v21, %v3171_v53  ;;  %v3216_v40 = vld [vmem:[%s11838_s17 + $0x1cc8] sm:$0xff] }
 0x330   : > { %9071 = vmatprep.subr.bf16.mxu1 %v11055_v26  ;;  %v11095_v26 = vcombine.high %v3168_v23, %v3172_v28  ;;  %v3220_v12 = vld [vmem:[%s11838_s17 + $0x1ce8] sm:$0xff] }
 0x332   : > { %8744 = vmatpush1.bf16.msra.mxu0 %v11052_v30  ;;  %v11092_v30 = vcombine.low %v3167_v21, %v3171_v53  ;;  %v3200_v21 = vld [vmem:[%s11838_s17 + $0x1c48] sm:$0xff] }
 0x333   : > { %9072 = vmatpush1.bf16.msra.mxu1 %v11054_v32  ;;  %8745 = vmatprep.subr.bf16.mxu0 %v11061_v49  ;;  %v12469_v32 = vld [vmem:[#allocation4 + $0x8] sm:$0xff]  ;;  %v3204_v53 = vld [vmem:[%s11838_s17 + $0x1c68] sm:$0xff] }
 0x334   : > { %9073 = vmatprep.subr.bf16.mxu1 %v11063_v1  ;;  %v619_v49 = vrot.slane %v12469_v32, %v12133_v47  ;;  %v11094_v1 = vcombine.low %v3168_v23, %v3172_v28 }
 0x336   : > { %8746 = vmatpush1.bf16.msra.mxu0 %v11060_v33  ;;  %v631_v33 = vrot.slane %v12469_v32, %v12138_v56  ;;  %v2216_v55 = vadd.f32 %v12190_v35, %v619_v49 }
 0x337   : > { %9074 = vmatpush1.bf16.msra.mxu1 %v11062_v48  ;;  %8747 = vmatprep.subr.bf16.mxu0 %v11069_v50  ;;  %v3184_v48 = vld [vmem:[%s11838_s17 + $0x1bc8] sm:$0xff] }
 0x338   : > { %9075 = vmatprep.subr.bf16.mxu1 %v11071_v52  ;;  %v3188_v50 = vld [vmem:[%s11838_s17 + $0x1be8] sm:$0xff]  ;;  %v11100_v52 = vcombine.low %v3175_v42, %v3179_v37  ;;  %v2275_v7 = vmax.f32 %v2216_v55, 0.0  ;;  %v11127_v42 = vcombine.high %v3200_v21, %v3204_v53  ;;  %v3223_v55 = vld [vmem:[%s11838_s17 + $0x1d00] sm:$0xff] }
 0x339   : > { %v11111_v60 = vcombine.high %v3184_v48, %v3188_v50  ;;  %v11110_v35 = vcombine.low %v3184_v48, %v3188_v50  ;;  %v3208_v37 = vld [vmem:[%s11838_s17 + $0x1c88] sm:$0xff] }
 0x33a   : > { %8748 = vmatpush1.bf16.msra.mxu0 %v11068_v8  ;;  %v3191_v8 = vld [vmem:[%s11838_s17 + $0x1c00] sm:$0xff]  ;;  %v12489_v23 = vpack.c.bf16 %v2275_v7, %v2275_v7  ;;  %v11134_v48 = vcombine.low %v3208_v37, %v3212_v27  ;;  %v3232_v7 = vld [vmem:[%s11838_s17 + $0x1d48] sm:$0xff] }
 0x33b   : > { %9076 = vmatpush1.bf16.msra.mxu1 %v11070_v2  ;;  %8749 = vmatprep.subr.bf16.mxu0 %v11077_v3  ;;  %v3195_v2 = vld [vmem:[%s11838_s17 + $0x1c20] sm:$0xff]  ;;  %v2259_v3 = vadd.f32 %v12200_v16, %v631_v33 }
 0x33c   : > { %9077 = vmatprep.subr.bf16.mxu1 %v11079_v4  ;;  %v3192_v4 = vld [vmem:[%s11838_s17 + $0x1c08] sm:$0xff]  ;;  %v11117_v10 = vcombine.high %v3191_v8, %v3195_v2  ;;  %v11116_v16 = vcombine.low %v3191_v8, %v3195_v2  ;;  %v11142_v2 = vcombine.low %v3216_v40, %v3220_v12 }
 0x33d   : > { %v11118_v28 = vcombine.low %v3192_v4, %v3196_v5 }
 0x33e   : > { %8750 = vmatpush1.bf16.msra.mxu0 %v11076_v11  ;;  %v11119_v11 = vcombine.high %v3192_v4, %v3196_v5  ;;  %v3231_v5 = vld [vmem:[%s11838_s17 + $0x1d40] sm:$0xff] }
 0x33f   : > { %9078 = vmatpush1.bf16.msra.mxu1 %v11078_v17  ;;  %8751 = vmatprep.subr.bf16.mxu0 %v11085_v18  ;;  %v2278_v17 = vmax.f32 %v2259_v3, 0.0  ;;  %v3199_v18 = vld [vmem:[%s11838_s17 + $0x1c40] sm:$0xff] }
 0x340   : > { %9079 = vmatprep.subr.bf16.mxu1 %v11087_v20  ;;  %v3203_v20 = vld [vmem:[%s11838_s17 + $0x1c60] sm:$0xff] }
 0x341   : > { %v11124_v13 = vcombine.low %v3199_v18, %v3203_v20 }
 0x342   : > { %8752 = vmatpush1.bf16.msra.mxu0 %v11084_v61  ;;  %v11125_v61 = vcombine.high %v3199_v18, %v3203_v20  ;;  %v3239_v20 = vld [vmem:[%s11838_s17 + $0x1d80] sm:$0xff] }
 0x343   : > { %9080 = vmatpush1.bf16.msra.mxu1 %v11086_v57  ;;  %8753 = vmatprep.subr.bf16.mxu0 %v11093_v25  ;;  %v3207_v57 = vld [vmem:[%s11838_s17 + $0x1c80] sm:$0xff] }
 0x344   : > { %9081 = vmatprep.subr.bf16.mxu1 %v11095_v26  ;;  %v3211_v25 = vld [vmem:[%s11838_s17 + $0x1ca0] sm:$0xff]  ;;  %v12493_v26 = vpack.c.bf16 %v2278_v17, %v2278_v17 }
 0x345   : > { %v11133_v49 = vcombine.high %v3207_v57, %v3211_v25  ;;  %v11132_v33 = vcombine.low %v3207_v57, %v3211_v25 }
 0x346   : > { %8754 = vmatpush1.bf16.msra.mxu0 %v11092_v30  ;;  %v11126_v30 = vcombine.low %v3200_v21, %v3204_v53  ;;  %v3240_v21 = vld [vmem:[%s11838_s17 + $0x1d88] sm:$0xff] }
 0x347   : > { %9082 = vmatpush1.bf16.msra.mxu1 %v11094_v1  ;;  %8755 = vmatprep.subr.bf16.mxu0 %v11101_v24  ;;  %v11135_v1 = vcombine.high %v3208_v37, %v3212_v27  ;;  %v3215_v24 = vld [vmem:[%s11838_s17 + $0x1cc0] sm:$0xff]  ;;  %v3244_v53 = vld [vmem:[%s11838_s17 + $0x1da8] sm:$0xff] }
 0x348   : > { %9083 = vmatprep.subr.bf16.mxu1 %v11103_v39  ;;  %v3219_v39 = vld [vmem:[%s11838_s17 + $0x1ce0] sm:$0xff]  ;;  %v11167_v25 = vcombine.high %v3240_v21, %v3244_v53  ;;  %v3248_v27 = vld [vmem:[%s11838_s17 + $0x1dc8] sm:$0xff] }
 0x349   : > { %v11141_v50 = vcombine.high %v3215_v24, %v3219_v39  ;;  %v11140_v8 = vcombine.low %v3215_v24, %v3219_v39  ;;  %v3251_v37 = vld [vmem:[%s11838_s17 + $0x1de0] sm:$0xff] }
 0x34a   : > { %8756 = vmatpush1.bf16.msra.mxu0 %v11100_v52  ;;  %v11143_v52 = vcombine.high %v3216_v40, %v3220_v12  ;;  %v3255_v39 = vld [vmem:[%s11838_s17 + $0x1e00] sm:$0xff]  ;;  %v3256_v12 = vld [vmem:[%s11838_s17 + $0x1e08] sm:$0xff] }
 0x34b   : > { %9084 = vmatpush1.bf16.msra.mxu1 %v11102_v58  ;;  %8757 = vmatprep.subr.bf16.mxu0 %v11109_v45  ;;  %v3227_v58 = vld [vmem:[%s11838_s17 + $0x1d20] sm:$0xff]  ;;  %v3224_v45 = vld [vmem:[%s11838_s17 + $0x1d08] sm:$0xff] }
 0x34c   : > { %9085 = vmatprep.subr.bf16.mxu1 %v11111_v60  ;;  %v3228_v60 = vld [vmem:[%s11838_s17 + $0x1d28] sm:$0xff]  ;;  %v11149_v3 = vcombine.high %v3223_v55, %v3227_v58  ;;  %v3259_v40 = vld [vmem:[%s11838_s17 + $0x1e20] sm:$0xff] }
 0x34d   : > { %v11151_v4 = vcombine.high %v3224_v45, %v3228_v60 }
 0x34e   : > { %8758 = vmatpush1.bf16.msra.mxu0 %v11108_v6  ;;  %v3235_v6 = vld [vmem:[%s11838_s17 + $0x1d60] sm:$0xff] }
 0x34f   : > { %9086 = vmatpush1.bf16.msra.mxu1 %v11110_v35  ;;  %8768 = vmatprep.subr.bf16.mxu0 %v11117_v10  ;;  %v3236_v35 = vld [vmem:[%s11838_s17 + $0x1d68] sm:$0xff]  ;;  %v11148_v10 = vcombine.low %v3223_v55, %v3227_v58  ;;  %v11157_v17 = vcombine.high %v3231_v5, %v3235_v6  ;;  %v3263_v58 = vld [vmem:[%s11838_s17 + $0x1e40] sm:$0xff] }
 0x350   : > { %9096 = vmatprep.subr.bf16.mxu1 %v11119_v11  ;;  %v11150_v11 = vcombine.low %v3224_v45, %v3228_v60  ;;  %v11159_v18 = vcombine.high %v3232_v7, %v3236_v35  ;;  %v3267_v45 = vld [vmem:[%s11838_s17 + $0x1e60] sm:$0xff]  ;;  %v3264_v60 = vld [vmem:[%s11838_s17 + $0x1e48] sm:$0xff] }
 0x351   : > { %8760 = vmatmul.mubr.bf16.vlgmr.msra.gmra.mrb[16].mxu0 %v12489_v23 }
 0x352   : > { %9088 = vmatmul.mubr.bf16.vlgmr.msra.gmra.mrb[16].mxu1 %v12489_v23  ;;  %8769 = vmatpush1.bf16.msra.mxu0 %v11116_v16  ;;  %v3243_v16 = vld [vmem:[%s11838_s17 + $0x1da0] sm:$0xff] }
 0x353   : > { %8800 = vmatprep.mubr.bf16.mxu0 %v12493_v26  ;;  %9097 = vmatpush1.bf16.msra.mxu1 %v11118_v28  ;;  %v11156_v28 = vcombine.low %v3231_v5, %v3235_v6  ;;  %v11165_v57 = vcombine.high %v3239_v20, %v3243_v16  ;;  %v3271_v6 = vld [vmem:[%s11838_s17 + $0x1e80] sm:$0xff] }
 0x354   : > { %9128 = vmatprep.mubr.bf16.mxu1 %v12493_v26  ;;  %8770 = vmatprep.subr.bf16.mxu0 %v11125_v61  ;;  %v11158_v61 = vcombine.low %v3232_v7, %v3236_v35  ;;  %v3275_v7 = vld [vmem:[%s11838_s17 + $0x1ea0] sm:$0xff]  ;;  %v3272_v35 = vld [vmem:[%s11838_s17 + $0x1e88] sm:$0xff] }
 0x355   : > { %9098 = vmatprep.subr.bf16.mxu1 %v11127_v42  ;;  %v3247_v42 = vld [vmem:[%s11838_s17 + $0x1dc0] sm:$0xff] }
 0x356   : > { %8771 = vmatpush1.bf16.msra.mxu0 %v11124_v13  ;;  %v3252_v13 = vld [vmem:[%s11838_s17 + $0x1de8] sm:$0xff] }
 0x357   : > { %9099 = vmatpush1.bf16.msra.mxu1 %v11126_v30  ;;  %8772 = vmatprep.subr.bf16.mxu0 %v11133_v49  ;;  %v11164_v30 = vcombine.low %v3239_v20, %v3243_v16  ;;  %v11166_v49 = vcombine.low %v3240_v21, %v3244_v53  ;;  %v11175_v24 = vcombine.high %v3248_v27, %v3252_v13  ;;  %v3279_v16 = vld [vmem:[%s11838_s17 + $0x1ec0] sm:$0xff]  ;;  %v3280_v53 = vld [vmem:[%s11838_s17 + $0x1ec8] sm:$0xff] }
 0x358   : > { %9100 = vmatprep.subr.bf16.mxu1 %v11135_v1  ;;  %v11173_v1 = vcombine.high %v3247_v42, %v3251_v37  ;;  %v3283_v21 = vld [vmem:[%s11838_s17 + $0x1ee0] sm:$0xff] }
 0x35a   : > { %8773 = vmatpush1.bf16.msra.mxu0 %v11132_v33  ;;  %v3260_v33 = vld [vmem:[%s11838_s17 + $0x1e28] sm:$0xff] }
 0x35b   : > { %9101 = vmatpush1.bf16.msra.mxu1 %v11134_v48  ;;  %8774 = vmatprep.subr.bf16.mxu0 %v11141_v50  ;;  %v11172_v48 = vcombine.low %v3247_v42, %v3251_v37  ;;  %v11174_v50 = vcombine.low %v3248_v27, %v3252_v13  ;;  %v11183_v55 = vcombine.high %v3256_v12, %v3260_v33  ;;  %v3287_v37 = vld [vmem:[%s11838_s17 + $0x1f00] sm:$0xff]  ;;  %v3288_v13 = vld [vmem:[%s11838_s17 + $0x1f08] sm:$0xff] }
 0x35c   : > { %9102 = vmatprep.subr.bf16.mxu1 %v11143_v52  ;;  %v11181_v52 = vcombine.high %v3255_v39, %v3259_v40  ;;  %v3291_v27 = vld [vmem:[%s11838_s17 + $0x1f20] sm:$0xff] }
 0x35e   : > { %8775 = vmatpush1.bf16.msra.mxu0 %v11140_v8  ;;  %v3268_v8 = vld [vmem:[%s11838_s17 + $0x1e68] sm:$0xff] }
 0x35f   : > { %9103 = vmatpush1.bf16.msra.mxu1 %v11142_v2  ;;  %8776 = vmatprep.subr.bf16.mxu0 %v11149_v3  ;;  %v11180_v2 = vcombine.low %v3255_v39, %v3259_v40  ;;  %v11182_v3 = vcombine.low %v3256_v12, %v3260_v33  ;;  %v11191_v5 = vcombine.high %v3264_v60, %v3268_v8  ;;  %v3295_v40 = vld [vmem:[%s11838_s17 + $0x1f40] sm:$0xff]  ;;  %v3296_v33 = vld [vmem:[%s11838_s17 + $0x1f48] sm:$0xff] }
 0x360   : > { %9104 = vmatprep.subr.bf16.mxu1 %v11151_v4  ;;  %v11189_v4 = vcombine.high %v3263_v58, %v3267_v45  ;;  %v3299_v12 = vld [vmem:[%s11838_s17 + $0x1f60] sm:$0xff] }
 0x362   : > { %8777 = vmatpush1.bf16.msra.mxu0 %v11148_v10  ;;  %v3276_v10 = vld [vmem:[%s11838_s17 + $0x1ea8] sm:$0xff] }
 0x363   : > { %9105 = vmatpush1.bf16.msra.mxu1 %v11150_v11  ;;  %8778 = vmatprep.subr.bf16.mxu0 %v11157_v17  ;;  %v11188_v11 = vcombine.low %v3263_v58, %v3267_v45  ;;  %v11190_v17 = vcombine.low %v3264_v60, %v3268_v8  ;;  %v11199_v20 = vcombine.high %v3272_v35, %v3276_v10  ;;  %v3303_v45 = vld [vmem:[%s11838_s17 + $0x1f80] sm:$0xff]  ;;  %v3304_v8 = vld [vmem:[%s11838_s17 + $0x1f88] sm:$0xff] }
 0x364   : > { %9106 = vmatprep.subr.bf16.mxu1 %v11159_v18  ;;  %v11197_v18 = vcombine.high %v3271_v6, %v3275_v7  ;;  %v3307_v60 = vld [vmem:[%s11838_s17 + $0x1fa0] sm:$0xff] }
 0x366   : > { %8779 = vmatpush1.bf16.msra.mxu0 %v11156_v28  ;;  %v3284_v28 = vld [vmem:[%s11838_s17 + $0x1ee8] sm:$0xff] }
 0x367   : > { %9107 = vmatpush1.bf16.msra.mxu1 %v11158_v61  ;;  %8780 = vmatprep.subr.bf16.mxu0 %v11165_v57  ;;  %v11196_v61 = vcombine.low %v3271_v6, %v3275_v7  ;;  %v11198_v57 = vcombine.low %v3272_v35, %v3276_v10  ;;  %v11207_v42 = vcombine.high %v3280_v53, %v3284_v28  ;;  %v3311_v35 = vld [vmem:[%s11838_s17 + $0x1fc0] sm:$0xff] }
 0x368   : > { %9108 = vmatprep.subr.bf16.mxu1 %v11167_v25  ;;  %v11205_v25 = vcombine.high %v3279_v16, %v3283_v21  ;;  %v11229_v6 = vcombine.high %v3303_v45, %v3307_v60  ;;  %v3315_v10 = vld [vmem:[%s11838_s17 + $0x1fe0] sm:$0xff] }
 0x36a   : > { %8781 = vmatpush1.bf16.msra.mxu0 %v11164_v30  ;;  %v3292_v30 = vld [vmem:[%s11838_s17 + $0x1f28] sm:$0xff] }
 0x36b   : > { %9109 = vmatpush1.bf16.msra.mxu1 %v11166_v49  ;;  %8782 = vmatprep.subr.bf16.mxu0 %v11173_v1  ;;  %v11204_v49 = vcombine.low %v3279_v16, %v3283_v21  ;;  %v11206_v1 = vcombine.low %v3280_v53, %v3284_v28  ;;  %v11215_v39 = vcombine.high %v3288_v13, %v3292_v30  ;;  %v2297_v53 = vld [vmem:[%s11838_s17 + $0x10] sm:$0xff] }
 0x36c   : > { %9110 = vmatprep.subr.bf16.mxu1 %v11175_v24  ;;  %v11213_v24 = vcombine.high %v3287_v37, %v3291_v27  ;;  %v11237_v16 = vcombine.high %v3311_v35, %v3315_v10  ;;  %v2301_v28 = vld [vmem:[%s11838_s17 + $0x30] sm:$0xff] }
 0x36e   : > { %8783 = vmatpush1.bf16.msra.mxu0 %v11172_v48  ;;  %v3300_v48 = vld [vmem:[%s11838_s17 + $0x1f68] sm:$0xff] }
 0x36f   : > { %9111 = vmatpush1.bf16.msra.mxu1 %v11174_v50  ;;  %8784 = vmatprep.subr.bf16.mxu0 %v11181_v52  ;;  %v11212_v50 = vcombine.low %v3287_v37, %v3291_v27  ;;  %v11214_v52 = vcombine.low %v3288_v13, %v3292_v30  ;;  %v11223_v58 = vcombine.high %v3296_v33, %v3300_v48  ;;  %v2305_v13 = vld [vmem:[%s11838_s17 + $0x50] sm:$0xff] }
 0x370   : > { %9112 = vmatprep.subr.bf16.mxu1 %v11183_v55  ;;  %v11221_v55 = vcombine.high %v3295_v40, %v3299_v12  ;;  %v10225_v37 = vcombine.high %v2297_v53, %v2301_v28  ;;  %v2309_v30 = vld [vmem:[%s11838_s17 + $0x70] sm:$0xff] }
 0x372   : > { %8785 = vmatpush1.bf16.msra.mxu0 %v11180_v2  ;;  %v3308_v2 = vld [vmem:[%s11838_s17 + $0x1fa8] sm:$0xff] }
 0x373   : > { %9113 = vmatpush1.bf16.msra.mxu1 %v11182_v3  ;;  %8786 = vmatprep.subr.bf16.mxu0 %v11189_v4  ;;  %v11220_v3 = vcombine.low %v3295_v40, %v3299_v12  ;;  %v627_v4 = vrot.slane %v12469_v32, %v12227_v14  ;;  %v11231_v7 = vcombine.high %v3304_v8, %v3308_v2 }
 0x374   : > { %9114 = vmatprep.subr.bf16.mxu1 %v11191_v5  ;;  %v11222_v5 = vcombine.low %v3296_v33, %v3300_v48  ;;  %v11230_v32 = vcombine.low %v3304_v8, %v3308_v2  ;;  %v10233_v12 = vcombine.high %v2305_v13, %v2309_v30  ;;  %v2313_v33 = vld [vmem:[%s11838_s17 + $0x90] sm:$0xff] }
 0x375   : > { %v2317_v48 = vld [vmem:[%s11838_s17 + $0xb0] sm:$0xff] }
 0x376   : > { %8787 = vmatpush1.bf16.msra.mxu0 %v11188_v11  ;;  %v3312_v11 = vld [vmem:[%s11838_s17 + $0x1fc8] sm:$0xff]  ;;  %v2321_v2 = vld [vmem:[%s11838_s17 + $0xd0] sm:$0xff] }
 0x377   : > { %9115 = vmatpush1.bf16.msra.mxu1 %v11190_v17  ;;  %8788 = vmatprep.subr.bf16.mxu0 %v11197_v18  ;;  %v3316_v17 = vld [vmem:[%s11838_s17 + $0x1fe8] sm:$0xff]  ;;  %v11228_v18 = vcombine.low %v3303_v45, %v3307_v60  ;;  %v10241_v60 = vcombine.high %v2313_v33, %v2317_v48 }
 0x378   : > { %9116 = vmatprep.subr.bf16.mxu1 %v11199_v20  ;;  %v2257_v20 = vadd.f32 %v12194_v43, %v627_v4  ;;  %v11239_v21 = vcombine.high %v3312_v11, %v3316_v17  ;;  %v11238_v43 = vcombine.low %v3312_v11, %v3316_v17  ;;  %v2322_v4 = vld [vmem:[%s11838_s17 + $0xd8] sm:$0xff]  ;;  %v2333_v11 = vld [vmem:[%s11838_s17 + $0x130] sm:$0xff] }
 0x379   : > { %v2330_v17 = vld [vmem:[%s11838_s17 + $0x118] sm:$0xff] }
 0x37a   : > { %8789 = vmatpush1.bf16.msra.mxu0 %v11196_v61  ;;  %v2298_v61 = vld [vmem:[%s11838_s17 + $0x18] sm:$0xff] }
 0x37b   : > { %9117 = vmatpush1.bf16.msra.mxu1 %v11198_v57  ;;  %8790 = vmatprep.subr.bf16.mxu0 %v11205_v25  ;;  %v2302_v57 = vld [vmem:[%s11838_s17 + $0x38] sm:$0xff]  ;;  %v11236_v25 = vcombine.low %v3311_v35, %v3315_v10  ;;  %v2329_v10 = vld [vmem:[%s11838_s17 + $0x110] sm:$0xff] }
 0x37c   : > { %9118 = vmatprep.subr.bf16.mxu1 %v11207_v42  ;;  %v2277_v42 = vmax.f32 %v2257_v20, 0.0  ;;  %v10227_v27 = vcombine.high %v2298_v61, %v2302_v57  ;;  %v10226_v40 = vcombine.low %v2298_v61, %v2302_v57  ;;  %v2338_v61 = vld [vmem:[%s11838_s17 + $0x158] sm:$0xff] }
 0x37d   : > { %v2342_v57 = vld [vmem:[%s11838_s17 + $0x178] sm:$0xff] }
 0x37e   : > { %8791 = vmatpush1.bf16.msra.mxu0 %v11204_v49  ;;  %v10224_v49 = vcombine.low %v2297_v53, %v2301_v28  ;;  %v2337_v53 = vld [vmem:[%s11838_s17 + $0x150] sm:$0xff] }
 0x37f   : > { %9119 = vmatpush1.bf16.msra.mxu1 %v11206_v1  ;;  %8792 = vmatprep.subr.bf16.mxu0 %v11213_v24  ;;  %v2306_v1 = vld [vmem:[%s11838_s17 + $0x58] sm:$0xff]  ;;  %v2341_v28 = vld [vmem:[%s11838_s17 + $0x170] sm:$0xff] }
 0x380   : > { %9120 = vmatprep.subr.bf16.mxu1 %v11215_v39  ;;  %v2310_v24 = vld [vmem:[%s11838_s17 + $0x78] sm:$0xff]  ;;  %v12564_v39 = vpack.c.bf16 %v2277_v42, %v2277_v42 }
 0x381   : > { %v10234_v45 = vcombine.low %v2306_v1, %v2310_v24 }
 0x382   : > { %8793 = vmatpush1.bf16.msra.mxu0 %v11212_v50  ;;  %v10235_v50 = vcombine.high %v2306_v1, %v2310_v24  ;;  %v10264_v1 = vcombine.low %v2337_v53, %v2341_v28  ;;  %v10266_v24 = vcombine.low %v2338_v61, %v2342_v57 }
 0x383   : > { %9121 = vmatpush1.bf16.msra.mxu1 %v11214_v52  ;;  %8794 = vmatprep.subr.bf16.mxu0 %v11221_v55  ;;  %v2314_v52 = vld [vmem:[%s11838_s17 + $0x98] sm:$0xff] }
 0x384   : > { %9122 = vmatprep.subr.bf16.mxu1 %v11223_v58  ;;  %v2318_v55 = vld [vmem:[%s11838_s17 + $0xb8] sm:$0xff]  ;;  %v10232_v58 = vcombine.low %v2305_v13, %v2309_v30  ;;  %v2349_v13 = vld [vmem:[%s11838_s17 + $0x1b0] sm:$0xff] }
 0x385   : > { %v10243_v8 = vcombine.high %v2314_v52, %v2318_v55  ;;  %v2346_v30 = vld [vmem:[%s11838_s17 + $0x198] sm:$0xff] }
 0x386   : > { %8795 = vmatpush1.bf16.msra.mxu0 %v11220_v3  ;;  %v2325_v3 = vld [vmem:[%s11838_s17 + $0xf0] sm:$0xff] }
 0x387   : > { %9123 = vmatpush1.bf16.msra.mxu1 %v11222_v5  ;;  %8796 = vmatprep.subr.bf16.mxu0 %v11229_v6  ;;  %v2326_v5 = vld [vmem:[%s11838_s17 + $0xf8] sm:$0xff]  ;;  %v10240_v6 = vcombine.low %v2313_v33, %v2317_v48  ;;  %v10249_v35 = vcombine.high %v2321_v2, %v2325_v3  ;;  %v10248_v20 = vcombine.low %v2321_v2, %v2325_v3  ;;  %v2353_v33 = vld [vmem:[%s11838_s17 + $0x1d0] sm:$0xff] }
 0x388   : > { %9124 = vmatprep.subr.bf16.mxu1 %v11231_v7  ;;  %v10242_v7 = vcombine.low %v2314_v52, %v2318_v55  ;;  %v2357_v48 = vld [vmem:[%s11838_s17 + $0x1f0] sm:$0xff]  ;;  %v2358_v52 = vld [vmem:[%s11838_s17 + $0x1f8] sm:$0xff] }
 0x389   : > { %v2365_v2 = vld [vmem:[%s11838_s17 + $0x230] sm:$0xff]  ;;  %v2362_v3 = vld [vmem:[%s11838_s17 + $0x218] sm:$0xff] }
 0x38a   : > { %8797 = vmatpush1.bf16.msra.mxu0 %v11228_v18  ;;  %v2334_v18 = vld [vmem:[%s11838_s17 + $0x138] sm:$0xff] }
 0x38b   : > { %9125 = vmatpush1.bf16.msra.mxu1 %v11230_v32  ;;  %8798 = vmatprep.subr.bf16.mxu0 %v11237_v16  ;;  %v10250_v32 = vcombine.low %v2322_v4, %v2326_v5  ;;  %v10257_v16 = vcombine.high %v2329_v10, %v2333_v11  ;;  %v10258_v42 = vcombine.low %v2330_v17, %v2334_v18 }
 0x38c   : > { %9126 = vmatprep.subr.bf16.mxu1 %v11239_v21  ;;  %v10259_v21 = vcombine.high %v2330_v17, %v2334_v18  ;;  %v2374_v17 = vld [vmem:[%s11838_s17 + $0x278] sm:$0xff] }
 0x38e   : > { %8799 = vmatpush1.bf16.msra.mxu0 %v11236_v25  ;;  %v10256_v25 = vcombine.low %v2329_v10, %v2333_v11  ;;  %v2373_v10 = vld [vmem:[%s11838_s17 + $0x270] sm:$0xff]  ;;  %v2370_v11 = vld [vmem:[%s11838_s17 + $0x258] sm:$0xff] }
 0x38f   : > { %9127 = vmatpush1.bf16.msra.mxu1 %v11238_v43  ;;  %9137 = vmatprep.subr.bf16.mxu0 %v10225_v37  ;;  %v10265_v43 = vcombine.high %v2337_v53, %v2341_v28  ;;  %v10267_v37 = vcombine.high %v2338_v61, %v2342_v57  ;;  %v2381_v53 = vld [vmem:[%s11838_s17 + $0x2b0] sm:$0xff]  ;;  %v2378_v28 = vld [vmem:[%s11838_s17 + $0x298] sm:$0xff] }
 0x390   : > { %9465 = vmatprep.subr.bf16.mxu1 %v10227_v27  ;;  %v2345_v27 = vld [vmem:[%s11838_s17 + $0x190] sm:$0xff]  ;;  %v2382_v61 = vld [vmem:[%s11838_s17 + $0x2b8] sm:$0xff] }
 0x391   : > { %8801 = vmatmul.mubr.bf16.vlgmr.msra.gmra.mrb[16].mxu0 %v12564_v39  ;;  %v10272_v55 = vcombine.low %v2345_v27, %v2349_v13 }
 0x392   : > { %9129 = vmatmul.mubr.bf16.vlgmr.msra.gmra.mrb[16].mxu1 %v12564_v39  ;;  %9138 = vmatpush1.bf16.msra.mxu0 %v10224_v49  ;;  %v2350_v49 = vld [vmem:[%s11838_s17 + $0x1b8] sm:$0xff] }
 0x393   : > { %9169 = vmatprep.mubr.bf16.mxu0 %v11924_v31  ;;  %9466 = vmatpush1.bf16.msra.mxu1 %v10226_v40  ;;  %v10273_v40 = vcombine.high %v2345_v27, %v2349_v13  ;;  %v2389_v27 = vld [vmem:[%s11838_s17 + $0x2f0] sm:$0xff]  ;;  %v2386_v13 = vld [vmem:[%s11838_s17 + $0x2d8] sm:$0xff] }
 0x394   : > { %9497 = vmatprep.mubr.bf16.mxu1 %v11924_v31  ;;  %9139 = vmatprep.subr.bf16.mxu0 %v10233_v12  ;;  %v10251_v31 = vcombine.high %v2322_v4, %v2326_v5  ;;  %v10275_v12 = vcombine.high %v2346_v30, %v2350_v49  ;;  %v2366_v4 = vld [vmem:[%s11838_s17 + $0x238] sm:$0xff]  ;;  %v10280_v5 = vcombine.low %v2353_v33, %v2357_v48 }
 0x395   : > { %9467 = vmatprep.subr.bf16.mxu1 %v10235_v50  ;;  %v2354_v50 = vld [vmem:[%s11838_s17 + $0x1d8] sm:$0xff] }
 0x396   : > { %9140 = vmatpush1.bf16.msra.mxu0 %v10232_v58  ;;  %v10274_v58 = vcombine.low %v2346_v30, %v2350_v49  ;;  %v2390_v30 = vld [vmem:[%s11838_s17 + $0x2f8] sm:$0xff] }
 0x397   : > { %9468 = vmatpush1.bf16.msra.mxu1 %v10234_v45  ;;  %9141 = vmatprep.subr.bf16.mxu0 %v10241_v60  ;;  %v10281_v45 = vcombine.high %v2353_v33, %v2357_v48  ;;  %v10283_v60 = vcombine.high %v2354_v50, %v2358_v52  ;;  %v2397_v33 = vld [vmem:[%s11838_s17 + $0x330] sm:$0xff]  ;;  %v2394_v48 = vld [vmem:[%s11838_s17 + $0x318] sm:$0xff] }
 0x398   : > { %9469 = vmatprep.subr.bf16.mxu1 %v10243_v8  ;;  %v2361_v8 = vld [vmem:[%s11838_s17 + $0x210] sm:$0xff] }
 0x399   : > { %v10288_v18 = vcombine.low %v2361_v8, %v2365_v2 }
 0x39a   : > { %9142 = vmatpush1.bf16.msra.mxu0 %v10240_v6  ;;  %v10282_v6 = vcombine.low %v2354_v50, %v2358_v52  ;;  %v2398_v50 = vld [vmem:[%s11838_s17 + $0x338] sm:$0xff] }
 0x39b   : > { %9470 = vmatpush1.bf16.msra.mxu1 %v10242_v7  ;;  %9143 = vmatprep.subr.bf16.mxu0 %v10249_v35  ;;  %v10289_v7 = vcombine.high %v2361_v8, %v2365_v2  ;;  %v10291_v35 = vcombine.high %v2362_v3, %v2366_v4  ;;  %v2405_v8 = vld [vmem:[%s11838_s17 + $0x370] sm:$0xff]  ;;  %v2402_v2 = vld [vmem:[%s11838_s17 + $0x358] sm:$0xff] }
 0x39c   : > { %9471 = vmatprep.subr.bf16.mxu1 %v10251_v31  ;;  %v2369_v31 = vld [vmem:[%s11838_s17 + $0x250] sm:$0xff] }
 0x39d   : > { %v10296_v57 = vcombine.low %v2369_v31, %v2373_v10 }
 0x39e   : > { %9144 = vmatpush1.bf16.msra.mxu0 %v10248_v20  ;;  %v10290_v20 = vcombine.low %v2362_v3, %v2366_v4  ;;  %v2406_v3 = vld [vmem:[%s11838_s17 + $0x378] sm:$0xff] }
 0x39f   : > { %9472 = vmatpush1.bf16.msra.mxu1 %v10250_v32  ;;  %9145 = vmatprep.subr.bf16.mxu0 %v10257_v16  ;;  %v10297_v32 = vcombine.high %v2369_v31, %v2373_v10  ;;  %v10299_v16 = vcombine.high %v2370_v11, %v2374_v17  ;;  %v2413_v31 = vld [vmem:[%s11838_s17 + $0x3b0] sm:$0xff]  ;;  %v2410_v10 = vld [vmem:[%s11838_s17 + $0x398] sm:$0xff] }
 0x3a0   : > { %9473 = vmatprep.subr.bf16.mxu1 %v10259_v21  ;;  %v2377_v21 = vld [vmem:[%s11838_s17 + $0x290] sm:$0xff] }
 0x3a1   : > { %v10304_v49 = vcombine.low %v2377_v21, %v2381_v53 }
 0x3a2   : > { %9146 = vmatpush1.bf16.msra.mxu0 %v10256_v25  ;;  %v10298_v25 = vcombine.low %v2370_v11, %v2374_v17  ;;  %v2414_v11 = vld [vmem:[%s11838_s17 + $0x3b8] sm:$0xff] }
 0x3a3   : > { %9474 = vmatpush1.bf16.msra.mxu1 %v10258_v42  ;;  %9147 = vmatprep.subr.bf16.mxu0 %v10265_v43  ;;  %v10305_v42 = vcombine.high %v2377_v21, %v2381_v53  ;;  %v10307_v43 = vcombine.high %v2378_v28, %v2382_v61  ;;  %v2421_v21 = vld [vmem:[%s11838_s17 + $0x3f0] sm:$0xff]  ;;  %v2418_v53 = vld [vmem:[%s11838_s17 + $0x3d8] sm:$0xff] }
 0x3a4   : > { %9475 = vmatprep.subr.bf16.mxu1 %v10267_v37  ;;  %v2385_v37 = vld [vmem:[%s11838_s17 + $0x2d0] sm:$0xff] }
 0x3a5   : > { %v10312_v52 = vcombine.low %v2385_v37, %v2389_v27 }
 0x3a6   : > { %9148 = vmatpush1.bf16.msra.mxu0 %v10264_v1  ;;  %v10306_v1 = vcombine.low %v2378_v28, %v2382_v61  ;;  %v2422_v28 = vld [vmem:[%s11838_s17 + $0x3f8] sm:$0xff] }
 0x3a7   : > { %9476 = vmatpush1.bf16.msra.mxu1 %v10266_v24  ;;  %9149 = vmatprep.subr.bf16.mxu0 %v10273_v40  ;;  %v10313_v24 = vcombine.high %v2385_v37, %v2389_v27  ;;  %v10315_v40 = vcombine.high %v2386_v13, %v2390_v30  ;;  %v2429_v37 = vld [vmem:[%s11838_s17 + $0x430] sm:$0xff]  ;;  %v2426_v27 = vld [vmem:[%s11838_s17 + $0x418] sm:$0xff] }
 0x3a8   : > { %9477 = vmatprep.subr.bf16.mxu1 %v10275_v12  ;;  %v2393_v12 = vld [vmem:[%s11838_s17 + $0x310] sm:$0xff] }
 0x3a9   : > { %v10320_v4 = vcombine.low %v2393_v12, %v2397_v33 }
 0x3aa   : > { %9150 = vmatpush1.bf16.msra.mxu0 %v10272_v55  ;;  %v10314_v55 = vcombine.low %v2386_v13, %v2390_v30  ;;  %v2430_v13 = vld [vmem:[%s11838_s17 + $0x438] sm:$0xff] }
 0x3ab   : > { %9478 = vmatpush1.bf16.msra.mxu1 %v10274_v58  ;;  %9151 = vmatprep.subr.bf16.mxu0 %v10281_v45  ;;  %v10321_v58 = vcombine.high %v2393_v12, %v2397_v33  ;;  %v10323_v45 = vcombine.high %v2394_v48, %v2398_v50  ;;  %v2437_v12 = vld [vmem:[%s11838_s17 + $0x470] sm:$0xff] }
 0x3ac   : > { %9479 = vmatprep.subr.bf16.mxu1 %v10283_v60  ;;  %v2401_v60 = vld [vmem:[%s11838_s17 + $0x350] sm:$0xff] }
 0x3ad   : > { %v10328_v17 = vcombine.low %v2401_v60, %v2405_v8 }
 0x3ae   : > { %9152 = vmatpush1.bf16.msra.mxu0 %v10280_v5  ;;  %v10322_v5 = vcombine.low %v2394_v48, %v2398_v50  ;;  %v2434_v48 = vld [vmem:[%s11838_s17 + $0x458] sm:$0xff] }
 0x3af   : > { %9480 = vmatpush1.bf16.msra.mxu1 %v10282_v6  ;;  %9153 = vmatprep.subr.bf16.mxu0 %v10289_v7  ;;  %v10329_v6 = vcombine.high %v2401_v60, %v2405_v8  ;;  %v10331_v7 = vcombine.high %v2402_v2, %v2406_v3  ;;  %v2438_v50 = vld [vmem:[%s11838_s17 + $0x478] sm:$0xff] }
 0x3b0   : > { %9481 = vmatprep.subr.bf16.mxu1 %v10291_v35  ;;  %v2409_v35 = vld [vmem:[%s11838_s17 + $0x390] sm:$0xff]  ;;  %v10363_v60 = vcombine.high %v2434_v48, %v2438_v50  ;;  %v2442_v8 = vld [vmem:[%s11838_s17 + $0x498] sm:$0xff] }
 0x3b1   : > { %v10336_v61 = vcombine.low %v2409_v35, %v2413_v31 }
 0x3b2   : > { %9154 = vmatpush1.bf16.msra.mxu0 %v10288_v18  ;;  %v10330_v18 = vcombine.low %v2402_v2, %v2406_v3  ;;  %v2446_v2 = vld [vmem:[%s11838_s17 + $0x4b8] sm:$0xff] }
 0x3b3   : > { %9482 = vmatpush1.bf16.msra.mxu1 %v10290_v20  ;;  %9155 = vmatprep.subr.bf16.mxu0 %v10297_v32  ;;  %v10337_v20 = vcombine.high %v2409_v35, %v2413_v31  ;;  %v10339_v32 = vcombine.high %v2410_v10, %v2414_v11  ;;  %v2453_v35 = vld [vmem:[%s11838_s17 + $0x4f0] sm:$0xff]  ;;  %v2450_v31 = vld [vmem:[%s11838_s17 + $0x4d8] sm:$0xff] }
 0x3b4   : > { %9483 = vmatprep.subr.bf16.mxu1 %v10299_v16  ;;  %v2417_v16 = vld [vmem:[%s11838_s17 + $0x3d0] sm:$0xff] }
 0x3b5   : > { %v10344_v30 = vcombine.low %v2417_v16, %v2421_v21 }
 0x3b6   : > { %9156 = vmatpush1.bf16.msra.mxu0 %v10296_v57  ;;  %v10338_v57 = vcombine.low %v2410_v10, %v2414_v11  ;;  %v10370_v11 = vcombine.low %v2442_v8, %v2446_v2 }
 0x3b7   : > { %9484 = vmatpush1.bf16.msra.mxu1 %v10298_v25  ;;  %9157 = vmatprep.subr.bf16.mxu0 %v10305_v42  ;;  %v10345_v25 = vcombine.high %v2417_v16, %v2421_v21  ;;  %v10347_v42 = vcombine.high %v2418_v53, %v2422_v28  ;;  %v2462_v16 = vld [vmem:[%s11838_s17 + $0x538] sm:$0xff] }
 0x3b8   : > { %9485 = vmatprep.subr.bf16.mxu1 %v10307_v43  ;;  %v2425_v43 = vld [vmem:[%s11838_s17 + $0x410] sm:$0xff] }
 0x3b9   : > { %v10352_v33 = vcombine.low %v2425_v43, %v2429_v37 }
 0x3ba   : > { %9158 = vmatpush1.bf16.msra.mxu0 %v10304_v49  ;;  %v10346_v49 = vcombine.low %v2418_v53, %v2422_v28 }
 0x3bb   : > { %9486 = vmatpush1.bf16.msra.mxu1 %v10306_v1  ;;  %9159 = vmatprep.subr.bf16.mxu0 %v10313_v24  ;;  %v10353_v1 = vcombine.high %v2425_v43, %v2429_v37  ;;  %v10355_v24 = vcombine.high %v2426_v27, %v2430_v13  ;;  %v2470_v43 = vld [vmem:[%s11838_s17 + $0x578] sm:$0xff] }
 0x3bc   : > { %9487 = vmatprep.subr.bf16.mxu1 %v10315_v40  ;;  %v2433_v40 = vld [vmem:[%s11838_s17 + $0x450] sm:$0xff] }
 0x3bd   : > { %v10360_v3 = vcombine.low %v2433_v40, %v2437_v12 }
 0x3be   : > { %9160 = vmatpush1.bf16.msra.mxu0 %v10312_v52  ;;  %v10354_v52 = vcombine.low %v2426_v27, %v2430_v13 }
 0x3bf   : > { %9488 = vmatpush1.bf16.msra.mxu1 %v10314_v55  ;;  %9161 = vmatprep.subr.bf16.mxu0 %v10321_v58  ;;  %v10361_v55 = vcombine.high %v2433_v40, %v2437_v12  ;;  %v2441_v58 = vld [vmem:[%s11838_s17 + $0x490] sm:$0xff]  ;;  %v2478_v40 = vld [vmem:[%s11838_s17 + $0x5b8] sm:$0xff] }
 0x3c0   : > { %9489 = vmatprep.subr.bf16.mxu1 %v10323_v45  ;;  %v2445_v45 = vld [vmem:[%s11838_s17 + $0x4b0] sm:$0xff] }
 0x3c1   : > { %v10368_v10 = vcombine.low %v2441_v58, %v2445_v45 }
 0x3c2   : > { %9162 = vmatpush1.bf16.msra.mxu0 %v10320_v4  ;;  %v10362_v4 = vcombine.low %v2434_v48, %v2438_v50 }
 0x3c3   : > { %9490 = vmatpush1.bf16.msra.mxu1 %v10322_v5  ;;  %9163 = vmatprep.subr.bf16.mxu0 %v10329_v6  ;;  %v10369_v5 = vcombine.high %v2441_v58, %v2445_v45  ;;  %v10371_v6 = vcombine.high %v2442_v8, %v2446_v2  ;;  %v2482_v58 = vld [vmem:[%s11838_s17 + $0x5d8] sm:$0xff] }
 0x3c4   : > { %9491 = vmatprep.subr.bf16.mxu1 %v10331_v7  ;;  %v2449_v7 = vld [vmem:[%s11838_s17 + $0x4d0] sm:$0xff]  ;;  %v2486_v45 = vld [vmem:[%s11838_s17 + $0x5f8] sm:$0xff] }
 0x3c5   : > { %v10376_v21 = vcombine.low %v2449_v7, %v2453_v35 }
 0x3c6   : > { %9164 = vmatpush1.bf16.msra.mxu0 %v10328_v17  ;;  %v10377_v17 = vcombine.high %v2449_v7, %v2453_v35  ;;  %v2494_v7 = vld [vmem:[%s11838_s17 + $0x638] sm:$0xff] }
 0x3c7   : > { %9492 = vmatpush1.bf16.msra.mxu1 %v10330_v18  ;;  %9165 = vmatprep.subr.bf16.mxu0 %v10337_v20  ;;  %v2457_v18 = vld [vmem:[%s11838_s17 + $0x510] sm:$0xff] }
 0x3c8   : > { %9493 = vmatprep.subr.bf16.mxu1 %v10339_v32  ;;  %v2461_v20 = vld [vmem:[%s11838_s17 + $0x530] sm:$0xff]  ;;  %v2458_v32 = vld [vmem:[%s11838_s17 + $0x518] sm:$0xff] }
 0x3c9   : > { %v10385_v28 = vcombine.high %v2457_v18, %v2461_v20  ;;  %v10384_v37 = vcombine.low %v2457_v18, %v2461_v20  ;;  %v10386_v27 = vcombine.low %v2458_v32, %v2462_v16  ;;  %v2502_v18 = vld [vmem:[%s11838_s17 + $0x678] sm:$0xff] }
 0x3ca   : > { %9166 = vmatpush1.bf16.msra.mxu0 %v10336_v61  ;;  %v10387_v61 = vcombine.high %v2458_v32, %v2462_v16 }
 0x3cb   : > { %9494 = vmatpush1.bf16.msra.mxu1 %v10338_v57  ;;  %9167 = vmatprep.subr.bf16.mxu0 %v10345_v25  ;;  %v2465_v57 = vld [vmem:[%s11838_s17 + $0x550] sm:$0xff] }
 0x3cc   : > { %9495 = vmatprep.subr.bf16.mxu1 %v10347_v42  ;;  %v2469_v25 = vld [vmem:[%s11838_s17 + $0x570] sm:$0xff]  ;;  %v2466_v42 = vld [vmem:[%s11838_s17 + $0x558] sm:$0xff] }
 0x3cd   : > { %v10393_v13 = vcombine.high %v2465_v57, %v2469_v25  ;;  %v10392_v12 = vcombine.low %v2465_v57, %v2469_v25  ;;  %v2510_v57 = vld [vmem:[%s11838_s17 + $0x6b8] sm:$0xff] }
 0x3ce   : > { %9168 = vmatpush1.bf16.msra.mxu0 %v10344_v30  ;;  %v10395_v30 = vcombine.high %v2466_v42, %v2470_v43 }
 0x3cf   : > { %9496 = vmatpush1.bf16.msra.mxu1 %v10346_v49  ;;  %9178 = vmatprep.subr.bf16.mxu0 %v10353_v1  ;;  %v2473_v49 = vld [vmem:[%s11838_s17 + $0x590] sm:$0xff] }
 0x3d0   : > { %9506 = vmatprep.subr.bf16.mxu1 %v10355_v24  ;;  %v2477_v1 = vld [vmem:[%s11838_s17 + $0x5b0] sm:$0xff]  ;;  %v2474_v24 = vld [vmem:[%s11838_s17 + $0x598] sm:$0xff] }
 0x3d1   : > { %9170 = vmatmul.mubr.bf16.vlgmr.msra.gmra.mrb[20].mxu0 %v11976_v54  ;;  %v10401_v48 = vcombine.high %v2473_v49, %v2477_v1  ;;  %v10403_v50 = vcombine.high %v2474_v24, %v2478_v40  ;;  %v10402_v8 = vcombine.low %v2474_v24, %v2478_v40 }
 0x3d2   : > { %9498 = vmatmul.mubr.bf16.vlgmr.msra.gmra.mrb[20].mxu1 %v11976_v54  ;;  %9179 = vmatpush1.bf16.msra.mxu0 %v10352_v33  ;;  %v2454_v54 = vld [vmem:[%s11838_s17 + $0x4f8] sm:$0xff]  ;;  %v10394_v33 = vcombine.low %v2466_v42, %v2470_v43 }
 0x3d3   : > { %9210 = vmatprep.mubr.bf16.mxu0 %v11980_v62  ;;  %9507 = vmatpush1.bf16.msra.mxu1 %v10354_v52  ;;  %v10378_v53 = vcombine.low %v2450_v31, %v2454_v54  ;;  %v2481_v52 = vld [vmem:[%s11838_s17 + $0x5d0] sm:$0xff] }
 0x3d4   : > { %9538 = vmatprep.mubr.bf16.mxu1 %v11980_v62  ;;  %9180 = vmatprep.subr.bf16.mxu0 %v10361_v55  ;;  %v10379_v62 = vcombine.high %v2450_v31, %v2454_v54  ;;  %v2485_v55 = vld [vmem:[%s11838_s17 + $0x5f0] sm:$0xff]  ;;  %v10410_v31 = vcombine.low %v2482_v58, %v2486_v45 }
 0x3d5   : > { %9508 = vmatprep.subr.bf16.mxu1 %v10363_v60  ;;  %v10400_v60 = vcombine.low %v2473_v49, %v2477_v1  ;;  %v10409_v2 = vcombine.high %v2481_v52, %v2485_v55  ;;  %v10408_v35 = vcombine.low %v2481_v52, %v2485_v55  ;;  %v2518_v49 = vld [vmem:[%s11838_s17 + $0x6f8] sm:$0xff] }
 0x3d6   : > { %9181 = vmatpush1.bf16.msra.mxu0 %v10360_v3  ;;  %v10411_v3 = vcombine.high %v2482_v58, %v2486_v45  ;;  %v2526_v52 = vld [vmem:[%s11838_s17 + $0x738] sm:$0xff] }
 0x3d7   : > { %9509 = vmatpush1.bf16.msra.mxu1 %v10362_v4  ;;  %9182 = vmatprep.subr.bf16.mxu0 %v10369_v5  ;;  %v2489_v4 = vld [vmem:[%s11838_s17 + $0x610] sm:$0xff] }
 0x3d8   : > { %9510 = vmatprep.subr.bf16.mxu1 %v10371_v6  ;;  %v2493_v5 = vld [vmem:[%s11838_s17 + $0x630] sm:$0xff]  ;;  %v2490_v6 = vld [vmem:[%s11838_s17 + $0x618] sm:$0xff] }
 0x3d9   : > { %v10417_v54 = vcombine.high %v2489_v4, %v2493_v5  ;;  %v10416_v20 = vcombine.low %v2489_v4, %v2493_v5  ;;  %v10418_v32 = vcombine.low %v2490_v6, %v2494_v7  ;;  %v2534_v4 = vld [vmem:[%s11838_s17 + $0x778] sm:$0xff] }
 0x3da   : > { %9183 = vmatpush1.bf16.msra.mxu0 %v10368_v10  ;;  %v10419_v10 = vcombine.high %v2490_v6, %v2494_v7 }
 0x3db   : > { %9511 = vmatpush1.bf16.msra.mxu1 %v10370_v11  ;;  %9184 = vmatprep.subr.bf16.mxu0 %v10377_v17  ;;  %v2497_v11 = vld [vmem:[%s11838_s17 + $0x650] sm:$0xff] }
 0x3dc   : > { %9512 = vmatprep.subr.bf16.mxu1 %v10379_v62  ;;  %v2501_v17 = vld [vmem:[%s11838_s17 + $0x670] sm:$0xff]  ;;  %v2498_v62 = vld [vmem:[%s11838_s17 + $0x658] sm:$0xff] }
 0x3dd   : > { %v10425_v16 = vcombine.high %v2497_v11, %v2501_v17  ;;  %v10424_v25 = vcombine.low %v2497_v11, %v2501_v17  ;;  %v10426_v42 = vcombine.low %v2498_v62, %v2502_v18  ;;  %v2542_v11 = vld [vmem:[%s11838_s17 + $0x7b8] sm:$0xff] }
 0x3de   : > { %9185 = vmatpush1.bf16.msra.mxu0 %v10376_v21  ;;  %v10427_v21 = vcombine.high %v2498_v62, %v2502_v18 }
 0x3df   : > { %9513 = vmatpush1.bf16.msra.mxu1 %v10378_v53  ;;  %9186 = vmatprep.subr.bf16.mxu0 %v10385_v28  ;;  %v2505_v53 = vld [vmem:[%s11838_s17 + $0x690] sm:$0xff] }
 0x3e0   : > { %9514 = vmatprep.subr.bf16.mxu1 %v10387_v61  ;;  %v2509_v28 = vld [vmem:[%s11838_s17 + $0x6b0] sm:$0xff]  ;;  %v2506_v61 = vld [vmem:[%s11838_s17 + $0x698] sm:$0xff] }
 0x3e1   : > { %v10433_v43 = vcombine.high %v2505_v53, %v2509_v28  ;;  %v10432_v1 = vcombine.low %v2505_v53, %v2509_v28  ;;  %v10434_v24 = vcombine.low %v2506_v61, %v2510_v57  ;;  %v2550_v53 = vld [vmem:[%s11838_s17 + $0x7f8] sm:$0xff] }
 0x3e2   : > { %9187 = vmatpush1.bf16.msra.mxu0 %v10384_v37  ;;  %v10435_v37 = vcombine.high %v2506_v61, %v2510_v57 }
 0x3e3   : > { %9515 = vmatpush1.bf16.msra.mxu1 %v10386_v27  ;;  %9188 = vmatprep.subr.bf16.mxu0 %v10393_v13  ;;  %v2513_v27 = vld [vmem:[%s11838_s17 + $0x6d0] sm:$0xff] }
 0x3e4   : > { %9516 = vmatprep.subr.bf16.mxu1 %v10395_v30  ;;  %v2517_v13 = vld [vmem:[%s11838_s17 + $0x6f0] sm:$0xff]  ;;  %v2514_v30 = vld [vmem:[%s11838_s17 + $0x6d8] sm:$0xff] }
 0x3e5   : > { %v10441_v40 = vcombine.high %v2513_v27, %v2517_v13  ;;  %v10440_v55 = vcombine.low %v2513_v27, %v2517_v13  ;;  %v10442_v58 = vcombine.low %v2514_v30, %v2518_v49  ;;  %v2558_v27 = vld [vmem:[%s11838_s17 + $0x838] sm:$0xff] }
 0x3e6   : > { %9189 = vmatpush1.bf16.msra.mxu0 %v10392_v12  ;;  %v10443_v12 = vcombine.high %v2514_v30, %v2518_v49 }
 0x3e7   : > { %9517 = vmatpush1.bf16.msra.mxu1 %v10394_v33  ;;  %9190 = vmatprep.subr.bf16.mxu0 %v10401_v48  ;;  %v2521_v33 = vld [vmem:[%s11838_s17 + $0x710] sm:$0xff] }
 0x3e8   : > { %9518 = vmatprep.subr.bf16.mxu1 %v10403_v50  ;;  %v2525_v48 = vld [vmem:[%s11838_s17 + $0x730] sm:$0xff]  ;;  %v2522_v50 = vld [vmem:[%s11838_s17 + $0x718] sm:$0xff] }
 0x3e9   : > { %v10449_v45 = vcombine.high %v2521_v33, %v2525_v48  ;;  %v10448_v5 = vcombine.low %v2521_v33, %v2525_v48  ;;  %v10450_v6 = vcombine.low %v2522_v50, %v2526_v52  ;;  %v2562_v33 = vld [vmem:[%s11838_s17 + $0x858] sm:$0xff] }
 0x3ea   : > { %9191 = vmatpush1.bf16.msra.mxu0 %v10400_v60  ;;  %v10451_v60 = vcombine.high %v2522_v50, %v2526_v52  ;;  %v2566_v48 = vld [vmem:[%s11838_s17 + $0x878] sm:$0xff] }
 0x3eb   : > { %9519 = vmatpush1.bf16.msra.mxu1 %v10402_v8  ;;  %9192 = vmatprep.subr.bf16.mxu0 %v10409_v2  ;;  %v2529_v8 = vld [vmem:[%s11838_s17 + $0x750] sm:$0xff] }
 0x3ec   : > { %9520 = vmatprep.subr.bf16.mxu1 %v10411_v3  ;;  %v2533_v2 = vld [vmem:[%s11838_s17 + $0x770] sm:$0xff]  ;;  %v2530_v3 = vld [vmem:[%s11838_s17 + $0x758] sm:$0xff] }
 0x3ed   : > { %v10457_v7 = vcombine.high %v2529_v8, %v2533_v2  ;;  %v10456_v17 = vcombine.low %v2529_v8, %v2533_v2  ;;  %v10458_v62 = vcombine.low %v2530_v3, %v2534_v4  ;;  %v2574_v8 = vld [vmem:[%s11838_s17 + $0x8b8] sm:$0xff] }
 0x3ee   : > { %9193 = vmatpush1.bf16.msra.mxu0 %v10408_v35  ;;  %v10459_v35 = vcombine.high %v2530_v3, %v2534_v4  ;;  %v10490_v3 = vcombine.low %v2562_v33, %v2566_v48 }
 0x3ef   : > { %9521 = vmatpush1.bf16.msra.mxu1 %v10410_v31  ;;  %9194 = vmatprep.subr.bf16.mxu0 %v10417_v54  ;;  %v2537_v31 = vld [vmem:[%s11838_s17 + $0x790] sm:$0xff] }
 0x3f0   : > { %9522 = vmatprep.subr.bf16.mxu1 %v10419_v10  ;;  %v2541_v54 = vld [vmem:[%s11838_s17 + $0x7b0] sm:$0xff]  ;;  %v2538_v10 = vld [vmem:[%s11838_s17 + $0x798] sm:$0xff] }
 0x3f1   : > { %v10465_v18 = vcombine.high %v2537_v31, %v2541_v54  ;;  %v10464_v28 = vcombine.low %v2537_v31, %v2541_v54  ;;  %v10466_v61 = vcombine.low %v2538_v10, %v2542_v11 }
 0x3f2   : > { %9195 = vmatpush1.bf16.msra.mxu0 %v10416_v20  ;;  %v10467_v20 = vcombine.high %v2538_v10, %v2542_v11  ;;  %v2585_v11 = vld [vmem:[%s11838_s17 + $0x910] sm:$0xff] }
 0x3f3   : > { %9523 = vmatpush1.bf16.msra.mxu1 %v10418_v32  ;;  %9196 = vmatprep.subr.bf16.mxu0 %v10425_v16  ;;  %v2545_v32 = vld [vmem:[%s11838_s17 + $0x7d0] sm:$0xff] }
 0x3f4   : > { %9524 = vmatprep.subr.bf16.mxu1 %v10427_v21  ;;  %v2549_v16 = vld [vmem:[%s11838_s17 + $0x7f0] sm:$0xff]  ;;  %v2546_v21 = vld [vmem:[%s11838_s17 + $0x7d8] sm:$0xff] }
 0x3f5   : > { %v10473_v57 = vcombine.high %v2545_v32, %v2549_v16  ;;  %v10472_v13 = vcombine.low %v2545_v32, %v2549_v16  ;;  %v10474_v30 = vcombine.low %v2546_v21, %v2550_v53 }
 0x3f6   : > { %9197 = vmatpush1.bf16.msra.mxu0 %v10424_v25  ;;  %v10475_v25 = vcombine.high %v2546_v21, %v2550_v53  ;;  %v2593_v53 = vld [vmem:[%s11838_s17 + $0x950] sm:$0xff] }
 0x3f7   : > { %9525 = vmatpush1.bf16.msra.mxu1 %v10426_v42  ;;  %9198 = vmatprep.subr.bf16.mxu0 %v10433_v43  ;;  %v2553_v42 = vld [vmem:[%s11838_s17 + $0x810] sm:$0xff] }
 0x3f8   : > { %9526 = vmatprep.subr.bf16.mxu1 %v10435_v37  ;;  %v2557_v43 = vld [vmem:[%s11838_s17 + $0x830] sm:$0xff]  ;;  %v2554_v37 = vld [vmem:[%s11838_s17 + $0x818] sm:$0xff] }
 0x3f9   : > { %v10481_v49 = vcombine.high %v2553_v42, %v2557_v43  ;;  %v10482_v50 = vcombine.low %v2554_v37, %v2558_v27 }
 0x3fa   : > { %9199 = vmatpush1.bf16.msra.mxu0 %v10432_v1  ;;  %v10483_v1 = vcombine.high %v2554_v37, %v2558_v27  ;;  %v2601_v27 = vld [vmem:[%s11838_s17 + $0x990] sm:$0xff] }
 0x3fb   : > { %9527 = vmatpush1.bf16.msra.mxu1 %v10434_v24  ;;  %9200 = vmatprep.subr.bf16.mxu0 %v10441_v40  ;;  %v2561_v24 = vld [vmem:[%s11838_s17 + $0x850] sm:$0xff] }
 0x3fc   : > { %9528 = vmatprep.subr.bf16.mxu1 %v10443_v12  ;;  %v2565_v40 = vld [vmem:[%s11838_s17 + $0x870] sm:$0xff]  ;;  %v10480_v12 = vcombine.low %v2553_v42, %v2557_v43 }
 0x3fd   : > { %v10489_v52 = vcombine.high %v2561_v24, %v2565_v40  ;;  %v10488_v2 = vcombine.low %v2561_v24, %v2565_v40 }
 0x3fe   : > { %9201 = vmatpush1.bf16.msra.mxu0 %v10440_v55  ;;  %v2569_v55 = vld [vmem:[%s11838_s17 + $0x890] sm:$0xff] }
 0x3ff   : > { %9529 = vmatpush1.bf16.msra.mxu1 %v10442_v58  ;;  %9202 = vmatprep.subr.bf16.mxu0 %v10449_v45  ;;  %v2573_v58 = vld [vmem:[%s11838_s17 + $0x8b0] sm:$0xff]  ;;  %v10491_v45 = vcombine.high %v2562_v33, %v2566_v48 }
 0x400   : > { %9530 = vmatprep.subr.bf16.mxu1 %v10451_v60  ;;  %v2570_v60 = vld [vmem:[%s11838_s17 + $0x898] sm:$0xff]  ;;  %v10497_v4 = vcombine.high %v2569_v55, %v2573_v58  ;;  %v10496_v31 = vcombine.low %v2569_v55, %v2573_v58  ;;  %v2609_v33 = vld [vmem:[%s11838_s17 + $0x9d0] sm:$0xff] }
 0x401   : > { %v10498_v54 = vcombine.low %v2570_v60, %v2574_v8  ;;  %v2613_v48 = vld [vmem:[%s11838_s17 + $0x9f0] sm:$0xff] }
 0x402   : > { %9203 = vmatpush1.bf16.msra.mxu0 %v10448_v5  ;;  %v10499_v5 = vcombine.high %v2570_v60, %v2574_v8  ;;  %v2617_v8 = vld [vmem:[%s11838_s17 + $0xa10] sm:$0xff] }
 0x403   : > { %9531 = vmatpush1.bf16.msra.mxu1 %v10450_v6  ;;  %9204 = vmatprep.subr.bf16.mxu0 %v10457_v7  ;;  %v2577_v6 = vld [vmem:[%s11838_s17 + $0x8d0] sm:$0xff] }
 0x404   : > { %9532 = vmatprep.subr.bf16.mxu1 %v10459_v35  ;;  %v2581_v7 = vld [vmem:[%s11838_s17 + $0x8f0] sm:$0xff]  ;;  %v2578_v35 = vld [vmem:[%s11838_s17 + $0x8d8] sm:$0xff] }
 0x405   : > { %v10505_v10 = vcombine.high %v2577_v6, %v2581_v7 }
 0x406   : > { %9205 = vmatpush1.bf16.msra.mxu0 %v10456_v17  ;;  %v2589_v17 = vld [vmem:[%s11838_s17 + $0x930] sm:$0xff] }
 0x407   : > { %9533 = vmatpush1.bf16.msra.mxu1 %v10458_v62  ;;  %9206 = vmatprep.subr.bf16.mxu0 %v10465_v18  ;;  %v2586_v62 = vld [vmem:[%s11838_s17 + $0x918] sm:$0xff]  ;;  %v10513_v16 = vcombine.high %v2585_v11, %v2589_v17 }
 0x408   : > { %9534 = vmatprep.subr.bf16.mxu1 %v10467_v20  ;;  %v2590_v18 = vld [vmem:[%s11838_s17 + $0x938] sm:$0xff]  ;;  %v10504_v20 = vcombine.low %v2577_v6, %v2581_v7 }
 0x409   : > { %v10515_v21 = vcombine.high %v2586_v62, %v2590_v18  ;;  %v10514_v42 = vcombine.low %v2586_v62, %v2590_v18  ;;  %v2633_v18 = vld [vmem:[%s11838_s17 + $0xa90] sm:$0xff] }
 0x40a   : > { %9207 = vmatpush1.bf16.msra.mxu0 %v10464_v28  ;;  %v2597_v28 = vld [vmem:[%s11838_s17 + $0x970] sm:$0xff] }
 0x40b   : > { %9535 = vmatpush1.bf16.msra.mxu1 %v10466_v61  ;;  %9208 = vmatprep.subr.bf16.mxu0 %v10473_v57  ;;  %v2594_v61 = vld [vmem:[%s11838_s17 + $0x958] sm:$0xff]  ;;  %v10521_v43 = vcombine.high %v2593_v53, %v2597_v28 }
 0x40c   : > { %9536 = vmatprep.subr.bf16.mxu1 %v10475_v25  ;;  %v2598_v57 = vld [vmem:[%s11838_s17 + $0x978] sm:$0xff]  ;;  %v10512_v25 = vcombine.low %v2585_v11, %v2589_v17 }
 0x40d   : > { %v10523_v37 = vcombine.high %v2594_v61, %v2598_v57  ;;  %v10522_v24 = vcombine.low %v2594_v61, %v2598_v57  ;;  %v2641_v57 = vld [vmem:[%s11838_s17 + $0xad0] sm:$0xff] }
 0x40e   : > { %9209 = vmatpush1.bf16.msra.mxu0 %v10472_v13  ;;  %v2605_v13 = vld [vmem:[%s11838_s17 + $0x9b0] sm:$0xff] }
 0x40f   : > { %9537 = vmatpush1.bf16.msra.mxu1 %v10474_v30  ;;  %9219 = vmatprep.subr.bf16.mxu0 %v10481_v49  ;;  %v2602_v30 = vld [vmem:[%s11838_s17 + $0x998] sm:$0xff]  ;;  %v10529_v40 = vcombine.high %v2601_v27, %v2605_v13  ;;  %v10528_v55 = vcombine.low %v2601_v27, %v2605_v13 }
 0x410   : > { %9547 = vmatprep.subr.bf16.mxu1 %v10483_v1  ;;  %v2606_v49 = vld [vmem:[%s11838_s17 + $0x9b8] sm:$0xff]  ;;  %v10520_v1 = vcombine.low %v2593_v53, %v2597_v28 }
 0x411   : > { %9211 = vmatmul.mubr.bf16.vlgmr.msra.gmra.mrb[20].mxu0 %v12068_v36  ;;  %v10530_v58 = vcombine.low %v2602_v30, %v2606_v49 }
 0x412   : > { %9539 = vmatmul.mubr.bf16.vlgmr.msra.gmra.mrb[20].mxu1 %v12068_v36  ;;  %9220 = vmatpush1.bf16.msra.mxu0 %v10480_v12  ;;  %v2582_v36 = vld [vmem:[%s11838_s17 + $0x8f8] sm:$0xff]  ;;  %v10531_v12 = vcombine.high %v2602_v30, %v2606_v49  ;;  %v2649_v49 = vld [vmem:[%s11838_s17 + $0xb10] sm:$0xff] }
 0x413   : > { %9251 = vmatprep.mubr.bf16.mxu0 %v12072_v41  ;;  %9548 = vmatpush1.bf16.msra.mxu1 %v10482_v50  ;;  %v10506_v32 = vcombine.low %v2578_v35, %v2582_v36  ;;  %v2610_v50 = vld [vmem:[%s11838_s17 + $0x9d8] sm:$0xff] }
 0x414   : > { %9579 = vmatprep.mubr.bf16.mxu1 %v12072_v41  ;;  %9221 = vmatprep.subr.bf16.mxu0 %v10489_v52  ;;  %v10507_v41 = vcombine.high %v2578_v35, %v2582_v36  ;;  %v2614_v52 = vld [vmem:[%s11838_s17 + $0x9f8] sm:$0xff]  ;;  %v2625_v36 = vld [vmem:[%s11838_s17 + $0xa50] sm:$0xff] }
 0x415   : > { %9549 = vmatprep.subr.bf16.mxu1 %v10491_v45  ;;  %v10537_v45 = vcombine.high %v2609_v33, %v2613_v48  ;;  %v10539_v60 = vcombine.high %v2610_v50, %v2614_v52  ;;  %v10538_v6 = vcombine.low %v2610_v50, %v2614_v52  ;;  %v2657_v52 = vld [vmem:[%s11838_s17 + $0xb50] sm:$0xff] }
 0x416   : > { %9222 = vmatpush1.bf16.msra.mxu0 %v10488_v2  ;;  %v2621_v2 = vld [vmem:[%s11838_s17 + $0xa30] sm:$0xff] }
 0x417   : > { %9550 = vmatpush1.bf16.msra.mxu1 %v10490_v3  ;;  %9223 = vmatprep.subr.bf16.mxu0 %v10497_v4  ;;  %v2618_v3 = vld [vmem:[%s11838_s17 + $0xa18] sm:$0xff]  ;;  %v10545_v7 = vcombine.high %v2617_v8, %v2621_v2 }
 0x418   : > { %9551 = vmatprep.subr.bf16.mxu1 %v10499_v5  ;;  %v2622_v4 = vld [vmem:[%s11838_s17 + $0xa38] sm:$0xff]  ;;  %v10536_v5 = vcombine.low %v2609_v33, %v2613_v48 }
 0x419   : > { %v10547_v35 = vcombine.high %v2618_v3, %v2622_v4  ;;  %v10546_v11 = vcombine.low %v2618_v3, %v2622_v4  ;;  %v2665_v4 = vld [vmem:[%s11838_s17 + $0xb90] sm:$0xff] }
 0x41a   : > { %9224 = vmatpush1.bf16.msra.mxu0 %v10496_v31  ;;  %v2629_v31 = vld [vmem:[%s11838_s17 + $0xa70] sm:$0xff] }
 0x41b   : > { %9552 = vmatpush1.bf16.msra.mxu1 %v10498_v54  ;;  %9225 = vmatprep.subr.bf16.mxu0 %v10505_v10  ;;  %v2626_v54 = vld [vmem:[%s11838_s17 + $0xa58] sm:$0xff]  ;;  %v10553_v17 = vcombine.high %v2625_v36, %v2629_v31 }
 0x41c   : > { %9553 = vmatprep.subr.bf16.mxu1 %v10507_v41  ;;  %v2630_v10 = vld [vmem:[%s11838_s17 + $0xa78] sm:$0xff]  ;;  %v10544_v41 = vcombine.low %v2617_v8, %v2621_v2 }
 0x41d   : > { %v10555_v62 = vcombine.high %v2626_v54, %v2630_v10  ;;  %v10554_v53 = vcombine.low %v2626_v54, %v2630_v10  ;;  %v2673_v10 = vld [vmem:[%s11838_s17 + $0xbd0] sm:$0xff] }
 0x41e   : > { %9226 = vmatpush1.bf16.msra.mxu0 %v10504_v20  ;;  %v2637_v20 = vld [vmem:[%s11838_s17 + $0xab0] sm:$0xff] }
 0x41f   : > { %9554 = vmatpush1.bf16.msra.mxu1 %v10506_v32  ;;  %9227 = vmatprep.subr.bf16.mxu0 %v10513_v16  ;;  %v2634_v32 = vld [vmem:[%s11838_s17 + $0xa98] sm:$0xff]  ;;  %v10561_v28 = vcombine.high %v2633_v18, %v2637_v20 }
 0x420   : > { %9555 = vmatprep.subr.bf16.mxu1 %v10515_v21  ;;  %v2638_v16 = vld [vmem:[%s11838_s17 + $0xab8] sm:$0xff]  ;;  %v10552_v21 = vcombine.low %v2625_v36, %v2629_v31 }
 0x421   : > { %v10563_v61 = vcombine.high %v2634_v32, %v2638_v16  ;;  %v10562_v27 = vcombine.low %v2634_v32, %v2638_v16  ;;  %v2681_v16 = vld [vmem:[%s11838_s17 + $0xc10] sm:$0xff] }
 0x422   : > { %9228 = vmatpush1.bf16.msra.mxu0 %v10512_v25  ;;  %v2645_v25 = vld [vmem:[%s11838_s17 + $0xaf0] sm:$0xff] }
 0x423   : > { %9556 = vmatpush1.bf16.msra.mxu1 %v10514_v42  ;;  %9229 = vmatprep.subr.bf16.mxu0 %v10521_v43  ;;  %v2642_v42 = vld [vmem:[%s11838_s17 + $0xad8] sm:$0xff]  ;;  %v10569_v13 = vcombine.high %v2641_v57, %v2645_v25 }
 0x424   : > { %9557 = vmatprep.subr.bf16.mxu1 %v10523_v37  ;;  %v2646_v43 = vld [vmem:[%s11838_s17 + $0xaf8] sm:$0xff]  ;;  %v10560_v37 = vcombine.low %v2633_v18, %v2637_v20 }
 0x425   : > { %v10571_v30 = vcombine.high %v2642_v42, %v2646_v43  ;;  %v10570_v33 = vcombine.low %v2642_v42, %v2646_v43  ;;  %v2689_v43 = vld [vmem:[%s11838_s17 + $0xc50] sm:$0xff] }
 0x426   : > { %9230 = vmatpush1.bf16.msra.mxu0 %v10520_v1  ;;  %v2653_v1 = vld [vmem:[%s11838_s17 + $0xb30] sm:$0xff] }
 0x427   : > { %9558 = vmatpush1.bf16.msra.mxu1 %v10522_v24  ;;  %9231 = vmatprep.subr.bf16.mxu0 %v10529_v40  ;;  %v2650_v24 = vld [vmem:[%s11838_s17 + $0xb18] sm:$0xff]  ;;  %v10577_v48 = vcombine.high %v2649_v49, %v2653_v1 }
 0x428   : > { %9559 = vmatprep.subr.bf16.mxu1 %v10531_v12  ;;  %v2654_v40 = vld [vmem:[%s11838_s17 + $0xb38] sm:$0xff]  ;;  %v10568_v12 = vcombine.low %v2641_v57, %v2645_v25 }
 0x429   : > { %v10579_v50 = vcombine.high %v2650_v24, %v2654_v40  ;;  %v10578_v8 = vcombine.low %v2650_v24, %v2654_v40  ;;  %v2697_v24 = vld [vmem:[%s11838_s17 + $0xc90] sm:$0xff] }
 0x42a   : > { %9232 = vmatpush1.bf16.msra.mxu0 %v10528_v55  ;;  %v2661_v55 = vld [vmem:[%s11838_s17 + $0xb70] sm:$0xff] }
 0x42b   : > { %9560 = vmatpush1.bf16.msra.mxu1 %v10530_v58  ;;  %9233 = vmatprep.subr.bf16.mxu0 %v10537_v45  ;;  %v2658_v58 = vld [vmem:[%s11838_s17 + $0xb58] sm:$0xff]  ;;  %v10585_v2 = vcombine.high %v2657_v52, %v2661_v55  ;;  %v2701_v40 = vld [vmem:[%s11838_s17 + $0xcb0] sm:$0xff] }
 0x42c   : > { %9561 = vmatprep.subr.bf16.mxu1 %v10539_v60  ;;  %v2662_v45 = vld [vmem:[%s11838_s17 + $0xb78] sm:$0xff]  ;;  %v10576_v60 = vcombine.low %v2649_v49, %v2653_v1 }
 0x42d   : > { %v10587_v3 = vcombine.high %v2658_v58, %v2662_v45  ;;  %v10586_v36 = vcombine.low %v2658_v58, %v2662_v45  ;;  %v2705_v45 = vld [vmem:[%s11838_s17 + $0xcd0] sm:$0xff] }
 0x42e   : > { %9234 = vmatpush1.bf16.msra.mxu0 %v10536_v5  ;;  %v2669_v5 = vld [vmem:[%s11838_s17 + $0xbb0] sm:$0xff] }
 0x42f   : > { %9562 = vmatpush1.bf16.msra.mxu1 %v10538_v6  ;;  %9235 = vmatprep.subr.bf16.mxu0 %v10545_v7  ;;  %v2666_v6 = vld [vmem:[%s11838_s17 + $0xb98] sm:$0xff]  ;;  %v10593_v31 = vcombine.high %v2665_v4, %v2669_v5 }
 0x430   : > { %9563 = vmatprep.subr.bf16.mxu1 %v10547_v35  ;;  %v2670_v7 = vld [vmem:[%s11838_s17 + $0xbb8] sm:$0xff]  ;;  %v10584_v35 = vcombine.low %v2657_v52, %v2661_v55  ;;  %v10625_v55 = vcombine.high %v2697_v24, %v2701_v40 }
 0x431   : > { %v10595_v54 = vcombine.high %v2666_v6, %v2670_v7  ;;  %v10594_v18 = vcombine.low %v2666_v6, %v2670_v7  ;;  %v2717_v6 = vld [vmem:[%s11838_s17 + $0xd30] sm:$0xff]  ;;  %v2714_v7 = vld [vmem:[%s11838_s17 + $0xd18] sm:$0xff] }
 0x432   : > { %9236 = vmatpush1.bf16.msra.mxu0 %v10544_v41  ;;  %v2677_v41 = vld [vmem:[%s11838_s17 + $0xbf0] sm:$0xff] }
 0x433   : > { %9564 = vmatpush1.bf16.msra.mxu1 %v10546_v11  ;;  %9237 = vmatprep.subr.bf16.mxu0 %v10553_v17  ;;  %v2674_v11 = vld [vmem:[%s11838_s17 + $0xbd8] sm:$0xff]  ;;  %v10601_v20 = vcombine.high %v2673_v10, %v2677_v41 }
 0x434   : > { %9565 = vmatprep.subr.bf16.mxu1 %v10555_v62  ;;  %v2678_v17 = vld [vmem:[%s11838_s17 + $0xbf8] sm:$0xff]  ;;  %v10592_v62 = vcombine.low %v2665_v4, %v2669_v5  ;;  %v2713_v5 = vld [vmem:[%s11838_s17 + $0xd10] sm:$0xff] }
 0x435   : > { %v10603_v32 = vcombine.high %v2674_v11, %v2678_v17  ;;  %v10602_v57 = vcombine.low %v2674_v11, %v2678_v17  ;;  %v2725_v11 = vld [vmem:[%s11838_s17 + $0xd70] sm:$0xff]  ;;  %v2722_v17 = vld [vmem:[%s11838_s17 + $0xd58] sm:$0xff] }
 0x436   : > { %9238 = vmatpush1.bf16.msra.mxu0 %v10552_v21  ;;  %v2685_v21 = vld [vmem:[%s11838_s17 + $0xc30] sm:$0xff] }
 0x437   : > { %9566 = vmatpush1.bf16.msra.mxu1 %v10554_v53  ;;  %9239 = vmatprep.subr.bf16.mxu0 %v10561_v28  ;;  %v2682_v53 = vld [vmem:[%s11838_s17 + $0xc18] sm:$0xff]  ;;  %v10609_v25 = vcombine.high %v2681_v16, %v2685_v21 }
 0x438   : > { %9567 = vmatprep.subr.bf16.mxu1 %v10563_v61  ;;  %v2686_v28 = vld [vmem:[%s11838_s17 + $0xc38] sm:$0xff]  ;;  %v10600_v61 = vcombine.low %v2673_v10, %v2677_v41  ;;  %v2721_v41 = vld [vmem:[%s11838_s17 + $0xd50] sm:$0xff] }
 0x439   : > { %v10611_v42 = vcombine.high %v2682_v53, %v2686_v28  ;;  %v10610_v49 = vcombine.low %v2682_v53, %v2686_v28  ;;  %v2729_v53 = vld [vmem:[%s11838_s17 + $0xd90] sm:$0xff] }
 0x43a   : > { %9240 = vmatpush1.bf16.msra.mxu0 %v10560_v37  ;;  %v2693_v37 = vld [vmem:[%s11838_s17 + $0xc70] sm:$0xff] }
 0x43b   : > { %9568 = vmatpush1.bf16.msra.mxu1 %v10562_v27  ;;  %9241 = vmatprep.subr.bf16.mxu0 %v10569_v13  ;;  %v10608_v27 = vcombine.low %v2681_v16, %v2685_v21  ;;  %v2690_v13 = vld [vmem:[%s11838_s17 + $0xc58] sm:$0xff]  ;;  %v10617_v1 = vcombine.high %v2689_v43, %v2693_v37  ;;  %v10649_v16 = vcombine.high %v2721_v41, %v2725_v11  ;;  %v2733_v28 = vld [vmem:[%s11838_s17 + $0xdb0] sm:$0xff] }
 0x43c   : > { %9569 = vmatprep.subr.bf16.mxu1 %v10571_v30  ;;  %v2694_v30 = vld [vmem:[%s11838_s17 + $0xc78] sm:$0xff] }
 0x43d   : > { %v10618_v52 = vcombine.low %v2690_v13, %v2694_v30 }
 0x43e   : > { %9242 = vmatpush1.bf16.msra.mxu0 %v10568_v12  ;;  %v10619_v12 = vcombine.high %v2690_v13, %v2694_v30  ;;  %v10657_v13 = vcombine.high %v2729_v53, %v2733_v28 }
 0x43f   : > { %9570 = vmatpush1.bf16.msra.mxu1 %v10570_v33  ;;  %9243 = vmatprep.subr.bf16.mxu0 %v10577_v48  ;;  %v2698_v33 = vld [vmem:[%s11838_s17 + $0xc98] sm:$0xff] }
 0x440   : > { %9571 = vmatprep.subr.bf16.mxu1 %v10579_v50  ;;  %v2702_v48 = vld [vmem:[%s11838_s17 + $0xcb8] sm:$0xff]  ;;  %v10616_v50 = vcombine.low %v2689_v43, %v2693_v37  ;;  %v10648_v37 = vcombine.low %v2721_v41, %v2725_v11 }
 0x441   : > { %v10627_v58 = vcombine.high %v2698_v33, %v2702_v48 }
 0x442   : > { %9244 = vmatpush1.bf16.msra.mxu0 %v10576_v60  ;;  %v2709_v60 = vld [vmem:[%s11838_s17 + $0xcf0] sm:$0xff] }
 0x443   : > { %9572 = vmatpush1.bf16.msra.mxu1 %v10578_v8  ;;  %9245 = vmatprep.subr.bf16.mxu0 %v10585_v2  ;;  %v2710_v8 = vld [vmem:[%s11838_s17 + $0xcf8] sm:$0xff]  ;;  %v10624_v2 = vcombine.low %v2697_v24, %v2701_v40  ;;  %v10633_v4 = vcombine.high %v2705_v45, %v2709_v60 }
 0x444   : > { %9573 = vmatprep.subr.bf16.mxu1 %v10587_v3  ;;  %v10626_v3 = vcombine.low %v2698_v33, %v2702_v48  ;;  %v2738_v33 = vld [vmem:[%s11838_s17 + $0xdd8] sm:$0xff] }
 0x445   : > { %v2742_v48 = vld [vmem:[%s11838_s17 + $0xdf8] sm:$0xff] }
 0x446   : > { %9246 = vmatpush1.bf16.msra.mxu0 %v10584_v35  ;;  %v2718_v35 = vld [vmem:[%s11838_s17 + $0xd38] sm:$0xff]  ;;  %v10666_v11 = vcombine.low %v2738_v33, %v2742_v48 }
 0x447   : > { %9574 = vmatpush1.bf16.msra.mxu1 %v10586_v36  ;;  %9247 = vmatprep.subr.bf16.mxu0 %v10593_v31  ;;  %v10632_v36 = vcombine.low %v2705_v45, %v2709_v60  ;;  %v10643_v10 = vcombine.high %v2714_v7, %v2718_v35 }
 0x448   : > { %9575 = vmatprep.subr.bf16.mxu1 %v10595_v54  ;;  %v10641_v54 = vcombine.high %v2713_v5, %v2717_v6 }
 0x44a   : > { %9248 = vmatpush1.bf16.msra.mxu0 %v10592_v62  ;;  %v2726_v62 = vld [vmem:[%s11838_s17 + $0xd78] sm:$0xff] }
 0x44b   : > { %9576 = vmatpush1.bf16.msra.mxu1 %v10594_v18  ;;  %9249 = vmatprep.subr.bf16.mxu0 %v10601_v20  ;;  %v10640_v18 = vcombine.low %v2713_v5, %v2717_v6  ;;  %v3319_v20 = vld [vmem:[%s268_s24] sm:$0xff]  ;;  %v10651_v21 = vcombine.high %v2722_v17, %v2726_v62  ;;  %v10667_v5 = vcombine.high %v2738_v33, %v2742_v48  ;;  %v2745_v6 = vld [vmem:[%s11838_s17 + $0xe10] sm:$0xff] }
 0x44c   : > { %9577 = vmatprep.subr.bf16.mxu1 %v10603_v32  ;;  %v10642_v32 = vcombine.low %v2714_v7, %v2718_v35  ;;  %v3328_v43 = vrot.slane %v3319_v20, %v11900_v59  ;;  %v2749_v7 = vld [vmem:[%s11838_s17 + $0xe30] sm:$0xff] }
 0x44d   : > { %v2777_v48 = vld [vmem:[%s11838_s17 + $0xf10] sm:$0xff] }
 0x44e   : > { %9250 = vmatpush1.bf16.msra.mxu0 %v10600_v61  ;;  %v3324_v61 = vrot.slane %v3319_v20, %v11949_v15  ;;  %v10650_v15 = vcombine.low %v2722_v17, %v2726_v62  ;;  %v10673_v17 = vcombine.high %v2745_v6, %v2749_v7 }
 0x44f   : > { %9578 = vmatpush1.bf16.msra.mxu1 %v10602_v57  ;;  %9260 = vmatprep.subr.bf16.mxu0 %v10609_v25  ;;  %v2730_v57 = vld [vmem:[%s11838_s17 + $0xd98] sm:$0xff] }
 0x450   : > { %9588 = vmatprep.subr.bf16.mxu1 %v10611_v42  ;;  %v2734_v25 = vld [vmem:[%s11838_s17 + $0xdb8] sm:$0xff]  ;;  %v3332_v42 = vrot.slane %v3319_v20, %v12041_v51  ;;  %v2741_v51 = vld [vmem:[%s11838_s17 + $0xdf0] sm:$0xff] }
 0x451   : > { %9252 = vmatmul.mubr.bf16.vlgmr.msra.gmra.mrb[20].mxu0 %v12162_v38 }
 0x452   : > { %9580 = vmatmul.mubr.bf16.vlgmr.msra.gmra.mrb[20].mxu1 %v12162_v38  ;;  %9261 = vmatpush1.bf16.msra.mxu0 %v10608_v27  ;;  %v2706_v38 = vld [vmem:[%s11838_s17 + $0xcd8] sm:$0xff]  ;;  %v3336_v27 = vrot.slane %v3319_v20, %v11954_v22  ;;  %v10656_v22 = vcombine.low %v2729_v53, %v2733_v28  ;;  %v2757_v20 = vld [vmem:[%s11838_s17 + $0xe70] sm:$0xff] }
 0x453   : > { %9292 = vmatprep.mubr.bf16.mxu0 %v12166_v44  ;;  %9589 = vmatpush1.bf16.msra.mxu1 %v10610_v49  ;;  %v10634_v31 = vcombine.low %v2706_v38, %v2710_v8  ;;  %v10659_v49 = vcombine.high %v2730_v57, %v2734_v25 }
 0x454   : > { %9620 = vmatprep.mubr.bf16.mxu1 %v12166_v44  ;;  %9262 = vmatprep.subr.bf16.mxu0 %v10617_v1  ;;  %v10635_v44 = vcombine.high %v2706_v38, %v2710_v8  ;;  %v2737_v1 = vld [vmem:[%s11838_s17 + $0xdd0] sm:$0xff]  ;;  %v10658_v8 = vcombine.low %v2730_v57, %v2734_v25 }
 0x455   : > { %9590 = vmatprep.subr.bf16.mxu1 %v10619_v12  ;;  %v2761_v57 = vld [vmem:[%s11838_s17 + $0xe90] sm:$0xff] }
 0x456   : > { %9263 = vmatpush1.bf16.msra.mxu0 %v10616_v50  ;;  %v2765_v25 = vld [vmem:[%s11838_s17 + $0xeb0] sm:$0xff] }
 0x457   : > { %9591 = vmatpush1.bf16.msra.mxu1 %v10618_v52  ;;  %9264 = vmatprep.subr.bf16.mxu0 %v10625_v55 }
 0x458   : > { %9592 = vmatprep.subr.bf16.mxu1 %v10627_v58 }
 0x45a   : > { %9265 = vmatpush1.bf16.msra.mxu0 %v10624_v2  ;;  %v10665_v2 = vcombine.high %v2737_v1, %v2741_v51 }
 0x45b   : > { %9593 = vmatpush1.bf16.msra.mxu1 %v10626_v3  ;;  %9266 = vmatprep.subr.bf16.mxu0 %v10633_v4 }
 0x45c   : > { %9594 = vmatprep.subr.bf16.mxu1 %v10635_v44 }
 0x45e   : > { %9267 = vmatpush1.bf16.msra.mxu0 %v10632_v36  ;;  %v2746_v36 = vld [vmem:[%s11838_s17 + $0xe18] sm:$0xff] }
 0x45f   : > { %9595 = vmatpush1.bf16.msra.mxu1 %v10634_v31  ;;  %9268 = vmatprep.subr.bf16.mxu0 %v10641_v54  ;;  %v2750_v31 = vld [vmem:[%s11838_s17 + $0xe38] sm:$0xff] }
 0x460   : > { %9596 = vmatprep.subr.bf16.mxu1 %v10643_v10  ;;  %v10664_v10 = vcombine.low %v2737_v1, %v2741_v51  ;;  %v10675_v62 = vcombine.high %v2746_v36, %v2750_v31  ;;  %v10674_v53 = vcombine.low %v2746_v36, %v2750_v31  ;;  %v2770_v1 = vld [vmem:[%s11838_s17 + $0xed8] sm:$0xff] }
 0x461   : > { %v2774_v51 = vld [vmem:[%s11838_s17 + $0xef8] sm:$0xff] }
 0x462   : > { %9269 = vmatpush1.bf16.msra.mxu0 %v10640_v18  ;;  %v2753_v18 = vld [vmem:[%s11838_s17 + $0xe50] sm:$0xff]  ;;  %v10699_v33 = vcombine.high %v2770_v1, %v2774_v51  ;;  %v2798_v36 = vld [vmem:[%s11838_s17 + $0xfb8] sm:$0xff] }
 0x463   : > { %9597 = vmatpush1.bf16.msra.mxu1 %v10642_v32  ;;  %9270 = vmatprep.subr.bf16.mxu0 %v10649_v16  ;;  %v2754_v32 = vld [vmem:[%s11838_s17 + $0xe58] sm:$0xff]  ;;  %v10681_v28 = vcombine.high %v2753_v18, %v2757_v20 }
 0x464   : > { %v8802_v30 = vpop.f32.mrb[16].mxu0  ;;  %9598 = vmatprep.subr.bf16.mxu1 %v10651_v21  ;;  %v2758_v16 = vld [vmem:[%s11838_s17 + $0xe78] sm:$0xff]  ;;  %v10672_v21 = vcombine.low %v2745_v6, %v2749_v7  ;;  %v2793_v6 = vld [vmem:[%s11838_s17 + $0xf90] sm:$0xff] }
 0x465   : > { %v11256_v24 = vadd.f32 %v8802_v30, %v3324_v61  ;;  %v9130_v40 = vpop.f32.mrb[16].mxu1  ;;  %v8804_v12 = vpop.f32.mrb[17].mxu0  ;;  %v10683_v61 = vcombine.high %v2754_v32, %v2758_v16  ;;  %v2769_v30 = vld [vmem:[%s11838_s17 + $0xed0] sm:$0xff] }
 0x466   : > { %v11258_v59 = vadd.f32 %v9130_v40, %v3332_v42  ;;  %v11257_v50 = vadd.f32 %v8804_v12, %v3328_v43  ;;  %v9132_v52 = vpop.f32.mrb[17].mxu1  ;;  %v8806_v55 = vpop.f32.mrb[18].mxu0  ;;  %9271 = vmatpush1.bf16.msra.mxu0 %v10648_v37  ;;  %v2762_v42 = vld [vmem:[%s11838_s17 + $0xe98] sm:$0xff]  ;;  %v10680_v37 = vcombine.low %v2753_v18, %v2757_v20  ;;  %v2797_v7 = vld [vmem:[%s11838_s17 + $0xfb0] sm:$0xff] }
 0x467   : > { %v9793_v58 = vmax.f32 %v11256_v24, 0.0  ;;  %v11259_v45 = vadd.f32 %v9132_v52, %v3336_v27  ;;  %v9134_v60 = vpop.f32.mrb[18].mxu1  ;;  %9599 = vmatpush1.bf16.msra.mxu1 %v10650_v15  ;;  %v8807_v38 = vpop.f32.mrb[19].mxu0  ;;  %9272 = vmatprep.subr.bf16.mxu0 %v10657_v13  ;;  %v2766_v43 = vld [vmem:[%s11838_s17 + $0xeb8] sm:$0xff]  ;;  %v10682_v27 = vcombine.low %v2754_v32, %v2758_v16  ;;  %v10689_v15 = vcombine.high %v2761_v57, %v2765_v25 }
 0x468   : > { %v9795_v3 = vmax.f32 %v11258_v59, 0.0  ;;  %v9794_v4 = vmax.f32 %v11257_v50, 0.0  ;;  %v9135_v44 = vpop.f32.mrb[19].mxu1  ;;  %9600 = vmatprep.subr.bf16.mxu1 %v10659_v49  ;;  %v10691_v13 = vcombine.high %v2762_v42, %v2766_v43  ;;  %v2773_v49 = vld [vmem:[%s11838_s17 + $0xef0] sm:$0xff]  ;;  %v10688_v24 = vcombine.low %v2761_v57, %v2765_v25  ;;  %v2778_v50 = vld [vmem:[%s11838_s17 + $0xf18] sm:$0xff] }
 0x469   : > { %v9796_v35 = vmax.f32 %v11259_v45, 0.0  ;;  %v10690_v40 = vcombine.low %v2762_v42, %v2766_v43  ;;  %v10697_v12 = vcombine.high %v2769_v30, %v2773_v49  ;;  %v2781_v59 = vld [vmem:[%s11838_s17 + $0xf30] sm:$0xff]  ;;  %v2782_v52 = vld [vmem:[%s11838_s17 + $0xf38] sm:$0xff]  ;;  %v10696_v55 = vcombine.low %v2769_v30, %v2773_v49 }
 0x46a   : > { %v11252_v54 = vpack.c.bf16 %v9794_v4, %v9793_v58  ;;  %9273 = vmatpush1.bf16.msra.mxu0 %v10656_v22  ;;  %v10698_v22 = vcombine.low %v2770_v1, %v2774_v51  ;;  %v10705_v58 = vcombine.high %v2777_v48, %v2781_v59  ;;  %v10707_v45 = vcombine.high %v2778_v50, %v2782_v52  ;;  %v2785_v60 = vld [vmem:[%s11838_s17 + $0xf50] sm:$0xff]  ;;  %v2806_v18 = vld [vmem:[%s11838_s17 + $0xff8] sm:$0xff] }
 0x46b   : > { %v11253_v41 = vpack.c.bf16 %v9796_v35, %v9795_v3  ;;  %9601 = vmatpush1.bf16.msra.mxu1 %v10658_v8  ;;  %9274 = vmatprep.subr.bf16.mxu0 %v10665_v2  ;;  %v2789_v38 = vld [vmem:[%s11838_s17 + $0xf70] sm:$0xff]  ;;  %v2786_v8 = vld [vmem:[%s11838_s17 + $0xf58] sm:$0xff]  ;;  %v10704_v3 = vcombine.low %v2777_v48, %v2781_v59  ;;  %v10706_v4 = vcombine.low %v2778_v50, %v2782_v52 }
 0x46c   : > { %9833 = vst [vmem:[%s12824_s25] sm:$0xff] %v11252_v54  ;;  %9602 = vmatprep.subr.bf16.mxu1 %v10667_v5  ;;  %v2790_v2 = vld [vmem:[%s11838_s17 + $0xf78] sm:$0xff]  ;;  %v10713_v44 = vcombine.high %v2785_v60, %v2789_v38  ;;  %v10712_v31 = vcombine.low %v2785_v60, %v2789_v38  ;;  %v10720_v20 = vcombine.low %v2793_v6, %v2797_v7 }
 0x46d   : > { %9834 = vst [vmem:[%s12824_s25 + $0x8] sm:$0xff] %v11253_v41  ;;  %v10715_v5 = vcombine.high %v2786_v8, %v2790_v2  ;;  %v2794_v35 = vld [vmem:[%s11838_s17 + $0xf98] sm:$0xff]  ;;  %v10714_v54 = vcombine.low %v2786_v8, %v2790_v2  ;;  %v2841_v2 = vld [vmem:[%s11838_s17 + $0x1110] sm:$0xff] }
 0x46e   : > { %9275 = vmatpush1.bf16.msra.mxu0 %v10664_v10  ;;  %v10721_v10 = vcombine.high %v2793_v6, %v2797_v7  ;;  %v10723_v41 = vcombine.high %v2794_v35, %v2798_v36  ;;  %v10722_v32 = vcombine.low %v2794_v35, %v2798_v36  ;;  %v2814_v57 = vld [vmem:[%s11838_s17 + $0x1038] sm:$0xff]  ;;  %v2849_v36 = vld [vmem:[%s11838_s17 + $0x1150] sm:$0xff] }
 0x46f   : > { %9603 = vmatpush1.bf16.msra.mxu1 %v10666_v11  ;;  %9276 = vmatprep.subr.bf16.mxu0 %v10673_v17  ;;  %v2801_v11 = vld [vmem:[%s11838_s17 + $0xfd0] sm:$0xff]  ;;  %v2818_v30 = vld [vmem:[%s11838_s17 + $0x1058] sm:$0xff] }
 0x470   : > { %9604 = vmatprep.subr.bf16.mxu1 %v10675_v62  ;;  %v2805_v17 = vld [vmem:[%s11838_s17 + $0xff0] sm:$0xff]  ;;  %v2802_v62 = vld [vmem:[%s11838_s17 + $0xfd8] sm:$0xff] }
 0x471   : > { %v10729_v16 = vcombine.high %v2801_v11, %v2805_v17  ;;  %v10728_v25 = vcombine.low %v2801_v11, %v2805_v17  ;;  %v10730_v42 = vcombine.low %v2802_v62, %v2806_v18  ;;  %v2822_v49 = vld [vmem:[%s11838_s17 + $0x1078] sm:$0xff] }
 0x472   : > { %9277 = vmatpush1.bf16.msra.mxu0 %v10672_v21  ;;  %v10731_v21 = vcombine.high %v2802_v62, %v2806_v18  ;;  %v2830_v48 = vld [vmem:[%s11838_s17 + $0x10b8] sm:$0xff]  ;;  %v10746_v50 = vcombine.low %v2818_v30, %v2822_v49  ;;  %v2857_v18 = vld [vmem:[%s11838_s17 + $0x1190] sm:$0xff] }
 0x473   : > { %9605 = vmatpush1.bf16.msra.mxu1 %v10674_v53  ;;  %9278 = vmatprep.subr.bf16.mxu0 %v10681_v28  ;;  %v2809_v53 = vld [vmem:[%s11838_s17 + $0x1010] sm:$0xff] }
 0x474   : > { %9606 = vmatprep.subr.bf16.mxu1 %v10683_v61  ;;  %v2813_v28 = vld [vmem:[%s11838_s17 + $0x1030] sm:$0xff]  ;;  %v2810_v61 = vld [vmem:[%s11838_s17 + $0x1018] sm:$0xff] }
 0x475   : > { %v10737_v43 = vcombine.high %v2809_v53, %v2813_v28  ;;  %v10738_v1 = vcombine.low %v2810_v61, %v2814_v57 }
 0x476   : > { %9279 = vmatpush1.bf16.msra.mxu0 %v10680_v37  ;;  %v10739_v37 = vcombine.high %v2810_v61, %v2814_v57  ;;  %v2865_v57 = vld [vmem:[%s11838_s17 + $0x11d0] sm:$0xff] }
 0x477   : > { %9607 = vmatpush1.bf16.msra.mxu1 %v10682_v27  ;;  %9280 = vmatprep.subr.bf16.mxu0 %v10689_v15  ;;  %v2817_v27 = vld [vmem:[%s11838_s17 + $0x1050] sm:$0xff] }
 0x478   : > { %9608 = vmatprep.subr.bf16.mxu1 %v10691_v13  ;;  %v2821_v15 = vld [vmem:[%s11838_s17 + $0x1070] sm:$0xff]  ;;  %v10736_v13 = vcombine.low %v2809_v53, %v2813_v28 }
 0x479   : > { %v10745_v51 = vcombine.high %v2817_v27, %v2821_v15  ;;  %v10744_v59 = vcombine.low %v2817_v27, %v2821_v15 }
 0x47a   : > { %9281 = vmatpush1.bf16.msra.mxu0 %v10688_v24  ;;  %v2825_v24 = vld [vmem:[%s11838_s17 + $0x1090] sm:$0xff] }
 0x47b   : > { %9609 = vmatpush1.bf16.msra.mxu1 %v10690_v40  ;;  %9282 = vmatprep.subr.bf16.mxu0 %v10697_v12  ;;  %v2829_v40 = vld [vmem:[%s11838_s17 + $0x10b0] sm:$0xff]  ;;  %v10747_v12 = vcombine.high %v2818_v30, %v2822_v49 }
 0x47c   : > { %9610 = vmatprep.subr.bf16.mxu1 %v10699_v33  ;;  %v2826_v33 = vld [vmem:[%s11838_s17 + $0x1098] sm:$0xff]  ;;  %v10753_v52 = vcombine.high %v2825_v24, %v2829_v40  ;;  %v10752_v60 = vcombine.low %v2825_v24, %v2829_v40  ;;  %v2873_v30 = vld [vmem:[%s11838_s17 + $0x1210] sm:$0xff] }
 0x47d   : > { %v10754_v38 = vcombine.low %v2826_v33, %v2830_v48  ;;  %v2877_v49 = vld [vmem:[%s11838_s17 + $0x1230] sm:$0xff] }
 0x47e   : > { %9283 = vmatpush1.bf16.msra.mxu0 %v10696_v55  ;;  %v10755_v55 = vcombine.high %v2826_v33, %v2830_v48  ;;  %v2881_v48 = vld [vmem:[%s11838_s17 + $0x1250] sm:$0xff] }
 0x47f   : > { %9611 = vmatpush1.bf16.msra.mxu1 %v10698_v22  ;;  %9284 = vmatprep.subr.bf16.mxu0 %v10705_v58  ;;  %v2833_v22 = vld [vmem:[%s11838_s17 + $0x10d0] sm:$0xff] }
 0x480   : > { %9612 = vmatprep.subr.bf16.mxu1 %v10707_v45  ;;  %v2837_v58 = vld [vmem:[%s11838_s17 + $0x10f0] sm:$0xff]  ;;  %v2834_v45 = vld [vmem:[%s11838_s17 + $0x10d8] sm:$0xff] }
 0x481   : > { %v10761_v8 = vcombine.high %v2833_v22, %v2837_v58 }
 0x482   : > { %9285 = vmatpush1.bf16.msra.mxu0 %v10704_v3  ;;  %v2845_v3 = vld [vmem:[%s11838_s17 + $0x1130] sm:$0xff] }
 0x483   : > { %9613 = vmatpush1.bf16.msra.mxu1 %v10706_v4  ;;  %9286 = vmatprep.subr.bf16.mxu0 %v10713_v44  ;;  %v2842_v4 = vld [vmem:[%s11838_s17 + $0x1118] sm:$0xff]  ;;  %v10769_v7 = vcombine.high %v2841_v2, %v2845_v3 }
 0x484   : > { %9614 = vmatprep.subr.bf16.mxu1 %v10715_v5  ;;  %v2846_v44 = vld [vmem:[%s11838_s17 + $0x1138] sm:$0xff]  ;;  %v10760_v5 = vcombine.low %v2833_v22, %v2837_v58 }
 0x485   : > { %v10771_v35 = vcombine.high %v2842_v4, %v2846_v44  ;;  %v10770_v11 = vcombine.low %v2842_v4, %v2846_v44  ;;  %v2897_v44 = vld [vmem:[%s11838_s17 + $0x12d0] sm:$0xff] }
 0x486   : > { %9287 = vmatpush1.bf16.msra.mxu0 %v10712_v31  ;;  %v2853_v31 = vld [vmem:[%s11838_s17 + $0x1170] sm:$0xff] }
 0x487   : > { %9615 = vmatpush1.bf16.msra.mxu1 %v10714_v54  ;;  %9288 = vmatprep.subr.bf16.mxu0 %v10721_v10  ;;  %v2850_v54 = vld [vmem:[%s11838_s17 + $0x1158] sm:$0xff]  ;;  %v10777_v17 = vcombine.high %v2849_v36, %v2853_v31 }
 0x488   : > { %9616 = vmatprep.subr.bf16.mxu1 %v10723_v41  ;;  %v2854_v10 = vld [vmem:[%s11838_s17 + $0x1178] sm:$0xff]  ;;  %v10768_v41 = vcombine.low %v2841_v2, %v2845_v3 }
 0x489   : > { %v10779_v62 = vcombine.high %v2850_v54, %v2854_v10  ;;  %v10778_v53 = vcombine.low %v2850_v54, %v2854_v10  ;;  %v2905_v10 = vld [vmem:[%s11838_s17 + $0x1310] sm:$0xff] }
 0x48a   : > { %9289 = vmatpush1.bf16.msra.mxu0 %v10720_v20  ;;  %v2861_v20 = vld [vmem:[%s11838_s17 + $0x11b0] sm:$0xff] }
 0x48b   : > { %9617 = vmatpush1.bf16.msra.mxu1 %v10722_v32  ;;  %9290 = vmatprep.subr.bf16.mxu0 %v10729_v16  ;;  %v2858_v32 = vld [vmem:[%s11838_s17 + $0x1198] sm:$0xff]  ;;  %v10785_v28 = vcombine.high %v2857_v18, %v2861_v20 }
 0x48c   : > { %9618 = vmatprep.subr.bf16.mxu1 %v10731_v21  ;;  %v2862_v16 = vld [vmem:[%s11838_s17 + $0x11b8] sm:$0xff]  ;;  %v10776_v21 = vcombine.low %v2849_v36, %v2853_v31 }
 0x48d   : > { %v10787_v61 = vcombine.high %v2858_v32, %v2862_v16  ;;  %v10786_v27 = vcombine.low %v2858_v32, %v2862_v16  ;;  %v2913_v16 = vld [vmem:[%s11838_s17 + $0x1350] sm:$0xff] }
 0x48e   : > { %9291 = vmatpush1.bf16.msra.mxu0 %v10728_v25  ;;  %v2869_v25 = vld [vmem:[%s11838_s17 + $0x11f0] sm:$0xff] }
 0x48f   : > { %9619 = vmatpush1.bf16.msra.mxu1 %v10730_v42  ;;  %9301 = vmatprep.subr.bf16.mxu0 %v10737_v43  ;;  %v2866_v42 = vld [vmem:[%s11838_s17 + $0x11d8] sm:$0xff]  ;;  %v10793_v15 = vcombine.high %v2865_v57, %v2869_v25  ;;  %v10792_v24 = vcombine.low %v2865_v57, %v2869_v25 }
 0x490   : > { %9629 = vmatprep.subr.bf16.mxu1 %v10739_v37  ;;  %v2870_v43 = vld [vmem:[%s11838_s17 + $0x11f8] sm:$0xff]  ;;  %v10784_v37 = vcombine.low %v2857_v18, %v2861_v20 }
 0x491   : > { %9293 = vmatmul.mubr.bf16.vlgmr.msra.gmra.mrb[20].mxu0 %v12253_v9  ;;  %v10794_v40 = vcombine.low %v2866_v42, %v2870_v43 }
 0x492   : > { %9621 = vmatmul.mubr.bf16.vlgmr.msra.gmra.mrb[20].mxu1 %v12253_v9  ;;  %9302 = vmatpush1.bf16.msra.mxu0 %v10736_v13  ;;  %v2838_v9 = vld [vmem:[%s11838_s17 + $0x10f8] sm:$0xff]  ;;  %v10795_v13 = vcombine.high %v2866_v42, %v2870_v43  ;;  %v2921_v43 = vld [vmem:[%s11838_s17 + $0x1390] sm:$0xff] }
 0x493   : > { %9333 = vmatprep.mubr.bf16.mxu0 %v12257_v19  ;;  %9630 = vmatpush1.bf16.msra.mxu1 %v10738_v1  ;;  %v10762_v6 = vcombine.low %v2834_v45, %v2838_v9  ;;  %v2874_v1 = vld [vmem:[%s11838_s17 + $0x1218] sm:$0xff] }
 0x494   : > { %9661 = vmatprep.mubr.bf16.mxu1 %v12257_v19  ;;  %9303 = vmatprep.subr.bf16.mxu0 %v10745_v51  ;;  %v10763_v19 = vcombine.high %v2834_v45, %v2838_v9  ;;  %v2878_v51 = vld [vmem:[%s11838_s17 + $0x1238] sm:$0xff]  ;;  %v2889_v9 = vld [vmem:[%s11838_s17 + $0x1290] sm:$0xff] }
 0x495   : > { %9631 = vmatprep.subr.bf16.mxu1 %v10747_v12  ;;  %v10801_v12 = vcombine.high %v2873_v30, %v2877_v49  ;;  %v10803_v33 = vcombine.high %v2874_v1, %v2878_v51  ;;  %v10802_v22 = vcombine.low %v2874_v1, %v2878_v51  ;;  %v2929_v51 = vld [vmem:[%s11838_s17 + $0x13d0] sm:$0xff] }
 0x496   : > { %9304 = vmatpush1.bf16.msra.mxu0 %v10744_v59  ;;  %v2885_v59 = vld [vmem:[%s11838_s17 + $0x1270] sm:$0xff] }
 0x497   : > { %9632 = vmatpush1.bf16.msra.mxu1 %v10746_v50  ;;  %9305 = vmatprep.subr.bf16.mxu0 %v10753_v52  ;;  %v2882_v50 = vld [vmem:[%s11838_s17 + $0x1258] sm:$0xff]  ;;  %v10809_v58 = vcombine.high %v2881_v48, %v2885_v59 }
 0x498   : > { %9633 = vmatprep.subr.bf16.mxu1 %v10755_v55  ;;  %v2886_v52 = vld [vmem:[%s11838_s17 + $0x1278] sm:$0xff]  ;;  %v10800_v55 = vcombine.low %v2873_v30, %v2877_v49 }
 0x499   : > { %v10811_v45 = vcombine.high %v2882_v50, %v2886_v52  ;;  %v10810_v2 = vcombine.low %v2882_v50, %v2886_v52  ;;  %v2937_v52 = vld [vmem:[%s11838_s17 + $0x1410] sm:$0xff] }
 0x49a   : > { %9306 = vmatpush1.bf16.msra.mxu0 %v10752_v60  ;;  %v2893_v60 = vld [vmem:[%s11838_s17 + $0x12b0] sm:$0xff] }
 0x49b   : > { %9634 = vmatpush1.bf16.msra.mxu1 %v10754_v38  ;;  %9307 = vmatprep.subr.bf16.mxu0 %v10761_v8  ;;  %v2890_v38 = vld [vmem:[%s11838_s17 + $0x1298] sm:$0xff]  ;;  %v10817_v3 = vcombine.high %v2889_v9, %v2893_v60 }
 0x49c   : > { %9635 = vmatprep.subr.bf16.mxu1 %v10763_v19  ;;  %v2894_v8 = vld [vmem:[%s11838_s17 + $0x12b8] sm:$0xff]  ;;  %v10808_v19 = vcombine.low %v2881_v48, %v2885_v59 }
 0x49d   : > { %v10819_v4 = vcombine.high %v2890_v38, %v2894_v8  ;;  %v10818_v36 = vcombine.low %v2890_v38, %v2894_v8  ;;  %v2945_v8 = vld [vmem:[%s11838_s17 + $0x1450] sm:$0xff] }
 0x49e   : > { %9308 = vmatpush1.bf16.msra.mxu0 %v10760_v5  ;;  %v2901_v5 = vld [vmem:[%s11838_s17 + $0x12f0] sm:$0xff] }
 0x49f   : > { %9636 = vmatpush1.bf16.msra.mxu1 %v10762_v6  ;;  %9309 = vmatprep.subr.bf16.mxu0 %v10769_v7  ;;  %v2898_v6 = vld [vmem:[%s11838_s17 + $0x12d8] sm:$0xff]  ;;  %v10825_v31 = vcombine.high %v2897_v44, %v2901_v5 }
 0x4a0   : > { %9637 = vmatprep.subr.bf16.mxu1 %v10771_v35  ;;  %v2902_v7 = vld [vmem:[%s11838_s17 + $0x12f8] sm:$0xff]  ;;  %v10816_v35 = vcombine.low %v2889_v9, %v2893_v60 }
 0x4a1   : > { %v10827_v54 = vcombine.high %v2898_v6, %v2902_v7  ;;  %v10826_v18 = vcombine.low %v2898_v6, %v2902_v7  ;;  %v2953_v6 = vld [vmem:[%s11838_s17 + $0x1490] sm:$0xff] }
 0x4a2   : > { %9310 = vmatpush1.bf16.msra.mxu0 %v10768_v41  ;;  %v2909_v41 = vld [vmem:[%s11838_s17 + $0x1330] sm:$0xff] }
 0x4a3   : > { %9638 = vmatpush1.bf16.msra.mxu1 %v10770_v11  ;;  %9311 = vmatprep.subr.bf16.mxu0 %v10777_v17  ;;  %v2906_v11 = vld [vmem:[%s11838_s17 + $0x1318] sm:$0xff]  ;;  %v10833_v20 = vcombine.high %v2905_v10, %v2909_v41  ;;  %v2957_v7 = vld [vmem:[%s11838_s17 + $0x14b0] sm:$0xff] }
 0x4a4   : > { %9639 = vmatprep.subr.bf16.mxu1 %v10779_v62  ;;  %v2910_v17 = vld [vmem:[%s11838_s17 + $0x1338] sm:$0xff]  ;;  %v10824_v62 = vcombine.low %v2897_v44, %v2901_v5 }
 0x4a5   : > { %v10835_v32 = vcombine.high %v2906_v11, %v2910_v17  ;;  %v10834_v57 = vcombine.low %v2906_v11, %v2910_v17  ;;  %v2961_v17 = vld [vmem:[%s11838_s17 + $0x14d0] sm:$0xff] }
 0x4a6   : > { %9312 = vmatpush1.bf16.msra.mxu0 %v10776_v21  ;;  %v2917_v21 = vld [vmem:[%s11838_s17 + $0x1370] sm:$0xff] }
 0x4a7   : > { %9640 = vmatpush1.bf16.msra.mxu1 %v10778_v53  ;;  %9313 = vmatprep.subr.bf16.mxu0 %v10785_v28  ;;  %v2914_v53 = vld [vmem:[%s11838_s17 + $0x1358] sm:$0xff]  ;;  %v10841_v25 = vcombine.high %v2913_v16, %v2917_v21 }
 0x4a8   : > { %9641 = vmatprep.subr.bf16.mxu1 %v10787_v61  ;;  %v2918_v28 = vld [vmem:[%s11838_s17 + $0x1378] sm:$0xff]  ;;  %v10832_v61 = vcombine.low %v2905_v10, %v2909_v41  ;;  %v10881_v41 = vcombine.high %v2953_v6, %v2957_v7 }
 0x4a9   : > { %v10843_v42 = vcombine.high %v2914_v53, %v2918_v28  ;;  %v10842_v30 = vcombine.low %v2914_v53, %v2918_v28  ;;  %v2973_v53 = vld [vmem:[%s11838_s17 + $0x1530] sm:$0xff]  ;;  %v2970_v28 = vld [vmem:[%s11838_s17 + $0x1518] sm:$0xff] }
 0x4aa   : > { %9314 = vmatpush1.bf16.msra.mxu0 %v10784_v37  ;;  %v2925_v37 = vld [vmem:[%s11838_s17 + $0x13b0] sm:$0xff] }
 0x4ab   : > { %9642 = vmatpush1.bf16.msra.mxu1 %v10786_v27  ;;  %9315 = vmatprep.subr.bf16.mxu0 %v10793_v15  ;;  %v2922_v27 = vld [vmem:[%s11838_s17 + $0x1398] sm:$0xff]  ;;  %v10849_v49 = vcombine.high %v2921_v43, %v2925_v37 }
 0x4ac   : > { %9643 = vmatprep.subr.bf16.mxu1 %v10795_v13  ;;  %v2926_v15 = vld [vmem:[%s11838_s17 + $0x13b8] sm:$0xff]  ;;  %v10840_v13 = vcombine.low %v2913_v16, %v2917_v21  ;;  %v2969_v21 = vld [vmem:[%s11838_s17 + $0x1510] sm:$0xff] }
 0x4ad   : > { %v10851_v1 = vcombine.high %v2922_v27, %v2926_v15  ;;  %v10850_v48 = vcombine.low %v2922_v27, %v2926_v15  ;;  %v2981_v27 = vld [vmem:[%s11838_s17 + $0x1570] sm:$0xff]  ;;  %v2978_v15 = vld [vmem:[%s11838_s17 + $0x1558] sm:$0xff] }
 0x4ae   : > { %9316 = vmatpush1.bf16.msra.mxu0 %v10792_v24  ;;  %v2933_v24 = vld [vmem:[%s11838_s17 + $0x13f0] sm:$0xff] }
 0x4af   : > { %9644 = vmatpush1.bf16.msra.mxu1 %v10794_v40  ;;  %9317 = vmatprep.subr.bf16.mxu0 %v10801_v12  ;;  %v2930_v40 = vld [vmem:[%s11838_s17 + $0x13d8] sm:$0xff]  ;;  %v10857_v59 = vcombine.high %v2929_v51, %v2933_v24 }
 0x4b0   : > { %9645 = vmatprep.subr.bf16.mxu1 %v10803_v33  ;;  %v2934_v12 = vld [vmem:[%s11838_s17 + $0x13f8] sm:$0xff]  ;;  %v10848_v33 = vcombine.low %v2921_v43, %v2925_v37  ;;  %v2977_v37 = vld [vmem:[%s11838_s17 + $0x1550] sm:$0xff] }
 0x4b1   : > { %v10859_v50 = vcombine.high %v2930_v40, %v2934_v12  ;;  %v10858_v9 = vcombine.low %v2930_v40, %v2934_v12  ;;  %v2989_v40 = vld [vmem:[%s11838_s17 + $0x15b0] sm:$0xff]  ;;  %v2986_v12 = vld [vmem:[%s11838_s17 + $0x1598] sm:$0xff] }
 0x4b2   : > { %9318 = vmatpush1.bf16.msra.mxu0 %v10800_v55  ;;  %v2941_v55 = vld [vmem:[%s11838_s17 + $0x1430] sm:$0xff] }
 0x4b3   : > { %9646 = vmatpush1.bf16.msra.mxu1 %v10802_v22  ;;  %9319 = vmatprep.subr.bf16.mxu0 %v10809_v58  ;;  %v2938_v22 = vld [vmem:[%s11838_s17 + $0x1418] sm:$0xff]  ;;  %v10865_v60 = vcombine.high %v2937_v52, %v2941_v55 }
 0x4b4   : > { %9647 = vmatprep.subr.bf16.mxu1 %v10811_v45  ;;  %v2942_v58 = vld [vmem:[%s11838_s17 + $0x1438] sm:$0xff]  ;;  %v10856_v45 = vcombine.low %v2929_v51, %v2933_v24  ;;  %v2985_v24 = vld [vmem:[%s11838_s17 + $0x1590] sm:$0xff] }
 0x4b5   : > { %v10867_v38 = vcombine.high %v2938_v22, %v2942_v58  ;;  %v10866_v44 = vcombine.low %v2938_v22, %v2942_v58  ;;  %v2997_v22 = vld [vmem:[%s11838_s17 + $0x15f0] sm:$0xff]  ;;  %v2994_v58 = vld [vmem:[%s11838_s17 + $0x15d8] sm:$0xff] }
 0x4b6   : > { %9320 = vmatpush1.bf16.msra.mxu0 %v10808_v19  ;;  %v2949_v19 = vld [vmem:[%s11838_s17 + $0x1470] sm:$0xff] }
 0x4b7   : > { %9648 = vmatpush1.bf16.msra.mxu1 %v10810_v2  ;;  %9321 = vmatprep.subr.bf16.mxu0 %v10817_v3  ;;  %v10864_v2 = vcombine.low %v2937_v52, %v2941_v55  ;;  %v2946_v3 = vld [vmem:[%s11838_s17 + $0x1458] sm:$0xff]  ;;  %v10873_v5 = vcombine.high %v2945_v8, %v2949_v19  ;;  %v2993_v55 = vld [vmem:[%s11838_s17 + $0x15d0] sm:$0xff] }
 0x4b8   : > { %9649 = vmatprep.subr.bf16.mxu1 %v10819_v4  ;;  %v2950_v4 = vld [vmem:[%s11838_s17 + $0x1478] sm:$0xff] }
 0x4b9   : > { %v10874_v10 = vcombine.low %v2946_v3, %v2950_v4 }
 0x4ba   : > { %9322 = vmatpush1.bf16.msra.mxu0 %v10816_v35  ;;  %v10875_v35 = vcombine.high %v2946_v3, %v2950_v4  ;;  %v3002_v3 = vld [vmem:[%s11838_s17 + $0x1618] sm:$0xff] }
 0x4bb   : > { %9650 = vmatpush1.bf16.msra.mxu1 %v10818_v36  ;;  %9323 = vmatprep.subr.bf16.mxu0 %v10825_v31  ;;  %v2954_v36 = vld [vmem:[%s11838_s17 + $0x1498] sm:$0xff] }
 0x4bc   : > { %9651 = vmatprep.subr.bf16.mxu1 %v10827_v54  ;;  %v2958_v31 = vld [vmem:[%s11838_s17 + $0x14b8] sm:$0xff]  ;;  %v10872_v54 = vcombine.low %v2945_v8, %v2949_v19  ;;  %v3001_v19 = vld [vmem:[%s11838_s17 + $0x1610] sm:$0xff] }
 0x4bd   : > { %v10883_v11 = vcombine.high %v2954_v36, %v2958_v31  ;;  %v3006_v4 = vld [vmem:[%s11838_s17 + $0x1638] sm:$0xff] }
 0x4be   : > { %9324 = vmatpush1.bf16.msra.mxu0 %v10824_v62  ;;  %v2965_v62 = vld [vmem:[%s11838_s17 + $0x14f0] sm:$0xff] }
 0x4bf   : > { %9652 = vmatpush1.bf16.msra.mxu1 %v10826_v18  ;;  %9325 = vmatprep.subr.bf16.mxu0 %v10833_v20  ;;  %v2962_v18 = vld [vmem:[%s11838_s17 + $0x14d8] sm:$0xff]  ;;  %v10880_v20 = vcombine.low %v2953_v6, %v2957_v7  ;;  %v10889_v16 = vcombine.high %v2961_v17, %v2965_v62  ;;  %v10931_v7 = vcombine.high %v3002_v3, %v3006_v4 }
 0x4c0   : > { %9653 = vmatprep.subr.bf16.mxu1 %v10835_v32  ;;  %v10882_v32 = vcombine.low %v2954_v36, %v2958_v31  ;;  %v3013_v36 = vld [vmem:[%s11838_s17 + $0x1670] sm:$0xff]  ;;  %v3010_v31 = vld [vmem:[%s11838_s17 + $0x1658] sm:$0xff] }
 0x4c2   : > { %9326 = vmatpush1.bf16.msra.mxu0 %v10832_v61  ;;  %v2974_v61 = vld [vmem:[%s11838_s17 + $0x1538] sm:$0xff] }
 0x4c3   : > { %9654 = vmatpush1.bf16.msra.mxu1 %v10834_v57  ;;  %9327 = vmatprep.subr.bf16.mxu0 %v10841_v25  ;;  %v10888_v57 = vcombine.low %v2961_v17, %v2965_v62  ;;  %v10899_v43 = vcombine.high %v2970_v28, %v2974_v61  ;;  %v3017_v62 = vld [vmem:[%s11838_s17 + $0x1690] sm:$0xff] }
 0x4c4   : > { %9655 = vmatprep.subr.bf16.mxu1 %v10843_v42  ;;  %v10897_v42 = vcombine.high %v2969_v21, %v2973_v53 }
 0x4c6   : > { %9328 = vmatpush1.bf16.msra.mxu0 %v10840_v13  ;;  %v2982_v13 = vld [vmem:[%s11838_s17 + $0x1578] sm:$0xff] }
 0x4c7   : > { %9656 = vmatpush1.bf16.msra.mxu1 %v10842_v30  ;;  %9329 = vmatprep.subr.bf16.mxu0 %v10849_v49  ;;  %v10896_v30 = vcombine.low %v2969_v21, %v2973_v53  ;;  %v10898_v49 = vcombine.low %v2970_v28, %v2974_v61  ;;  %v10907_v51 = vcombine.high %v2978_v15, %v2982_v13  ;;  %v3025_v53 = vld [vmem:[%s11838_s17 + $0x16d0] sm:$0xff]  ;;  %v3026_v61 = vld [vmem:[%s11838_s17 + $0x16d8] sm:$0xff] }
 0x4c8   : > { %9657 = vmatprep.subr.bf16.mxu1 %v10851_v1  ;;  %v10905_v1 = vcombine.high %v2977_v37, %v2981_v27  ;;  %v3029_v28 = vld [vmem:[%s11838_s17 + $0x16f0] sm:$0xff] }
 0x4ca   : > { %9330 = vmatpush1.bf16.msra.mxu0 %v10848_v33  ;;  %v2990_v33 = vld [vmem:[%s11838_s17 + $0x15b8] sm:$0xff] }
 0x4cb   : > { %9658 = vmatpush1.bf16.msra.mxu1 %v10850_v48  ;;  %9331 = vmatprep.subr.bf16.mxu0 %v10857_v59  ;;  %v10904_v48 = vcombine.low %v2977_v37, %v2981_v27  ;;  %v10906_v59 = vcombine.low %v2978_v15, %v2982_v13  ;;  %v10915_v52 = vcombine.high %v2986_v12, %v2990_v33  ;;  %v3033_v27 = vld [vmem:[%s11838_s17 + $0x1710] sm:$0xff]  ;;  %v3034_v13 = vld [vmem:[%s11838_s17 + $0x1718] sm:$0xff] }
 0x4cc   : > { %9659 = vmatprep.subr.bf16.mxu1 %v10859_v50  ;;  %v10913_v50 = vcombine.high %v2985_v24, %v2989_v40  ;;  %v3037_v15 = vld [vmem:[%s11838_s17 + $0x1730] sm:$0xff] }
 0x4ce   : > { %9332 = vmatpush1.bf16.msra.mxu0 %v10856_v45  ;;  %v2998_v45 = vld [vmem:[%s11838_s17 + $0x15f8] sm:$0xff] }
 0x4cf   : > { %9660 = vmatpush1.bf16.msra.mxu1 %v10858_v9  ;;  %9342 = vmatprep.subr.bf16.mxu0 %v10865_v60  ;;  %v10912_v9 = vcombine.low %v2985_v24, %v2989_v40  ;;  %v10914_v60 = vcombine.low %v2986_v12, %v2990_v33  ;;  %v10923_v8 = vcombine.high %v2994_v58, %v2998_v45  ;;  %v3041_v40 = vld [vmem:[%s11838_s17 + $0x1750] sm:$0xff]  ;;  %v3042_v33 = vld [vmem:[%s11838_s17 + $0x1758] sm:$0xff] }
 0x4d0   : > { %9670 = vmatprep.subr.bf16.mxu1 %v10867_v38  ;;  %v10921_v38 = vcombine.high %v2993_v55, %v2997_v22  ;;  %v3045_v12 = vld [vmem:[%s11838_s17 + $0x1770] sm:$0xff] }
 0x4d1   : > { %9334 = vmatmul.mubr.bf16.vlgmr.msra.gmra.mrb[20].mxu0 %v12331_v29 }
 0x4d2   : > { %9662 = vmatmul.mubr.bf16.vlgmr.msra.gmra.mrb[20].mxu1 %v12331_v29  ;;  %9343 = vmatpush1.bf16.msra.mxu0 %v10864_v2  ;;  %v2966_v29 = vld [vmem:[%s11838_s17 + $0x14f8] sm:$0xff]  ;;  %v3005_v2 = vld [vmem:[%s11838_s17 + $0x1630] sm:$0xff] }
 0x4d3   : > { %9374 = vmatprep.mubr.bf16.mxu0 %v12335_v34  ;;  %9671 = vmatpush1.bf16.msra.mxu1 %v10866_v44  ;;  %v10890_v25 = vcombine.low %v2962_v18, %v2966_v29  ;;  %v10920_v44 = vcombine.low %v2993_v55, %v2997_v22  ;;  %v10929_v6 = vcombine.high %v3001_v19, %v3005_v2  ;;  %v3049_v22 = vld [vmem:[%s11838_s17 + $0x1790] sm:$0xff] }
 0x4d4   : > { %9702 = vmatprep.mubr.bf16.mxu1 %v12335_v34  ;;  %9344 = vmatprep.subr.bf16.mxu0 %v10873_v5  ;;  %v10891_v34 = vcombine.high %v2962_v18, %v2966_v29  ;;  %v10922_v5 = vcombine.low %v2994_v58, %v2998_v45  ;;  %v3021_v18 = vld [vmem:[%s11838_s17 + $0x16b0] sm:$0xff]  ;;  %v3018_v29 = vld [vmem:[%s11838_s17 + $0x1698] sm:$0xff] }
 0x4d5   : > { %9672 = vmatprep.subr.bf16.mxu1 %v10875_v35  ;;  %v3009_v35 = vld [vmem:[%s11838_s17 + $0x1650] sm:$0xff]  ;;  %v3050_v45 = vld [vmem:[%s11838_s17 + $0x1798] sm:$0xff] }
 0x4d6   : > { %9345 = vmatpush1.bf16.msra.mxu0 %v10872_v54  ;;  %v3014_v54 = vld [vmem:[%s11838_s17 + $0x1678] sm:$0xff]  ;;  %v3053_v58 = vld [vmem:[%s11838_s17 + $0x17b0] sm:$0xff] }
 0x4d7   : > { %9673 = vmatpush1.bf16.msra.mxu1 %v10874_v10  ;;  %9346 = vmatprep.subr.bf16.mxu0 %v10881_v41  ;;  %v10928_v10 = vcombine.low %v3001_v19, %v3005_v2  ;;  %v10930_v41 = vcombine.low %v3002_v3, %v3006_v4  ;;  %v10939_v17 = vcombine.high %v3010_v31, %v3014_v54  ;;  %v3057_v2 = vld [vmem:[%s11838_s17 + $0x17d0] sm:$0xff]  ;;  %v3058_v4 = vld [vmem:[%s11838_s17 + $0x17d8] sm:$0xff] }
 0x4d8   : > { %9674 = vmatprep.subr.bf16.mxu1 %v10883_v11  ;;  %v10937_v11 = vcombine.high %v3009_v35, %v3013_v36  ;;  %v3061_v3 = vld [vmem:[%s11838_s17 + $0x17f0] sm:$0xff] }
 0x4da   : > { %9347 = vmatpush1.bf16.msra.mxu0 %v10880_v20  ;;  %v3022_v20 = vld [vmem:[%s11838_s17 + $0x16b8] sm:$0xff] }
 0x4db   : > { %9675 = vmatpush1.bf16.msra.mxu1 %v10882_v32  ;;  %9348 = vmatprep.subr.bf16.mxu0 %v10889_v16  ;;  %v10936_v32 = vcombine.low %v3009_v35, %v3013_v36  ;;  %v10938_v16 = vcombine.low %v3010_v31, %v3014_v54  ;;  %v10947_v21 = vcombine.high %v3018_v29, %v3022_v20  ;;  %v3065_v36 = vld [vmem:[%s11838_s17 + $0x1810] sm:$0xff]  ;;  %v3066_v54 = vld [vmem:[%s11838_s17 + $0x1818] sm:$0xff] }
 0x4dc   : > { %9676 = vmatprep.subr.bf16.mxu1 %v10891_v34  ;;  %v10945_v34 = vcombine.high %v3017_v62, %v3021_v18  ;;  %v3069_v31 = vld [vmem:[%s11838_s17 + $0x1830] sm:$0xff] }
 0x4de   : > { %9349 = vmatpush1.bf16.msra.mxu0 %v10888_v57  ;;  %v3030_v57 = vld [vmem:[%s11838_s17 + $0x16f8] sm:$0xff] }
 0x4df   : > { %9677 = vmatpush1.bf16.msra.mxu1 %v10890_v25  ;;  %9350 = vmatprep.subr.bf16.mxu0 %v10897_v42  ;;  %v10944_v25 = vcombine.low %v3017_v62, %v3021_v18  ;;  %v10946_v42 = vcombine.low %v3018_v29, %v3022_v20  ;;  %v10955_v37 = vcombine.high %v3026_v61, %v3030_v57  ;;  %v3073_v18 = vld [vmem:[%s11838_s17 + $0x1850] sm:$0xff] }
 0x4e0   : > { %9678 = vmatprep.subr.bf16.mxu1 %v10899_v43  ;;  %v10953_v43 = vcombine.high %v3025_v53, %v3029_v28  ;;  %v3077_v29 = vld [vmem:[%s11838_s17 + $0x1870] sm:$0xff]  ;;  %v10992_v20 = vcombine.low %v3065_v36, %v3069_v31 }
 0x4e2   : > { %9351 = vmatpush1.bf16.msra.mxu0 %v10896_v30  ;;  %v3038_v30 = vld [vmem:[%s11838_s17 + $0x1738] sm:$0xff] }
 0x4e3   : > { %9679 = vmatpush1.bf16.msra.mxu1 %v10898_v49  ;;  %9352 = vmatprep.subr.bf16.mxu0 %v10905_v1  ;;  %v10952_v49 = vcombine.low %v3025_v53, %v3029_v28  ;;  %v10954_v1 = vcombine.low %v3026_v61, %v3030_v57  ;;  %v10963_v24 = vcombine.high %v3034_v13, %v3038_v30  ;;  %v3081_v53 = vld [vmem:[%s11838_s17 + $0x1890] sm:$0xff]  ;;  %v3082_v57 = vld [vmem:[%s11838_s17 + $0x1898] sm:$0xff] }
 0x4e4   : > { %9680 = vmatprep.subr.bf16.mxu1 %v10907_v51  ;;  %v10961_v51 = vcombine.high %v3033_v27, %v3037_v15  ;;  %v3085_v28 = vld [vmem:[%s11838_s17 + $0x18b0] sm:$0xff] }
 0x4e6   : > { %9353 = vmatpush1.bf16.msra.mxu0 %v10904_v48  ;;  %v3046_v48 = vld [vmem:[%s11838_s17 + $0x1778] sm:$0xff] }
 0x4e7   : > { %9681 = vmatpush1.bf16.msra.mxu1 %v10906_v59  ;;  %9354 = vmatprep.subr.bf16.mxu0 %v10913_v50  ;;  %v10960_v59 = vcombine.low %v3033_v27, %v3037_v15  ;;  %v10962_v50 = vcombine.low %v3034_v13, %v3038_v30  ;;  %v10971_v55 = vcombine.high %v3042_v33, %v3046_v48  ;;  %v3089_v15 = vld [vmem:[%s11838_s17 + $0x18d0] sm:$0xff]  ;;  %v3090_v30 = vld [vmem:[%s11838_s17 + $0x18d8] sm:$0xff] }
 0x4e8   : > { %9682 = vmatprep.subr.bf16.mxu1 %v10915_v52  ;;  %v10969_v52 = vcombine.high %v3041_v40, %v3045_v12  ;;  %v3093_v13 = vld [vmem:[%s11838_s17 + $0x18f0] sm:$0xff] }
 0x4ea   : > { %9355 = vmatpush1.bf16.msra.mxu0 %v10912_v9  ;;  %v3054_v9 = vld [vmem:[%s11838_s17 + $0x17b8] sm:$0xff] }
 0x4eb   : > { %9683 = vmatpush1.bf16.msra.mxu1 %v10914_v60  ;;  %9356 = vmatprep.subr.bf16.mxu0 %v10921_v38  ;;  %v10968_v60 = vcombine.low %v3041_v40, %v3045_v12  ;;  %v10970_v38 = vcombine.low %v3042_v33, %v3046_v48  ;;  %v10979_v19 = vcombine.high %v3050_v45, %v3054_v9  ;;  %v3101_v40 = vld [vmem:[%s11838_s17 + $0x1930] sm:$0xff]  ;;  %v3098_v12 = vld [vmem:[%s11838_s17 + $0x1918] sm:$0xff] }
 0x4ec   : > { %9684 = vmatprep.subr.bf16.mxu1 %v10923_v8  ;;  %v10977_v8 = vcombine.high %v3049_v22, %v3053_v58  ;;  %v3102_v33 = vld [vmem:[%s11838_s17 + $0x1938] sm:$0xff]  ;;  %v11016_v48 = vcombine.low %v3089_v15, %v3093_v13 }
 0x4ee   : > { %9357 = vmatpush1.bf16.msra.mxu0 %v10920_v44  ;;  %v3062_v44 = vld [vmem:[%s11838_s17 + $0x17f8] sm:$0xff] }
 0x4ef   : > { %9685 = vmatpush1.bf16.msra.mxu1 %v10922_v5  ;;  %9358 = vmatprep.subr.bf16.mxu0 %v10929_v6  ;;  %v10976_v5 = vcombine.low %v3049_v22, %v3053_v58  ;;  %v10978_v6 = vcombine.low %v3050_v45, %v3054_v9  ;;  %v10987_v35 = vcombine.high %v3058_v4, %v3062_v44  ;;  %v3109_v22 = vld [vmem:[%s11838_s17 + $0x1970] sm:$0xff]  ;;  %v3106_v58 = vld [vmem:[%s11838_s17 + $0x1958] sm:$0xff] }
 0x4f0   : > { %9686 = vmatprep.subr.bf16.mxu1 %v10931_v7  ;;  %v10985_v7 = vcombine.high %v3057_v2, %v3061_v3  ;;  %v3110_v45 = vld [vmem:[%s11838_s17 + $0x1978] sm:$0xff] }
 0x4f2   : > { %9359 = vmatpush1.bf16.msra.mxu0 %v10928_v10  ;;  %v3070_v10 = vld [vmem:[%s11838_s17 + $0x1838] sm:$0xff] }
 0x4f3   : > { %9687 = vmatpush1.bf16.msra.mxu1 %v10930_v41  ;;  %9360 = vmatprep.subr.bf16.mxu0 %v10937_v11  ;;  %v10984_v41 = vcombine.low %v3057_v2, %v3061_v3  ;;  %v10986_v11 = vcombine.low %v3058_v4, %v3062_v44  ;;  %v10995_v62 = vcombine.high %v3066_v54, %v3070_v10  ;;  %v3117_v2 = vld [vmem:[%s11838_s17 + $0x19b0] sm:$0xff]  ;;  %v3114_v3 = vld [vmem:[%s11838_s17 + $0x1998] sm:$0xff] }
 0x4f4   : > { %9688 = vmatprep.subr.bf16.mxu1 %v10939_v17  ;;  %v10993_v17 = vcombine.high %v3065_v36, %v3069_v31  ;;  %v3118_v4 = vld [vmem:[%s11838_s17 + $0x19b8] sm:$0xff]  ;;  %v3125_v36 = vld [vmem:[%s11838_s17 + $0x19f0] sm:$0xff] }
 0x4f5   : > { %v3122_v31 = vld [vmem:[%s11838_s17 + $0x19d8] sm:$0xff] }
 0x4f6   : > { %9361 = vmatpush1.bf16.msra.mxu0 %v10936_v32  ;;  %v3074_v32 = vld [vmem:[%s11838_s17 + $0x1858] sm:$0xff] }
 0x4f7   : > { %9689 = vmatpush1.bf16.msra.mxu1 %v10938_v16  ;;  %9362 = vmatprep.subr.bf16.mxu0 %v10945_v34  ;;  %v3078_v16 = vld [vmem:[%s11838_s17 + $0x1878] sm:$0xff]  ;;  %v10994_v34 = vcombine.low %v3066_v54, %v3070_v10 }
 0x4f8   : > { %9690 = vmatprep.subr.bf16.mxu1 %v10947_v21  ;;  %v11001_v21 = vcombine.high %v3073_v18, %v3077_v29  ;;  %v11003_v61 = vcombine.high %v3074_v32, %v3078_v16  ;;  %v3126_v54 = vld [vmem:[%s11838_s17 + $0x19f8] sm:$0xff] }
 0x4fa   : > { %9363 = vmatpush1.bf16.msra.mxu0 %v10944_v25  ;;  %v3086_v25 = vld [vmem:[%s11838_s17 + $0x18b8] sm:$0xff] }
 0x4fb   : > { %9691 = vmatpush1.bf16.msra.mxu1 %v10946_v42  ;;  %9364 = vmatprep.subr.bf16.mxu0 %v10953_v43  ;;  %v11000_v42 = vcombine.low %v3073_v18, %v3077_v29  ;;  %v11002_v43 = vcombine.low %v3074_v32, %v3078_v16  ;;  %v11011_v27 = vcombine.high %v3082_v57, %v3086_v25  ;;  %v3133_v18 = vld [vmem:[%s11838_s17 + $0x1a30] sm:$0xff]  ;;  %v3130_v29 = vld [vmem:[%s11838_s17 + $0x1a18] sm:$0xff] }
 0x4fc   : > { %9692 = vmatprep.subr.bf16.mxu1 %v10955_v37  ;;  %v11009_v37 = vcombine.high %v3081_v53, %v3085_v28  ;;  %v11050_v16 = vcombine.low %v3122_v31, %v3126_v54 }
 0x4fe   : > { %9365 = vmatpush1.bf16.msra.mxu0 %v10952_v49  ;;  %v11008_v49 = vcombine.low %v3081_v53, %v3085_v28  ;;  %v3137_v53 = vld [vmem:[%s11838_s17 + $0x1a50] sm:$0xff] }
 0x4ff   : > { %9693 = vmatpush1.bf16.msra.mxu1 %v10954_v1  ;;  %9366 = vmatprep.subr.bf16.mxu0 %v10961_v51  ;;  %v11010_v1 = vcombine.low %v3082_v57, %v3086_v25  ;;  %v11017_v51 = vcombine.high %v3089_v15, %v3093_v13  ;;  %v3141_v28 = vld [vmem:[%s11838_s17 + $0x1a70] sm:$0xff]  ;;  %v3142_v57 = vld [vmem:[%s11838_s17 + $0x1a78] sm:$0xff] }
 0x500   : > { %9694 = vmatprep.subr.bf16.mxu1 %v10963_v24  ;;  %v3097_v24 = vld [vmem:[%s11838_s17 + $0x1910] sm:$0xff]  ;;  %v3146_v13 = vld [vmem:[%s11838_s17 + $0x1a98] sm:$0xff] }
 0x501   : > { %v11024_v9 = vcombine.low %v3097_v24, %v3101_v40  ;;  %v3149_v15 = vld [vmem:[%s11838_s17 + $0x1ab0] sm:$0xff] }
 0x502   : > { %9367 = vmatpush1.bf16.msra.mxu0 %v10960_v59 }
 0x503   : > { %9695 = vmatpush1.bf16.msra.mxu1 %v10962_v50  ;;  %9368 = vmatprep.subr.bf16.mxu0 %v10969_v52  ;;  %v11025_v50 = vcombine.high %v3097_v24, %v3101_v40  ;;  %v11027_v52 = vcombine.high %v3098_v12, %v3102_v33  ;;  %v3157_v24 = vld [vmem:[%s11838_s17 + $0x1af0] sm:$0xff]  ;;  %v3154_v40 = vld [vmem:[%s11838_s17 + $0x1ad8] sm:$0xff] }
 0x504   : > { %9696 = vmatprep.subr.bf16.mxu1 %v10971_v55  ;;  %v3105_v55 = vld [vmem:[%s11838_s17 + $0x1950] sm:$0xff] }
 0x505   : > { %v11032_v44 = vcombine.low %v3105_v55, %v3109_v22 }
 0x506   : > { %9369 = vmatpush1.bf16.msra.mxu0 %v10968_v60  ;;  %v11026_v60 = vcombine.low %v3098_v12, %v3102_v33  ;;  %v3158_v12 = vld [vmem:[%s11838_s17 + $0x1af8] sm:$0xff] }
 0x507   : > { %9697 = vmatpush1.bf16.msra.mxu1 %v10970_v38  ;;  %9370 = vmatprep.subr.bf16.mxu0 %v10977_v8  ;;  %v11033_v38 = vcombine.high %v3105_v55, %v3109_v22  ;;  %v11035_v8 = vcombine.high %v3106_v58, %v3110_v45  ;;  %v3165_v55 = vld [vmem:[%s11838_s17 + $0x1b30] sm:$0xff]  ;;  %v3162_v22 = vld [vmem:[%s11838_s17 + $0x1b18] sm:$0xff] }
 0x508   : > { %9698 = vmatprep.subr.bf16.mxu1 %v10979_v19  ;;  %v3113_v19 = vld [vmem:[%s11838_s17 + $0x1990] sm:$0xff] }
 0x509   : > { %v11040_v10 = vcombine.low %v3113_v19, %v3117_v2 }
 0x50a   : > { %9371 = vmatpush1.bf16.msra.mxu0 %v10976_v5  ;;  %v11034_v5 = vcombine.low %v3106_v58, %v3110_v45  ;;  %v3166_v58 = vld [vmem:[%s11838_s17 + $0x1b38] sm:$0xff] }
 0x50b   : > { %9699 = vmatpush1.bf16.msra.mxu1 %v10978_v6  ;;  %9372 = vmatprep.subr.bf16.mxu0 %v10985_v7  ;;  %v11041_v6 = vcombine.high %v3113_v19, %v3117_v2  ;;  %v11043_v7 = vcombine.high %v3114_v3, %v3118_v4  ;;  %v3173_v19 = vld [vmem:[%s11838_s17 + $0x1b70] sm:$0xff]  ;;  %v3170_v2 = vld [vmem:[%s11838_s17 + $0x1b58] sm:$0xff] }
 0x50c   : > { %9700 = vmatprep.subr.bf16.mxu1 %v10987_v35  ;;  %v3121_v35 = vld [vmem:[%s11838_s17 + $0x19d0] sm:$0xff] }
 0x50d   : > { %v11048_v32 = vcombine.low %v3121_v35, %v3125_v36 }
 0x50e   : > { %9373 = vmatpush1.bf16.msra.mxu0 %v10984_v41  ;;  %v11042_v41 = vcombine.low %v3114_v3, %v3118_v4  ;;  %v3174_v3 = vld [vmem:[%s11838_s17 + $0x1b78] sm:$0xff] }
 0x50f   : > { %9701 = vmatpush1.bf16.msra.mxu1 %v10986_v11  ;;  %9383 = vmatprep.subr.bf16.mxu0 %v10993_v17  ;;  %v11049_v11 = vcombine.high %v3121_v35, %v3125_v36  ;;  %v11051_v17 = vcombine.high %v3122_v31, %v3126_v54  ;;  %v3181_v35 = vld [vmem:[%s11838_s17 + $0x1bb0] sm:$0xff]  ;;  %v3178_v36 = vld [vmem:[%s11838_s17 + $0x1b98] sm:$0xff] }
 0x510   : > { %9711 = vmatprep.subr.bf16.mxu1 %v10995_v62  ;;  %v3129_v62 = vld [vmem:[%s11838_s17 + $0x1a10] sm:$0xff]  ;;  %v3182_v31 = vld [vmem:[%s11838_s17 + $0x1bb8] sm:$0xff] }
 0x511   : > { %9375 = vmatmul.mubr.bf16.vlgmr.msra.gmra.mrb[20].mxu0 %v12409_v0  ;;  %v11056_v25 = vcombine.low %v3129_v62, %v3133_v18 }
 0x512   : > { %9703 = vmatmul.mubr.bf16.vlgmr.msra.gmra.mrb[20].mxu1 %v12409_v0  ;;  %9384 = vmatpush1.bf16.msra.mxu0 %v10992_v20  ;;  %v3094_v0 = vld [vmem:[%s11838_s17 + $0x18f8] sm:$0xff] }
 0x513   : > { %9415 = vmatprep.mubr.bf16.mxu0 %v12413_v46  ;;  %9712 = vmatpush1.bf16.msra.mxu1 %v10994_v34  ;;  %v11018_v59 = vcombine.low %v3090_v30, %v3094_v0  ;;  %v3134_v20 = vld [vmem:[%s11838_s17 + $0x1a38] sm:$0xff]  ;;  %v11057_v34 = vcombine.high %v3129_v62, %v3133_v18  ;;  %v3189_v62 = vld [vmem:[%s11838_s17 + $0x1bf0] sm:$0xff] }
 0x514   : > { %9743 = vmatprep.mubr.bf16.mxu1 %v12413_v46  ;;  %9385 = vmatprep.subr.bf16.mxu0 %v11001_v21  ;;  %v11019_v46 = vcombine.high %v3090_v30, %v3094_v0  ;;  %v11059_v21 = vcombine.high %v3130_v29, %v3134_v20  ;;  %v3150_v30 = vld [vmem:[%s11838_s17 + $0x1ab8] sm:$0xff]  ;;  %v11064_v0 = vcombine.low %v3137_v53, %v3141_v28 }
 0x515   : > { %9713 = vmatprep.subr.bf16.mxu1 %v11003_v61  ;;  %v3138_v61 = vld [vmem:[%s11838_s17 + $0x1a58] sm:$0xff] }
 0x516   : > { %9386 = vmatpush1.bf16.msra.mxu0 %v11000_v42  ;;  %v11058_v42 = vcombine.low %v3130_v29, %v3134_v20  ;;  %v3186_v18 = vld [vmem:[%s11838_s17 + $0x1bd8] sm:$0xff] }
 0x517   : > { %9714 = vmatpush1.bf16.msra.mxu1 %v11002_v43  ;;  %9387 = vmatprep.subr.bf16.mxu0 %v11009_v37  ;;  %v11065_v43 = vcombine.high %v3137_v53, %v3141_v28  ;;  %v11067_v37 = vcombine.high %v3138_v61, %v3142_v57  ;;  %v3190_v29 = vld [vmem:[%s11838_s17 + $0x1bf8] sm:$0xff]  ;;  %v3197_v53 = vld [vmem:[%s11838_s17 + $0x1c30] sm:$0xff] }
 0x518   : > { %9715 = vmatprep.subr.bf16.mxu1 %v11011_v27  ;;  %v3145_v27 = vld [vmem:[%s11838_s17 + $0x1a90] sm:$0xff]  ;;  %v3194_v28 = vld [vmem:[%s11838_s17 + $0x1c18] sm:$0xff] }
 0x519   : > { %v11072_v33 = vcombine.low %v3145_v27, %v3149_v15 }
 0x51a   : > { %9388 = vmatpush1.bf16.msra.mxu0 %v11008_v49  ;;  %v11066_v49 = vcombine.low %v3138_v61, %v3142_v57  ;;  %v3198_v61 = vld [vmem:[%s11838_s17 + $0x1c38] sm:$0xff] }
 0x51b   : > { %9716 = vmatpush1.bf16.msra.mxu1 %v11010_v1  ;;  %9389 = vmatprep.subr.bf16.mxu0 %v11017_v51  ;;  %v11073_v1 = vcombine.high %v3145_v27, %v3149_v15  ;;  %v11075_v51 = vcombine.high %v3146_v13, %v3150_v30  ;;  %v3205_v27 = vld [vmem:[%s11838_s17 + $0x1c70] sm:$0xff] }
 0x51c   : > { %9717 = vmatprep.subr.bf16.mxu1 %v11019_v46  ;;  %v3153_v46 = vld [vmem:[%s11838_s17 + $0x1ad0] sm:$0xff] }
 0x51d   : > { %v11080_v45 = vcombine.low %v3153_v46, %v3157_v24 }
 0x51e   : > { %9390 = vmatpush1.bf16.msra.mxu0 %v11016_v48  ;;  %v11074_v48 = vcombine.low %v3146_v13, %v3150_v30  ;;  %v3202_v13 = vld [vmem:[%s11838_s17 + $0x1c58] sm:$0xff] }
 0x51f   : > { %9718 = vmatpush1.bf16.msra.mxu1 %v11018_v59  ;;  %9391 = vmatprep.subr.bf16.mxu0 %v11025_v50  ;;  %v11081_v59 = vcombine.high %v3153_v46, %v3157_v24  ;;  %v11083_v50 = vcombine.high %v3154_v40, %v3158_v12  ;;  %v3206_v30 = vld [vmem:[%s11838_s17 + $0x1c78] sm:$0xff] }
 0x520   : > { %9719 = vmatprep.subr.bf16.mxu1 %v11027_v52  ;;  %v3161_v52 = vld [vmem:[%s11838_s17 + $0x1b10] sm:$0xff]  ;;  %v11131_v46 = vcombine.high %v3202_v13, %v3206_v30  ;;  %v3210_v24 = vld [vmem:[%s11838_s17 + $0x1c98] sm:$0xff] }
 0x521   : > { %v11088_v4 = vcombine.low %v3161_v52, %v3165_v55 }
 0x522   : > { %9392 = vmatpush1.bf16.msra.mxu0 %v11024_v9  ;;  %v11082_v9 = vcombine.low %v3154_v40, %v3158_v12  ;;  %v3214_v40 = vld [vmem:[%s11838_s17 + $0x1cb8] sm:$0xff] }
 0x523   : > { %9720 = vmatpush1.bf16.msra.mxu1 %v11026_v60  ;;  %9393 = vmatprep.subr.bf16.mxu0 %v11033_v38  ;;  %v11089_v60 = vcombine.high %v3161_v52, %v3165_v55  ;;  %v11091_v38 = vcombine.high %v3162_v22, %v3166_v58  ;;  %v3221_v52 = vld [vmem:[%s11838_s17 + $0x1cf0] sm:$0xff]  ;;  %v3218_v55 = vld [vmem:[%s11838_s17 + $0x1cd8] sm:$0xff] }
 0x524   : > { %9721 = vmatprep.subr.bf16.mxu1 %v11035_v8  ;;  %v3169_v8 = vld [vmem:[%s11838_s17 + $0x1b50] sm:$0xff] }
 0x525   : > { %v11096_v54 = vcombine.low %v3169_v8, %v3173_v19 }
 0x526   : > { %9394 = vmatpush1.bf16.msra.mxu0 %v11032_v44  ;;  %v11090_v44 = vcombine.low %v3162_v22, %v3166_v58  ;;  %v11138_v58 = vcombine.low %v3210_v24, %v3214_v40 }
 0x527   : > { %9722 = vmatpush1.bf16.msra.mxu1 %v11034_v5  ;;  %9395 = vmatprep.subr.bf16.mxu0 %v11041_v6  ;;  %v11097_v5 = vcombine.high %v3169_v8, %v3173_v19  ;;  %v11099_v6 = vcombine.high %v3170_v2, %v3174_v3  ;;  %v3230_v8 = vld [vmem:[%s11838_s17 + $0x1d38] sm:$0xff] }
 0x528   : > { %9723 = vmatprep.subr.bf16.mxu1 %v11043_v7  ;;  %v3177_v7 = vld [vmem:[%s11838_s17 + $0x1b90] sm:$0xff] }
 0x529   : > { %v11104_v20 = vcombine.low %v3177_v7, %v3181_v35 }
 0x52a   : > { %9396 = vmatpush1.bf16.msra.mxu0 %v11040_v10  ;;  %v11098_v10 = vcombine.low %v3170_v2, %v3174_v3 }
 0x52b   : > { %9724 = vmatpush1.bf16.msra.mxu1 %v11042_v41  ;;  %9397 = vmatprep.subr.bf16.mxu0 %v11049_v11  ;;  %v11105_v41 = vcombine.high %v3177_v7, %v3181_v35  ;;  %v11107_v11 = vcombine.high %v3178_v36, %v3182_v31  ;;  %v3238_v7 = vld [vmem:[%s11838_s17 + $0x1d78] sm:$0xff] }
 0x52c   : > { %9725 = vmatprep.subr.bf16.mxu1 %v11051_v17  ;;  %v3185_v17 = vld [vmem:[%s11838_s17 + $0x1bd0] sm:$0xff] }
 0x52d   : > { %v11112_v57 = vcombine.low %v3185_v17, %v3189_v62 }
 0x52e   : > { %9398 = vmatpush1.bf16.msra.mxu0 %v11048_v32  ;;  %v11106_v32 = vcombine.low %v3178_v36, %v3182_v31 }
 0x52f   : > { %9726 = vmatpush1.bf16.msra.mxu1 %v11050_v16  ;;  %9399 = vmatprep.subr.bf16.mxu0 %v11057_v34  ;;  %v11113_v16 = vcombine.high %v3185_v17, %v3189_v62  ;;  %v11115_v34 = vcombine.high %v3186_v18, %v3190_v29  ;;  %v3246_v17 = vld [vmem:[%s11838_s17 + $0x1db8] sm:$0xff] }
 0x530   : > { %9727 = vmatprep.subr.bf16.mxu1 %v11059_v21  ;;  %v3193_v21 = vld [vmem:[%s11838_s17 + $0x1c10] sm:$0xff] }
 0x531   : > { %v11120_v15 = vcombine.low %v3193_v21, %v3197_v53 }
 0x532   : > { %9400 = vmatpush1.bf16.msra.mxu0 %v11056_v25  ;;  %v11114_v25 = vcombine.low %v3186_v18, %v3190_v29 }
 0x533   : > { %9728 = vmatpush1.bf16.msra.mxu1 %v11058_v42  ;;  %9401 = vmatprep.subr.bf16.mxu0 %v11065_v43  ;;  %v11121_v42 = vcombine.high %v3193_v21, %v3197_v53  ;;  %v11123_v43 = vcombine.high %v3194_v28, %v3198_v61  ;;  %v3254_v21 = vld [vmem:[%s11838_s17 + $0x1df8] sm:$0xff] }
 0x534   : > { %9729 = vmatprep.subr.bf16.mxu1 %v11067_v37  ;;  %v3201_v37 = vld [vmem:[%s11838_s17 + $0x1c50] sm:$0xff] }
 0x535   : > { %v11128_v12 = vcombine.low %v3201_v37, %v3205_v27 }
 0x536   : > { %9402 = vmatpush1.bf16.msra.mxu0 %v11064_v0  ;;  %v11122_v0 = vcombine.low %v3194_v28, %v3198_v61 }
 0x537   : > { %9730 = vmatpush1.bf16.msra.mxu1 %v11066_v49  ;;  %9403 = vmatprep.subr.bf16.mxu0 %v11073_v1  ;;  %v11129_v49 = vcombine.high %v3201_v37, %v3205_v27  ;;  %v3209_v1 = vld [vmem:[%s11838_s17 + $0x1c90] sm:$0xff]  ;;  %v3262_v37 = vld [vmem:[%s11838_s17 + $0x1e38] sm:$0xff] }
 0x538   : > { %9731 = vmatprep.subr.bf16.mxu1 %v11075_v51  ;;  %v3213_v51 = vld [vmem:[%s11838_s17 + $0x1cb0] sm:$0xff] }
 0x539   : > { %v11136_v22 = vcombine.low %v3209_v1, %v3213_v51 }
 0x53a   : > { %9404 = vmatpush1.bf16.msra.mxu0 %v11072_v33  ;;  %v11130_v33 = vcombine.low %v3202_v13, %v3206_v30 }
 0x53b   : > { %9732 = vmatpush1.bf16.msra.mxu1 %v11074_v48  ;;  %9405 = vmatprep.subr.bf16.mxu0 %v11081_v59  ;;  %v11137_v48 = vcombine.high %v3209_v1, %v3213_v51  ;;  %v11139_v59 = vcombine.high %v3210_v24, %v3214_v40  ;;  %v3266_v1 = vld [vmem:[%s11838_s17 + $0x1e58] sm:$0xff] }
 0x53c   : > { %9733 = vmatprep.subr.bf16.mxu1 %v11083_v50  ;;  %v3217_v50 = vld [vmem:[%s11838_s17 + $0x1cd0] sm:$0xff]  ;;  %v3270_v51 = vld [vmem:[%s11838_s17 + $0x1e78] sm:$0xff] }
 0x53d   : > { %v11144_v19 = vcombine.low %v3217_v50, %v3221_v52 }
 0x53e   : > { %9406 = vmatpush1.bf16.msra.mxu0 %v11080_v45  ;;  %v11145_v45 = vcombine.high %v3217_v50, %v3221_v52  ;;  %v3278_v50 = vld [vmem:[%s11838_s17 + $0x1eb8] sm:$0xff] }
 0x53f   : > { %9734 = vmatpush1.bf16.msra.mxu1 %v11082_v9  ;;  %9407 = vmatprep.subr.bf16.mxu0 %v11089_v60  ;;  %v3225_v9 = vld [vmem:[%s11838_s17 + $0x1d10] sm:$0xff] }
 0x540   : > { %9735 = vmatprep.subr.bf16.mxu1 %v11091_v38  ;;  %v3229_v60 = vld [vmem:[%s11838_s17 + $0x1d30] sm:$0xff]  ;;  %v3226_v38 = vld [vmem:[%s11838_s17 + $0x1d18] sm:$0xff] }
 0x541   : > { %v11153_v3 = vcombine.high %v3225_v9, %v3229_v60  ;;  %v11152_v35 = vcombine.low %v3225_v9, %v3229_v60  ;;  %v11154_v36 = vcombine.low %v3226_v38, %v3230_v8  ;;  %v3286_v9 = vld [vmem:[%s11838_s17 + $0x1ef8] sm:$0xff] }
 0x542   : > { %9408 = vmatpush1.bf16.msra.mxu0 %v11088_v4  ;;  %v11155_v4 = vcombine.high %v3226_v38, %v3230_v8 }
 0x543   : > { %9736 = vmatpush1.bf16.msra.mxu1 %v11090_v44  ;;  %9409 = vmatprep.subr.bf16.mxu0 %v11097_v5  ;;  %v3233_v44 = vld [vmem:[%s11838_s17 + $0x1d50] sm:$0xff] }
 0x544   : > { %9737 = vmatprep.subr.bf16.mxu1 %v11099_v6  ;;  %v3237_v5 = vld [vmem:[%s11838_s17 + $0x1d70] sm:$0xff]  ;;  %v3234_v6 = vld [vmem:[%s11838_s17 + $0x1d58] sm:$0xff] }
 0x545   : > { %v11161_v31 = vcombine.high %v3233_v44, %v3237_v5  ;;  %v11160_v62 = vcombine.low %v3233_v44, %v3237_v5  ;;  %v11162_v18 = vcombine.low %v3234_v6, %v3238_v7  ;;  %v3294_v44 = vld [vmem:[%s11838_s17 + $0x1f38] sm:$0xff] }
 0x546   : > { %9410 = vmatpush1.bf16.msra.mxu0 %v11096_v54  ;;  %v11163_v54 = vcombine.high %v3234_v6, %v3238_v7 }
 0x547   : > { %9738 = vmatpush1.bf16.msra.mxu1 %v11098_v10  ;;  %9411 = vmatprep.subr.bf16.mxu0 %v11105_v41  ;;  %v3241_v10 = vld [vmem:[%s11838_s17 + $0x1d90] sm:$0xff] }
 0x548   : > { %9739 = vmatprep.subr.bf16.mxu1 %v11107_v11  ;;  %v3245_v41 = vld [vmem:[%s11838_s17 + $0x1db0] sm:$0xff]  ;;  %v3242_v11 = vld [vmem:[%s11838_s17 + $0x1d98] sm:$0xff] }
 0x549   : > { %v11169_v29 = vcombine.high %v3241_v10, %v3245_v41  ;;  %v11168_v53 = vcombine.low %v3241_v10, %v3245_v41  ;;  %v11170_v28 = vcombine.low %v3242_v11, %v3246_v17  ;;  %v3302_v10 = vld [vmem:[%s11838_s17 + $0x1f78] sm:$0xff] }
 0x54a   : > { %9412 = vmatpush1.bf16.msra.mxu0 %v11104_v20  ;;  %v11171_v20 = vcombine.high %v3242_v11, %v3246_v17 }
 0x54b   : > { %9740 = vmatpush1.bf16.msra.mxu1 %v11106_v32  ;;  %9413 = vmatprep.subr.bf16.mxu0 %v11113_v16  ;;  %v3249_v32 = vld [vmem:[%s11838_s17 + $0x1dd0] sm:$0xff] }
 0x54c   : > { %9741 = vmatprep.subr.bf16.mxu1 %v11115_v34  ;;  %v3253_v16 = vld [vmem:[%s11838_s17 + $0x1df0] sm:$0xff]  ;;  %v3250_v34 = vld [vmem:[%s11838_s17 + $0x1dd8] sm:$0xff] }
 0x54d   : > { %v11177_v61 = vcombine.high %v3249_v32, %v3253_v16  ;;  %v11176_v27 = vcombine.low %v3249_v32, %v3253_v16  ;;  %v3310_v32 = vld [vmem:[%s11838_s17 + $0x1fb8] sm:$0xff] }
 0x54e   : > { %9414 = vmatpush1.bf16.msra.mxu0 %v11112_v57  ;;  %v11179_v57 = vcombine.high %v3250_v34, %v3254_v21 }
 0x54f   : > { %9742 = vmatpush1.bf16.msra.mxu1 %v11114_v25  ;;  %9424 = vmatprep.subr.bf16.mxu0 %v11121_v42  ;;  %v3257_v25 = vld [vmem:[%s11838_s17 + $0x1e10] sm:$0xff] }
 0x550   : > { %9752 = vmatprep.subr.bf16.mxu1 %v11123_v43  ;;  %v3261_v42 = vld [vmem:[%s11838_s17 + $0x1e30] sm:$0xff]  ;;  %v3258_v43 = vld [vmem:[%s11838_s17 + $0x1e18] sm:$0xff] }
 0x551   : > { %9416 = vmatmul.mubr.bf16.vlgmr.msra.gmra.mrb[20].mxu0 %v12489_v23  ;;  %v11185_v13 = vcombine.high %v3257_v25, %v3261_v42  ;;  %v11187_v30 = vcombine.high %v3258_v43, %v3262_v37  ;;  %v11186_v24 = vcombine.low %v3258_v43, %v3262_v37 }
 0x552   : > { %9744 = vmatmul.mubr.bf16.vlgmr.msra.gmra.mrb[20].mxu1 %v12489_v23  ;;  %9425 = vmatpush1.bf16.msra.mxu0 %v11120_v15  ;;  %v3222_v23 = vld [vmem:[%s11838_s17 + $0x1cf8] sm:$0xff]  ;;  %v11178_v15 = vcombine.low %v3250_v34, %v3254_v21 }
 0x553   : > { %9456 = vmatprep.mubr.bf16.mxu0 %v12493_v26  ;;  %9753 = vmatpush1.bf16.msra.mxu1 %v11122_v0  ;;  %v11146_v2 = vcombine.low %v3218_v55, %v3222_v23  ;;  %v3265_v0 = vld [vmem:[%s11838_s17 + $0x1e50] sm:$0xff] }
 0x554   : > { %9784 = vmatprep.mubr.bf16.mxu1 %v12493_v26  ;;  %9426 = vmatprep.subr.bf16.mxu0 %v11129_v49  ;;  %v11147_v26 = vcombine.high %v3218_v55, %v3222_v23  ;;  %v3269_v49 = vld [vmem:[%s11838_s17 + $0x1e70] sm:$0xff]  ;;  %v11194_v55 = vcombine.low %v3266_v1, %v3270_v51 }
 0x555   : > { %9754 = vmatprep.subr.bf16.mxu1 %v11131_v46  ;;  %v11184_v46 = vcombine.low %v3257_v25, %v3261_v42  ;;  %v11193_v40 = vcombine.high %v3265_v0, %v3269_v49  ;;  %v11192_v52 = vcombine.low %v3265_v0, %v3269_v49  ;;  %v3318_v25 = vld [vmem:[%s11838_s17 + $0x1ff8] sm:$0xff] }
 0x556   : > { %9427 = vmatpush1.bf16.msra.mxu0 %v11128_v12  ;;  %v11195_v12 = vcombine.high %v3266_v1, %v3270_v51 }
 0x557   : > { %9755 = vmatpush1.bf16.msra.mxu1 %v11130_v33  ;;  %9428 = vmatprep.subr.bf16.mxu0 %v11137_v48  ;;  %v3273_v33 = vld [vmem:[%s11838_s17 + $0x1e90] sm:$0xff] }
 0x558   : > { %9756 = vmatprep.subr.bf16.mxu1 %v11139_v59  ;;  %v3277_v48 = vld [vmem:[%s11838_s17 + $0x1eb0] sm:$0xff]  ;;  %v3274_v59 = vld [vmem:[%s11838_s17 + $0x1e98] sm:$0xff] }
 0x559   : > { %v11201_v23 = vcombine.high %v3273_v33, %v3277_v48  ;;  %v11200_v60 = vcombine.low %v3273_v33, %v3277_v48  ;;  %v11202_v38 = vcombine.low %v3274_v59, %v3278_v50 }
 0x55a   : > { %9429 = vmatpush1.bf16.msra.mxu0 %v11136_v22  ;;  %v11203_v22 = vcombine.high %v3274_v59, %v3278_v50 }
 0x55b   : > { %9757 = vmatpush1.bf16.msra.mxu1 %v11138_v58  ;;  %9430 = vmatprep.subr.bf16.mxu0 %v11145_v45  ;;  %v3281_v58 = vld [vmem:[%s11838_s17 + $0x1ed0] sm:$0xff] }
 0x55c   : > { %9758 = vmatprep.subr.bf16.mxu1 %v11147_v26  ;;  %v3285_v45 = vld [vmem:[%s11838_s17 + $0x1ef0] sm:$0xff]  ;;  %v3282_v26 = vld [vmem:[%s11838_s17 + $0x1ed8] sm:$0xff] }
 0x55d   : > { %v11209_v8 = vcombine.high %v3281_v58, %v3285_v45  ;;  %v11208_v5 = vcombine.low %v3281_v58, %v3285_v45  ;;  %v11210_v6 = vcombine.low %v3282_v26, %v3286_v9 }
 0x55e   : > { %9431 = vmatpush1.bf16.msra.mxu0 %v11144_v19  ;;  %v11211_v19 = vcombine.high %v3282_v26, %v3286_v9 }
 0x55f   : > { %9759 = vmatpush1.bf16.msra.mxu1 %v11146_v2  ;;  %9432 = vmatprep.subr.bf16.mxu0 %v11153_v3  ;;  %v3289_v2 = vld [vmem:[%s11838_s17 + $0x1f10] sm:$0xff] }
 0x560   : > { %9760 = vmatprep.subr.bf16.mxu1 %v11155_v4  ;;  %v3293_v3 = vld [vmem:[%s11838_s17 + $0x1f30] sm:$0xff]  ;;  %v3290_v4 = vld [vmem:[%s11838_s17 + $0x1f18] sm:$0xff] }
 0x561   : > { %v11217_v7 = vcombine.high %v3289_v2, %v3293_v3  ;;  %v11216_v41 = vcombine.low %v3289_v2, %v3293_v3  ;;  %v11218_v11 = vcombine.low %v3290_v4, %v3294_v44 }
 0x562   : > { %9433 = vmatpush1.bf16.msra.mxu0 %v11152_v35  ;;  %v11219_v35 = vcombine.high %v3290_v4, %v3294_v44 }
 0x563   : > { %9761 = vmatpush1.bf16.msra.mxu1 %v11154_v36  ;;  %9434 = vmatprep.subr.bf16.mxu0 %v11161_v31  ;;  %v3297_v36 = vld [vmem:[%s11838_s17 + $0x1f50] sm:$0xff] }
 0x564   : > { %9762 = vmatprep.subr.bf16.mxu1 %v11163_v54  ;;  %v3301_v31 = vld [vmem:[%s11838_s17 + $0x1f70] sm:$0xff]  ;;  %v3298_v54 = vld [vmem:[%s11838_s17 + $0x1f58] sm:$0xff] }
 0x565   : > { %v11225_v17 = vcombine.high %v3297_v36, %v3301_v31  ;;  %v11224_v16 = vcombine.low %v3297_v36, %v3301_v31  ;;  %v11226_v34 = vcombine.low %v3298_v54, %v3302_v10 }
 0x566   : > { %9435 = vmatpush1.bf16.msra.mxu0 %v11160_v62  ;;  %v11227_v62 = vcombine.high %v3298_v54, %v3302_v10 }
 0x567   : > { %9763 = vmatpush1.bf16.msra.mxu1 %v11162_v18  ;;  %9436 = vmatprep.subr.bf16.mxu0 %v11169_v29  ;;  %v3305_v18 = vld [vmem:[%s11838_s17 + $0x1f90] sm:$0xff] }
 0x568   : > { %9764 = vmatprep.subr.bf16.mxu1 %v11171_v20  ;;  %v3309_v29 = vld [vmem:[%s11838_s17 + $0x1fb0] sm:$0xff]  ;;  %v3306_v20 = vld [vmem:[%s11838_s17 + $0x1f98] sm:$0xff] }
 0x569   : > { %v11233_v21 = vcombine.high %v3305_v18, %v3309_v29  ;;  %v11232_v42 = vcombine.low %v3305_v18, %v3309_v29  ;;  %v11234_v43 = vcombine.low %v3306_v20, %v3310_v32 }
 0x56a   : > { %9437 = vmatpush1.bf16.msra.mxu0 %v11168_v53  ;;  %v11235_v53 = vcombine.high %v3306_v20, %v3310_v32 }
 0x56b   : > { %9765 = vmatpush1.bf16.msra.mxu1 %v11170_v28  ;;  %9438 = vmatprep.subr.bf16.mxu0 %v11177_v61  ;;  %v3313_v28 = vld [vmem:[%s11838_s17 + $0x1fd0] sm:$0xff] }
 0x56c   : > { %9766 = vmatprep.subr.bf16.mxu1 %v11179_v57  ;;  %v3317_v61 = vld [vmem:[%s11838_s17 + $0x1ff0] sm:$0xff]  ;;  %v3314_v57 = vld [vmem:[%s11838_s17 + $0x1fd8] sm:$0xff] }
 0x56d   : > { %v11241_v37 = vcombine.high %v3313_v28, %v3317_v61 }
 0x56e   : > { %9439 = vmatpush1.bf16.msra.mxu0 %v11176_v27  ;;  %v11243_v27 = vcombine.high %v3314_v57, %v3318_v25 }
 0x56f   : > { %9767 = vmatpush1.bf16.msra.mxu1 %v11178_v15  ;;  %9440 = vmatprep.subr.bf16.mxu0 %v11185_v13  ;;  %v11240_v15 = vcombine.low %v3313_v28, %v3317_v61  ;;  %v11242_v13 = vcombine.low %v3314_v57, %v3318_v25 }
 0x570   : > { %9768 = vmatprep.subr.bf16.mxu1 %v11187_v30  ;;  %v11449_v30 = vld [vmem:[%s268_s24] sm:$0xff] }
 0x571   : > { %v3340_v0 = vrot.slane %v11449_v30, %v12133_v47  ;;  %v3348_v49 = vrot.slane %v11449_v30, %v12227_v14  ;;  %v3344_v1 = vrot.slane %v11449_v30, %v12046_v63  ;;  %v3352_v51 = vrot.slane %v11449_v30, %v12138_v56 }
 0x572   : > { %9441 = vmatpush1.bf16.msra.mxu0 %v11184_v46 }
 0x573   : > { %9769 = vmatpush1.bf16.msra.mxu1 %v11186_v24  ;;  %9442 = vmatprep.subr.bf16.mxu0 %v11193_v40 }
 0x574   : > { %9770 = vmatprep.subr.bf16.mxu1 %v11195_v12 }
 0x576   : > { %9443 = vmatpush1.bf16.msra.mxu0 %v11192_v52 }
 0x577   : > { %9771 = vmatpush1.bf16.msra.mxu1 %v11194_v55  ;;  %9444 = vmatprep.subr.bf16.mxu0 %v11201_v23 }
 0x578   : > { %9772 = vmatprep.subr.bf16.mxu1 %v11203_v22 }
 0x57a   : > { %9445 = vmatpush1.bf16.msra.mxu0 %v11200_v60 }
 0x57b   : > { %9773 = vmatpush1.bf16.msra.mxu1 %v11202_v38  ;;  %9446 = vmatprep.subr.bf16.mxu0 %v11209_v8 }
 0x57c   : > { %9774 = vmatprep.subr.bf16.mxu1 %v11211_v19 }
 0x57e   : > { %9447 = vmatpush1.bf16.msra.mxu0 %v11208_v5 }
 0x57f   : > { %9775 = vmatpush1.bf16.msra.mxu1 %v11210_v6  ;;  %9448 = vmatprep.subr.bf16.mxu0 %v11217_v7 }
 0x580   : > { %9776 = vmatprep.subr.bf16.mxu1 %v11219_v35 }
 0x582   : > { %9449 = vmatpush1.bf16.msra.mxu0 %v11216_v41 }
 0x583   : > { %9777 = vmatpush1.bf16.msra.mxu1 %v11218_v11  ;;  %9450 = vmatprep.subr.bf16.mxu0 %v11225_v17 }
 0x584   : > { %9778 = vmatprep.subr.bf16.mxu1 %v11227_v62 }
 0x586   : > { %9451 = vmatpush1.bf16.msra.mxu0 %v11224_v16 }
 0x587   : > { %9779 = vmatpush1.bf16.msra.mxu1 %v11226_v34  ;;  %9452 = vmatprep.subr.bf16.mxu0 %v11233_v21 }
 0x588   : > { %9780 = vmatprep.subr.bf16.mxu1 %v11235_v53 }
 0x58a   : > { %9453 = vmatpush1.bf16.msra.mxu0 %v11232_v42 }
 0x58b   : > { %9781 = vmatpush1.bf16.msra.mxu1 %v11234_v43  ;;  %9454 = vmatprep.subr.bf16.mxu0 %v11241_v37 }
 0x58c   : > { %9782 = vmatprep.subr.bf16.mxu1 %v11243_v27 }
 0x58e   : > { %9455 = vmatpush1.bf16.msra.mxu0 %v11240_v15 }
 0x58f   : > { %9783 = vmatpush1.bf16.msra.mxu1 %v11242_v13 }
 0x591   : > { %9457 = vmatmul.mubr.bf16.vlgmr.msra.gmra.mrb[20].mxu0 %v12564_v39 }
 0x592   : > { %9785 = vmatmul.mubr.bf16.vlgmr.msra.gmra.mrb[20].mxu1 %v12564_v39 }
 0x664   : > { %v9458_v46 = vpop.f32.mrb[20].mxu0 }
 0x665   : > { %v11260_v24 = vadd.f32 %v9458_v46, %v3340_v0  ;;  %v9786_v40 = vpop.f32.mrb[20].mxu1  ;;  %v9460_v12 = vpop.f32.mrb[21].mxu0 }
 0x666   : > { %v11262_v33 = vadd.f32 %v9786_v40, %v3348_v49  ;;  %v11261_v48 = vadd.f32 %v9460_v12, %v3344_v1  ;;  %v9788_v59 = vpop.f32.mrb[21].mxu1  ;;  %v9462_v39 = vpop.f32.mrb[22].mxu0 }
 0x667   : > { %v9797_v50 = vmax.f32 %v11260_v24, 0.0  ;;  %v11263_v52 = vadd.f32 %v9788_v59, %v3352_v51  ;;  %v9790_v55 = vpop.f32.mrb[22].mxu1  ;;  %v9463_v47 = vpop.f32.mrb[23].mxu0 }
 0x668   : > { %v9799_v23 = vmax.f32 %v11262_v33, 0.0  ;;  %v9798_v14 = vmax.f32 %v11261_v48, 0.0  ;;  %v9791_v22 = vpop.f32.mrb[23].mxu1 }
 0x669   : > { %v9800_v63 = vmax.f32 %v11263_v52, 0.0 }
 0x66a   : > { %v11254_v58 = vpack.c.bf16 %v9798_v14, %v9797_v50 }
 0x66b   : > { %v11255_v56 = vpack.c.bf16 %v9800_v63, %v9799_v23 }
 0x66c   : > { %9835 = vst [vmem:[%s12824_s25 + $0x10] sm:$0xff] %v11254_v58 }
 0x66d   : > { %9836 = vst [vmem:[%s12824_s25 + $0x18] sm:$0xff] %v11255_v56 }
 0x66e PF: > { %p14_p4 = scmp.ge.s32.totalorder %s11670_s23, 4   ;;  %s13186_s18 = smov %s11600_s19 }
 0x66f   : > { %s13187_s19 = smov %s11604_s20  ;;  %s13188_s20 = smov %s11680_s26 }
 0x670   : > { %s13189_s21 = smov %s11670_s23  ;;  %16 = sbr.rel (!%p14_p4) target bundleno = 5 (0x5), region = 98 }
 0x677   :  { %9859 = vsyncpa [#allocation3], 1 }
 0x678   :  { %9861 = vsyncpa [#allocation3 + $0x1], 1 }
 0x679   :  { %9862 = vsyncpa [#allocation5], 1 }

</bundles_post_ra>
